<compile_context>
chip_gen: v6e
topology: v6e:2x2x1
jax: 0.10.0
libtpu: 0.0.40
codegen_flags: <defaults>
</compile_context>

<pallas_src>
import math
import numpy as np

import jax
import jax.numpy as jnp
from jax.experimental import pallas as pl
from jax.experimental.pallas import tpu as pltpu


# --------------------------------------------------------------------------
# Fused Pallas kernel (one block of `bb` images per grid step)
# --------------------------------------------------------------------------

def _make_fused_kernel(H, W, n_heads, n_head_channels, ns, bb):
    HW = H * W
    L = HW                          # queries per image (L == HW for this module)
    d = n_head_channels
    C = n_heads * d
    P = n_heads * ns                # (head, sample) pairs, head-major: p = a*ns + j
    NHW = n_heads * HW              # lane-packed key columns: col = a*HW + k
    R = bb * L                      # rows handled per grid step
    # merged projection column layout (single 128-lane tile): [ v | att | off_y | off_x | pad ]
    V0, A0, Y0, X0 = 0, C, C + P, C + 2 * P

    def kernel(x_ref, w_all_ref, b_all_ref, w_out_ref, b_out_ref,
               ref_ref, e_ref, o_ref):
        # ---- 1. merged proj_v | proj_att | proj_off: one (R,C)@(C,128) MXU matmul
        proj = jnp.dot(x_ref[...], w_all_ref[...],
                       preferred_element_type=jnp.float32) + b_all_ref[...]
        vproj = proj[:, V0:V0 + C]                       # (R, C)
        att = proj[:, A0:A0 + P]                         # (R, P)
        off_y = proj[:, Y0:Y0 + P]                       # (R, P)
        off_x = proj[:, X0:X0 + P]                       # (R, P)

        # ---- 2. softmax over the ns samples, vectorized on (R, P); per-head
        # max / sum broadcast back with head-block selects (attn_drop = identity)
        ci = jax.lax.broadcasted_iota(jnp.int32, (R, P), 1)
        m_list, s_list = [], []
        for a in range(n_heads):
            att_a = att[:, a * ns:(a + 1) * ns]
            m_a = jnp.max(att_a, axis=-1, keepdims=True)
            s_list.append(jnp.sum(jnp.exp(att_a - m_a), axis=-1, keepdims=True))
            m_list.append(m_a)

        def _head_bcast(vals):                           # list of (R,1) -> (R,P)
            out = vals[-1]
            for a in range(n_heads - 2, -1, -1):
                out = jnp.where(ci < (a + 1) * ns, vals[a], out)
            return out

        attn = jnp.exp(att - _head_bcast(m_list)) * pl.reciprocal(
            _head_bcast(s_list), approx=True)            # (R, P)

        # ---- 3. bilinear coords + validity-masked corner weights, vectorized (R, P)
        ref_y = ref_ref[:, 0:1]
        ref_x = ref_ref[:, 1:2]
        iy = (ref_y + off_y + 1.0) * (0.5 * (H - 1))     # align_corners=True unnorm
        ix = (ref_x + off_x + 1.0) * (0.5 * (W - 1))
        y0 = jnp.floor(iy)
        x0 = jnp.floor(ix)
        wy1 = iy - y0
        wy0 = 1.0 - wy1
        wx1 = ix - x0
        wx0 = 1.0 - wx1
        vy0 = (y0 >= 0.0) & (y0 <= H - 1.0)
        vy1 = (y0 >= -1.0) & (y0 <= H - 2.0)             # y1 = y0+1 in range
        vx0 = (x0 >= 0.0) & (x0 <= W - 1.0)
        vx1 = (x0 >= -1.0) & (x0 <= W - 2.0)
        # zeros-padding semantics: OOB corners are zeroed HERE (before any packing),
        # so aliased flat indices (e.g. x1==W wrapping into the next row) add exactly 0.
        w00 = (jnp.where(vy0 & vx0, wy0 * wx0, 0.0) * attn).astype(jnp.bfloat16)
        w01 = (jnp.where(vy0 & vx1, wy0 * wx1, 0.0) * attn).astype(jnp.bfloat16)
        w10 = (jnp.where(vy1 & vx0, wy1 * wx0, 0.0) * attn).astype(jnp.bfloat16)
        w11 = (jnp.where(vy1 & vx1, wy1 * wx1, 0.0) * attn).astype(jnp.bfloat16)
        # per-(head,sample) top-left flat index; in-bounds values are < 256 -> exact bf16
        base = (y0 * float(W) + x0).astype(jnp.bfloat16)  # (R, P)

        # packed-column key index modulo HW (identical for every query row)
        iota = jax.lax.broadcasted_iota(jnp.int32, (L, NHW), 1).astype(jnp.float32)
        kk = iota - float(HW) * jnp.floor(iota * (1.0 / HW))          # (L, NHW)
        corner_off = (0.0, 1.0, float(W), float(W + 1))

        w_out = w_out_ref[...]
        w_out_heads = [w_out[a * d:(a + 1) * d, :] for a in range(n_heads)]
        b_out = b_out_ref[...]
        v_bf = vproj.astype(jnp.bfloat16)

        # ---- 4./5. per image in the block: lane-packed (L, n_heads*HW) sampling
        # matrix built with per-sample head-broadcast ("expansion") matmuls, then one
        # K = n_heads*HW matmul against the per-head pre-projected values.
        for b in range(bb):
            sl = slice(b * L, (b + 1) * L)
            base_b = base[sl]
            wc_b = (w00[sl], w01[sl], w10[sl], w11[sl])

            m_mat = jnp.zeros((L, NHW), jnp.float32)
            for j in range(ns):
                e_j = e_ref[j * P:(j + 1) * P, :]                     # (P, NHW) bf16
                bexp = jnp.dot(base_b, e_j, preferred_element_type=jnp.float32)
                delta = kk - bexp                                     # exact integers
                for c_off, w_c in zip(corner_off, wc_b):
                    wexp = jnp.dot(w_c, e_j, preferred_element_type=jnp.float32)
                    m_mat = m_mat + jnp.where(delta == c_off, wexp, 0.0)

            # reassociated output projection: U = stack_a(V_a @ Wout_a) -> one big matmul
            v_b = v_bf[sl]
            u = jnp.concatenate(
                [jnp.dot(v_b[:, a * d:(a + 1) * d], w_out_heads[a],
                         preferred_element_type=jnp.float32).astype(jnp.bfloat16)
                 for a in range(n_heads)], axis=0)                    # (NHW, C)
            acc = jnp.dot(m_mat.astype(jnp.bfloat16), u,
                          preferred_element_type=jnp.float32)         # (L, C)
            # proj_drop identity at inference; lane-dense store, out bias folded in
            o_ref[b * L:(b + 1) * L, :] = acc + b_out

    return kernel


# --------------------------------------------------------------------------
# Wrapper
# --------------------------------------------------------------------------

def _pick_batch_block(B, L):
    """Fold the batch into one grid step on single-TensorCore chips (v5e/v6e);
    keep >=2 parallel grid steps on multi-TensorCore chips (v7x)."""
    try:
        kind = jax.devices()[0].device_kind.lower()
    except Exception:
        kind = ""
    multi_tc = ("v7" in kind) or ("7x" in kind)
    bb = max(1, B // 2) if (multi_tc and B >= 2) else B
    bb = min(bb, max(1, 512 // L))        # keep the per-step row block modest
    while B % bb:
        bb -= 1
    return max(bb, 1)


def dattention_dcn_forward(x_nchw, params, *, n_heads, n_head_channels, ns,
                           batch_block=None):
    B, C, H, W = x_nchw.shape
    L = H * W
    d = n_head_channels
    P = n_heads * ns
    NHW = n_heads * L
    F_pad = 128
    assert C == n_heads * d and C + 3 * P <= F_pad

    bb = _pick_batch_block(B, L) if batch_block is None else batch_block
    assert B % bb == 0
    R = bb * L

    # channels-last, bf16 activations (halves the only per-step HBM->VMEM DMA)
    x_rows = (jnp.transpose(x_nchw, (0, 2, 3, 1))
              .reshape(B // bb, R, C).astype(jnp.bfloat16))

    # merged projection [ v | att | off_y | off_x | pad ] in one 128-lane tile;
    # off columns are pre-split into y / x blocks so the kernel never strided-slices.
    w_offy = params["w_off"][:, 0::2]
    w_offx = params["w_off"][:, 1::2]
    b_offy = params["b_off"][:, 0::2]
    b_offx = params["b_off"][:, 1::2]
    pad_w = jnp.zeros((C, F_pad - (C + 3 * P)), jnp.float32)
    pad_b = jnp.zeros((1, F_pad - (C + 3 * P)), jnp.float32)
    w_all = jnp.concatenate(
        [params["w_v"], params["w_att"], w_offy, w_offx, pad_w], axis=1
    ).astype(jnp.bfloat16)
    b_all = jnp.concatenate(
        [params["b_v"], params["b_att"], b_offy, b_offx, pad_b], axis=1)

    w_out = params["w_out"].astype(jnp.bfloat16)
    b_out = params["b_out"]
    ref_t = jnp.tile(params["ref"], (bb, 1))                     # (R, 2)

    # per-sample head-broadcast ("expansion") matrices, precomputed on the host:
    #   E[j*P + p, a*HW + k] = 1  iff  (p // ns == a) and (p % ns == j)
    p_idx = np.arange(P)
    c_idx = np.arange(NHW)
    e_np = np.zeros((ns, P, NHW), np.float32)
    for j in range(ns):
        e_np[j] = ((p_idx[:, None] // ns == c_idx[None, :] // L) &
                   (p_idx[:, None] % ns == j)).astype(np.float32)
    e_stack = jnp.asarray(e_np.reshape(ns * P, NHW)).astype(jnp.bfloat16)

    y_rows = pl.pallas_call(
        _make_fused_kernel(H, W, n_heads, d, ns, bb),
        out_shape=jax.ShapeDtypeStruct((B // bb, R, C), jnp.float32),
        grid=(B // bb,),
        in_specs=[pl.BlockSpec((None, R, C), lambda i: (i, 0, 0)),
                  pl.BlockSpec((C, F_pad), lambda i: (0, 0)),
                  pl.BlockSpec((1, F_pad), lambda i: (0, 0)),
                  pl.BlockSpec((C, C), lambda i: (0, 0)),
                  pl.BlockSpec((1, C), lambda i: (0, 0)),
                  pl.BlockSpec((R, 2), lambda i: (0, 0)),
                  pl.BlockSpec((ns * P, NHW), lambda i: (0, 0))],
        out_specs=pl.BlockSpec((None, R, C), lambda i: (i, 0, 0)),
        compiler_params=pltpu.CompilerParams(dimension_semantics=("parallel",)),
    )(x_rows, w_all, b_all, w_out, b_out, ref_t, e_stack)

    y = y_rows.reshape(B, H, W, C).transpose(0, 3, 1, 2)          # back to NCHW
    return y, None, None


# --------------------------------------------------------------------------
# Deterministic parameter construction (mirrors __init__ / _init_projections)
# --------------------------------------------------------------------------

def make_ref_points(H, W):
    i = np.arange(H, dtype=np.float32)
    j = np.arange(W, dtype=np.float32)
    py = ((0.5 + i) / (H - 1)) * 2.0 - 1.0
    px = ((0.5 + j) / (W - 1)) * 2.0 - 1.0
    ref = np.stack(np.meshgrid(py, px, indexing="ij"), axis=-1)   # (H, W, 2)
    return ref.reshape(H * W, 2).astype(np.float32)


def init_params(key, n_heads, d, ns, H, W):
    nc = n_heads * d
    k1, k2, k3, k4 = jax.random.split(key, 4)

    # proj_off: zero weight, structured bias (grid_init)
    thetas = np.arange(n_heads, dtype=np.float32) * (2.0 * math.pi / n_heads)
    grid_init = np.stack([np.cos(thetas), np.sin(thetas)], axis=-1)   # (h, 2)
    grid_init = grid_init / np.abs(grid_init).max(axis=-1, keepdims=True)
    grid_init = np.tile(grid_init.reshape(n_heads, 1, 2), (1, ns, 1))
    for i in range(ns):
        grid_init[:, i, :] *= (i + 1)

    bound = 1.0 / math.sqrt(nc)
    params = dict(
        w_att=jnp.zeros((nc, n_heads * ns), jnp.float32),
        b_att=jnp.zeros((1, n_heads * ns), jnp.float32),
        w_off=jnp.zeros((nc, n_heads * ns * 2), jnp.float32),
        b_off=jnp.asarray(grid_init.reshape(1, -1).astype(np.float32)),
        w_v=jax.random.uniform(k1, (nc, nc), jnp.float32, -bound, bound),
        b_v=jax.random.uniform(k2, (1, nc), jnp.float32, -bound, bound),
        w_out=jax.random.uniform(k3, (nc, nc), jnp.float32, -bound, bound),
        b_out=jax.random.uniform(k4, (1, nc), jnp.float32, -bound, bound),
        ref=jnp.asarray(make_ref_points(H, W)),
    )
    return params


# --------------------------------------------------------------------------
# Pure-numpy reference (gather-based grid_sample) for verification
# --------------------------------------------------------------------------

def reference_forward(x_nchw, params, n_heads, d, ns, H, W):
    x = np.asarray(x_nchw, np.float32)
    p = {k: np.asarray(v, np.float32) for k, v in params.items()}
    B, C = x.shape[0], x.shape[1]
    L = H * W
    xf = np.transpose(x, (0, 2, 3, 1)).reshape(B, L, C)

    att = (xf @ p["w_att"] + p["b_att"]).reshape(B, L, n_heads, ns)
    att = att - att.max(axis=-1, keepdims=True)
    att = np.exp(att)
    att = att / att.sum(axis=-1, keepdims=True)

    off = (xf @ p["w_off"] + p["b_off"]).reshape(B, L, n_heads, ns, 2)
    pos = p["ref"].reshape(1, L, 1, 1, 2) + off                       # (B,L,h,ns,2)

    v = (xf @ p["w_v"] + p["b_v"]).reshape(B, L, n_heads, d)
    v = np.transpose(v, (0, 2, 1, 3))                                 # (B, h, L, d)

    ix = (pos[..., 1] + 1.0) * 0.5 * (W - 1)
    iy = (pos[..., 0] + 1.0) * 0.5 * (H - 1)
    x0 = np.floor(ix)
    x1 = x0 + 1.0
    y0 = np.floor(iy)
    y1 = y0 + 1.0
    wx1 = ix - x0
    wx0 = 1.0 - wx1
    wy1 = iy - y0
    wy0 = 1.0 - wy1

    b_idx = np.arange(B)[:, None, None, None]
    a_idx = np.arange(n_heads)[None, None, :, None]
    samp = np.zeros((B, L, n_heads, ns, d), np.float32)
    for yc, xc, wy, wx in ((y0, x0, wy0, wx0), (y0, x1, wy0, wx1),
                           (y1, x0, wy1, wx0), (y1, x1, wy1, wx1)):
        valid = (xc >= 0) & (xc <= W - 1) & (yc >= 0) & (yc <= H - 1)
        w = np.where(valid, wy * wx, 0.0).astype(np.float32)
        xi = np.clip(xc, 0, W - 1).astype(np.int64)
        yi = np.clip(yc, 0, H - 1).astype(np.int64)
        flat = yi * W + xi                                            # (B,L,h,ns)
        vg = v[b_idx, a_idx, flat]                                    # (B,L,h,ns,d)
        samp += w[..., None] * vg

    out = (att[..., None] * samp).sum(axis=3)                         # (B,L,h,d)
    v_out = out.reshape(B, L, C)
    y = (v_out @ p["w_out"] + p["b_out"]).reshape(B, H, W, C)
    return np.transpose(y, (0, 3, 1, 2))


# --------------------------------------------------------------------------

if __name__ == "__main__":
    # module config: q_size=(8,8), ns_per_pt=4, n_heads=4, n_head_channels=8
    B, n_heads, d, ns = 2, 4, 8, 4
    H = W = 8
    C = n_heads * d                                                   # nc = 32

    key = jax.random.PRNGKey(0)
    kx, kp = jax.random.split(key)
    x = jax.random.normal(kx, (B, C, H, W), jnp.float32)
    params = init_params(kp, n_heads, d, ns, H, W)

    fwd = jax.jit(lambda xx: dattention_dcn_forward(
        xx, params, n_heads=n_heads, n_head_channels=d, ns=ns))
    y, _, _ = fwd(x)
    y = jax.block_until_ready(y)

    y_ref = reference_forward(np.asarray(x), params, n_heads, d, ns, H, W)
    np.testing.assert_allclose(np.asarray(y), y_ref, rtol=2e-2, atol=2e-2)

    print("KERNEL_OK")
</pallas_src>

<mosaic_0001>
module attributes {stable_mosaic.version = 11 : i64} {
  func.func @kernel(%arg0: i32, %arg1: memref<1x128x32xbf16, #tpu.memory_space<vmem>>, %arg2: memref<32x128xbf16, #tpu.memory_space<vmem>>, %arg3: memref<1x128xf32, #tpu.memory_space<vmem>>, %arg4: memref<32x32xbf16, #tpu.memory_space<vmem>>, %arg5: memref<1x32xf32, #tpu.memory_space<vmem>>, %arg6: memref<128x2xf32, #tpu.memory_space<vmem>>, %arg7: memref<64x256xbf16, #tpu.memory_space<vmem>>, %arg8: memref<1x128x32xf32, #tpu.memory_space<vmem>>) attributes {dimension_semantics = [#tpu.dimension_semantics<parallel>], iteration_bounds = array<i64: 1>, scalar_prefetch = 0 : i64, scratch_operands = 0 : i64, tpu.core_type = #tpu.core_type<tc>, window_params = [{transform_indices = @transform_0, window_bounds = array<i64: 1, 128, 32>}, {pipeline_mode = #tpu.pipeline_mode<synchronous>, transform_indices = @transform_1, window_bounds = array<i64: 32, 128>}, {pipeline_mode = #tpu.pipeline_mode<synchronous>, transform_indices = @transform_2, window_bounds = array<i64: 1, 128>}, {pipeline_mode = #tpu.pipeline_mode<synchronous>, transform_indices = @transform_3, window_bounds = array<i64: 32, 32>}, {pipeline_mode = #tpu.pipeline_mode<synchronous>, transform_indices = @transform_4, window_bounds = array<i64: 1, 32>}, {pipeline_mode = #tpu.pipeline_mode<synchronous>, transform_indices = @transform_5, window_bounds = array<i64: 128, 2>}, {pipeline_mode = #tpu.pipeline_mode<synchronous>, transform_indices = @transform_6, window_bounds = array<i64: 64, 256>}, {transform_indices = @transform_7, window_bounds = array<i64: 1, 128, 32>}]} {
    %c0 = arith.constant 0 : index
    %c0_0 = arith.constant 0 : index
    %c0_1 = arith.constant 0 : index
    %0 = vector.load %arg1[%c0, %c0_0, %c0_1] : memref<1x128x32xbf16, #tpu.memory_space<vmem>>, vector<1x128x32xbf16>
    %1 = vector.shape_cast %0 : vector<1x128x32xbf16> to vector<128x32xbf16>
    %c0_2 = arith.constant 0 : index
    %c0_3 = arith.constant 0 : index
    %2 = vector.load %arg2[%c0_2, %c0_3] : memref<32x128xbf16, #tpu.memory_space<vmem>>, vector<32x128xbf16>
    %cst = arith.constant dense<0.000000e+00> : vector<128x128xf32>
    %3 = tpu.matmul %1, %2, %cst {dimension_numbers = #tpu.dot_dimension_numbers<[1], [0], [0], [1], [0, 0, 1, 1], [], []>} : vector<128x32xbf16>, vector<32x128xbf16>, vector<128x128xf32> -> vector<128x128xf32>
    %c0_4 = arith.constant 0 : index
    %c0_5 = arith.constant 0 : index
    %4 = vector.load %arg3[%c0_4, %c0_5] : memref<1x128xf32, #tpu.memory_space<vmem>>, vector<1x128xf32>
    %5 = vector.broadcast %4 : vector<1x128xf32> to vector<128x128xf32>
    %6 = arith.addf %3, %5 : vector<128x128xf32>
    %7 = vector.extract_strided_slice %6 {offsets = [0, 0], sizes = [128, 32], strides = [1, 1]} : vector<128x128xf32> to vector<128x32xf32>
    %8 = vector.extract_strided_slice %6 {offsets = [0, 32], sizes = [128, 16], strides = [1, 1]} : vector<128x128xf32> to vector<128x16xf32>
    %9 = vector.extract_strided_slice %6 {offsets = [0, 48], sizes = [128, 16], strides = [1, 1]} : vector<128x128xf32> to vector<128x16xf32>
    %10 = vector.extract_strided_slice %6 {offsets = [0, 64], sizes = [128, 16], strides = [1, 1]} : vector<128x128xf32> to vector<128x16xf32>
    %11 = tpu.iota {dimensions = array<i32: 1>} : vector<128x16xi32>
    %12 = vector.extract_strided_slice %8 {offsets = [0, 0], sizes = [128, 4], strides = [1, 1]} : vector<128x16xf32> to vector<128x4xf32>
    %cst_6 = arith.constant dense<0xFF800000> : vector<128xf32>
    %13 = vector.multi_reduction <maximumf>, %12, %cst_6 [1] : vector<128x4xf32> to vector<128xf32>
    %14 = vector.shape_cast %13 : vector<128xf32> to vector<128x1xf32>
    %15 = vector.broadcast %14 : vector<128x1xf32> to vector<128x4xf32>
    %16 = arith.subf %12, %15 : vector<128x4xf32>
    %17 = math.exp %16 : vector<128x4xf32>
    %cst_7 = arith.constant dense<0.000000e+00> : vector<128xf32>
    %18 = vector.multi_reduction <add>, %17, %cst_7 [1] : vector<128x4xf32> to vector<128xf32>
    %19 = vector.shape_cast %18 : vector<128xf32> to vector<128x1xf32>
    %20 = vector.extract_strided_slice %8 {offsets = [0, 4], sizes = [128, 4], strides = [1, 1]} : vector<128x16xf32> to vector<128x4xf32>
    %cst_8 = arith.constant dense<0xFF800000> : vector<128xf32>
    %21 = vector.multi_reduction <maximumf>, %20, %cst_8 [1] : vector<128x4xf32> to vector<128xf32>
    %22 = vector.shape_cast %21 : vector<128xf32> to vector<128x1xf32>
    %23 = vector.broadcast %22 : vector<128x1xf32> to vector<128x4xf32>
    %24 = arith.subf %20, %23 : vector<128x4xf32>
    %25 = math.exp %24 : vector<128x4xf32>
    %cst_9 = arith.constant dense<0.000000e+00> : vector<128xf32>
    %26 = vector.multi_reduction <add>, %25, %cst_9 [1] : vector<128x4xf32> to vector<128xf32>
    %27 = vector.shape_cast %26 : vector<128xf32> to vector<128x1xf32>
    %28 = vector.extract_strided_slice %8 {offsets = [0, 8], sizes = [128, 4], strides = [1, 1]} : vector<128x16xf32> to vector<128x4xf32>
    %cst_10 = arith.constant dense<0xFF800000> : vector<128xf32>
    %29 = vector.multi_reduction <maximumf>, %28, %cst_10 [1] : vector<128x4xf32> to vector<128xf32>
    %30 = vector.shape_cast %29 : vector<128xf32> to vector<128x1xf32>
    %31 = vector.broadcast %30 : vector<128x1xf32> to vector<128x4xf32>
    %32 = arith.subf %28, %31 : vector<128x4xf32>
    %33 = math.exp %32 : vector<128x4xf32>
    %cst_11 = arith.constant dense<0.000000e+00> : vector<128xf32>
    %34 = vector.multi_reduction <add>, %33, %cst_11 [1] : vector<128x4xf32> to vector<128xf32>
    %35 = vector.shape_cast %34 : vector<128xf32> to vector<128x1xf32>
    %36 = vector.extract_strided_slice %8 {offsets = [0, 12], sizes = [128, 4], strides = [1, 1]} : vector<128x16xf32> to vector<128x4xf32>
    %cst_12 = arith.constant dense<0xFF800000> : vector<128xf32>
    %37 = vector.multi_reduction <maximumf>, %36, %cst_12 [1] : vector<128x4xf32> to vector<128xf32>
    %38 = vector.shape_cast %37 : vector<128xf32> to vector<128x1xf32>
    %39 = vector.broadcast %38 : vector<128x1xf32> to vector<128x4xf32>
    %40 = arith.subf %36, %39 : vector<128x4xf32>
    %41 = math.exp %40 : vector<128x4xf32>
    %cst_13 = arith.constant dense<0.000000e+00> : vector<128xf32>
    %42 = vector.multi_reduction <add>, %41, %cst_13 [1] : vector<128x4xf32> to vector<128xf32>
    %43 = vector.shape_cast %42 : vector<128xf32> to vector<128x1xf32>
    %c12_i32 = arith.constant 12 : i32
    %44 = vector.broadcast %c12_i32 : i32 to vector<128x16xi32>
    %45 = arith.cmpi slt, %11, %44 : vector<128x16xi32>
    %46 = vector.shape_cast %30 : vector<128x1xf32> to vector<128x1xf32>
    %47 = vector.broadcast %46 : vector<128x1xf32> to vector<128x16xf32>
    %48 = vector.shape_cast %38 : vector<128x1xf32> to vector<128x1xf32>
    %49 = vector.broadcast %48 : vector<128x1xf32> to vector<128x16xf32>
    %50 = arith.select %45, %47, %49 : vector<128x16xi1>, vector<128x16xf32>
    %c8_i32 = arith.constant 8 : i32
    %51 = vector.broadcast %c8_i32 : i32 to vector<128x16xi32>
    %52 = arith.cmpi slt, %11, %51 : vector<128x16xi32>
    %53 = vector.shape_cast %22 : vector<128x1xf32> to vector<128x1xf32>
    %54 = vector.broadcast %53 : vector<128x1xf32> to vector<128x16xf32>
    %55 = arith.select %52, %54, %50 : vector<128x16xi1>, vector<128x16xf32>
    %c4_i32 = arith.constant 4 : i32
    %56 = vector.broadcast %c4_i32 : i32 to vector<128x16xi32>
    %57 = arith.cmpi slt, %11, %56 : vector<128x16xi32>
    %58 = vector.shape_cast %14 : vector<128x1xf32> to vector<128x1xf32>
    %59 = vector.broadcast %58 : vector<128x1xf32> to vector<128x16xf32>
    %60 = arith.select %57, %59, %55 : vector<128x16xi1>, vector<128x16xf32>
    %61 = arith.subf %8, %60 : vector<128x16xf32>
    %62 = math.exp %61 : vector<128x16xf32>
    %c12_i32_14 = arith.constant 12 : i32
    %63 = vector.broadcast %c12_i32_14 : i32 to vector<128x16xi32>
    %64 = arith.cmpi slt, %11, %63 : vector<128x16xi32>
    %65 = vector.shape_cast %35 : vector<128x1xf32> to vector<128x1xf32>
    %66 = vector.broadcast %65 : vector<128x1xf32> to vector<128x16xf32>
    %67 = vector.shape_cast %43 : vector<128x1xf32> to vector<128x1xf32>
    %68 = vector.broadcast %67 : vector<128x1xf32> to vector<128x16xf32>
    %69 = arith.select %64, %66, %68 : vector<128x16xi1>, vector<128x16xf32>
    %c8_i32_15 = arith.constant 8 : i32
    %70 = vector.broadcast %c8_i32_15 : i32 to vector<128x16xi32>
    %71 = arith.cmpi slt, %11, %70 : vector<128x16xi32>
    %72 = vector.shape_cast %27 : vector<128x1xf32> to vector<128x1xf32>
    %73 = vector.broadcast %72 : vector<128x1xf32> to vector<128x16xf32>
    %74 = arith.select %71, %73, %69 : vector<128x16xi1>, vector<128x16xf32>
    %c4_i32_16 = arith.constant 4 : i32
    %75 = vector.broadcast %c4_i32_16 : i32 to vector<128x16xi32>
    %76 = arith.cmpi slt, %11, %75 : vector<128x16xi32>
    %77 = vector.shape_cast %19 : vector<128x1xf32> to vector<128x1xf32>
    %78 = vector.broadcast %77 : vector<128x1xf32> to vector<128x16xf32>
    %79 = arith.select %76, %78, %74 : vector<128x16xi1>, vector<128x16xf32>
    %80 = tpu.reciprocal %79 {approx = true} : vector<128x16xf32> -> vector<128x16xf32>
    %81 = arith.mulf %62, %80 : vector<128x16xf32>
    %c0_17 = arith.constant 0 : index
    %c0_18 = arith.constant 0 : index
    %82 = vector.load %arg6[%c0_17, %c0_18] : memref<128x2xf32, #tpu.memory_space<vmem>>, vector<128x1xf32>
    %c0_19 = arith.constant 0 : index
    %c1 = arith.constant 1 : index
    %83 = vector.load %arg6[%c0_19, %c1] : memref<128x2xf32, #tpu.memory_space<vmem>>, vector<128x1xf32>
    %84 = vector.broadcast %82 : vector<128x1xf32> to vector<128x16xf32>
    %85 = arith.addf %84, %9 : vector<128x16xf32>
    %cst_20 = arith.constant 1.000000e+00 : f32
    %86 = vector.broadcast %cst_20 : f32 to vector<128x16xf32>
    %87 = arith.addf %85, %86 : vector<128x16xf32>
    %cst_21 = arith.constant 3.500000e+00 : f32
    %88 = vector.broadcast %cst_21 : f32 to vector<128x16xf32>
    %89 = arith.mulf %87, %88 : vector<128x16xf32>
    %90 = vector.broadcast %83 : vector<128x1xf32> to vector<128x16xf32>
    %91 = arith.addf %90, %10 : vector<128x16xf32>
    %cst_22 = arith.constant 1.000000e+00 : f32
    %92 = vector.broadcast %cst_22 : f32 to vector<128x16xf32>
    %93 = arith.addf %91, %92 : vector<128x16xf32>
    %cst_23 = arith.constant 3.500000e+00 : f32
    %94 = vector.broadcast %cst_23 : f32 to vector<128x16xf32>
    %95 = arith.mulf %93, %94 : vector<128x16xf32>
    %96 = math.floor %89 : vector<128x16xf32>
    %97 = math.floor %95 : vector<128x16xf32>
    %98 = arith.subf %89, %96 : vector<128x16xf32>
    %cst_24 = arith.constant 1.000000e+00 : f32
    %99 = vector.broadcast %cst_24 : f32 to vector<128x16xf32>
    %100 = arith.subf %99, %98 : vector<128x16xf32>
    %101 = arith.subf %95, %97 : vector<128x16xf32>
    %cst_25 = arith.constant 1.000000e+00 : f32
    %102 = vector.broadcast %cst_25 : f32 to vector<128x16xf32>
    %103 = arith.subf %102, %101 : vector<128x16xf32>
    %cst_26 = arith.constant 0.000000e+00 : f32
    %104 = vector.broadcast %cst_26 : f32 to vector<128x16xf32>
    %105 = arith.cmpf oge, %96, %104 : vector<128x16xf32>
    %cst_27 = arith.constant 7.000000e+00 : f32
    %106 = vector.broadcast %cst_27 : f32 to vector<128x16xf32>
    %107 = arith.cmpf ole, %96, %106 : vector<128x16xf32>
    %108 = arith.andi %105, %107 : vector<128x16xi1>
    %cst_28 = arith.constant -1.000000e+00 : f32
    %109 = vector.broadcast %cst_28 : f32 to vector<128x16xf32>
    %110 = arith.cmpf oge, %96, %109 : vector<128x16xf32>
    %cst_29 = arith.constant 6.000000e+00 : f32
    %111 = vector.broadcast %cst_29 : f32 to vector<128x16xf32>
    %112 = arith.cmpf ole, %96, %111 : vector<128x16xf32>
    %113 = arith.andi %110, %112 : vector<128x16xi1>
    %cst_30 = arith.constant 0.000000e+00 : f32
    %114 = vector.broadcast %cst_30 : f32 to vector<128x16xf32>
    %115 = arith.cmpf oge, %97, %114 : vector<128x16xf32>
    %cst_31 = arith.constant 7.000000e+00 : f32
    %116 = vector.broadcast %cst_31 : f32 to vector<128x16xf32>
    %117 = arith.cmpf ole, %97, %116 : vector<128x16xf32>
    %118 = arith.andi %115, %117 : vector<128x16xi1>
    %cst_32 = arith.constant -1.000000e+00 : f32
    %119 = vector.broadcast %cst_32 : f32 to vector<128x16xf32>
    %120 = arith.cmpf oge, %97, %119 : vector<128x16xf32>
    %cst_33 = arith.constant 6.000000e+00 : f32
    %121 = vector.broadcast %cst_33 : f32 to vector<128x16xf32>
    %122 = arith.cmpf ole, %97, %121 : vector<128x16xf32>
    %123 = arith.andi %120, %122 : vector<128x16xi1>
    %124 = arith.andi %108, %118 : vector<128x16xi1>
    %125 = arith.mulf %100, %103 : vector<128x16xf32>
    %cst_34 = arith.constant 0.000000e+00 : f32
    %126 = vector.broadcast %cst_34 : f32 to vector<128x16xf32>
    %127 = arith.select %124, %125, %126 : vector<128x16xi1>, vector<128x16xf32>
    %128 = arith.mulf %127, %81 : vector<128x16xf32>
    %129 = arith.truncf %128 : vector<128x16xf32> to vector<128x16xbf16>
    %130 = arith.andi %108, %123 : vector<128x16xi1>
    %131 = arith.mulf %100, %101 : vector<128x16xf32>
    %cst_35 = arith.constant 0.000000e+00 : f32
    %132 = vector.broadcast %cst_35 : f32 to vector<128x16xf32>
    %133 = arith.select %130, %131, %132 : vector<128x16xi1>, vector<128x16xf32>
    %134 = arith.mulf %133, %81 : vector<128x16xf32>
    %135 = arith.truncf %134 : vector<128x16xf32> to vector<128x16xbf16>
    %136 = arith.andi %113, %118 : vector<128x16xi1>
    %137 = arith.mulf %98, %103 : vector<128x16xf32>
    %cst_36 = arith.constant 0.000000e+00 : f32
    %138 = vector.broadcast %cst_36 : f32 to vector<128x16xf32>
    %139 = arith.select %136, %137, %138 : vector<128x16xi1>, vector<128x16xf32>
    %140 = arith.mulf %139, %81 : vector<128x16xf32>
    %141 = arith.truncf %140 : vector<128x16xf32> to vector<128x16xbf16>
    %142 = arith.andi %113, %123 : vector<128x16xi1>
    %143 = arith.mulf %98, %101 : vector<128x16xf32>
    %cst_37 = arith.constant 0.000000e+00 : f32
    %144 = vector.broadcast %cst_37 : f32 to vector<128x16xf32>
    %145 = arith.select %142, %143, %144 : vector<128x16xi1>, vector<128x16xf32>
    %146 = arith.mulf %145, %81 : vector<128x16xf32>
    %147 = arith.truncf %146 : vector<128x16xf32> to vector<128x16xbf16>
    %cst_38 = arith.constant 8.000000e+00 : f32
    %148 = vector.broadcast %cst_38 : f32 to vector<128x16xf32>
    %149 = arith.mulf %96, %148 : vector<128x16xf32>
    %150 = arith.addf %149, %97 : vector<128x16xf32>
    %151 = arith.truncf %150 : vector<128x16xf32> to vector<128x16xbf16>
    %152 = tpu.iota {dimensions = array<i32: 1>} : vector<64x256xi32>
    %153 = arith.sitofp %152 : vector<64x256xi32> to vector<64x256xf32>
    %cst_39 = arith.constant 1.562500e-02 : f32
    %154 = vector.broadcast %cst_39 : f32 to vector<64x256xf32>
    %155 = arith.mulf %153, %154 : vector<64x256xf32>
    %156 = math.floor %155 : vector<64x256xf32>
    %cst_40 = arith.constant 6.400000e+01 : f32
    %157 = vector.broadcast %cst_40 : f32 to vector<64x256xf32>
    %158 = arith.mulf %157, %156 : vector<64x256xf32>
    %159 = arith.subf %153, %158 : vector<64x256xf32>
    %c0_41 = arith.constant 0 : index
    %c0_42 = arith.constant 0 : index
    %160 = vector.load %arg4[%c0_41, %c0_42] : memref<32x32xbf16, #tpu.memory_space<vmem>>, vector<32x32xbf16>
    %161 = vector.extract_strided_slice %160 {offsets = [0, 0], sizes = [8, 32], strides = [1, 1]} : vector<32x32xbf16> to vector<8x32xbf16>
    %162 = vector.extract_strided_slice %160 {offsets = [8, 0], sizes = [8, 32], strides = [1, 1]} : vector<32x32xbf16> to vector<8x32xbf16>
    %163 = vector.extract_strided_slice %160 {offsets = [16, 0], sizes = [8, 32], strides = [1, 1]} : vector<32x32xbf16> to vector<8x32xbf16>
    %164 = vector.extract_strided_slice %160 {offsets = [24, 0], sizes = [8, 32], strides = [1, 1]} : vector<32x32xbf16> to vector<8x32xbf16>
    %c0_43 = arith.constant 0 : index
    %c0_44 = arith.constant 0 : index
    %165 = vector.load %arg5[%c0_43, %c0_44] : memref<1x32xf32, #tpu.memory_space<vmem>>, vector<1x32xf32>
    %166 = arith.truncf %7 : vector<128x32xf32> to vector<128x32xbf16>
    %167 = vector.extract_strided_slice %151 {offsets = [0, 0], sizes = [64, 16], strides = [1, 1]} : vector<128x16xbf16> to vector<64x16xbf16>
    %168 = vector.extract_strided_slice %129 {offsets = [0, 0], sizes = [64, 16], strides = [1, 1]} : vector<128x16xbf16> to vector<64x16xbf16>
    %169 = vector.extract_strided_slice %135 {offsets = [0, 0], sizes = [64, 16], strides = [1, 1]} : vector<128x16xbf16> to vector<64x16xbf16>
    %170 = vector.extract_strided_slice %141 {offsets = [0, 0], sizes = [64, 16], strides = [1, 1]} : vector<128x16xbf16> to vector<64x16xbf16>
    %171 = vector.extract_strided_slice %147 {offsets = [0, 0], sizes = [64, 16], strides = [1, 1]} : vector<128x16xbf16> to vector<64x16xbf16>
    %cst_45 = arith.constant 0.000000e+00 : f32
    %172 = vector.broadcast %cst_45 : f32 to vector<64x256xf32>
    %c0_46 = arith.constant 0 : index
    %c0_47 = arith.constant 0 : index
    %173 = vector.load %arg7[%c0_46, %c0_47] : memref<64x256xbf16, #tpu.memory_space<vmem>>, vector<16x256xbf16>
    %cst_48 = arith.constant dense<0.000000e+00> : vector<64x256xf32>
    %174 = tpu.matmul %167, %173, %cst_48 {dimension_numbers = #tpu.dot_dimension_numbers<[1], [0], [0], [1], [0, 0, 1, 1], [], []>} : vector<64x16xbf16>, vector<16x256xbf16>, vector<64x256xf32> -> vector<64x256xf32>
    %175 = arith.subf %159, %174 : vector<64x256xf32>
    %cst_49 = arith.constant dense<0.000000e+00> : vector<64x256xf32>
    %176 = tpu.matmul %168, %173, %cst_49 {dimension_numbers = #tpu.dot_dimension_numbers<[1], [0], [0], [1], [0, 0, 1, 1], [], []>} : vector<64x16xbf16>, vector<16x256xbf16>, vector<64x256xf32> -> vector<64x256xf32>
    %cst_50 = arith.constant 0.000000e+00 : f32
    %177 = vector.broadcast %cst_50 : f32 to vector<64x256xf32>
    %178 = arith.cmpf oeq, %175, %177 : vector<64x256xf32>
    %cst_51 = arith.constant 0.000000e+00 : f32
    %179 = vector.broadcast %cst_51 : f32 to vector<64x256xf32>
    %180 = arith.select %178, %176, %179 : vector<64x256xi1>, vector<64x256xf32>
    %181 = arith.addf %172, %180 : vector<64x256xf32>
    %cst_52 = arith.constant dense<0.000000e+00> : vector<64x256xf32>
    %182 = tpu.matmul %169, %173, %cst_52 {dimension_numbers = #tpu.dot_dimension_numbers<[1], [0], [0], [1], [0, 0, 1, 1], [], []>} : vector<64x16xbf16>, vector<16x256xbf16>, vector<64x256xf32> -> vector<64x256xf32>
    %cst_53 = arith.constant 1.000000e+00 : f32
    %183 = vector.broadcast %cst_53 : f32 to vector<64x256xf32>
    %184 = arith.cmpf oeq, %175, %183 : vector<64x256xf32>
    %cst_54 = arith.constant 0.000000e+00 : f32
    %185 = vector.broadcast %cst_54 : f32 to vector<64x256xf32>
    %186 = arith.select %184, %182, %185 : vector<64x256xi1>, vector<64x256xf32>
    %187 = arith.addf %181, %186 : vector<64x256xf32>
    %cst_55 = arith.constant dense<0.000000e+00> : vector<64x256xf32>
    %188 = tpu.matmul %170, %173, %cst_55 {dimension_numbers = #tpu.dot_dimension_numbers<[1], [0], [0], [1], [0, 0, 1, 1], [], []>} : vector<64x16xbf16>, vector<16x256xbf16>, vector<64x256xf32> -> vector<64x256xf32>
    %cst_56 = arith.constant 8.000000e+00 : f32
    %189 = vector.broadcast %cst_56 : f32 to vector<64x256xf32>
    %190 = arith.cmpf oeq, %175, %189 : vector<64x256xf32>
    %cst_57 = arith.constant 0.000000e+00 : f32
    %191 = vector.broadcast %cst_57 : f32 to vector<64x256xf32>
    %192 = arith.select %190, %188, %191 : vector<64x256xi1>, vector<64x256xf32>
    %193 = arith.addf %187, %192 : vector<64x256xf32>
    %cst_58 = arith.constant dense<0.000000e+00> : vector<64x256xf32>
    %194 = tpu.matmul %171, %173, %cst_58 {dimension_numbers = #tpu.dot_dimension_numbers<[1], [0], [0], [1], [0, 0, 1, 1], [], []>} : vector<64x16xbf16>, vector<16x256xbf16>, vector<64x256xf32> -> vector<64x256xf32>
    %cst_59 = arith.constant 9.000000e+00 : f32
    %195 = vector.broadcast %cst_59 : f32 to vector<64x256xf32>
    %196 = arith.cmpf oeq, %175, %195 : vector<64x256xf32>
    %cst_60 = arith.constant 0.000000e+00 : f32
    %197 = vector.broadcast %cst_60 : f32 to vector<64x256xf32>
    %198 = arith.select %196, %194, %197 : vector<64x256xi1>, vector<64x256xf32>
    %199 = arith.addf %193, %198 : vector<64x256xf32>
    %c16 = arith.constant 16 : index
    %c0_61 = arith.constant 0 : index
    %200 = vector.load %arg7[%c16, %c0_61] : memref<64x256xbf16, #tpu.memory_space<vmem>>, vector<16x256xbf16>
    %cst_62 = arith.constant dense<0.000000e+00> : vector<64x256xf32>
    %201 = tpu.matmul %167, %200, %cst_62 {dimension_numbers = #tpu.dot_dimension_numbers<[1], [0], [0], [1], [0, 0, 1, 1], [], []>} : vector<64x16xbf16>, vector<16x256xbf16>, vector<64x256xf32> -> vector<64x256xf32>
    %202 = arith.subf %159, %201 : vector<64x256xf32>
    %cst_63 = arith.constant dense<0.000000e+00> : vector<64x256xf32>
    %203 = tpu.matmul %168, %200, %cst_63 {dimension_numbers = #tpu.dot_dimension_numbers<[1], [0], [0], [1], [0, 0, 1, 1], [], []>} : vector<64x16xbf16>, vector<16x256xbf16>, vector<64x256xf32> -> vector<64x256xf32>
    %cst_64 = arith.constant 0.000000e+00 : f32
    %204 = vector.broadcast %cst_64 : f32 to vector<64x256xf32>
    %205 = arith.cmpf oeq, %202, %204 : vector<64x256xf32>
    %cst_65 = arith.constant 0.000000e+00 : f32
    %206 = vector.broadcast %cst_65 : f32 to vector<64x256xf32>
    %207 = arith.select %205, %203, %206 : vector<64x256xi1>, vector<64x256xf32>
    %208 = arith.addf %199, %207 : vector<64x256xf32>
    %cst_66 = arith.constant dense<0.000000e+00> : vector<64x256xf32>
    %209 = tpu.matmul %169, %200, %cst_66 {dimension_numbers = #tpu.dot_dimension_numbers<[1], [0], [0], [1], [0, 0, 1, 1], [], []>} : vector<64x16xbf16>, vector<16x256xbf16>, vector<64x256xf32> -> vector<64x256xf32>
    %cst_67 = arith.constant 1.000000e+00 : f32
    %210 = vector.broadcast %cst_67 : f32 to vector<64x256xf32>
    %211 = arith.cmpf oeq, %202, %210 : vector<64x256xf32>
    %cst_68 = arith.constant 0.000000e+00 : f32
    %212 = vector.broadcast %cst_68 : f32 to vector<64x256xf32>
    %213 = arith.select %211, %209, %212 : vector<64x256xi1>, vector<64x256xf32>
    %214 = arith.addf %208, %213 : vector<64x256xf32>
    %cst_69 = arith.constant dense<0.000000e+00> : vector<64x256xf32>
    %215 = tpu.matmul %170, %200, %cst_69 {dimension_numbers = #tpu.dot_dimension_numbers<[1], [0], [0], [1], [0, 0, 1, 1], [], []>} : vector<64x16xbf16>, vector<16x256xbf16>, vector<64x256xf32> -> vector<64x256xf32>
    %cst_70 = arith.constant 8.000000e+00 : f32
    %216 = vector.broadcast %cst_70 : f32 to vector<64x256xf32>
    %217 = arith.cmpf oeq, %202, %216 : vector<64x256xf32>
    %cst_71 = arith.constant 0.000000e+00 : f32
    %218 = vector.broadcast %cst_71 : f32 to vector<64x256xf32>
    %219 = arith.select %217, %215, %218 : vector<64x256xi1>, vector<64x256xf32>
    %220 = arith.addf %214, %219 : vector<64x256xf32>
    %cst_72 = arith.constant dense<0.000000e+00> : vector<64x256xf32>
    %221 = tpu.matmul %171, %200, %cst_72 {dimension_numbers = #tpu.dot_dimension_numbers<[1], [0], [0], [1], [0, 0, 1, 1], [], []>} : vector<64x16xbf16>, vector<16x256xbf16>, vector<64x256xf32> -> vector<64x256xf32>
    %cst_73 = arith.constant 9.000000e+00 : f32
    %222 = vector.broadcast %cst_73 : f32 to vector<64x256xf32>
    %223 = arith.cmpf oeq, %202, %222 : vector<64x256xf32>
    %cst_74 = arith.constant 0.000000e+00 : f32
    %224 = vector.broadcast %cst_74 : f32 to vector<64x256xf32>
    %225 = arith.select %223, %221, %224 : vector<64x256xi1>, vector<64x256xf32>
    %226 = arith.addf %220, %225 : vector<64x256xf32>
    %c32 = arith.constant 32 : index
    %c0_75 = arith.constant 0 : index
    %227 = vector.load %arg7[%c32, %c0_75] : memref<64x256xbf16, #tpu.memory_space<vmem>>, vector<16x256xbf16>
    %cst_76 = arith.constant dense<0.000000e+00> : vector<64x256xf32>
    %228 = tpu.matmul %167, %227, %cst_76 {dimension_numbers = #tpu.dot_dimension_numbers<[1], [0], [0], [1], [0, 0, 1, 1], [], []>} : vector<64x16xbf16>, vector<16x256xbf16>, vector<64x256xf32> -> vector<64x256xf32>
    %229 = arith.subf %159, %228 : vector<64x256xf32>
    %cst_77 = arith.constant dense<0.000000e+00> : vector<64x256xf32>
    %230 = tpu.matmul %168, %227, %cst_77 {dimension_numbers = #tpu.dot_dimension_numbers<[1], [0], [0], [1], [0, 0, 1, 1], [], []>} : vector<64x16xbf16>, vector<16x256xbf16>, vector<64x256xf32> -> vector<64x256xf32>
    %cst_78 = arith.constant 0.000000e+00 : f32
    %231 = vector.broadcast %cst_78 : f32 to vector<64x256xf32>
    %232 = arith.cmpf oeq, %229, %231 : vector<64x256xf32>
    %cst_79 = arith.constant 0.000000e+00 : f32
    %233 = vector.broadcast %cst_79 : f32 to vector<64x256xf32>
    %234 = arith.select %232, %230, %233 : vector<64x256xi1>, vector<64x256xf32>
    %235 = arith.addf %226, %234 : vector<64x256xf32>
    %cst_80 = arith.constant dense<0.000000e+00> : vector<64x256xf32>
    %236 = tpu.matmul %169, %227, %cst_80 {dimension_numbers = #tpu.dot_dimension_numbers<[1], [0], [0], [1], [0, 0, 1, 1], [], []>} : vector<64x16xbf16>, vector<16x256xbf16>, vector<64x256xf32> -> vector<64x256xf32>
    %cst_81 = arith.constant 1.000000e+00 : f32
    %237 = vector.broadcast %cst_81 : f32 to vector<64x256xf32>
    %238 = arith.cmpf oeq, %229, %237 : vector<64x256xf32>
    %cst_82 = arith.constant 0.000000e+00 : f32
    %239 = vector.broadcast %cst_82 : f32 to vector<64x256xf32>
    %240 = arith.select %238, %236, %239 : vector<64x256xi1>, vector<64x256xf32>
    %241 = arith.addf %235, %240 : vector<64x256xf32>
    %cst_83 = arith.constant dense<0.000000e+00> : vector<64x256xf32>
    %242 = tpu.matmul %170, %227, %cst_83 {dimension_numbers = #tpu.dot_dimension_numbers<[1], [0], [0], [1], [0, 0, 1, 1], [], []>} : vector<64x16xbf16>, vector<16x256xbf16>, vector<64x256xf32> -> vector<64x256xf32>
    %cst_84 = arith.constant 8.000000e+00 : f32
    %243 = vector.broadcast %cst_84 : f32 to vector<64x256xf32>
    %244 = arith.cmpf oeq, %229, %243 : vector<64x256xf32>
    %cst_85 = arith.constant 0.000000e+00 : f32
    %245 = vector.broadcast %cst_85 : f32 to vector<64x256xf32>
    %246 = arith.select %244, %242, %245 : vector<64x256xi1>, vector<64x256xf32>
    %247 = arith.addf %241, %246 : vector<64x256xf32>
    %cst_86 = arith.constant dense<0.000000e+00> : vector<64x256xf32>
    %248 = tpu.matmul %171, %227, %cst_86 {dimension_numbers = #tpu.dot_dimension_numbers<[1], [0], [0], [1], [0, 0, 1, 1], [], []>} : vector<64x16xbf16>, vector<16x256xbf16>, vector<64x256xf32> -> vector<64x256xf32>
    %cst_87 = arith.constant 9.000000e+00 : f32
    %249 = vector.broadcast %cst_87 : f32 to vector<64x256xf32>
    %250 = arith.cmpf oeq, %229, %249 : vector<64x256xf32>
    %cst_88 = arith.constant 0.000000e+00 : f32
    %251 = vector.broadcast %cst_88 : f32 to vector<64x256xf32>
    %252 = arith.select %250, %248, %251 : vector<64x256xi1>, vector<64x256xf32>
    %253 = arith.addf %247, %252 : vector<64x256xf32>
    %c48 = arith.constant 48 : index
    %c0_89 = arith.constant 0 : index
    %254 = vector.load %arg7[%c48, %c0_89] : memref<64x256xbf16, #tpu.memory_space<vmem>>, vector<16x256xbf16>
    %cst_90 = arith.constant dense<0.000000e+00> : vector<64x256xf32>
    %255 = tpu.matmul %167, %254, %cst_90 {dimension_numbers = #tpu.dot_dimension_numbers<[1], [0], [0], [1], [0, 0, 1, 1], [], []>} : vector<64x16xbf16>, vector<16x256xbf16>, vector<64x256xf32> -> vector<64x256xf32>
    %256 = arith.subf %159, %255 : vector<64x256xf32>
    %cst_91 = arith.constant dense<0.000000e+00> : vector<64x256xf32>
    %257 = tpu.matmul %168, %254, %cst_91 {dimension_numbers = #tpu.dot_dimension_numbers<[1], [0], [0], [1], [0, 0, 1, 1], [], []>} : vector<64x16xbf16>, vector<16x256xbf16>, vector<64x256xf32> -> vector<64x256xf32>
    %cst_92 = arith.constant 0.000000e+00 : f32
    %258 = vector.broadcast %cst_92 : f32 to vector<64x256xf32>
    %259 = arith.cmpf oeq, %256, %258 : vector<64x256xf32>
    %cst_93 = arith.constant 0.000000e+00 : f32
    %260 = vector.broadcast %cst_93 : f32 to vector<64x256xf32>
    %261 = arith.select %259, %257, %260 : vector<64x256xi1>, vector<64x256xf32>
    %262 = arith.addf %253, %261 : vector<64x256xf32>
    %cst_94 = arith.constant dense<0.000000e+00> : vector<64x256xf32>
    %263 = tpu.matmul %169, %254, %cst_94 {dimension_numbers = #tpu.dot_dimension_numbers<[1], [0], [0], [1], [0, 0, 1, 1], [], []>} : vector<64x16xbf16>, vector<16x256xbf16>, vector<64x256xf32> -> vector<64x256xf32>
    %cst_95 = arith.constant 1.000000e+00 : f32
    %264 = vector.broadcast %cst_95 : f32 to vector<64x256xf32>
    %265 = arith.cmpf oeq, %256, %264 : vector<64x256xf32>
    %cst_96 = arith.constant 0.000000e+00 : f32
    %266 = vector.broadcast %cst_96 : f32 to vector<64x256xf32>
    %267 = arith.select %265, %263, %266 : vector<64x256xi1>, vector<64x256xf32>
    %268 = arith.addf %262, %267 : vector<64x256xf32>
    %cst_97 = arith.constant dense<0.000000e+00> : vector<64x256xf32>
    %269 = tpu.matmul %170, %254, %cst_97 {dimension_numbers = #tpu.dot_dimension_numbers<[1], [0], [0], [1], [0, 0, 1, 1], [], []>} : vector<64x16xbf16>, vector<16x256xbf16>, vector<64x256xf32> -> vector<64x256xf32>
    %cst_98 = arith.constant 8.000000e+00 : f32
    %270 = vector.broadcast %cst_98 : f32 to vector<64x256xf32>
    %271 = arith.cmpf oeq, %256, %270 : vector<64x256xf32>
    %cst_99 = arith.constant 0.000000e+00 : f32
    %272 = vector.broadcast %cst_99 : f32 to vector<64x256xf32>
    %273 = arith.select %271, %269, %272 : vector<64x256xi1>, vector<64x256xf32>
    %274 = arith.addf %268, %273 : vector<64x256xf32>
    %cst_100 = arith.constant dense<0.000000e+00> : vector<64x256xf32>
    %275 = tpu.matmul %171, %254, %cst_100 {dimension_numbers = #tpu.dot_dimension_numbers<[1], [0], [0], [1], [0, 0, 1, 1], [], []>} : vector<64x16xbf16>, vector<16x256xbf16>, vector<64x256xf32> -> vector<64x256xf32>
    %cst_101 = arith.constant 9.000000e+00 : f32
    %276 = vector.broadcast %cst_101 : f32 to vector<64x256xf32>
    %277 = arith.cmpf oeq, %256, %276 : vector<64x256xf32>
    %cst_102 = arith.constant 0.000000e+00 : f32
    %278 = vector.broadcast %cst_102 : f32 to vector<64x256xf32>
    %279 = arith.select %277, %275, %278 : vector<64x256xi1>, vector<64x256xf32>
    %280 = arith.addf %274, %279 : vector<64x256xf32>
    %281 = vector.extract_strided_slice %166 {offsets = [0, 0], sizes = [64, 32], strides = [1, 1]} : vector<128x32xbf16> to vector<64x32xbf16>
    %282 = vector.extract_strided_slice %281 {offsets = [0, 0], sizes = [64, 8], strides = [1, 1]} : vector<64x32xbf16> to vector<64x8xbf16>
    %cst_103 = arith.constant dense<0.000000e+00> : vector<64x32xf32>
    %283 = tpu.matmul %282, %161, %cst_103 {dimension_numbers = #tpu.dot_dimension_numbers<[1], [0], [0], [1], [0, 0, 1, 1], [], []>} : vector<64x8xbf16>, vector<8x32xbf16>, vector<64x32xf32> -> vector<64x32xf32>
    %284 = arith.truncf %283 : vector<64x32xf32> to vector<64x32xbf16>
    %285 = vector.extract_strided_slice %281 {offsets = [0, 8], sizes = [64, 8], strides = [1, 1]} : vector<64x32xbf16> to vector<64x8xbf16>
    %cst_104 = arith.constant dense<0.000000e+00> : vector<64x32xf32>
    %286 = tpu.matmul %285, %162, %cst_104 {dimension_numbers = #tpu.dot_dimension_numbers<[1], [0], [0], [1], [0, 0, 1, 1], [], []>} : vector<64x8xbf16>, vector<8x32xbf16>, vector<64x32xf32> -> vector<64x32xf32>
    %287 = arith.truncf %286 : vector<64x32xf32> to vector<64x32xbf16>
    %288 = vector.extract_strided_slice %281 {offsets = [0, 16], sizes = [64, 8], strides = [1, 1]} : vector<64x32xbf16> to vector<64x8xbf16>
    %cst_105 = arith.constant dense<0.000000e+00> : vector<64x32xf32>
    %289 = tpu.matmul %288, %163, %cst_105 {dimension_numbers = #tpu.dot_dimension_numbers<[1], [0], [0], [1], [0, 0, 1, 1], [], []>} : vector<64x8xbf16>, vector<8x32xbf16>, vector<64x32xf32> -> vector<64x32xf32>
    %290 = arith.truncf %289 : vector<64x32xf32> to vector<64x32xbf16>
    %291 = vector.extract_strided_slice %281 {offsets = [0, 24], sizes = [64, 8], strides = [1, 1]} : vector<64x32xbf16> to vector<64x8xbf16>
    %cst_106 = arith.constant dense<0.000000e+00> : vector<64x32xf32>
    %292 = tpu.matmul %291, %164, %cst_106 {dimension_numbers = #tpu.dot_dimension_numbers<[1], [0], [0], [1], [0, 0, 1, 1], [], []>} : vector<64x8xbf16>, vector<8x32xbf16>, vector<64x32xf32> -> vector<64x32xf32>
    %293 = arith.truncf %292 : vector<64x32xf32> to vector<64x32xbf16>
    %294 = tpu.concatenate %284, %287, %290, %293 in 0 : vector<64x32xbf16>, vector<64x32xbf16>, vector<64x32xbf16>, vector<64x32xbf16> -> vector<256x32xbf16>
    %295 = arith.truncf %280 : vector<64x256xf32> to vector<64x256xbf16>
    %cst_107 = arith.constant dense<0.000000e+00> : vector<64x32xf32>
    %296 = tpu.matmul %295, %294, %cst_107 {dimension_numbers = #tpu.dot_dimension_numbers<[1], [0], [0], [1], [0, 0, 1, 1], [], []>} : vector<64x256xbf16>, vector<256x32xbf16>, vector<64x32xf32> -> vector<64x32xf32>
    %297 = vector.broadcast %165 : vector<1x32xf32> to vector<64x32xf32>
    %298 = arith.addf %296, %297 : vector<64x32xf32>
    %c0_108 = arith.constant 0 : index
    %c0_109 = arith.constant 0 : index
    %c0_110 = arith.constant 0 : index
    %299 = vector.load %arg8[%c0_108, %c0_109, %c0_110] : memref<1x128x32xf32, #tpu.memory_space<vmem>>, vector<1x64x32xf32>
    %300 = vector.shape_cast %299 : vector<1x64x32xf32> to vector<64x32xf32>
    %301 = vector.shape_cast %298 : vector<64x32xf32> to vector<1x64x32xf32>
    tpu.vector_store %arg8[%c0_108, %c0_109, %c0_110], %301 {strides = array<i32>} : memref<1x128x32xf32, #tpu.memory_space<vmem>>, vector<1x64x32xf32>,
    %302 = vector.extract_strided_slice %151 {offsets = [64, 0], sizes = [64, 16], strides = [1, 1]} : vector<128x16xbf16> to vector<64x16xbf16>
    %303 = vector.extract_strided_slice %129 {offsets = [64, 0], sizes = [64, 16], strides = [1, 1]} : vector<128x16xbf16> to vector<64x16xbf16>
    %304 = vector.extract_strided_slice %135 {offsets = [64, 0], sizes = [64, 16], strides = [1, 1]} : vector<128x16xbf16> to vector<64x16xbf16>
    %305 = vector.extract_strided_slice %141 {offsets = [64, 0], sizes = [64, 16], strides = [1, 1]} : vector<128x16xbf16> to vector<64x16xbf16>
    %306 = vector.extract_strided_slice %147 {offsets = [64, 0], sizes = [64, 16], strides = [1, 1]} : vector<128x16xbf16> to vector<64x16xbf16>
    %cst_111 = arith.constant 0.000000e+00 : f32
    %307 = vector.broadcast %cst_111 : f32 to vector<64x256xf32>
    %c0_112 = arith.constant 0 : index
    %c0_113 = arith.constant 0 : index
    %308 = vector.load %arg7[%c0_112, %c0_113] : memref<64x256xbf16, #tpu.memory_space<vmem>>, vector<16x256xbf16>
    %cst_114 = arith.constant dense<0.000000e+00> : vector<64x256xf32>
    %309 = tpu.matmul %302, %308, %cst_114 {dimension_numbers = #tpu.dot_dimension_numbers<[1], [0], [0], [1], [0, 0, 1, 1], [], []>} : vector<64x16xbf16>, vector<16x256xbf16>, vector<64x256xf32> -> vector<64x256xf32>
    %310 = arith.subf %159, %309 : vector<64x256xf32>
    %cst_115 = arith.constant dense<0.000000e+00> : vector<64x256xf32>
    %311 = tpu.matmul %303, %308, %cst_115 {dimension_numbers = #tpu.dot_dimension_numbers<[1], [0], [0], [1], [0, 0, 1, 1], [], []>} : vector<64x16xbf16>, vector<16x256xbf16>, vector<64x256xf32> -> vector<64x256xf32>
    %cst_116 = arith.constant 0.000000e+00 : f32
    %312 = vector.broadcast %cst_116 : f32 to vector<64x256xf32>
    %313 = arith.cmpf oeq, %310, %312 : vector<64x256xf32>
    %cst_117 = arith.constant 0.000000e+00 : f32
    %314 = vector.broadcast %cst_117 : f32 to vector<64x256xf32>
    %315 = arith.select %313, %311, %314 : vector<64x256xi1>, vector<64x256xf32>
    %316 = arith.addf %307, %315 : vector<64x256xf32>
    %cst_118 = arith.constant dense<0.000000e+00> : vector<64x256xf32>
    %317 = tpu.matmul %304, %308, %cst_118 {dimension_numbers = #tpu.dot_dimension_numbers<[1], [0], [0], [1], [0, 0, 1, 1], [], []>} : vector<64x16xbf16>, vector<16x256xbf16>, vector<64x256xf32> -> vector<64x256xf32>
    %cst_119 = arith.constant 1.000000e+00 : f32
    %318 = vector.broadcast %cst_119 : f32 to vector<64x256xf32>
    %319 = arith.cmpf oeq, %310, %318 : vector<64x256xf32>
    %cst_120 = arith.constant 0.000000e+00 : f32
    %320 = vector.broadcast %cst_120 : f32 to vector<64x256xf32>
    %321 = arith.select %319, %317, %320 : vector<64x256xi1>, vector<64x256xf32>
    %322 = arith.addf %316, %321 : vector<64x256xf32>
    %cst_121 = arith.constant dense<0.000000e+00> : vector<64x256xf32>
    %323 = tpu.matmul %305, %308, %cst_121 {dimension_numbers = #tpu.dot_dimension_numbers<[1], [0], [0], [1], [0, 0, 1, 1], [], []>} : vector<64x16xbf16>, vector<16x256xbf16>, vector<64x256xf32> -> vector<64x256xf32>
    %cst_122 = arith.constant 8.000000e+00 : f32
    %324 = vector.broadcast %cst_122 : f32 to vector<64x256xf32>
    %325 = arith.cmpf oeq, %310, %324 : vector<64x256xf32>
    %cst_123 = arith.constant 0.000000e+00 : f32
    %326 = vector.broadcast %cst_123 : f32 to vector<64x256xf32>
    %327 = arith.select %325, %323, %326 : vector<64x256xi1>, vector<64x256xf32>
    %328 = arith.addf %322, %327 : vector<64x256xf32>
    %cst_124 = arith.constant dense<0.000000e+00> : vector<64x256xf32>
    %329 = tpu.matmul %306, %308, %cst_124 {dimension_numbers = #tpu.dot_dimension_numbers<[1], [0], [0], [1], [0, 0, 1, 1], [], []>} : vector<64x16xbf16>, vector<16x256xbf16>, vector<64x256xf32> -> vector<64x256xf32>
    %cst_125 = arith.constant 9.000000e+00 : f32
    %330 = vector.broadcast %cst_125 : f32 to vector<64x256xf32>
    %331 = arith.cmpf oeq, %310, %330 : vector<64x256xf32>
    %cst_126 = arith.constant 0.000000e+00 : f32
    %332 = vector.broadcast %cst_126 : f32 to vector<64x256xf32>
    %333 = arith.select %331, %329, %332 : vector<64x256xi1>, vector<64x256xf32>
    %334 = arith.addf %328, %333 : vector<64x256xf32>
    %c16_127 = arith.constant 16 : index
    %c0_128 = arith.constant 0 : index
    %335 = vector.load %arg7[%c16_127, %c0_128] : memref<64x256xbf16, #tpu.memory_space<vmem>>, vector<16x256xbf16>
    %cst_129 = arith.constant dense<0.000000e+00> : vector<64x256xf32>
    %336 = tpu.matmul %302, %335, %cst_129 {dimension_numbers = #tpu.dot_dimension_numbers<[1], [0], [0], [1], [0, 0, 1, 1], [], []>} : vector<64x16xbf16>, vector<16x256xbf16>, vector<64x256xf32> -> vector<64x256xf32>
    %337 = arith.subf %159, %336 : vector<64x256xf32>
    %cst_130 = arith.constant dense<0.000000e+00> : vector<64x256xf32>
    %338 = tpu.matmul %303, %335, %cst_130 {dimension_numbers = #tpu.dot_dimension_numbers<[1], [0], [0], [1], [0, 0, 1, 1], [], []>} : vector<64x16xbf16>, vector<16x256xbf16>, vector<64x256xf32> -> vector<64x256xf32>
    %cst_131 = arith.constant 0.000000e+00 : f32
    %339 = vector.broadcast %cst_131 : f32 to vector<64x256xf32>
    %340 = arith.cmpf oeq, %337, %339 : vector<64x256xf32>
    %cst_132 = arith.constant 0.000000e+00 : f32
    %341 = vector.broadcast %cst_132 : f32 to vector<64x256xf32>
    %342 = arith.select %340, %338, %341 : vector<64x256xi1>, vector<64x256xf32>
    %343 = arith.addf %334, %342 : vector<64x256xf32>
    %cst_133 = arith.constant dense<0.000000e+00> : vector<64x256xf32>
    %344 = tpu.matmul %304, %335, %cst_133 {dimension_numbers = #tpu.dot_dimension_numbers<[1], [0], [0], [1], [0, 0, 1, 1], [], []>} : vector<64x16xbf16>, vector<16x256xbf16>, vector<64x256xf32> -> vector<64x256xf32>
    %cst_134 = arith.constant 1.000000e+00 : f32
    %345 = vector.broadcast %cst_134 : f32 to vector<64x256xf32>
    %346 = arith.cmpf oeq, %337, %345 : vector<64x256xf32>
    %cst_135 = arith.constant 0.000000e+00 : f32
    %347 = vector.broadcast %cst_135 : f32 to vector<64x256xf32>
    %348 = arith.select %346, %344, %347 : vector<64x256xi1>, vector<64x256xf32>
    %349 = arith.addf %343, %348 : vector<64x256xf32>
    %cst_136 = arith.constant dense<0.000000e+00> : vector<64x256xf32>
    %350 = tpu.matmul %305, %335, %cst_136 {dimension_numbers = #tpu.dot_dimension_numbers<[1], [0], [0], [1], [0, 0, 1, 1], [], []>} : vector<64x16xbf16>, vector<16x256xbf16>, vector<64x256xf32> -> vector<64x256xf32>
    %cst_137 = arith.constant 8.000000e+00 : f32
    %351 = vector.broadcast %cst_137 : f32 to vector<64x256xf32>
    %352 = arith.cmpf oeq, %337, %351 : vector<64x256xf32>
    %cst_138 = arith.constant 0.000000e+00 : f32
    %353 = vector.broadcast %cst_138 : f32 to vector<64x256xf32>
    %354 = arith.select %352, %350, %353 : vector<64x256xi1>, vector<64x256xf32>
    %355 = arith.addf %349, %354 : vector<64x256xf32>
    %cst_139 = arith.constant dense<0.000000e+00> : vector<64x256xf32>
    %356 = tpu.matmul %306, %335, %cst_139 {dimension_numbers = #tpu.dot_dimension_numbers<[1], [0], [0], [1], [0, 0, 1, 1], [], []>} : vector<64x16xbf16>, vector<16x256xbf16>, vector<64x256xf32> -> vector<64x256xf32>
    %cst_140 = arith.constant 9.000000e+00 : f32
    %357 = vector.broadcast %cst_140 : f32 to vector<64x256xf32>
    %358 = arith.cmpf oeq, %337, %357 : vector<64x256xf32>
    %cst_141 = arith.constant 0.000000e+00 : f32
    %359 = vector.broadcast %cst_141 : f32 to vector<64x256xf32>
    %360 = arith.select %358, %356, %359 : vector<64x256xi1>, vector<64x256xf32>
    %361 = arith.addf %355, %360 : vector<64x256xf32>
    %c32_142 = arith.constant 32 : index
    %c0_143 = arith.constant 0 : index
    %362 = vector.load %arg7[%c32_142, %c0_143] : memref<64x256xbf16, #tpu.memory_space<vmem>>, vector<16x256xbf16>
    %cst_144 = arith.constant dense<0.000000e+00> : vector<64x256xf32>
    %363 = tpu.matmul %302, %362, %cst_144 {dimension_numbers = #tpu.dot_dimension_numbers<[1], [0], [0], [1], [0, 0, 1, 1], [], []>} : vector<64x16xbf16>, vector<16x256xbf16>, vector<64x256xf32> -> vector<64x256xf32>
    %364 = arith.subf %159, %363 : vector<64x256xf32>
    %cst_145 = arith.constant dense<0.000000e+00> : vector<64x256xf32>
    %365 = tpu.matmul %303, %362, %cst_145 {dimension_numbers = #tpu.dot_dimension_numbers<[1], [0], [0], [1], [0, 0, 1, 1], [], []>} : vector<64x16xbf16>, vector<16x256xbf16>, vector<64x256xf32> -> vector<64x256xf32>
    %cst_146 = arith.constant 0.000000e+00 : f32
    %366 = vector.broadcast %cst_146 : f32 to vector<64x256xf32>
    %367 = arith.cmpf oeq, %364, %366 : vector<64x256xf32>
    %cst_147 = arith.constant 0.000000e+00 : f32
    %368 = vector.broadcast %cst_147 : f32 to vector<64x256xf32>
    %369 = arith.select %367, %365, %368 : vector<64x256xi1>, vector<64x256xf32>
    %370 = arith.addf %361, %369 : vector<64x256xf32>
    %cst_148 = arith.constant dense<0.000000e+00> : vector<64x256xf32>
    %371 = tpu.matmul %304, %362, %cst_148 {dimension_numbers = #tpu.dot_dimension_numbers<[1], [0], [0], [1], [0, 0, 1, 1], [], []>} : vector<64x16xbf16>, vector<16x256xbf16>, vector<64x256xf32> -> vector<64x256xf32>
    %cst_149 = arith.constant 1.000000e+00 : f32
    %372 = vector.broadcast %cst_149 : f32 to vector<64x256xf32>
    %373 = arith.cmpf oeq, %364, %372 : vector<64x256xf32>
    %cst_150 = arith.constant 0.000000e+00 : f32
    %374 = vector.broadcast %cst_150 : f32 to vector<64x256xf32>
    %375 = arith.select %373, %371, %374 : vector<64x256xi1>, vector<64x256xf32>
    %376 = arith.addf %370, %375 : vector<64x256xf32>
    %cst_151 = arith.constant dense<0.000000e+00> : vector<64x256xf32>
    %377 = tpu.matmul %305, %362, %cst_151 {dimension_numbers = #tpu.dot_dimension_numbers<[1], [0], [0], [1], [0, 0, 1, 1], [], []>} : vector<64x16xbf16>, vector<16x256xbf16>, vector<64x256xf32> -> vector<64x256xf32>
    %cst_152 = arith.constant 8.000000e+00 : f32
    %378 = vector.broadcast %cst_152 : f32 to vector<64x256xf32>
    %379 = arith.cmpf oeq, %364, %378 : vector<64x256xf32>
    %cst_153 = arith.constant 0.000000e+00 : f32
    %380 = vector.broadcast %cst_153 : f32 to vector<64x256xf32>
    %381 = arith.select %379, %377, %380 : vector<64x256xi1>, vector<64x256xf32>
    %382 = arith.addf %376, %381 : vector<64x256xf32>
    %cst_154 = arith.constant dense<0.000000e+00> : vector<64x256xf32>
    %383 = tpu.matmul %306, %362, %cst_154 {dimension_numbers = #tpu.dot_dimension_numbers<[1], [0], [0], [1], [0, 0, 1, 1], [], []>} : vector<64x16xbf16>, vector<16x256xbf16>, vector<64x256xf32> -> vector<64x256xf32>
    %cst_155 = arith.constant 9.000000e+00 : f32
    %384 = vector.broadcast %cst_155 : f32 to vector<64x256xf32>
    %385 = arith.cmpf oeq, %364, %384 : vector<64x256xf32>
    %cst_156 = arith.constant 0.000000e+00 : f32
    %386 = vector.broadcast %cst_156 : f32 to vector<64x256xf32>
    %387 = arith.select %385, %383, %386 : vector<64x256xi1>, vector<64x256xf32>
    %388 = arith.addf %382, %387 : vector<64x256xf32>
    %c48_157 = arith.constant 48 : index
    %c0_158 = arith.constant 0 : index
    %389 = vector.load %arg7[%c48_157, %c0_158] : memref<64x256xbf16, #tpu.memory_space<vmem>>, vector<16x256xbf16>
    %cst_159 = arith.constant dense<0.000000e+00> : vector<64x256xf32>
    %390 = tpu.matmul %302, %389, %cst_159 {dimension_numbers = #tpu.dot_dimension_numbers<[1], [0], [0], [1], [0, 0, 1, 1], [], []>} : vector<64x16xbf16>, vector<16x256xbf16>, vector<64x256xf32> -> vector<64x256xf32>
    %391 = arith.subf %159, %390 : vector<64x256xf32>
    %cst_160 = arith.constant dense<0.000000e+00> : vector<64x256xf32>
    %392 = tpu.matmul %303, %389, %cst_160 {dimension_numbers = #tpu.dot_dimension_numbers<[1], [0], [0], [1], [0, 0, 1, 1], [], []>} : vector<64x16xbf16>, vector<16x256xbf16>, vector<64x256xf32> -> vector<64x256xf32>
    %cst_161 = arith.constant 0.000000e+00 : f32
    %393 = vector.broadcast %cst_161 : f32 to vector<64x256xf32>
    %394 = arith.cmpf oeq, %391, %393 : vector<64x256xf32>
    %cst_162 = arith.constant 0.000000e+00 : f32
    %395 = vector.broadcast %cst_162 : f32 to vector<64x256xf32>
    %396 = arith.select %394, %392, %395 : vector<64x256xi1>, vector<64x256xf32>
    %397 = arith.addf %388, %396 : vector<64x256xf32>
    %cst_163 = arith.constant dense<0.000000e+00> : vector<64x256xf32>
    %398 = tpu.matmul %304, %389, %cst_163 {dimension_numbers = #tpu.dot_dimension_numbers<[1], [0], [0], [1], [0, 0, 1, 1], [], []>} : vector<64x16xbf16>, vector<16x256xbf16>, vector<64x256xf32> -> vector<64x256xf32>
    %cst_164 = arith.constant 1.000000e+00 : f32
    %399 = vector.broadcast %cst_164 : f32 to vector<64x256xf32>
    %400 = arith.cmpf oeq, %391, %399 : vector<64x256xf32>
    %cst_165 = arith.constant 0.000000e+00 : f32
    %401 = vector.broadcast %cst_165 : f32 to vector<64x256xf32>
    %402 = arith.select %400, %398, %401 : vector<64x256xi1>, vector<64x256xf32>
    %403 = arith.addf %397, %402 : vector<64x256xf32>
    %cst_166 = arith.constant dense<0.000000e+00> : vector<64x256xf32>
    %404 = tpu.matmul %305, %389, %cst_166 {dimension_numbers = #tpu.dot_dimension_numbers<[1], [0], [0], [1], [0, 0, 1, 1], [], []>} : vector<64x16xbf16>, vector<16x256xbf16>, vector<64x256xf32> -> vector<64x256xf32>
    %cst_167 = arith.constant 8.000000e+00 : f32
    %405 = vector.broadcast %cst_167 : f32 to vector<64x256xf32>
    %406 = arith.cmpf oeq, %391, %405 : vector<64x256xf32>
    %cst_168 = arith.constant 0.000000e+00 : f32
    %407 = vector.broadcast %cst_168 : f32 to vector<64x256xf32>
    %408 = arith.select %406, %404, %407 : vector<64x256xi1>, vector<64x256xf32>
    %409 = arith.addf %403, %408 : vector<64x256xf32>
    %cst_169 = arith.constant dense<0.000000e+00> : vector<64x256xf32>
    %410 = tpu.matmul %306, %389, %cst_169 {dimension_numbers = #tpu.dot_dimension_numbers<[1], [0], [0], [1], [0, 0, 1, 1], [], []>} : vector<64x16xbf16>, vector<16x256xbf16>, vector<64x256xf32> -> vector<64x256xf32>
    %cst_170 = arith.constant 9.000000e+00 : f32
    %411 = vector.broadcast %cst_170 : f32 to vector<64x256xf32>
    %412 = arith.cmpf oeq, %391, %411 : vector<64x256xf32>
    %cst_171 = arith.constant 0.000000e+00 : f32
    %413 = vector.broadcast %cst_171 : f32 to vector<64x256xf32>
    %414 = arith.select %412, %410, %413 : vector<64x256xi1>, vector<64x256xf32>
    %415 = arith.addf %409, %414 : vector<64x256xf32>
    %416 = vector.extract_strided_slice %166 {offsets = [64, 0], sizes = [64, 32], strides = [1, 1]} : vector<128x32xbf16> to vector<64x32xbf16>
    %417 = vector.extract_strided_slice %416 {offsets = [0, 0], sizes = [64, 8], strides = [1, 1]} : vector<64x32xbf16> to vector<64x8xbf16>
    %cst_172 = arith.constant dense<0.000000e+00> : vector<64x32xf32>
    %418 = tpu.matmul %417, %161, %cst_172 {dimension_numbers = #tpu.dot_dimension_numbers<[1], [0], [0], [1], [0, 0, 1, 1], [], []>} : vector<64x8xbf16>, vector<8x32xbf16>, vector<64x32xf32> -> vector<64x32xf32>
    %419 = arith.truncf %418 : vector<64x32xf32> to vector<64x32xbf16>
    %420 = vector.extract_strided_slice %416 {offsets = [0, 8], sizes = [64, 8], strides = [1, 1]} : vector<64x32xbf16> to vector<64x8xbf16>
    %cst_173 = arith.constant dense<0.000000e+00> : vector<64x32xf32>
    %421 = tpu.matmul %420, %162, %cst_173 {dimension_numbers = #tpu.dot_dimension_numbers<[1], [0], [0], [1], [0, 0, 1, 1], [], []>} : vector<64x8xbf16>, vector<8x32xbf16>, vector<64x32xf32> -> vector<64x32xf32>
    %422 = arith.truncf %421 : vector<64x32xf32> to vector<64x32xbf16>
    %423 = vector.extract_strided_slice %416 {offsets = [0, 16], sizes = [64, 8], strides = [1, 1]} : vector<64x32xbf16> to vector<64x8xbf16>
    %cst_174 = arith.constant dense<0.000000e+00> : vector<64x32xf32>
    %424 = tpu.matmul %423, %163, %cst_174 {dimension_numbers = #tpu.dot_dimension_numbers<[1], [0], [0], [1], [0, 0, 1, 1], [], []>} : vector<64x8xbf16>, vector<8x32xbf16>, vector<64x32xf32> -> vector<64x32xf32>
    %425 = arith.truncf %424 : vector<64x32xf32> to vector<64x32xbf16>
    %426 = vector.extract_strided_slice %416 {offsets = [0, 24], sizes = [64, 8], strides = [1, 1]} : vector<64x32xbf16> to vector<64x8xbf16>
    %cst_175 = arith.constant dense<0.000000e+00> : vector<64x32xf32>
    %427 = tpu.matmul %426, %164, %cst_175 {dimension_numbers = #tpu.dot_dimension_numbers<[1], [0], [0], [1], [0, 0, 1, 1], [], []>} : vector<64x8xbf16>, vector<8x32xbf16>, vector<64x32xf32> -> vector<64x32xf32>
    %428 = arith.truncf %427 : vector<64x32xf32> to vector<64x32xbf16>
    %429 = tpu.concatenate %419, %422, %425, %428 in 0 : vector<64x32xbf16>, vector<64x32xbf16>, vector<64x32xbf16>, vector<64x32xbf16> -> vector<256x32xbf16>
    %430 = arith.truncf %415 : vector<64x256xf32> to vector<64x256xbf16>
    %cst_176 = arith.constant dense<0.000000e+00> : vector<64x32xf32>
    %431 = tpu.matmul %430, %429, %cst_176 {dimension_numbers = #tpu.dot_dimension_numbers<[1], [0], [0], [1], [0, 0, 1, 1], [], []>} : vector<64x256xbf16>, vector<256x32xbf16>, vector<64x32xf32> -> vector<64x32xf32>
    %432 = vector.broadcast %165 : vector<1x32xf32> to vector<64x32xf32>
    %433 = arith.addf %431, %432 : vector<64x32xf32>
    %c0_177 = arith.constant 0 : index
    %c64 = arith.constant 64 : index
    %c0_178 = arith.constant 0 : index
    %434 = vector.load %arg8[%c0_177, %c64, %c0_178] : memref<1x128x32xf32, #tpu.memory_space<vmem>>, vector<1x64x32xf32>
    %435 = vector.shape_cast %434 : vector<1x64x32xf32> to vector<64x32xf32>
    %436 = vector.shape_cast %433 : vector<64x32xf32> to vector<1x64x32xf32>
    tpu.vector_store %arg8[%c0_177, %c64, %c0_178], %436 {strides = array<i32>} : memref<1x128x32xf32, #tpu.memory_space<vmem>>, vector<1x64x32xf32>,
    return
  }
  func.func @transform_0(%arg0: i32) -> (i32, i32, i32) {
    %c0_i32 = arith.constant 0 : i32
    %c0_i32_0 = arith.constant 0 : i32
    %c0_i32_1 = arith.constant 0 : i32
    return %arg0, %c0_i32, %c0_i32_0 : i32, i32, i32
  }
  func.func @transform_1(%arg0: i32) -> (i32, i32) {
    %c0_i32 = arith.constant 0 : i32
    %c0_i32_0 = arith.constant 0 : i32
    %c0_i32_1 = arith.constant 0 : i32
    return %c0_i32, %c0_i32_0 : i32, i32
  }
  func.func @transform_2(%arg0: i32) -> (i32, i32) {
    %c0_i32 = arith.constant 0 : i32
    %c0_i32_0 = arith.constant 0 : i32
    %c0_i32_1 = arith.constant 0 : i32
    return %c0_i32, %c0_i32_0 : i32, i32
  }
  func.func @transform_3(%arg0: i32) -> (i32, i32) {
    %c0_i32 = arith.constant 0 : i32
    %c0_i32_0 = arith.constant 0 : i32
    %c0_i32_1 = arith.constant 0 : i32
    return %c0_i32, %c0_i32_0 : i32, i32
  }
  func.func @transform_4(%arg0: i32) -> (i32, i32) {
    %c0_i32 = arith.constant 0 : i32
    %c0_i32_0 = arith.constant 0 : i32
    %c0_i32_1 = arith.constant 0 : i32
    return %c0_i32, %c0_i32_0 : i32, i32
  }
  func.func @transform_5(%arg0: i32) -> (i32, i32) {
    %c0_i32 = arith.constant 0 : i32
    %c0_i32_0 = arith.constant 0 : i32
    %c0_i32_1 = arith.constant 0 : i32
    return %c0_i32, %c0_i32_0 : i32, i32
  }
  func.func @transform_6(%arg0: i32) -> (i32, i32) {
    %c0_i32 = arith.constant 0 : i32
    %c0_i32_0 = arith.constant 0 : i32
    %c0_i32_1 = arith.constant 0 : i32
    return %c0_i32, %c0_i32_0 : i32, i32
  }
  func.func @transform_7(%arg0: i32) -> (i32, i32, i32) {
    %c0_i32 = arith.constant 0 : i32
    %c0_i32_0 = arith.constant 0 : i32
    %c0_i32_1 = arith.constant 0 : i32
    return %arg0, %c0_i32, %c0_i32_0 : i32, i32, i32
  }
}

</mosaic_0001>

<bundles_post_ra>
// kernel: _lambda_.1
= control target key start
LH: loop header
LB: loop body
LE: loop exit
PB: predicated region body
PF: predicated region fallthrough
CT: control target
= control target key end

     0   :  { %vm15872_vm0 = vcmask 261120   ;;  %v15883_v3 = vmov 1   ;;  %s15864_s0 = inlined_call_operand.vmem [shape: bf16[1,128,32], index: 0, kind: input, shape index: {}]   ;;  %s15865_s1 = inlined_call_operand.vmem [shape: bf16[32,128], index: 1, kind: input, shape index: {}]   ;;  %s15866_s2 = inlined_call_operand.vmem [shape: f32[1,128], index: 2, kind: input, shape index: {}]   ;;  %s15867_s3 = inlined_call_operand.vmem [shape: bf16[32,32], index: 3, kind: input, shape index: {}]   ;;  %s15868_s4 = inlined_call_operand.vmem [shape: f32[1,32], index: 4, kind: input, shape index: {}]   ;;  %s15869_s5 = inlined_call_operand.vmem [shape: f32[128,2], index: 5, kind: input, shape index: {}]   ;;  %s15870_s6 = inlined_call_operand.vmem [shape: bf16[64,256], index: 6, kind: input, shape index: {}]   ;;  %s15871_s7 = inlined_call_operand.hbm [shape: f32[1,128,32], index: 7, kind: output, shape index: {}]  }
   0x1   :  { %v8968_v0 = vld [vmem:[%s15865_s1 + $0x8] sm:$0xff]   ;;  %v8969_v1 = vld [vmem:[%s15865_s1] sm:$0xff]   ;;  %8960 = vset.pattern.permute.xlu1 %v15883_v3  ;;  %8959 = vset.pattern.permute.xlu0 %v15883_v3  ;;  %v8972_v7 = vld [vmem:[%s15864_s0 + $0x10] sm:$0xff]  }
   0x2   :  { %8836 = vmatprep.subr.bf16.mxu0 %v8968_v0  ;;  %v8970_v2 = vld [vmem:[%s15864_s0] sm:$0xff]   ;;  %v8971_v4 = vld [vmem:[%s15864_s0 + $0x8] sm:$0xff]   ;;  %v9317_v8 = vld [vmem:[%s15869_s5 + $0x10] sm:$0xff] }
   0x3   :  { %8837 = vmatpush3.bf16.msra.mxu0 %v8968_v0  ;;  %8840 = vmatprep.mubr.msk.bf16.mxu0 %vm15872_vm0, %v8970_v2  ;;  %v9303_v5 = vld [vmem:[%s15869_s5 + $0x8] sm:$0xff]  ;;  %v9308_v6 = vld [vmem:[%s15869_s5] sm:$0xff]  ;;  %v9324_v9 = vld [vmem:[%s15869_s5 + $0x18] sm:$0xff] }
   0x4   :  { %8838 = vmatprep.subr.bf16.mxu0 %v8969_v1  ;;  %1524 = vperm.xlu1 %8960, %v9303_v5   ;;  %v8973_v10 = vld [vmem:[%s15864_s0 + $0x18] sm:$0xff]  }
   0x5   :  { %1520 = vperm.xlu0 %8959, %v9308_v6  }
   0x7   :  { %8839 = vmatpush3.bf16.msra.mxu0 %v8969_v1 }
   0x8   :  { %1528 = vperm.xlu1 %8960, %v9317_v8  }
   0xa   :  { %8841 = vmatmul.mubr.msk.bf16.vlgmr.msra.gmra.mxu0 %vm15872_vm0, %v8971_v4 }
   0xb   :  { %8844 = vmatprep.mubr.msk.bf16.mxu0 %vm15872_vm0, %v8972_v7 }
   0xc   :  { %1532 = vperm.xlu1 %8960, %v9324_v9  }
   0xd   :  { %12 = vsyncpa [#allocation3], 0  ;;  %v9335_v11 = vld [vmem:[%s15869_s5 + $0x20] sm:$0xff]  ;;  %v9342_v12 = vld [vmem:[%s15869_s5 + $0x28] sm:$0xff]  ;;  %v15885_v14 = vmov 0   ;;  %vm15880_vm1 = vcmask 359744  }
   0xe   :  { %v1381_v13 = vld [vmem:[%s15869_s5 + $0x30] sm:$0xff]  ;;  %2724 = vmatprep.mubr.bf16.mxu1 %v15885_v14  ;;  %v9353_v15 = vld [vmem:[%s15866_s2] ss:$0 sm:$0xff]  ;;  %vm15877_vm2 = vcmask 392544   ;;  %vm15879_vm3 = vcmask 326944   ;;  %vm15878_vm4 = vcmask 294144  }
   0xf   :  { %s9232_s28 = smov 32   ;;  %s9233_s29 = smov 88   ;;  %vm15876_vm8 = vcmask 31744  }
  0x10   :  { %1536 = vperm.xlu1 %8960, %v9335_v11   ;;  %s9234_s30 = smov 84   ;;  %s9235_s8 = smov 92  }
  0x11   :  { %s9236_s9 = smov 96   ;;  %s9237_s11 = smov 112  }
  0x12   :  { %8845 = vmatmul.mubr.msk.bf16.gmra.mxu0 %vm15872_vm0, %v8973_v10  ;;  %s9239_s26 = smov 80   ;;  %s9240_s14 = smov 120  }
  0x13   :  { %s9241_s15 = smov 104  }
  0x14   :  { %1540 = vperm.xlu1 %8960, %v9342_v12  }
  0x18   :  { %1544 = vperm.xlu1 %8960, %v1381_v13  }
  0x1c   :  { %8961 = vset.pattern.permute.xlu1 %v15885_v14 }
  0x7f   :  { %v9443_v0 = vpop.permute.xlu1 %1524 }
  0x80   :  { %v9453_v10 = vpop.permute.xlu0 %1520 }
  0x83   :  { %v9445_v1 = vpop.permute.xlu1 %1528 }
  0x87   :  { %v9447_v2 = vpop.permute.xlu1 %1532 }
  0x8b   :  { %v9449_v4 = vpop.permute.xlu1 %1536 }
  0x8f   :  { %v9451_v7 = vpop.permute.xlu1 %1540 }
  0x93   :  { %v9455_v13 = vpop.permute.xlu1 %1544 }
  0xca   :  { %v8842_v16 = vpop.f32.mrf.mxu0 }
  0xcb   :  { %v9356_v17 = vadd.f32 %v8842_v16, %v9353_v15  ;;  %v229_v16 = vlaneseq }
  0xcc   :  { %v166_v18 = vpop.f32.mrf.mxu0 }
  0xcd   :  { %16060 = vst [vmem:[#allocation5_spill] sm:$0xff] %v9356_v17  ;;  %v9359_v19 = vadd.f32 %v9353_v15, %v166_v18  ;;  %v657_v20 = vsel %vm15880_vm1, %v9356_v17, -inf  ;;  %v866_v24 = vsel %vm15877_vm2, %v9356_v17, -inf  ;;  %v448_v26 = vsel %vm15879_vm3, %v9356_v17, -inf }
  0xce   :  { %658 = vmax.xlane.f32.xlu0 %v657_v20  ;;  %v8843_v21 = vpop.f32.mrf.mxu0  ;;  %v238_v28 = vsel %vm15878_vm4, %v9356_v17, -inf }
  0xcf   :  { %v9364_v22 = vadd.f32 %v8843_v21, %v9353_v15  ;;  %v860_v23 = vsel %vm15877_vm2, %v9359_v19, -inf  ;;  %v651_v31 = vsel %vm15880_vm1, %v9359_v19, -inf  ;;  %v442_v35 = vsel %vm15879_vm3, %v9359_v19, -inf }
  0xd0   :  { %861 = vmax.xlane.f32.xlu1 %v860_v23  ;;  %v169_v30 = vpop.f32.mrf.mxu0  ;;  %v232_v38 = vsel %vm15878_vm4, %v9359_v19, -inf  ;;  %v9458_v21 = vand.u32 127, %v229_v16 }
  0xd1   :  { %16061 = vst [vmem:[#allocation6_spill] sm:$0xff] %v9364_v22  ;;  %v660_v25 = vsel %vm15880_vm1, %v9364_v22, -inf  ;;  %v869_v27 = vsel %vm15877_vm2, %v9364_v22, -inf  ;;  %v451_v29 = vsel %vm15879_vm3, %v9364_v22, -inf  ;;  %v9383_v33 = vadd.f32 %v9353_v15, %v169_v30 }
  0xd2   :  { %867 = vmax.xlane.f32.xlu0 %v866_v24  ;;  %v8846_v32 = vpop.f32.mrf.mxu0  ;;  %v241_v34 = vsel %vm15878_vm4, %v9364_v22, -inf  ;;  %16066 = vst [vmem:[#allocation11_spill] sm:$0xff] %v9458_v21  ;;  %vm15875_vm5 = vcmp.lt.s32.totalorder %v9458_v21, 12  ;;  %vm15874_vm6 = vcmp.lt.s32.totalorder %v9458_v21, 8  ;;  %vm15873_vm7 = vcmp.lt.s32.totalorder %v9458_v21, 4 }
  0xd3   :  { %v863_v37 = vsel %vm15877_vm2, %v9383_v33, -inf  ;;  %v9394_v40 = vadd.f32 %v8846_v32, %v9353_v15  ;;  %v445_v41 = vsel %vm15879_vm3, %v9383_v33, -inf  ;;  %v654_v42 = vsel %vm15880_vm1, %v9383_v33, -inf }
  0xd4   :  { %661 = vmax.xlane.f32.xlu1 %v660_v25  ;;  %v182_v36 = vpop.f32.mrf.mxu0  ;;  %v235_v44 = vsel %vm15878_vm4, %v9383_v33, -inf }
  0xd5   :  { %16062 = vst [vmem:[#allocation7_spill] sm:$0xff] %v9394_v40  ;;  %v669_v45 = vsel %vm15880_vm1, %v9394_v40, -inf  ;;  %v878_v47 = vsel %vm15877_vm2, %v9394_v40, -inf  ;;  %v460_v49 = vsel %vm15879_vm3, %v9394_v40, -inf  ;;  %v9418_v52 = vadd.f32 %v9353_v15, %v182_v36 }
  0xd6   :  { %449 = vmax.xlane.f32.xlu0 %v448_v26  ;;  %v8847_v39 = vpop.f32.mrf.mxu0  ;;  %v250_v53 = vsel %vm15878_vm4, %v9394_v40, -inf }
  0xd7   :  { %v9401_v43 = vadd.f32 %v8847_v39, %v9353_v15  ;;  %16064 = vst [vmem:[#allocation9_spill] sm:$0xff] %v9418_v52  ;;  %v663_v56 = vsel %vm15880_vm1, %v9418_v52, -inf  ;;  %v872_v58 = vsel %vm15877_vm2, %v9418_v52, -inf  ;;  %v454_v60 = vsel %vm15879_vm3, %v9418_v52, -inf }
  0xd8   :  { %870 = vmax.xlane.f32.xlu1 %v869_v27  ;;  %v185_v51 = vpop.f32.mrf.mxu0  ;;  %v244_v62 = vsel %vm15878_vm4, %v9418_v52, -inf }
  0xd9   :  { %16063 = vst [vmem:[#allocation8_spill] sm:$0xff] %v9401_v43  ;;  %v672_v46 = vsel %vm15880_vm1, %v9401_v43, -inf  ;;  %v881_v48 = vsel %vm15877_vm2, %v9401_v43, -inf  ;;  %v463_v50 = vsel %vm15879_vm3, %v9401_v43, -inf  ;;  %v9423_v54 = vadd.f32 %v9353_v15, %v185_v51 }
  0xda   :  { %239 = vmax.xlane.f32.xlu0 %v238_v28  ;;  %v253_v55 = vsel %vm15878_vm4, %v9401_v43, -inf }
  0xdb   :  { %16065 = vst [vmem:[#allocation10_spill] sm:$0xff] %v9423_v54  ;;  %v666_v57 = vsel %vm15880_vm1, %v9423_v54, -inf  ;;  %v875_v59 = vsel %vm15877_vm2, %v9423_v54, -inf  ;;  %v457_v61 = vsel %vm15879_vm3, %v9423_v54, -inf  ;;  %v247_v63 = vsel %vm15878_vm4, %v9423_v54, -inf }
  0xdc   :  { %452 = vmax.xlane.f32.xlu1 %v451_v29 }
  0xde   :  { %652 = vmax.xlane.f32.xlu0 %v651_v31 }
  0xe0   :  { %242 = vmax.xlane.f32.xlu1 %v241_v34 }
  0xe2   :  { %443 = vmax.xlane.f32.xlu0 %v442_v35 }
  0xe4   :  { %864 = vmax.xlane.f32.xlu1 %v863_v37 }
  0xe6   :  { %233 = vmax.xlane.f32.xlu0 %v232_v38 }
  0xe8   :  { %446 = vmax.xlane.f32.xlu1 %v445_v41 }
  0xea   :  { %655 = vmax.xlane.f32.xlu0 %v654_v42 }
  0xec   :  { %236 = vmax.xlane.f32.xlu1 %v235_v44 }
  0xee   :  { %670 = vmax.xlane.f32.xlu0 %v669_v45 }
  0xf0   :  { %673 = vmax.xlane.f32.xlu1 %v672_v46 }
  0xf2   :  { %879 = vmax.xlane.f32.xlu0 %v878_v47 }
  0xf4   :  { %882 = vmax.xlane.f32.xlu1 %v881_v48 }
  0xf6   :  { %461 = vmax.xlane.f32.xlu0 %v460_v49 }
  0xf8   :  { %464 = vmax.xlane.f32.xlu1 %v463_v50 }
  0xfa   :  { %251 = vmax.xlane.f32.xlu0 %v250_v53 }
  0xfc   :  { %254 = vmax.xlane.f32.xlu1 %v253_v55 }
  0xfe   :  { %664 = vmax.xlane.f32.xlu0 %v663_v56 }
 0x100   :  { %667 = vmax.xlane.f32.xlu1 %v666_v57 }
 0x102   :  { %873 = vmax.xlane.f32.xlu0 %v872_v58 }
 0x104   :  { %876 = vmax.xlane.f32.xlu1 %v875_v59 }
 0x106   :  { %455 = vmax.xlane.f32.xlu0 %v454_v60 }
 0x108   :  { %458 = vmax.xlane.f32.xlu1 %v457_v61 }
 0x10a   :  { %245 = vmax.xlane.f32.xlu0 %v244_v62 }
 0x10c   :  { %248 = vmax.xlane.f32.xlu1 %v247_v63 }
 0x157   :  { %v659_v15 = vpop.xlane.xlu0 %658 }
 0x158   :  { %v701_v18 = vsub.f32 %v9356_v17, %v659_v15 }
 0x159   :  { %v862_v20 = vpop.xlane.xlu1 %861 }
 0x15a   :  { %v719_v24 = vmul.f32 1.442695, %v701_v18  ;;  %v908_v35 = vsub.f32 %v9359_v19, %v862_v20 }
 0x15b   :  { %v868_v23 = vpop.xlane.xlu0 %867 }
 0x15c   :  { %v910_v25 = vsub.f32 %v9356_v17, %v868_v23  ;;  %9001 = vpow2.f32 %v719_v24  ;;  %v1071_v31 = vsel %vm15875_vm5, %v659_v15, %v868_v23  ;;  %v924_v42 = vmul.f32 1.442695, %v908_v35 }
 0x15d   :  { %v662_v26 = vpop.xlane.xlu1 %661 }
 0x15e   :  { %v928_v28 = vmul.f32 1.442695, %v910_v25  ;;  %v702_v44 = vsub.f32 %v9364_v22, %v662_v26 }
 0x15f   :  { %v450_v27 = vpop.xlane.xlu0 %449 }
 0x160   :  { %v492_v29 = vsub.f32 %v9356_v17, %v450_v27  ;;  %v1088_v32 = vsel %vm15874_vm6, %v450_v27, %v1071_v31  ;;  %9003 = vpow2.f32 %v928_v28  ;;  %v721_v53 = vmul.f32 1.442695, %v702_v44 }
 0x161   :  { %v871_v30 = vpop.xlane.xlu1 %870 }
 0x162   :  { %v510_v37 = vmul.f32 1.442695, %v492_v29  ;;  %v1072_v45 = vsel %vm15875_vm5, %v662_v26, %v871_v30  ;;  %v911_v55 = vsub.f32 %v9364_v22, %v871_v30 }
 0x163   :  { %v240_v34 = vpop.xlane.xlu0 %239 }
 0x164   :  { %v1105_v36 = vsel %vm15873_vm7, %v240_v34, %v1088_v32  ;;  %v282_v38 = vsub.f32 %v9356_v17, %v240_v34  ;;  %9005 = vpow2.f32 %v510_v37  ;;  %v930_v63 = vmul.f32 1.442695, %v911_v55 }
 0x165   :  { %1139 = vrot.lane.b32.xlu1 %v1105_v36, %s9232_s28  ;;  %v453_v39 = vpop.xlane.xlu1 %452  ;;  %9007 = vpow2.f32 %v924_v42 }
 0x166   :  { %v300_v46 = vmul.f32 1.442695, %v282_v38  ;;  %v1089_v47 = vsel %vm15874_vm6, %v453_v39, %v1072_v45  ;;  %v493_v15 = vsub.f32 %v9364_v22, %v453_v39 }
 0x167   :  { %v653_v41 = vpop.xlane.xlu0 %652 }
 0x168   :  { %v699_v48 = vsub.f32 %v9359_v19, %v653_v41  ;;  %9009 = vpow2.f32 %v300_v46  ;;  %v1069_v60 = vsel %vm15875_vm5, %v653_v41, %v862_v20  ;;  %v512_v26 = vmul.f32 1.442695, %v493_v15 }
 0x169   :  { %v243_v49 = vpop.xlane.xlu1 %242  ;;  %v9002_v59 = vpop.eup %9001  ;;  %9011 = vpow2.f32 %v721_v53 }
 0x16a   :  { %v1106_v50 = vsel %vm15873_vm7, %v243_v49, %v1089_v47  ;;  %v715_v56 = vmul.f32 1.442695, %v699_v48  ;;  %v283_v28 = vsub.f32 %v9364_v22, %v243_v49 }
 0x16b   :  { %v444_v51 = vpop.xlane.xlu0 %443  ;;  %1141 = vrot.lane.b32.xlu0 %v1106_v50, %s9232_s28 }
 0x16c   :  { %v490_v57 = vsub.f32 %v9359_v19, %v444_v51  ;;  %v1086_v61 = vsel %vm15874_vm6, %v444_v51, %v1069_v60  ;;  %9013 = vpow2.f32 %v715_v56  ;;  %v302_v38 = vmul.f32 1.442695, %v283_v28 }
 0x16d   :  { %v865_v58 = vpop.xlane.xlu1 %864  ;;  %v9004_v20 = vpop.eup %9003  ;;  %9015 = vpow2.f32 %v930_v63 }
 0x16e   :  { %v506_v18 = vmul.f32 1.442695, %v490_v57  ;;  %v909_v48 = vsub.f32 %v9383_v33, %v865_v58 }
 0x16f   :  { %767 = vrot.lane.b32.xlu0 %v9002_v59, %s9233_s29  ;;  %v234_v62 = vpop.xlane.xlu0 %233 }
 0x170   :  { %v1103_v16 = vsel %vm15873_vm7, %v234_v62, %v1086_v61  ;;  %v280_v23 = vsub.f32 %v9359_v19, %v234_v62  ;;  %9017 = vpow2.f32 %v506_v18  ;;  %v926_v59 = vmul.f32 1.442695, %v909_v48 }
 0x171   :  { %v447_v24 = vpop.xlane.xlu1 %446  ;;  %1135 = vrot.lane.b32.xlu1 %v1103_v16, %s9232_s28  ;;  %v9006_v32 = vpop.eup %9005  ;;  %9019 = vpow2.f32 %v512_v26 }
 0x172   :  { %v296_v29 = vmul.f32 1.442695, %v280_v23  ;;  %v9008_v37 = vpop.eup %9007  ;;  %v491_v60 = vsub.f32 %v9383_v33, %v447_v24 }
 0x173   :  { %976 = vrot.lane.b32.xlu0 %v9004_v20, %s9234_s30  ;;  %v656_v25 = vpop.xlane.xlu0 %655 }
 0x174   :  { %v1070_v27 = vsel %vm15875_vm5, %v656_v25, %v865_v58  ;;  %9021 = vpow2.f32 %v296_v29  ;;  %v700_v39 = vsub.f32 %v9383_v33, %v656_v25  ;;  %v508_v18 = vmul.f32 1.442695, %v491_v60 }
 0x175   :  { %v237_v30 = vpop.xlane.xlu1 %236  ;;  %v1087_v31 = vsel %vm15874_vm6, %v447_v24, %v1070_v27  ;;  %v9010_v42 = vpop.eup %9009 }
 0x176   :  { %v1104_v34 = vsel %vm15873_vm7, %v237_v30, %v1087_v31  ;;  %v9012_v47 = vpop.eup %9011  ;;  %v717_v49 = vmul.f32 1.442695, %v700_v39  ;;  %v281_v23 = vsub.f32 %v9383_v33, %v237_v30 }
 0x177   :  { %558 = vrot.lane.b32.xlu0 %v9006_v32, %s9235_s8  ;;  %1137 = vrot.lane.b32.xlu1 %v1104_v34, %s9232_s28  ;;  %v9505_v35 = vpop.xlane.xlu0 %670 }
 0x178   :  { %v705_v36 = vsub.f32 %v9394_v40, %v9505_v35  ;;  %v298_v28 = vmul.f32 1.442695, %v281_v23 }
 0x179   :  { %v9510_v41 = vpop.xlane.xlu1 %673  ;;  %v9014_v50 = vpop.eup %9013 }
 0x17a   :  { %v727_v44 = vmul.f32 1.442695, %v705_v36  ;;  %v9016_v57 = vpop.eup %9015  ;;  %v706_v29 = vsub.f32 %v9401_v43, %v9510_v41 }
 0x17b   :  { %348 = vrot.lane.b32.xlu0 %v9010_v42, %s9236_s9  ;;  %972 = vrot.lane.b32.xlu1 %v9008_v37, %s9234_s30  ;;  %v9514_v45 = vpop.xlane.xlu0 %879 }
 0x17c   :  { %9023 = vpow2.f32 %v727_v44  ;;  %v914_v46 = vsub.f32 %v9394_v40, %v9514_v45 }
 0x17d   :  { %9025 = vpow2.f32 %v302_v38  ;;  %v9519_v53 = vpop.xlane.xlu1 %882  ;;  %v9018_v58 = vpop.eup %9017  ;;  %v729_v38 = vmul.f32 1.442695, %v706_v29 }
 0x17e   :  { %v936_v51 = vmul.f32 1.442695, %v914_v46  ;;  %v9020_v16 = vpop.eup %9019  ;;  %v915_v39 = vsub.f32 %v9401_v43, %v9519_v53 }
 0x17f   :  { %763 = vrot.lane.b32.xlu0 %v9014_v50, %s9233_s29  ;;  %769 = vrot.lane.b32.xlu1 %v9012_v47, %s9233_s29  ;;  %v9523_v55 = vpop.xlane.xlu0 %461 }
 0x180   :  { %9027 = vpow2.f32 %v936_v51  ;;  %v496_v56 = vsub.f32 %v9394_v40, %v9523_v55  ;;  %v938_v50 = vmul.f32 1.442695, %v915_v39 }
 0x181   :  { %9029 = vpow2.f32 %v717_v49  ;;  %v9532_v63 = vpop.xlane.xlu1 %464  ;;  %v9022_v24 = vpop.eup %9021 }
 0x182   :  { %v518_v61 = vmul.f32 1.442695, %v496_v56  ;;  %v497_v51 = vsub.f32 %v9401_v43, %v9532_v63 }
 0x183   :  { %554 = vrot.lane.b32.xlu0 %v9018_v58, %s9235_s8  ;;  %978 = vrot.lane.b32.xlu1 %v9016_v57, %s9234_s30  ;;  %v9530_v62 = vpop.xlane.xlu0 %251 }
 0x184   :  { %9031 = vpow2.f32 %v518_v61  ;;  %v286_v15 = vsub.f32 %v9394_v40, %v9530_v62  ;;  %v520_v61 = vmul.f32 1.442695, %v497_v51 }
 0x185   :  { %9033 = vpow2.f32 %v926_v59  ;;  %v9545_v30 = vpop.xlane.xlu1 %254 }
 0x186   :  { %v308_v20 = vmul.f32 1.442695, %v286_v15  ;;  %v287_v15 = vsub.f32 %v9401_v43, %v9545_v30 }
 0x187   :  { %344 = vrot.lane.b32.xlu0 %v9022_v24, %s9236_s9  ;;  %560 = vrot.lane.b32.xlu1 %v9020_v16, %s9235_s8  ;;  %v9539_v25 = vpop.xlane.xlu0 %664 }
 0x188   :  { %9035 = vpow2.f32 %v308_v20  ;;  %v703_v26 = vsub.f32 %v9418_v52, %v9539_v25  ;;  %v310_v20 = vmul.f32 1.442695, %v287_v15 }
 0x189   :  { %v9024_v27 = vpop.eup %9023  ;;  %9037 = vpow2.f32 %v508_v18  ;;  %v9559_v47 = vpop.xlane.xlu1 %667 }
 0x18a   :  { %v9026_v31 = vpop.eup %9025  ;;  %v723_v32 = vmul.f32 1.442695, %v703_v26  ;;  %v704_v26 = vsub.f32 %v9423_v54, %v9559_v47 }
 0x18b   :  { %350 = vrot.lane.b32.xlu1 %v9026_v31, %s9236_s9  ;;  %775 = vrot.lane.b32.xlu0 %v9024_v27, %s9233_s29  ;;  %v9549_v34 = vpop.xlane.xlu0 %873 }
 0x18c   :  { %9039 = vpow2.f32 %v723_v32  ;;  %v912_v36 = vsub.f32 %v9418_v52, %v9549_v34  ;;  %v725_v31 = vmul.f32 1.442695, %v704_v26 }
 0x18d   :  { %v9028_v37 = vpop.eup %9027  ;;  %9041 = vpow2.f32 %v298_v28  ;;  %v9573_v18 = vpop.xlane.xlu1 %876 }
 0x18e   :  { %v9030_v42 = vpop.eup %9029  ;;  %v932_v44 = vmul.f32 1.442695, %v912_v36  ;;  %v913_v32 = vsub.f32 %v9423_v54, %v9573_v18 }
 0x18f   :  { %765 = vrot.lane.b32.xlu1 %v9030_v42, %s9233_s29  ;;  %984 = vrot.lane.b32.xlu0 %v9028_v37, %s9234_s30  ;;  %v9557_v46 = vpop.xlane.xlu0 %455 }
 0x190   :  { %9043 = vpow2.f32 %v932_v44  ;;  %v494_v48 = vsub.f32 %v9418_v52, %v9557_v46 }
 0x191   :  { %v9032_v49 = vpop.eup %9031  ;;  %9045 = vpow2.f32 %v729_v38  ;;  %v9581_v28 = vpop.xlane.xlu1 %458  ;;  %v934_v38 = vmul.f32 1.442695, %v913_v32 }
 0x192   :  { %v9034_v56 = vpop.eup %9033  ;;  %v514_v57 = vmul.f32 1.442695, %v494_v48  ;;  %v495_v39 = vsub.f32 %v9423_v54, %v9581_v28 }
 0x193   :  { %974 = vrot.lane.b32.xlu1 %v9034_v56, %s9234_s30  ;;  %566 = vrot.lane.b32.xlu0 %v9032_v49, %s9235_s8  ;;  %v9567_v59 = vpop.xlane.xlu0 %245 }
 0x194   :  { %9047 = vpow2.f32 %v514_v57  ;;  %v284_v60 = vsub.f32 %v9418_v52, %v9567_v59  ;;  %v516_v49 = vmul.f32 1.442695, %v495_v39 }
 0x195   :  { %v9036_v58 = vpop.eup %9035  ;;  %9049 = vpow2.f32 %v938_v50  ;;  %v9589_v44 = vpop.xlane.xlu1 %248 }
 0x196   :  { %v9038_v16 = vpop.eup %9037  ;;  %v304_v23 = vmul.f32 1.442695, %v284_v60  ;;  %v285_v50 = vsub.f32 %v9423_v54, %v9589_v44 }
 0x197   :  { %556 = vrot.lane.b32.xlu1 %v9038_v16, %s9235_s8  ;;  %356 = vrot.lane.b32.xlu0 %v9036_v58, %s9236_s9 }
 0x198   :  { %9051 = vpow2.f32 %v304_v23  ;;  %v306_v56 = vmul.f32 1.442695, %v285_v50 }
 0x199   :  { %v9040_v24 = vpop.eup %9039  ;;  %9053 = vpow2.f32 %v520_v61 }
 0x19a   :  { %v9042_v27 = vpop.eup %9041  ;;  %9055 = vpow2.f32 %v310_v20 }
 0x19b   :  { %346 = vrot.lane.b32.xlu1 %v9042_v27, %s9236_s9  ;;  %771 = vrot.lane.b32.xlu0 %v9040_v24, %s9233_s29  ;;  %9057 = vpow2.f32 %v725_v31 }
 0x19c   :  { %9059 = vpow2.f32 %v934_v38 }
 0x19d   :  { %v9044_v29 = vpop.eup %9043  ;;  %9061 = vpow2.f32 %v516_v49 }
 0x19e   :  { %v9046_v36 = vpop.eup %9045  ;;  %9063 = vpow2.f32 %v306_v56 }
 0x19f   :  { %777 = vrot.lane.b32.xlu1 %v9046_v36, %s9233_s29  ;;  %980 = vrot.lane.b32.xlu0 %v9044_v29, %s9234_s30 }
 0x1a1   :  { %v9048_v37 = vpop.eup %9047 }
 0x1a2   :  { %v9050_v42 = vpop.eup %9049 }
 0x1a3   :  { %986 = vrot.lane.b32.xlu1 %v9050_v42, %s9234_s30  ;;  %562 = vrot.lane.b32.xlu0 %v9048_v37, %s9235_s8 }
 0x1a5   :  { %v9052_v48 = vpop.eup %9051 }
 0x1a6   :  { %v9054_v51 = vpop.eup %9053 }
 0x1a7   :  { %568 = vrot.lane.b32.xlu1 %v9054_v51, %s9235_s8  ;;  %352 = vrot.lane.b32.xlu0 %v9052_v48, %s9236_s9  ;;  %v9056_v57 = vpop.eup %9055 }
 0x1a8   :  { %v9058_v60 = vpop.eup %9057 }
 0x1a9   :  { %v9060_v58 = vpop.eup %9059 }
 0x1aa   :  { %v9062_v61 = vpop.eup %9061 }
 0x1ab   :  { %358 = vrot.lane.b32.xlu1 %v9056_v57, %s9236_s9  ;;  %v9064_v15 = vpop.eup %9063 }
 0x1af   :  { %773 = vrot.lane.b32.xlu1 %v9058_v60, %s9233_s29 }
 0x1b3   :  { %982 = vrot.lane.b32.xlu1 %v9060_v58, %s9234_s30 }
 0x1b7   :  { %564 = vrot.lane.b32.xlu1 %v9062_v61, %s9235_s8 }
 0x1bb   :  { %354 = vrot.lane.b32.xlu1 %v9064_v15, %s9236_s9 }
 0x1d7   :  { %v9604_v23 = vpop.permute.xlu1 %1139 }
 0x1dd   :  { %v9602_v16 = vpop.permute.xlu0 %1141 }
 0x1e1   :  { %v768_v24 = vpop.permute.xlu0 %767 }
 0x1e2   :  { %v817_v20 = vsel %vm15876_vm8, %v768_v24, 0.0 }
 0x1e3   :  { %818 = vadd.xlane.f32.xlu0 %v817_v20  ;;  %v9607_v26 = vpop.permute.xlu1 %1135 }
 0x1e5   :  { %v977_v27 = vpop.permute.xlu0 %976 }
 0x1e6   :  { %v1026_v29 = vsel %vm15876_vm8, %v977_v27, 0.0 }
 0x1e7   :  { %1027 = vadd.xlane.f32.xlu0 %v1026_v29 }
 0x1e9   :  { %v9610_v31 = vpop.permute.xlu1 %1137  ;;  %v559_v32 = vpop.permute.xlu0 %558 }
 0x1ea   :  { %v608_v36 = vsel %vm15876_vm8, %v559_v32, 0.0 }
 0x1eb   :  { %609 = vadd.xlane.f32.xlu0 %v608_v36 }
 0x1ed   :  { %v973_v37 = vpop.permute.xlu1 %972  ;;  %v349_v38 = vpop.permute.xlu0 %348 }
 0x1ee   :  { %v399_v39 = vsel %vm15876_vm8, %v349_v38, 0.0  ;;  %v1020_v60 = vsel %vm15876_vm8, %v973_v37, 0.0 }
 0x1ef   :  { %400 = vadd.xlane.f32.xlu0 %v399_v39 }
 0x1f1   :  { %v770_v42 = vpop.permute.xlu1 %769  ;;  %v764_v48 = vpop.permute.xlu0 %763 }
 0x1f2   :  { %v820_v49 = vsel %vm15876_vm8, %v770_v42, 0.0  ;;  %v811_v50 = vsel %vm15876_vm8, %v764_v48, 0.0 }
 0x1f3   :  { %821 = vadd.xlane.f32.xlu1 %v820_v49  ;;  %812 = vadd.xlane.f32.xlu0 %v811_v50 }
 0x1f5   :  { %v979_v51 = vpop.permute.xlu1 %978  ;;  %v555_v56 = vpop.permute.xlu0 %554 }
 0x1f6   :  { %v1029_v57 = vsel %vm15876_vm8, %v979_v51, 0.0  ;;  %v602_v24 = vsel %vm15876_vm8, %v555_v56, 0.0 }
 0x1f7   :  { %1030 = vadd.xlane.f32.xlu1 %v1029_v57  ;;  %1021 = vadd.xlane.f32.xlu0 %v1020_v60 }
 0x1f9   :  { %v561_v58 = vpop.permute.xlu1 %560  ;;  %v345_v61 = vpop.permute.xlu0 %344 }
 0x1fa   :  { %v611_v15 = vsel %vm15876_vm8, %v561_v58, 0.0  ;;  %v393_v32 = vsel %vm15876_vm8, %v345_v61, 0.0 }
 0x1fb   :  { %612 = vadd.xlane.f32.xlu1 %v611_v15  ;;  %603 = vadd.xlane.f32.xlu0 %v602_v24 }
 0x1fd   :  { %v351_v20 = vpop.permute.xlu1 %350  ;;  %v776_v27 = vpop.permute.xlu0 %775 }
 0x1fe   :  { %v402_v29 = vsel %vm15876_vm8, %v351_v20, 0.0  ;;  %v829_v51 = vsel %vm15876_vm8, %v776_v27, 0.0  ;;  %v1073_v27 = vsel %vm15875_vm5, %v9539_v25, %v9549_v34 }
 0x1ff   :  { %403 = vadd.xlane.f32.xlu1 %v402_v29  ;;  %394 = vadd.xlane.f32.xlu0 %v393_v32  ;;  %v1090_v32 = vsel %vm15874_vm6, %v9557_v46, %v1073_v27  ;;  %v1074_v46 = vsel %vm15875_vm5, %v9559_v47, %v9573_v18  ;;  %v1583_v47 = vadd.f32 %v9453_v10, %v9359_v19 }
 0x201   :  { %v766_v36 = vpop.permute.xlu1 %765  ;;  %v985_v37 = vpop.permute.xlu0 %984 }
 0x202   :  { %v814_v38 = vsel %vm15876_vm8, %v766_v36, 0.0  ;;  %v1038_v58 = vsel %vm15876_vm8, %v985_v37, 0.0 }
 0x203   :  { %815 = vadd.xlane.f32.xlu1 %v814_v38  ;;  %v1107_v38 = vsel %vm15873_vm7, %v9567_v59, %v1090_v32  ;;  %v9652_v59 = vld [vmem:[%s15869_s5 + $0x38] sm:$0xff] }
 0x205   :  { %v975_v39 = vpop.permute.xlu1 %974  ;;  %v567_v42 = vpop.permute.xlu0 %566 }
 0x206   :  { %v1023_v48 = vsel %vm15876_vm8, %v975_v39, 0.0  ;;  %v620_v15 = vsel %vm15876_vm8, %v567_v42, 0.0 }
 0x207   :  { %1024 = vadd.xlane.f32.xlu0 %v1023_v48 }
 0x209   :  { %v557_v49 = vpop.permute.xlu1 %556  ;;  %v357_v56 = vpop.permute.xlu0 %356 }
 0x20a   :  { %v605_v50 = vsel %vm15876_vm8, %v557_v49, 0.0  ;;  %v411_v24 = vsel %vm15876_vm8, %v357_v56, 0.0  ;;  %v1091_v49 = vsel %vm15874_vm6, %v9581_v28, %v1074_v46  ;;  %v1599_v28 = vadd.f32 1.0, %v1583_v47 }
 0x20b   :  { %606 = vadd.xlane.f32.xlu1 %v605_v50  ;;  %830 = vadd.xlane.f32.xlu0 %v829_v51  ;;  %v1076_v50 = vsel %vm15875_vm5, %v9510_v41, %v9519_v53  ;;  %v1108_v18 = vsel %vm15873_vm7, %v9589_v44, %v1091_v49  ;;  %v1585_v53 = vadd.f32 %v9445_v1, %v9356_v17 }
 0x20c   :  { %v1093_v56 = vsel %vm15874_vm6, %v9532_v63, %v1076_v50  ;;  %v9679_v44 = vmul.f32 3.5, %v1599_v28 }
 0x20d   :  { %v347_v57 = vpop.permute.xlu1 %346  ;;  %v772_v61 = vpop.permute.xlu0 %771  ;;  %v1110_v10 = vsel %vm15873_vm7, %v9545_v30, %v1093_v56 }
 0x20e   :  { %v396_v60 = vsel %vm15876_vm8, %v347_v57, 0.0  ;;  %v823_v29 = vsel %vm15876_vm8, %v772_v61, 0.0  ;;  %v9684_v61 = vfloor.f32 %v9679_v44 }
 0x20f   :  { %397 = vadd.xlane.f32.xlu1 %v396_v60  ;;  %1039 = vadd.xlane.f32.xlu0 %v1038_v58  ;;  %v1601_v58 = vadd.f32 1.0, %v1585_v53 }
 0x210   :  { %vm1871_vm12 = vcmp.ge.f32.partialorder %v9684_v61, -1.0  ;;  %vm1887_vm13 = vcmp.le.f32.partialorder %v9684_v61, 6.0 }
 0x211   :  { %v981_v20 = vpop.permute.xlu0 %980  ;;  %v778_v42 = vpop.permute.xlu1 %777  ;;  %v9689_v1 = vmul.f32 3.5, %v1601_v58  ;;  %vm1903_vm14 = vmand %vm1871_vm12, %vm1887_vm13 }
 0x212   :  { %v1032_v37 = vsel %vm15876_vm8, %v981_v20, 0.0  ;;  %v832_v57 = vsel %vm15876_vm8, %v778_v42, 0.0  ;;  %v1584_v42 = vadd.f32 %v9443_v0, %v9383_v33 }
 0x213   :  { %621 = vadd.xlane.f32.xlu0 %v620_v15 }
 0x214   :  { %v1600_v46 = vadd.f32 1.0, %v1584_v42 }
 0x215   :  { %v563_v36 = vpop.permute.xlu0 %562  ;;  %v987_v48 = vpop.permute.xlu1 %986 }
 0x216   :  { %v614_v39 = vsel %vm15876_vm8, %v563_v36, 0.0  ;;  %v1041_v63 = vsel %vm15876_vm8, %v987_v48, 0.0  ;;  %v9723_v49 = vmul.f32 3.5, %v1600_v46 }
 0x217   :  { %412 = vadd.xlane.f32.xlu0 %v411_v24 }
 0x219   :  { %v353_v25 = vpop.permute.xlu0 %352  ;;  %v569_v51 = vpop.permute.xlu1 %568 }
 0x21a   :  { %v405_v34 = vsel %vm15876_vm8, %v353_v25, 0.0  ;;  %v623_v15 = vsel %vm15876_vm8, %v569_v51, 0.0 }
 0x21b   :  { %824 = vadd.xlane.f32.xlu0 %v823_v29 }
 0x21d   :  { %v359_v41 = vpop.permute.xlu1 %358 }
 0x21e   :  { %v414_v30 = vsel %vm15876_vm8, %v359_v41, 0.0 }
 0x21f   :  { %1033 = vadd.xlane.f32.xlu0 %v1032_v37 }
 0x220   :  { %1143 = vrot.lane.b32.xlu1 %v1107_v38, %s9232_s28 }
 0x221   :  { %v774_v60 = vpop.permute.xlu1 %773 }
 0x222   :  { %v826_v20 = vsel %vm15876_vm8, %v774_v60, 0.0 }
 0x223   :  { %615 = vadd.xlane.f32.xlu0 %v614_v39 }
 0x225   :  { %v983_v24 = vpop.permute.xlu1 %982 }
 0x226   :  { %v1035_v29 = vsel %vm15876_vm8, %v983_v24, 0.0 }
 0x227   :  { %406 = vadd.xlane.f32.xlu0 %v405_v34 }
 0x229   :  { %v565_v27 = vpop.permute.xlu1 %564 }
 0x22a   :  { %v617_v32 = vsel %vm15876_vm8, %v565_v27, 0.0 }
 0x22d   :  { %v355_v36 = vpop.permute.xlu1 %354 }
 0x22e   :  { %v408_v37 = vsel %vm15876_vm8, %v355_v36, 0.0 }
 0x23d   :  { %1548 = vperm.xlu0 %8959, %v9652_v59  }
 0x241   :  { %1145 = vrot.lane.b32.xlu0 %v1108_v18, %s9232_s28 }
 0x242   :  { %8962 = vset.pattern.permute.xlu0 %v15885_v14 }
 0x244   :  { %833 = vadd.xlane.f32.xlu1 %v832_v57 }
 0x245   :  { %1149 = vrot.lane.b32.xlu0 %v1110_v10, %s9232_s28 }
 0x248   :  { %1042 = vadd.xlane.f32.xlu1 %v1041_v63 }
 0x249   :  { %1398 = vperm.xlu0 %8962, %v9303_v5   ;;  %v9694_v5 = vfloor.f32 %v9689_v1 }
 0x24c   :  { %624 = vadd.xlane.f32.xlu1 %v623_v15 }
 0x24d   :  { %2559 = vrot.lane.b32.xlu0 %v9684_v61, %s9237_s11 }
 0x250   :  { %415 = vadd.xlane.f32.xlu1 %v414_v30 }
 0x251   :  { %1413 = vperm.xlu0 %8962, %v9335_v11   ;;  %v1075_v11 = vsel %vm15875_vm5, %v9505_v35, %v9514_v45 }
 0x252   :  { %v1092_v39 = vsel %vm15874_vm6, %v9523_v55, %v1075_v11  ;;  %v1586_v55 = vadd.f32 %v9447_v2, %v9364_v22 }
 0x253   :  { %v1109_v34 = vsel %vm15873_vm7, %v9530_v62, %v1092_v39 }
 0x254   :  { %827 = vadd.xlane.f32.xlu1 %v826_v20  ;;  %v1602_v51 = vadd.f32 1.0, %v1586_v55 }
 0x255   :  { %2563 = vrot.lane.b32.xlu0 %v9694_v5, %s9237_s11 }
 0x256   :  { %v9733_v2 = vmul.f32 3.5, %v1602_v51  ;;  %v2183_v51 = vsel %vm1903_vm14, 1, %v15885_v14 }
 0x258   :  { %1036 = vadd.xlane.f32.xlu1 %v1035_v29  ;;  %v9737_v57 = vfloor.f32 %v9733_v2 }
 0x25a   :  { %vm1874_vm15 = vcmp.ge.f32.partialorder %v9737_v57, -1.0 }
 0x25c   :  { %618 = vadd.xlane.f32.xlu1 %v617_v32 }
 0x260   :  { %409 = vadd.xlane.f32.xlu1 %v408_v37 }
 0x26c   :  { %v819_v38 = vpop.xlane.xlu0 %818 }
 0x270   :  { %v1028_v25 = vpop.xlane.xlu0 %1027 }
 0x271   :  { %1147 = vrot.lane.b32.xlu1 %v1109_v34, %s9232_s28  ;;  %v1233_v45 = vsel %vm15875_vm5, %v819_v38, %v1028_v25 }
 0x274   :  { %v610_v48 = vpop.xlane.xlu0 %609 }
 0x275   :  { %1393 = vperm.xlu1 %8961, %v9308_v6   ;;  %v1249_v62 = vsel %vm15874_vm6, %v610_v48, %v1233_v45 }
 0x278   :  { %v401_v35 = vpop.xlane.xlu0 %400 }
 0x279   :  { %1403 = vperm.xlu1 %8961, %v9317_v8   ;;  %v1265_v0 = vsel %vm15873_vm7, %v401_v35, %v1249_v62  ;;  %v9729_v8 = vfloor.f32 %v9723_v49  ;;  %v9193_v62 = vld [vmem:[%s15869_s5 + $0x30] sm:$0xff] }
 0x27a   :  { %9065 = vrcp.f32 %v1265_v0 }
 0x27b   :  { %vm1872_vm9 = vcmp.ge.f32.partialorder %v9729_v8, -1.0  ;;  %vm1888_vm10 = vcmp.le.f32.partialorder %v9729_v8, 6.0  ;;  %vm1840_vm12 = vcmp.le.f32.partialorder %v9729_v8, 7.0 }
 0x27c   :  { %v822_v50 = vpop.xlane.xlu1 %821  ;;  %v813_v6 = vpop.xlane.xlu0 %812  ;;  %vm1904_vm11 = vmand %vm1872_vm9, %vm1888_vm10  ;;  %vm1890_vm9 = vcmp.le.f32.partialorder %v9737_v57, 6.0 }
 0x27d   :  { %1408 = vperm.xlu1 %8961, %v9324_v9   ;;  %v2184_v48 = vsel %vm1904_vm11, 1, %v15885_v14  ;;  %vm1906_vm10 = vmand %vm1874_vm15, %vm1890_vm9  ;;  %vm1824_vm11 = vcmp.ge.f32.partialorder %v9729_v8, 0.0 }
 0x27e   :  { %vm1856_vm13 = vmand %vm1824_vm11, %vm1840_vm12  ;;  %vm1889_vm11 = vcmp.le.f32.partialorder %v9694_v5, 6.0 }
 0x280   :  { %v1031_v47 = vpop.xlane.xlu1 %1030  ;;  %v1022_v18 = vpop.xlane.xlu0 %1021 }
 0x281   :  { %2561 = vrot.lane.b32.xlu1 %v9729_v8, %s9237_s11  ;;  %v1234_v9 = vsel %vm15875_vm5, %v822_v50, %v1031_v47  ;;  %v1231_v41 = vsel %vm15875_vm5, %v813_v6, %v1022_v18 }
 0x284   :  { %v613_v56 = vpop.xlane.xlu1 %612  ;;  %v604_v28 = vpop.xlane.xlu0 %603 }
 0x285   :  { %1418 = vperm.xlu1 %8961, %v9342_v12   ;;  %v1250_v10 = vsel %vm15874_vm6, %v613_v56, %v1234_v9  ;;  %v1247_v53 = vsel %vm15874_vm6, %v604_v28, %v1231_v41  ;;  %v1588_v41 = vadd.f32 %v9451_v7, %v9423_v54 }
 0x287   :  { %v9066_v15 = vpop.eup %9065 }
 0x288   :  { %v404_v63 = vpop.xlane.xlu1 %403  ;;  %v395_v60 = vpop.xlane.xlu0 %394 }
 0x289   :  { %v1266_v12 = vsel %vm15873_vm7, %v404_v63, %v1250_v10  ;;  %v1263_v58 = vsel %vm15873_vm7, %v395_v60, %v1247_v53  ;;  %2565 = vrot.lane.b32.xlu1 %v9737_v57, %s9237_s11  ;;  %v1604_v60 = vadd.f32 1.0, %v1588_v41 }
 0x28a   :  { %9067 = vrcp.f32 %v1266_v12 }
 0x28b   :  { %9069 = vrcp.f32 %v1263_v58 }
 0x28c   :  { %v816_v30 = vpop.xlane.xlu1 %815 }
 0x28d   :  { %1315 = vrot.lane.b32.xlu1 %v9066_v15, %s9232_s28 }
 0x290   :  { %v1025_v24 = vpop.xlane.xlu0 %1024 }
 0x291   :  { %v1232_v32 = vsel %vm15875_vm5, %v816_v30, %v1025_v24  ;;  %v1620_v24 = vmul.f32 3.5, %v1604_v60 }
 0x294   :  { %v607_v20 = vpop.xlane.xlu1 %606  ;;  %v831_v27 = vpop.xlane.xlu0 %830 }
 0x295   :  { %v1248_v37 = vsel %vm15874_vm6, %v607_v20, %v1232_v32  ;;  %v1696_v20 = vsub.f32 %v9723_v49, %v9729_v8 }
 0x297   :  { %v9068_v29 = vpop.eup %9067 }
 0x298   :  { %v9070_v36 = vpop.eup %9069  ;;  %v398_v11 = vpop.xlane.xlu1 %397  ;;  %1317 = vrot.lane.b32.xlu0 %v9068_v29, %s9232_s28  ;;  %v9809_v29 = vfloor.f32 %v1620_v24 }
 0x299   :  { %v1040_v38 = vpop.xlane.xlu0 %1039  ;;  %v1264_v39 = vsel %vm15873_vm7, %v398_v11, %v1248_v37  ;;  %1311 = vrot.lane.b32.xlu1 %v9070_v36, %s9232_s28 }
 0x29a   :  { %9071 = vrcp.f32 %v1264_v39  ;;  %v1237_v34 = vsel %vm15875_vm5, %v831_v27, %v1040_v38  ;;  %v2186_v38 = vsel %vm1906_vm10, 1, %v15885_v14  ;;  %vm1876_vm14 = vcmp.ge.f32.partialorder %v9809_v29, -1.0 }
 0x29b   :  { %vm1892_vm15 = vcmp.le.f32.partialorder %v9809_v29, 6.0  ;;  %v9862_v41 = vsub.f32 %v1620_v24, %v9809_v29  ;;  %vm1873_vm10 = vcmp.ge.f32.partialorder %v9694_v5, -1.0 }
 0x29c   :  { %v9815_v37 = vpop.permute.xlu1 %1143  ;;  %vm1908_vm9 = vmand %vm1876_vm14, %vm1892_vm15  ;;  %vm1839_vm14 = vcmp.le.f32.partialorder %v9684_v61, 7.0 }
 0x29d   :  { %v622_v25 = vpop.xlane.xlu0 %621  ;;  %1428 = vperm.xlu1 %8961, %v9652_v59   ;;  %vm1905_vm12 = vmand %vm1873_vm10, %vm1889_vm11 }
 0x29e   :  { %v1253_v42 = vsel %vm15874_vm6, %v622_v25, %v1237_v34 }
 0x2a1   :  { %v413_v46 = vpop.xlane.xlu0 %412  ;;  %2201 = vrot.lane.b32.xlu1 %v2184_v48, %s9237_s11  ;;  %v9827_v48 = vsub.f32 %v9733_v2, %v9737_v57 }
 0x2a2   :  { %v1269_v35 = vsel %vm15873_vm7, %v413_v46, %v1253_v42  ;;  %8963 = vset.pattern.permute.xlu1 %v15883_v3 }
 0x2a3   :  { %9073 = vrcp.f32 %v1269_v35 }
 0x2a5   :  { %v825_v45 = vpop.xlane.xlu0 %824 }
 0x2a7   :  { %v9072_v59 = vpop.eup %9071 }
 0x2a8   :  { %1313 = vrot.lane.b32.xlu0 %v9072_v59, %s9232_s28 }
 0x2a9   :  { %v1034_v55 = vpop.xlane.xlu0 %1033 }
 0x2aa   :  { %v1235_v6 = vsel %vm15875_vm5, %v825_v45, %v1034_v55 }
 0x2ac   :  { %1423 = vperm.xlu0 %8962, %v9193_v62   ;;  %v1920_v62 = vsel %vm1856_vm13, 1, %v15885_v14  ;;  %vm1823_vm13 = vcmp.ge.f32.partialorder %v9684_v61, 0.0 }
 0x2ad   :  { %v616_v0 = vpop.xlane.xlu0 %615  ;;  %vm1855_vm15 = vmand %vm1823_vm13, %vm1839_vm14  ;;  %vm1842_vm13 = vcmp.le.f32.partialorder %v9737_v57, 7.0 }
 0x2ae   :  { %v1251_v47 = vsel %vm15874_vm6, %v616_v0, %v1235_v6  ;;  %v8974_v6 = vld [vmem:[%s15864_s0 + $0x20] sm:$0xff]  }
 0x2af   :  { %8848 = vmatprep.mubr.msk.bf16.mxu0 %vm15872_vm0, %v8974_v6 }
 0x2b0   :  { %v9074_v50 = vpop.eup %9073  ;;  %2199 = vrot.lane.b32.xlu0 %v2183_v51, %s9237_s11  ;;  %v8975_v51 = vld [vmem:[%s15864_s0 + $0x28] sm:$0xff]  }
 0x2b1   :  { %1323 = vrot.lane.b32.xlu1 %v9074_v50, %s9232_s28  ;;  %v407_v18 = vpop.xlane.xlu0 %406  ;;  %8964 = vset.pattern.permute.xlu0 %v15883_v3 }
 0x2b2   :  { %v1267_v56 = vsel %vm15873_vm7, %v407_v18, %v1251_v47  ;;  %v1712_v18 = vsub.f32 1.0, %v1696_v20  ;;  %8849 = vmatmul.mubr.msk.bf16.gmra.mxu0 %vm15872_vm0, %v8975_v51 }
 0x2b3   :  { %9075 = vrcp.f32 %v1267_v56 }
 0x2b8   :  { %v1549_v28 = vpop.permute.xlu0 %1548 }
 0x2b9   :  { %v1590_v9 = vadd.f32 %v1549_v28, %v9401_v43  ;;  %v2188_v28 = vsel %vm1908_vm9, 1, %v15885_v14 }
 0x2bb   :  { %v1606_v10 = vadd.f32 1.0, %v1590_v9 }
 0x2bc   :  { %v9793_v53 = vpop.permute.xlu0 %1145 }
 0x2bd   :  { %v1622_v63 = vmul.f32 3.5, %v1606_v10 }
 0x2bf   :  { %v9795_v58 = vfloor.f32 %v1622_v63 }
 0x2c0   :  { %v9076_v12 = vpop.eup %9075  ;;  %v9798_v15 = vpop.permute.xlu0 %1149 }
 0x2c1   :  { %1319 = vrot.lane.b32.xlu1 %v9076_v12, %s9232_s28  ;;  %v9801_v30 = vsub.f32 %v1622_v63, %v9795_v58 }
 0x2c4   :  { %v1399_v7 = vpop.permute.xlu0 %1398 }
 0x2c5   :  { %2281 = vrot.lane.b32.xlu1 %v1696_v20, %s9237_s11  ;;  %v1472_v27 = vadd.f32 %v1399_v7, %v9383_v33 }
 0x2c7   :  { %v1488_v32 = vadd.f32 1.0, %v1472_v27 }
 0x2c8   :  { %v9813_v36 = vpop.permute.xlu0 %2559 }
 0x2c9   :  { %2569 = vrot.lane.b32.xlu1 %v9809_v29, %s9237_s11  ;;  %v1504_v49 = vmul.f32 3.5, %v1488_v32 }
 0x2cb   :  { %v9817_v11 = vfloor.f32 %v1504_v49 }
 0x2cc   :  { %v1414_v39 = vpop.permute.xlu0 %1413 }
 0x2cd   :  { %2205 = vrot.lane.b32.xlu1 %v2186_v38, %s9237_s11  ;;  %v9822_v25 = vsub.f32 %v1504_v49, %v9817_v11  ;;  %v1475_v34 = vadd.f32 %v1414_v39, %v9418_v52  ;;  %v834_v42 = vpop.xlane.xlu1 %833  ;;  %v1587_v49 = vadd.f32 %v9449_v4, %v9418_v52  ;;  %v1186_v39 = vsub.f32 %v9364_v22, %v9602_v16  ;;  %v8976_v4 = vld [vmem:[%s15864_s0 + $0x30] sm:$0xff]   ;;  %v8977_v16 = vld [vmem:[%s15864_s0 + $0x38] sm:$0xff]   ;;  %s9238_s0 = smov 16  }
 0x2ce   :  { %8852 = vmatprep.mubr.msk.bf16.mxu0 %vm15872_vm0, %v8976_v4  ;;  %vm1776_vm14 = vcmp.ge.f32.partialorder %v9817_v11, -1.0 }
 0x2cf   :  { %v1491_v46 = vadd.f32 1.0, %v1475_v34  ;;  %8853 = vmatmul.mubr.msk.bf16.gmra.mxu0 %vm15872_vm0, %v8977_v16 }
 0x2d0   :  { %2982 = vmatprep.mubr.bf16.mxu0 %v15885_v14 }
 0x2d1   :  { %2285 = vrot.lane.b32.xlu1 %v9827_v48, %s9237_s11  ;;  %v1507_v35 = vmul.f32 3.5, %v1491_v46  ;;  %v1043_v45 = vpop.xlane.xlu1 %1042  ;;  %v1603_v46 = vadd.f32 1.0, %v1587_v49 }
 0x2d2   :  { %v1238_v0 = vsel %vm15875_vm5, %v834_v42, %v1043_v45 }
 0x2d3   :  { %v9833_v59 = vfloor.f32 %v1507_v35 }
 0x2d5   :  { %2573 = vrot.lane.b32.xlu1 %v9795_v58, %s9237_s11  ;;  %v9838_v55 = vsub.f32 %v1507_v35, %v9833_v59  ;;  %v625_v2 = vpop.xlane.xlu1 %624 }
 0x2d6   :  { %v1254_v8 = vsel %vm15874_vm6, %v625_v2, %v1238_v0  ;;  %v1205_v2 = vmul.f32 1.442695, %v1186_v39 }
 0x2d9   :  { %1937 = vrot.lane.b32.xlu1 %v1920_v62, %s9237_s11  ;;  %v416_v50 = vpop.xlane.xlu1 %415 }
 0x2da   :  { %v1270_v47 = vsel %vm15873_vm7, %v416_v50, %v1254_v8  ;;  %v1695_v8 = vsub.f32 %v9679_v44, %v9684_v61  ;;  %v1619_v50 = vmul.f32 3.5, %v1603_v46  ;;  %v1589_v44 = vadd.f32 %v9455_v13, %v9394_v40 }
 0x2db   :  { %9077 = vrcp.f32 %v1270_v47  ;;  %v9921_v13 = vsub.f32 %v9689_v1, %v9694_v5 }
 0x2dc   :  { %v9906_v51 = vfloor.f32 %v1619_v50 }
 0x2dd   :  { %2017 = vrot.lane.b32.xlu1 %v1712_v18, %s9237_s11  ;;  %v828_v56 = vpop.xlane.xlu1 %827 }
 0x2de   :  { %vm1875_vm9 = vcmp.ge.f32.partialorder %v9906_v51, -1.0  ;;  %vm1891_vm10 = vcmp.le.f32.partialorder %v9906_v51, 6.0 }
 0x2df   :  { %vm1907_vm11 = vmand %vm1875_vm9, %vm1891_vm10 }
 0x2e0   :  { %v2187_v16 = vsel %vm1907_vm11, 1, %v15885_v14 }
 0x2e1   :  { %2209 = vrot.lane.b32.xlu1 %v2188_v28, %s9237_s11  ;;  %v1037_v9 = vpop.xlane.xlu1 %1036 }
 0x2e2   :  { %v1236_v60 = vsel %vm15875_vm5, %v828_v56, %v1037_v9  ;;  %v1605_v56 = vadd.f32 1.0, %v1589_v44  ;;  %v2185_v9 = vsel %vm1905_vm12, 1, %v15885_v14  ;;  %vm1826_vm12 = vcmp.ge.f32.partialorder %v9737_v57, 0.0 }
 0x2e3   :  { %vm1858_vm10 = vmand %vm1826_vm12, %vm1842_vm13  ;;  %vm1825_vm12 = vcmp.ge.f32.partialorder %v9694_v5, 0.0  ;;  %vm1841_vm13 = vcmp.le.f32.partialorder %v9694_v5, 7.0 }
 0x2e5   :  { %2289 = vrot.lane.b32.xlu1 %v9862_v41, %s9237_s11  ;;  %v619_v10 = vpop.xlane.xlu1 %618 }
 0x2e6   :  { %v1252_v12 = vsel %vm15874_vm6, %v619_v10, %v1236_v60  ;;  %v1184_v10 = vsub.f32 %v9383_v33, %v9610_v31 }
 0x2e8   :  { %v9078_v63 = vpop.eup %9077 }
 0x2e9   :  { %v410_v20 = vpop.xlane.xlu1 %409  ;;  %1325 = vrot.lane.b32.xlu0 %v9078_v63, %s9232_s28  ;;  %v9917_v63 = vpop.permute.xlu0 %2563 }
 0x2ea   :  { %v1268_v7 = vsel %vm15873_vm7, %v410_v20, %v1252_v12  ;;  %v9923_v12 = vmul.f32 3.5, %v1605_v56 }
 0x2eb   :  { %9079 = vrcp.f32 %v1268_v7 }
 0x2ec   :  { %9081 = vpow2.f32 %v1205_v2  ;;  %v9939_v1 = vfloor.f32 %v9923_v12 }
 0x2ed   :  { %v9873_v24 = vpop.permute.xlu1 %1147 }
 0x2f1   :  { %v1394_v27 = vpop.permute.xlu1 %1393 }
 0x2f2   :  { %v1471_v32 = vadd.f32 %v1394_v27, %v9359_v19  ;;  %v1185_v27 = vsub.f32 %v9356_v17, %v9604_v23  ;;  %v1183_v23 = vsub.f32 %v9359_v19, %v9607_v26  ;;  %v1711_v26 = vsub.f32 1.0, %v1695_v8 }
 0x2f4   :  { %v1487_v38 = vadd.f32 1.0, %v1471_v32  ;;  %v1201_v32 = vmul.f32 1.442695, %v1184_v10  ;;  %v1199_v61 = vmul.f32 1.442695, %v1183_v23  ;;  %v1187_v10 = vsub.f32 %v9418_v52, %v9815_v37 }
 0x2f5   :  { %v9880_v34 = vpop.permute.xlu1 %1403  ;;  %v1714_v23 = vsub.f32 1.0, %v9827_v48 }
 0x2f6   :  { %v1503_v42 = vmul.f32 3.5, %v1487_v38  ;;  %9083 = vpow2.f32 %v1201_v32 }
 0x2f8   :  { %v9080_v35 = vpop.eup %9079  ;;  %v9882_v45 = vfloor.f32 %v1503_v42 }
 0x2f9   :  { %v9884_v62 = vpop.permute.xlu1 %1408  ;;  %1321 = vrot.lane.b32.xlu0 %v9080_v35, %s9232_s28  ;;  %v9082_v31 = vpop.eup %9081  ;;  %v1919_v35 = vsel %vm1855_vm15, 1, %v15885_v14  ;;  %vm1792_vm15 = vcmp.le.f32.partialorder %v9817_v11, 6.0 }
 0x2fa   :  { %v9888_v0 = vsub.f32 %v1503_v42, %v9882_v45  ;;  %v1203_v42 = vmul.f32 1.442695, %v1185_v27  ;;  %vm9969_vm11 = vmand %vm1776_vm14, %vm1792_vm15  ;;  %vm1878_vm14 = vcmp.ge.f32.partialorder %v9795_v58, -1.0  ;;  %vm1894_vm15 = vcmp.le.f32.partialorder %v9795_v58, 6.0 }
 0x2fb   :  { %vm1910_vm7 = vmand %vm1878_vm14, %vm1894_vm15  ;;  %vm1775_vm6 = vcmp.ge.f32.partialorder %v9882_v45, -1.0  ;;  %vm1791_vm14 = vcmp.le.f32.partialorder %v9882_v45, 6.0 }
 0x2fc   :  { %9085 = vpow2.f32 %v1203_v42 }
 0x2fd   :  { %v9899_v6 = vpop.permute.xlu1 %2561  ;;  %2279 = vrot.lane.b32.xlu0 %v1695_v8, %s9237_s11  ;;  %9087 = vpow2.f32 %v1199_v61 }
 0x301   :  { %v1419_v47 = vpop.permute.xlu1 %1418  ;;  %2567 = vrot.lane.b32.xlu0 %v9906_v51, %s9237_s11 }
 0x302   :  { %v1476_v18 = vadd.f32 %v1419_v47, %v9423_v54 }
 0x303   :  { %v9084_v47 = vpop.eup %9083 }
 0x304   :  { %v1492_v28 = vadd.f32 1.0, %v1476_v18  ;;  %v9955_v18 = vsub.f32 %v1619_v50, %v9906_v51 }
 0x305   :  { %2203 = vrot.lane.b32.xlu0 %v2185_v9, %s9237_s11  ;;  %v9927_v7 = vpop.permute.xlu1 %2565 }
 0x306   :  { %v1508_v60 = vmul.f32 3.5, %v1492_v28 }
 0x308   :  { %v9925_v20 = vfloor.f32 %v1508_v60 }
 0x309   :  { %2283 = vrot.lane.b32.xlu0 %v9921_v13, %s9237_s11  ;;  %v1316_v46 = vpop.permute.xlu1 %1315  ;;  %v9086_v57 = vpop.eup %9085 }
 0x30a   :  { %v9934_v49 = vsub.f32 %v1508_v60, %v9925_v20  ;;  %v1318_v38 = vpop.permute.xlu0 %1317  ;;  %v1361_v27 = vmul.f32 %v9086_v57, %v1316_v46  ;;  %v9088_v42 = vpop.eup %9087 }
 0x30b   :  { %v1362_v39 = vmul.f32 %v9082_v31, %v1318_v38  ;;  %v1922_v31 = vsel %vm1858_vm10, 1, %v15885_v14  ;;  %v1207_v38 = vmul.f32 1.442695, %v1187_v10  ;;  %vm1857_vm10 = vmand %vm1825_vm12, %vm1841_vm13  ;;  %vm1877_vm12 = vcmp.ge.f32.partialorder %v9939_v1, -1.0 }
 0x30c   :  { %vm1893_vm13 = vcmp.le.f32.partialorder %v9939_v1, 6.0  ;;  %v15884_v50 = vsub.f32 1.0, %v9934_v49 }
 0x30d   :  { %2571 = vrot.lane.b32.xlu0 %v9939_v1, %s9237_s11  ;;  %2117 = vrot.lane.b32.xlu1 %v1362_v39, %s9238_s0  ;;  %v1312_v2 = vpop.permute.xlu1 %1311  ;;  %9089 = vpow2.f32 %v1207_v38  ;;  %vm1909_vm15 = vmand %vm1877_vm12, %vm1893_vm13  ;;  %vm1843_vm12 = vcmp.le.f32.partialorder %v9906_v51, 7.0 }
 0x30e   :  { %v1359_v46 = vmul.f32 %v9088_v42, %v1312_v2 }
 0x311   :  { %1935 = vrot.lane.b32.xlu0 %v1919_v35, %s9237_s11  ;;  %v1189_v35 = vsub.f32 %v9394_v40, %v9873_v24  ;;  %v1713_v24 = vsub.f32 1.0, %v9921_v13  ;;  %v16073_v13 = vmov 0 }
 0x315   :  { %2015 = vrot.lane.b32.xlu0 %v1711_v26, %s9237_s11  ;;  %v1921_v26 = vsel %vm1857_vm10, 1, %v15885_v14  ;;  %vm10013_vm10 = vmand %vm1775_vm6, %vm1791_vm14  ;;  %vm1827_vm6 = vcmp.ge.f32.partialorder %v9906_v51, 0.0 }
 0x318   :  { %v1429_v4 = vpop.permute.xlu1 %1428 }
 0x319   :  { %v1478_v44 = vadd.f32 %v1429_v4, %v9401_v43  ;;  %2207 = vrot.lane.b32.xlu0 %v2187_v16, %s9237_s11  ;;  %v2190_v4 = vsel %vm1910_vm7, 1, %v15885_v14  ;;  %v1211_v16 = vmul.f32 1.442695, %v1189_v35 }
 0x31a   :  { %v1314_v56 = vpop.permute.xlu0 %1313  ;;  %v9090_v57 = vpop.eup %9089 }
 0x31b   :  { %v1494_v8 = vadd.f32 1.0, %v1478_v44  ;;  %v1360_v28 = vmul.f32 %v9084_v47, %v1314_v56  ;;  %9091 = vpow2.f32 %v1211_v16  ;;  %v1474_v47 = vadd.f32 %v9884_v62, %v9364_v22 }
 0x31c   :  { %v9961_v9 = vpop.permute.xlu1 %2201  ;;  %v2189_v62 = vsel %vm1909_vm15, 1, %v15885_v14  ;;  %vm1859_vm15 = vmand %vm1827_vm6, %vm1843_vm12  ;;  %vm1829_vm6 = vcmp.ge.f32.partialorder %v9939_v1, 0.0  ;;  %vm1845_vm12 = vcmp.le.f32.partialorder %v9939_v1, 7.0 }
 0x31d   :  { %v1510_v60 = vmul.f32 3.5, %v1494_v8  ;;  %vm15891_vm9 = vcmp.ne.s32.totalorder %v9961_v9, 0  ;;  %2287 = vrot.lane.b32.xlu0 %v9955_v18, %s9237_s11  ;;  %2113 = vrot.lane.b32.xlu1 %v1360_v28, %s9238_s0 }
 0x31e   :  { %vm9979_vm0 = vmand %vm9969_vm11, %vm15891_vm9 }
 0x31f   :  { %v9973_v32 = vfloor.f32 %v1510_v60 }
 0x321   :  { %v9985_v39 = vsub.f32 %v1510_v60, %v9973_v32  ;;  %2115 = vrot.lane.b32.xlu0 %v1361_v27, %s9238_s0  ;;  %1941 = vrot.lane.b32.xlu1 %v1922_v31, %s9237_s11  ;;  %v1490_v60 = vadd.f32 1.0, %v1474_v47 }
 0x323   :  { %v1324_v8 = vpop.permute.xlu1 %1323  ;;  %v10033_v38 = vmul.f32 3.5, %v1490_v60 }
 0x325   :  { %2111 = vrot.lane.b32.xlu0 %v1359_v46, %s9238_s0  ;;  %2021 = vrot.lane.b32.xlu1 %v1714_v23, %s9237_s11  ;;  %v1701_v23 = vsub.f32 %v9923_v12, %v9939_v1  ;;  %v10041_v46 = vfloor.f32 %v10033_v38 }
 0x327   :  { %v1424_v61 = vpop.permute.xlu0 %1423  ;;  %vm1778_vm13 = vcmp.ge.f32.partialorder %v10041_v46, -1.0  ;;  %vm1794_vm14 = vcmp.le.f32.partialorder %v10041_v46, 6.0  ;;  %v1717_v60 = vsub.f32 1.0, %v1701_v23 }
 0x328   :  { %v1477_v5 = vadd.f32 %v1424_v61, %v9394_v40  ;;  %v9092_v35 = vpop.eup %9091  ;;  %vm10054_vm2 = vmand %vm1778_vm13, %vm1794_vm14 }
 0x329   :  { %1939 = vrot.lane.b32.xlu0 %v1921_v26, %s9237_s11  ;;  %2213 = vrot.lane.b32.xlu1 %v2190_v4, %s9237_s11  ;;  %v16075_v26 = vmov 0  ;;  %v1923_v4 = vsel %vm1859_vm15, 1, %v15885_v14  ;;  %vm1861_vm13 = vmand %vm1829_vm6, %vm1845_vm12  ;;  %vm1732_vm6 = vcmp.ge.f32.partialorder %v9925_v20, 0.0  ;;  %vm1748_vm12 = vcmp.le.f32.partialorder %v9925_v20, 7.0 }
 0x32a   :  { %v1493_v48 = vadd.f32 1.0, %v1477_v5  ;;  %v1365_v5 = vmul.f32 %v9092_v35, %v1324_v8  ;;  %v16076_v26 = vsel %vm10054_vm2, 4294967295, %v16075_v26  ;;  %v1925_v1 = vsel %vm1861_vm13, 1, %v15885_v14  ;;  %vm10117_vm1 = vmand %vm1732_vm6, %vm1748_vm12 }
 0x32b   :  { %v10008_v2 = vpop.permute.xlu0 %2199  ;;  %v2528_v8 = vmul.f32 8.0, %v9817_v11  ;;  %vm1780_vm13 = vcmp.ge.f32.partialorder %v9925_v20, -1.0  ;;  %vm1844_vm12 = vcmp.le.f32.partialorder %v9809_v29, 7.0 }
 0x32c   :  { %v1509_v44 = vmul.f32 3.5, %v1493_v48  ;;  %vm15890_vm7 = vcmp.ne.s32.totalorder %v10008_v2, 0  ;;  %v1715_v48 = vsub.f32 1.0, %v9955_v18  ;;  %v2527_v18 = vmul.f32 8.0, %v9882_v45 }
 0x32d   :  { %2019 = vrot.lane.b32.xlu0 %v1713_v24, %s9237_s11  ;;  %vm10024_vm5 = vmand %vm10013_vm10, %vm15890_vm7  ;;  %v10076_v24 = vld [vmem:[%s15870_s6 + $0x4] ss:$8 sps:$4 sm:$0xff]  }
 0x32e   :  { %v10018_v28 = vfloor.f32 %v1509_v44  ;;  %v16074_v13 = vsel %vm10024_vm5, 4294967295, %v16073_v13  ;;  %2706 = vmatprep.subr.bf16.mxu1 %v10076_v24  ;;  %2964 = vmatprep.subr.bf16.mxu0 %v10076_v24 }
 0x330   :  { %v10029_v10 = vsub.f32 %v1509_v44, %v10018_v28  ;;  %v10081_v44 = vld [vmem:[%s15870_s6] ss:$8 sps:$4 sm:$0xff]  }
 0x331   :  { %2211 = vrot.lane.b32.xlu0 %v2189_v62, %s9237_s11  ;;  %2707 = vmatpush1.bf16.msra.mxu1 %v10081_v44 }
 0x332   :  { %2965 = vmatpush1.bf16.msra.mxu0 %v10081_v44  ;;  %2819 = vmatprep.subr.bf16.mxu1 %v10076_v24 }
 0x333   :  { %v1320_v27 = vpop.permute.xlu1 %1319  ;;  %3254 = vmatprep.subr.bf16.mxu0 %v10076_v24 }
 0x334   :  { %v1363_v31 = vmul.f32 %v9090_v57, %v1320_v27  ;;  %v2608_v57 = vadd.f32 %v9899_v6, %v2528_v8  ;;  %v2607_v27 = vadd.f32 %v9813_v36, %v2527_v18  ;;  %v16081_v6 = vmov 0 }
 0x335   :  { %v16082_v6 = vsel %vm10117_vm1, 4294967295, %v16081_v6 }
 0x336   :  { %2119 = vrot.lane.b32.xlu0 %v1363_v31, %s9238_s0  ;;  %v16079_v31 = vmov 0 }
 0x337   :  { %v10036_v42 = vpop.permute.xlu1 %2281 }
 0x33a   :  { %2291 = vrot.lane.b32.xlu0 %v1701_v23, %s9237_s11  ;;  %v1188_v23 = vsub.f32 %v9423_v54, %v9793_v53  ;;  %v16087_v53 = vmov 0  ;;  %v16114_v54 = vsub.f32 1.0, %v9838_v55 }
 0x33b   :  { %v10044_v61 = vpop.permute.xlu1 %2569 }
 0x33e   :  { %2123 = vrot.lane.b32.xlu0 %v1365_v5, %s9238_s0  ;;  %v2623_v5 = vpack.c.bf16 %v2608_v57, %v2607_v27  ;;  %v1209_v27 = vmul.f32 1.442695, %v1188_v23 }
 0x33f   :  { %v10051_v12 = vpop.permute.xlu1 %2205 }
 0x340   :  { %vm15881_vm8 = vcmp.ne.s32.totalorder %v10051_v12, 0  ;;  %9093 = vpow2.f32 %v1209_v27 }
 0x341   :  { %vm10063_vm4 = vmand %vm10054_vm2, %vm15881_vm8 }
 0x342   :  { %1943 = vrot.lane.b32.xlu0 %v1923_v4, %s9237_s11  ;;  %v16083_v4 = vmov 0 }
 0x343   :  { %v10068_v16 = vpop.permute.xlu1 %2285 }
 0x346   :  { %2023 = vrot.lane.b32.xlu0 %v1715_v48, %s9237_s11 }
 0x347   :  { %v10085_v47 = vpop.permute.xlu1 %2573 }
 0x34a   :  { %1947 = vrot.lane.b32.xlu0 %v1925_v1, %s9237_s11  ;;  %v16085_v1 = vmov 0 }
 0x34b   :  { %v10096_v62 = vpop.permute.xlu1 %1937 }
 0x34c   :  { %vm15882_vm14 = vcmp.ne.s32.totalorder %v10096_v62, 0 }
 0x34d   :  { %vm10105_vm15 = vmand %vm9969_vm11, %vm15882_vm14  ;;  %vm1796_vm11 = vcmp.le.f32.partialorder %v9925_v20, 6.0  ;;  %v9094_v14 = vpop.eup %9093 }
 0x34e   :  { %v16080_v31 = vsel %vm10105_vm15, 4294967295, %v16079_v31  ;;  %2027 = vrot.lane.b32.xlu0 %v1717_v60, %s9237_s11  ;;  %vm10124_vm8 = vmand %vm1780_vm13, %vm1796_vm11 }
 0x34f   :  { %v10110_v35 = vpop.permute.xlu1 %2017  ;;  %v16084_v4 = vsel %vm10124_vm8, 4294967295, %v16083_v4 }
 0x352   :  { %2661 = vrot.lane.b32.xlu0 %v2623_v5, %s9239_s26  ;;  %v1190_v5 = vsub.f32 %v9401_v43, %v9798_v15  ;;  %v2532_v15 = vmul.f32 8.0, %v9925_v20 }
 0x353   :  { %v2210_v36 = vpop.permute.xlu1 %2209 }
 0x354   :  { %vm2236_vm3 = vcmp.ne.s32.totalorder %v2210_v36, 0  ;;  %v1213_v36 = vmul.f32 1.442695, %v1190_v5 }
 0x355   :  { %vm10130_vm14 = vmand %vm10117_vm1, %vm2236_vm3 }
 0x356   :  { %v16086_v1 = vsel %vm10130_vm14, 4294967295, %v16085_v1  ;;  %vm10143_vm6 = vmand %vm10124_vm8, %vm2236_vm3  ;;  %9095 = vpow2.f32 %v1213_v36  ;;  %vm1828_vm3 = vcmp.ge.f32.partialorder %v9809_v29, 0.0  ;;  %v16089_v29 = vmov 0 }
 0x357   :  { %v2290_v48 = vpop.permute.xlu1 %2289  ;;  %v16088_v53 = vsel %vm10143_vm6, 4294967295, %v16087_v53  ;;  %vm1860_vm7 = vmand %vm1828_vm3, %vm1844_vm12  ;;  %vm1830_vm3 = vcmp.ge.f32.partialorder %v9795_v58, 0.0  ;;  %vm1846_vm12 = vcmp.le.f32.partialorder %v9795_v58, 7.0  ;;  %vm1779_vm6 = vcmp.ge.f32.partialorder %v9833_v59, -1.0 }
 0x358   :  { %v10136_v18 = vmul.f32 %v2290_v48, %v15884_v50  ;;  %v10139_v8 = vmul.f32 %v2290_v48, %v9934_v49  ;;  %v1473_v48 = vadd.f32 %v9880_v34, %v9356_v17  ;;  %v2531_v34 = vmul.f32 8.0, %v9833_v59 }
 0x359   :  { %vm1795_vm14 = vcmp.le.f32.partialorder %v9833_v59, 6.0 }
 0x35a   :  { %v1489_v50 = vadd.f32 1.0, %v1473_v48 }
 0x35b   :  { %v1326_v3 = vpop.permute.xlu0 %1325 }
 0x35c   :  { %v10157_v60 = vmul.f32 3.5, %v1489_v50 }
 0x35e   :  { %v10163_v23 = vfloor.f32 %v10157_v60 }
 0x360   :  { %vm1777_vm13 = vcmp.ge.f32.partialorder %v10163_v23, -1.0  ;;  %vm1793_vm11 = vcmp.le.f32.partialorder %v10163_v23, 6.0  ;;  %vm1745_vm5 = vcmp.le.f32.partialorder %v10163_v23, 7.0 }
 0x361   :  { %vm10179_vm8 = vmand %vm1777_vm13, %vm1793_vm11 }
 0x362   :  { %v16090_v29 = vsel %vm10179_vm8, 4294967295, %v16089_v29 }
 0x363   :  { %v9096_v27 = vpop.eup %9095 }
 0x36b   :  { %v1322_v21 = vpop.permute.xlu0 %1321 }
 0x36c   :  { %v1364_v22 = vmul.f32 %v9094_v14, %v1322_v21  ;;  %v2612_v14 = vadd.f32 %v10044_v61, %v2532_v15  ;;  %v1716_v15 = vsub.f32 1.0, %v9862_v41 }
 0x36e   :  { %2121 = vrot.lane.b32.xlu1 %v1364_v22, %s9238_s0  ;;  %v1366_v22 = vmul.f32 %v9096_v27, %v1326_v3  ;;  %v16091_v3 = vmov 0   ;;  %v2533_v27 = vmul.f32 8.0, %v10018_v28 }
 0x36f   :  { %v10160_v57 = vpop.permute.xlu0 %2279  ;;  %v1924_v61 = vsel %vm1860_vm7, 1, %v16091_v3  ;;  %vm1862_vm7 = vmand %vm1830_vm3, %vm1846_vm12  ;;  %vm1728_vm3 = vcmp.ge.f32.partialorder %v9817_v11, 0.0  ;;  %vm1744_vm12 = vcmp.le.f32.partialorder %v9817_v11, 7.0 }
 0x372   :  { %2293 = vrot.lane.b32.xlu1 %v9801_v30, %s9237_s11 }
 0x373   :  { %v2568_v5 = vpop.permute.xlu0 %2567 }
 0x374   :  { %v2611_v21 = vadd.f32 %v2568_v5, %v2531_v34  ;;  %v2534_v34 = vmul.f32 8.0, %v9973_v32 }
 0x376   :  { %v2625_v50 = vpack.c.bf16 %v2612_v14, %v2611_v21  ;;  %2125 = vrot.lane.b32.xlu1 %v1366_v22, %s9238_s0  ;;  %v2614_v14 = vadd.f32 %v10085_v47, %v2534_v34  ;;  %v1926_v21 = vsel %vm1862_vm7, 1, %v16091_v3  ;;  %v16094_v34 = vmov 0 }
 0x377   :  { %v10175_v20 = vpop.permute.xlu0 %2203  ;;  %vm1731_vm7 = vcmp.ge.f32.partialorder %v9833_v59, 0.0 }
 0x378   :  { %vm15895_vm9 = vcmp.ne.s32.totalorder %v10175_v20, 0  ;;  %2665 = vrot.lane.b32.xlu0 %v2625_v50, %s9239_s26  ;;  %v2529_v50 = vmul.f32 8.0, %v10163_v23 }
 0x379   :  { %vm10188_vm1 = vmand %vm10179_vm8, %vm15895_vm9  ;;  %vm1747_vm9 = vcmp.le.f32.partialorder %v9833_v59, 7.0  ;;  %vm1743_vm8 = vcmp.le.f32.partialorder %v9882_v45, 7.0 }
 0x37a   :  { %1945 = vrot.lane.b32.xlu1 %v1924_v61, %s9237_s11  ;;  %v2530_v61 = vmul.f32 8.0, %v10041_v46  ;;  %v2609_v47 = vadd.f32 %v9917_v63, %v2529_v50  ;;  %v10230_v63 = vsub.f32 %v10033_v38, %v10041_v46 }
 0x37b   :  { %v10193_v48 = vpop.permute.xlu0 %2283 }
 0x37c   :  { %v2610_v17 = vadd.f32 %v9927_v7, %v2530_v61  ;;  %v1682_v43 = vsub.f32 1.0, %v10230_v63 }
 0x37e   :  { %2025 = vrot.lane.b32.xlu1 %v1716_v15, %s9237_s11  ;;  %v1718_v15 = vsub.f32 1.0, %v9801_v30  ;;  %v2624_v7 = vpack.c.bf16 %v2610_v17, %v2609_v47  ;;  %v10241_v17 = vsub.f32 %v10157_v60, %v10163_v23 }
 0x37f   :  { %v2572_v5 = vpop.permute.xlu0 %2571  ;;  %v10245_v11 = vpop.permute.xlu1 %2117 }
 0x380   :  { %v2613_v22 = vadd.f32 %v2572_v5, %v2533_v27 }
 0x382   :  { %v2626_v58 = vpack.c.bf16 %v2614_v14, %v2613_v22  ;;  %1949 = vrot.lane.b32.xlu1 %v1926_v21, %s9237_s11  ;;  %v2473_v14 = vmul.f32 %v10193_v48, %v10241_v17  ;;  %v1679_v21 = vsub.f32 1.0, %v9888_v0 }
 0x383   :  { %v10206_v41 = vpop.permute.xlu0 %1935 }
 0x384   :  { %vm15898_vm13 = vcmp.ne.s32.totalorder %v10206_v41, 0  ;;  %2667 = vrot.lane.b32.xlu0 %v2626_v58, %s9239_s26  ;;  %v2327_v51 = vmul.f32 %v10160_v57, %v1679_v21 }
 0x385   :  { %vm10217_vm11 = vmand %vm10013_vm10, %vm15898_vm13  ;;  %vm1727_vm13 = vcmp.ge.f32.partialorder %v9882_v45, 0.0  ;;  %v2474_v45 = vmul.f32 %v10068_v16, %v10230_v63 }
 0x386   :  { %v16095_v34 = vsel %vm10217_vm11, 4294967295, %v16094_v34  ;;  %2029 = vrot.lane.b32.xlu1 %v1718_v15, %s9237_s11  ;;  %vm10232_vm10 = vmand %vm1728_vm3, %vm1744_vm12  ;;  %vm1729_vm11 = vcmp.ge.f32.partialorder %v10163_v23, 0.0  ;;  %v1680_v23 = vsub.f32 1.0, %v9822_v25 }
 0x387   :  { %v2016_v30 = vpop.permute.xlu0 %2015  ;;  %vm10247_vm3 = vmand %vm1731_vm7, %vm1747_vm9  ;;  %vm16106_vm7 = vcmp.ne.s32.totalorder %v9961_v9, 0  ;;  %v2490_v50 = vsel %vm10063_vm4, %v2474_v45, 0.0  ;;  %v2471_v45 = vmul.f32 %v10160_v57, %v9888_v0 }
 0x388   :  { %vm10253_vm12 = vmand %vm1779_vm6, %vm1795_vm14  ;;  %v2328_v47 = vmul.f32 %v10036_v42, %v1680_v23  ;;  %v2064_v58 = vmul.f32 %v10110_v35, %v1680_v23  ;;  %v2489_v23 = vsel %vm10188_vm1, %v2473_v14, 0.0  ;;  %vm16125_vm1 = vnez %v16080_v31 }
 0x389   :  { %vm10257_vm2 = vmand %vm1727_vm13, %vm1743_vm8  ;;  %vm16118_vm13 = vcmp.ne.s32.totalorder %v10096_v62, 0 }
 0x38a   :  { %2663 = vrot.lane.b32.xlu1 %v2624_v7, %s9239_s26  ;;  %vm10262_vm15 = vmand %vm1729_vm11, %vm1745_vm5  ;;  %vm16109_vm5 = vcmp.ne.s32.totalorder %v10008_v2, 0  ;;  %v2472_v7 = vmul.f32 %v10036_v42, %v9822_v25  ;;  %v2400_v2 = vmul.f32 %v10110_v35, %v9822_v25  ;;  %v16115_v25 = vsub.f32 1.0, %v10241_v17 }
 0x38b   :  { %v2208_v38 = vpop.permute.xlu0 %2207  ;;  %vm10272_vm14 = vmand %vm10232_vm10, %vm16106_vm7 }
 0x38c   :  { %vm2235_vm9 = vcmp.ne.s32.totalorder %v2208_v38, 0  ;;  %vm10283_vm8 = vmand %vm10257_vm2, %vm16109_vm5  ;;  %v2329_v35 = vmul.f32 %v10193_v48, %v16115_v25  ;;  %v2399_v48 = vmul.f32 %v2016_v30, %v9888_v0  ;;  %v10350_v0 = vmul.f32 %v2490_v50, %v10245_v11 }
 0x38d   :  { %vm10299_vm6 = vmand %vm10247_vm3, %vm2235_vm9  ;;  %v2344_v56 = vsel %vm10272_vm14, %v2328_v47, 0.0  ;;  %vm1746_vm5 = vcmp.le.f32.partialorder %v10041_v46, 7.0  ;;  %v2343_v22 = vsel %vm10283_vm8, %v2327_v51, 0.0  ;;  %vm16131_vm8 = vcmp.ge.f32.partialorder %v10041_v46, 0.0 }
 0x38e   :  { %vm10321_vm4 = vmand %vm10253_vm12, %vm2235_vm9 }
 0x38f   :  { %v2114_v61 = vpop.permute.xlu1 %2113  ;;  %v2288_v15 = vpop.permute.xlu0 %2287  ;;  %vm10329_vm11 = vmand %vm10232_vm10, %vm16118_vm13  ;;  %vm16121_vm10 = vcmp.ne.s32.totalorder %v10175_v20, 0  ;;  %v2330_v20 = vmul.f32 %v10068_v16, %v1682_v43  ;;  %vm16124_vm13 = vcmp.ne.s32.totalorder %v10206_v41, 0 }
 0x390   :  { %v10305_v42 = vmul.f32 %v2288_v15, %v16114_v54  ;;  %v10308_v52 = vmul.f32 %v2288_v15, %v9838_v55  ;;  %v2063_v15 = vmul.f32 %v2016_v30, %v1679_v21  ;;  %vm10345_vm9 = vmand %vm10262_vm15, %vm16121_vm10  ;;  %v2488_v21 = vsel %vm9979_vm0, %v2472_v7, 0.0 }
 0x391   :  { %vm1983_vm10 = vmand %vm10257_vm2, %vm16124_vm13  ;;  %v2080_v50 = vsel %vm10329_vm11, %v2064_v58, 0.0  ;;  %vm16126_vm0 = vnez %v16076_v26  ;;  %vm16129_vm2 = vnez %v16074_v13  ;;  %v2345_v31 = vsel %vm10345_vm9, %v2329_v35, 0.0 }
 0x392   :  { %v2347_v36 = vsel %vm10299_vm6, %v10305_v42, 0.0  ;;  %v2491_v38 = vsel %vm10321_vm4, %v10308_v52, 0.0  ;;  %v2487_v41 = vsel %vm16129_vm2, %v2471_v45, 0.0  ;;  %v2079_v60 = vsel %vm1983_vm10, %v2063_v15, 0.0 }
 0x393   :  { %v1942_v14 = vpop.permute.xlu1 %1941  ;;  %v2116_v25 = vpop.permute.xlu0 %2115  ;;  %vm16130_vm11 = vnez %v16095_v34  ;;  %v2160_v47 = vmul.f32 %v2114_v61, %v2080_v50  ;;  %v2360_v26 = vmul.f32 %v2344_v56, %v2114_v61  ;;  %v10395_v45 = vmul.f32 %v2488_v21, %v2114_v61 }
 0x394   :  { %vm1970_vm7 = vcmp.ne.s32.totalorder %v1942_v14, 0  ;;  %v10352_v30 = vmul.f32 %v2489_v23, %v2116_v25  ;;  %v2416_v23 = vsel %vm16125_vm1, %v2400_v2, 0.0  ;;  %v2415_v58 = vsel %vm16130_vm11, %v2399_v48, 0.0  ;;  %vm10389_vm1 = vmand %vm16131_vm8, %vm1746_vm5 }
 0x395   :  { %vm10373_vm14 = vmand %vm16126_vm0, %vm1970_vm7  ;;  %v10393_v13 = vmul.f32 %v2416_v23, %v2114_v61  ;;  %vm16134_vm9 = vcmp.ne.s32.totalorder %v10051_v12, 0  ;;  %v2361_v15 = vmul.f32 %v2345_v31, %v2116_v25  ;;  %vm16135_vm0 = vnez %v16090_v29 }
 0x396   :  { %v2520_v16 = vpack.c.bf16 %v10350_v0, %v10352_v30  ;;  %vm2250_vm13 = vmand %vm10389_vm1, %vm16134_vm9  ;;  %vm1797_vm8 = vcmp.le.f32.partialorder %v10018_v28, 6.0  ;;  %v1686_v42 = vsub.f32 1.0, %v9985_v39 }
 0x397   :  { %v2112_v9 = vpop.permute.xlu0 %2111  ;;  %v2022_v35 = vpop.permute.xlu1 %2021  ;;  %v2346_v62 = vsel %vm2250_vm13, %v2330_v20, 0.0  ;;  %vm1986_vm10 = vmand %vm10389_vm1, %vm1970_vm7  ;;  %vm1733_vm7 = vcmp.ge.f32.partialorder %v10018_v28, 0.0 }
 0x398   :  { %v2159_v7 = vmul.f32 %v2112_v9, %v2079_v60  ;;  %v2359_v2 = vmul.f32 %v2343_v22, %v2112_v9  ;;  %v10397_v34 = vmul.f32 %v2415_v58, %v2112_v9  ;;  %v10399_v57 = vmul.f32 %v2487_v41, %v2112_v9 }
 0x399   :  { %v2362_v21 = vmul.f32 %v2346_v62, %v10245_v11  ;;  %v2066_v23 = vmul.f32 %v2022_v35, %v1682_v43  ;;  %v2402_v22 = vmul.f32 %v2022_v35, %v10230_v63  ;;  %v16136_v43 = vsub.f32 1.0, %v10241_v17 }
 0x39a   :  { %v2175_v46 = vpack.c.bf16 %v2160_v47, %v2159_v7  ;;  %v2375_v48 = vpack.c.bf16 %v2360_v26, %v2359_v2  ;;  %v2519_v50 = vpack.c.bf16 %v10395_v45, %v10399_v57  ;;  %v2447_v61 = vpack.c.bf16 %v10393_v13, %v10397_v34  ;;  %v10627_v13 = vld [vmem:[%s15870_s6 + $0x14] ss:$8 sps:$4 sm:$0xff]  }
 0x39b   :  { %v1940_v56 = vpop.permute.xlu0 %1939  ;;  %v2376_v12 = vpack.c.bf16 %v2362_v21, %v2361_v15  ;;  %v2082_v41 = vsel %vm1986_vm10, %v2066_v23, 0.0  ;;  %v2418_v31 = vsel %vm10373_vm14, %v2402_v22, 0.0  ;;  %vm1749_vm14 = vcmp.le.f32.partialorder %v10018_v28, 7.0 }
 0x39c   :  { %2785 = vrot.lane.b32.xlu0 %v2175_v46, %s9239_s26  ;;  %2930 = vrot.lane.b32.xlu1 %v2375_v48, %s9239_s26  ;;  %vm1969_vm5 = vcmp.ne.s32.totalorder %v1940_v56, 0  ;;  %v2162_v9 = vmul.f32 %v10245_v11, %v2082_v41  ;;  %v10428_v37 = vmul.f32 %v2418_v31, %v10245_v11  ;;  %vm10441_vm9 = vmand %vm1733_vm7, %vm1749_vm14  ;;  %vm15999_vm14 = vcmask 130048  }
 0x39d   :  { %vm2385_vm2 = vmand %vm16135_vm0, %vm1969_vm5 }
 0x39e   :  { %vm1985_vm11 = vmand %vm10262_vm15, %vm1969_vm5  ;;  %vm1781_vm15 = vcmp.ge.f32.partialorder %v10018_v28, -1.0 }
 0x39f   :  { %v2020_v20 = vpop.permute.xlu0 %2019  ;;  %vm10446_vm13 = vmand %vm1781_vm15, %vm1797_vm8  ;;  %vm1734_vm15 = vcmp.ge.f32.partialorder %v9973_v32, 0.0  ;;  %vm1750_vm8 = vcmp.le.f32.partialorder %v9973_v32, 7.0 }
 0x3a0   :  { %v2065_v63 = vmul.f32 %v2020_v20, %v16136_v43  ;;  %v2401_v60 = vmul.f32 %v2020_v20, %v10241_v17  ;;  %2932 = vrot.lane.b32.xlu1 %v2376_v12, %s9239_s26  ;;  %v16147_v12 = vsub.f32 1.0, %v9838_v55 }
 0x3a2   :  { %v2081_v14 = vsel %vm1985_vm11, %v2065_v63, 0.0  ;;  %v2417_v58 = vsel %vm2385_vm2, %v2401_v60, 0.0 }
 0x3a3   :  { %v2161_v47 = vmul.f32 %v2116_v25, %v2081_v14  ;;  %v10430_v29 = vmul.f32 %v2417_v58, %v2116_v25  ;;  %v2212_v26 = vpop.permute.xlu0 %2211  ;;  %v1685_v25 = vsub.f32 1.0, %v10029_v10 }
 0x3a4   :  { %vm2237_vm1 = vcmp.ne.s32.totalorder %v2212_v26, 0 }
 0x3a5   :  { %v2176_v7 = vpack.c.bf16 %v2162_v9, %v2161_v47  ;;  %v2448_v17 = vpack.c.bf16 %v10428_v37, %v10430_v29  ;;  %vm10452_vm5 = vmand %vm10441_vm9, %vm2237_vm1 }
 0x3a6   :  { %vm10459_vm10 = vmand %vm10446_vm13, %vm2237_vm1  ;;  %vm1782_vm1 = vcmp.ge.f32.partialorder %v9973_v32, -1.0 }
 0x3a7   :  { %2787 = vrot.lane.b32.xlu0 %v2176_v7, %s9239_s26 }
 0x3a8   :  { %v10437_v5 = vpop.permute.xlu0 %2119 }
 0x3a9   :  { %v2363_v11 = vmul.f32 %v2347_v36, %v10437_v5 }
 0x3ac   :  { %v2292_v51 = vpop.permute.xlu0 %2291 }
 0x3ad   :  { %v2333_v15 = vmul.f32 %v2292_v51, %v1685_v25  ;;  %v2477_v28 = vmul.f32 %v2292_v51, %v10029_v10 }
 0x3af   :  { %v2349_v48 = vsel %vm10452_vm5, %v2333_v15, 0.0  ;;  %v2493_v62 = vsel %vm10459_vm10, %v2477_v28, 0.0  ;;  %vm16157_vm5 = vnez %v16088_v53 }
 0x3b0   :  { %v10467_v56 = vpop.permute.xlu0 %2123 }
 0x3b1   :  { %v2365_v15 = vmul.f32 %v2349_v48, %v10467_v56  ;;  %v2509_v28 = vmul.f32 %v2493_v62, %v10467_v56 }
 0x3b4   :  { %v1944_v21 = vpop.permute.xlu0 %1943 }
 0x3b5   :  { %vm1971_vm0 = vcmp.ne.s32.totalorder %v1944_v21, 0 }
 0x3b6   :  { %vm10471_vm2 = vmand %vm10247_vm3, %vm1971_vm0 }
 0x3b7   :  { %vm10484_vm11 = vmand %vm10253_vm12, %vm1971_vm0 }
 0x3b8   :  { %v2024_v23 = vpop.permute.xlu0 %2023  ;;  %vm10546_vm0 = vmand %vm1734_vm15, %vm1750_vm8  ;;  %vm16165_vm8 = vnez %v16084_v4 }
 0x3b9   :  { %v10477_v20 = vmul.f32 %v2024_v23, %v16147_v12  ;;  %v10480_v41 = vmul.f32 %v2024_v23, %v9838_v55 }
 0x3bb   :  { %v2083_v59 = vsel %vm10471_vm2, %v10477_v20, 0.0  ;;  %v2419_v43 = vsel %vm10484_vm11, %v10480_v41, 0.0  ;;  %v16164_v41 = vsub.f32 1.0, %v9934_v49 }
 0x3bc   :  { %v1948_v63 = vpop.permute.xlu0 %1947 }
 0x3bd   :  { %vm1973_vm3 = vcmp.ne.s32.totalorder %v1948_v63, 0 }
 0x3be   :  { %vm10496_vm7 = vmand %vm10441_vm9, %vm1973_vm3  ;;  %vm1798_vm9 = vcmp.le.f32.partialorder %v9973_v32, 6.0  ;;  %v16158_v32 = vsel %vm16157_vm5, %v10139_v8, 0.0 }
 0x3bf   :  { %vm10507_vm12 = vmand %vm10446_vm13, %vm1973_vm3  ;;  %vm16155_vm13 = vnez %v16086_v1  ;;  %vm16163_vm3 = vnez %v16082_v6  ;;  %v2435_v6 = vmul.f32 %v2419_v43, %v10437_v5 }
 0x3c0   :  { %v2028_v60 = vpop.permute.xlu0 %2027  ;;  %vm10551_vm6 = vmand %vm1782_vm1, %vm1798_vm9 }
 0x3c1   :  { %v10500_v27 = vmul.f32 %v2028_v60, %v1685_v25  ;;  %v10503_v14 = vmul.f32 %v2028_v60, %v10029_v10  ;;  %v2214_v10 = vpop.permute.xlu1 %2213  ;;  %v16156_v25 = vsel %vm16155_vm13, %v10136_v18, 0.0  ;;  %v2163_v60 = vmul.f32 %v10437_v5, %v2083_v59 }
 0x3c2   :  { %vm2238_vm10 = vcmp.ne.s32.totalorder %v2214_v10, 0 }
 0x3c3   :  { %v2085_v9 = vsel %vm10496_vm7, %v10500_v27, 0.0  ;;  %v2421_v47 = vsel %vm10507_vm12, %v10503_v14, 0.0  ;;  %vm2254_vm4 = vmand %vm10546_vm0, %vm2238_vm10  ;;  %vm16172_vm7 = vcmask 359744   ;;  %vm16173_vm12 = vcmask 326944  }
 0x3c4   :  { %v10517_v26 = vpop.permute.xlu0 %2661  ;;  %vm2462_vm2 = vmand %vm10551_vm6, %vm2238_vm10  ;;  %v2165_v30 = vmul.f32 %v10467_v56, %v2085_v9 }
 0x3c5   :  { %16154 = vst [vmem:[#allocation12_spill] sm:$0xff] %v10517_v26  ;;  %8499 = vmatmul.mubr.msk.bf16.vlgmr.msra.gmra.mxu1 %vm15999_vm14, %v10517_v26  ;;  %vm16174_vm10 = vmmov %vm16172_vm7 }
 0x3c6   :  { %2734 = vmatprep.mubr.bf16.mxu1 %v16091_v3  ;;  %2820 = vmatpush1.bf16.msra.mxu1 %v10081_v44 }
 0x3c7   :  { %3109 = vmatprep.subr.bf16.mxu1 %v10076_v24  ;;  %v2507_v24 = vmul.f32 %v2491_v38, %v10437_v5 }
 0x3e0   :  { %v2122_v7 = vpop.permute.xlu1 %2121 }
 0x3e1   :  { %v2364_v2 = vmul.f32 %v16156_v25, %v2122_v7  ;;  %v2508_v51 = vmul.f32 %v16158_v32, %v2122_v7 }
 0x3e3   :  { %v2377_v54 = vpack.c.bf16 %v2364_v2, %v2363_v11  ;;  %v2521_v52 = vpack.c.bf16 %v2508_v51, %v2507_v24 }
 0x3e4   :  { %v2294_v1 = vpop.permute.xlu1 %2293 }
 0x3e5   :  { %v2334_v18 = vmul.f32 %v2294_v1, %v1686_v42  ;;  %v2478_v8 = vmul.f32 %v2294_v1, %v9985_v39  ;;  %2934 = vrot.lane.b32.xlu1 %v2377_v54, %s9239_s26 }
 0x3e7   :  { %v2350_v53 = vsel %vm2254_vm4, %v2334_v18, 0.0  ;;  %v2494_v38 = vsel %vm2462_vm2, %v2478_v8, 0.0  ;;  %vm16178_vm4 = vmmov %vm16172_vm7 }
 0x3e8   :  { %v2126_v35 = vpop.permute.xlu1 %2125 }
 0x3e9   :  { %v2366_v46 = vmul.f32 %v2350_v53, %v2126_v35  ;;  %v2510_v21 = vmul.f32 %v2494_v38, %v2126_v35 }
 0x3ea   :  { %v10606_v27 = vpop.permute.xlu0 %2665 }
 0x3eb   :  { %v2378_v23 = vpack.c.bf16 %v2366_v46, %v2365_v15  ;;  %v2522_v22 = vpack.c.bf16 %v2510_v21, %v2509_v28  ;;  %16167 = vst [vmem:[#allocation14_spill] sm:$0xff] %v10606_v27 }
 0x3ec   :  { %v1946_v12 = vpop.permute.xlu1 %1945 }
 0x3ed   :  { %2936 = vrot.lane.b32.xlu1 %v2378_v23, %s9239_s26  ;;  %vm1972_vm11 = vcmp.ne.s32.totalorder %v1946_v12, 0 }
 0x3ee   :  { %vm1988_vm15 = vmand %vm16163_vm3, %vm1972_vm11 }
 0x3ef   :  { %vm2388_vm1 = vmand %vm16165_vm8, %vm1972_vm11 }
 0x3f0   :  { %v2026_v20 = vpop.permute.xlu1 %2025  ;;  %vm16181_vm3 = vmmov %vm16173_vm12 }
 0x3f1   :  { %v2068_v31 = vmul.f32 %v2026_v20, %v16164_v41  ;;  %v2404_v63 = vmul.f32 %v2026_v20, %v9934_v49  ;;  %3220 = vrot.lane.b32.xlu1 %v2519_v50, %s9239_s26 }
 0x3f3   :  { %v2084_v48 = vsel %vm1988_vm15, %v2068_v31, 0.0  ;;  %v2420_v62 = vsel %vm2388_vm1, %v2404_v63, 0.0  ;;  %vm16182_vm15 = vmmov %vm16181_vm3 }
 0x3f4   :  { %v2164_v10 = vmul.f32 %v2122_v7, %v2084_v48  ;;  %v2436_v11 = vmul.f32 %v2420_v62, %v2122_v7  ;;  %v1950_v24 = vpop.permute.xlu1 %1949 }
 0x3f5   :  { %3222 = vrot.lane.b32.xlu1 %v2520_v16, %s9239_s26  ;;  %vm1974_vm9 = vcmp.ne.s32.totalorder %v1950_v24, 0  ;;  %v2437_v16 = vmul.f32 %v2421_v47, %v10467_v56  ;;  %v10656_v47 = vld [vmem:[%s15866_s2] ss:$0 sm:$0xff] }
 0x3f6   :  { %v2177_v49 = vpack.c.bf16 %v2164_v10, %v2163_v60  ;;  %v2449_v45 = vpack.c.bf16 %v2436_v11, %v2435_v6  ;;  %vm1990_vm13 = vmand %vm10546_vm0, %vm1974_vm9  ;;  %v10619_v56 = vpop.permute.xlu0 %2667  ;;  %vm16176_vm0 = vcmask 294144  }
 0x3f7   :  { %vm2390_vm5 = vmand %vm10551_vm6, %vm1974_vm9  ;;  %16168 = vst [vmem:[#allocation15_spill] sm:$0xff] %v10619_v56  ;;  %vm16177_vm6 = vcmask 392544  }
 0x3f8   :  { %v2030_v57 = vpop.permute.xlu1 %2029  ;;  %2789 = vrot.lane.b32.xlu0 %v2177_v49, %s9239_s26  ;;  %vm16179_vm2 = vmmov %vm16177_vm6 }
 0x3f9   :  { %v2070_v4 = vmul.f32 %v2030_v57, %v1686_v42  ;;  %v2406_v50 = vmul.f32 %v2030_v57, %v9985_v39  ;;  %3224 = vrot.lane.b32.xlu1 %v2521_v52, %s9239_s26  ;;  %vm16180_vm11 = vmmov %vm16179_vm2 }
 0x3fa   :  { %vm16184_vm8 = vmmov %vm16176_vm0 }
 0x3fb   :  { %v2086_v5 = vsel %vm1990_vm13, %v2070_v4, 0.0  ;;  %v2422_v0 = vsel %vm2390_vm5, %v2406_v50, 0.0  ;;  %vm16186_vm1 = vmmov %vm16176_vm0 }
 0x3fc   :  { %v2166_v39 = vmul.f32 %v2126_v35, %v2086_v5  ;;  %v2438_v59 = vmul.f32 %v2422_v0, %v2126_v35  ;;  %v10598_v43 = vpop.permute.xlu1 %2663  ;;  %vm16187_vm9 = vmmov %vm16178_vm4 }
 0x3fd   :  { %16166 = vst [vmem:[#allocation13_spill] sm:$0xff] %v10598_v43  ;;  %3226 = vrot.lane.b32.xlu1 %v2522_v22, %s9239_s26  ;;  %8500 = vmatmul.mubr.msk.bf16.gmra.mxu1 %vm15999_vm14, %v10598_v43  ;;  %vm16188_vm13 = vmmov %vm16178_vm4 }
 0x3fe   :  { %v2178_v55 = vpack.c.bf16 %v2166_v39, %v2165_v30  ;;  %v2450_v7 = vpack.c.bf16 %v2438_v59, %v2437_v16  ;;  %2744 = vmatprep.mubr.bf16.mxu1 %v16091_v3  ;;  %vm16189_vm5 = vmmov %vm16179_vm2  ;;  %v10756_v59 = vld [vmem:[%s15870_s6 + $0x10] ss:$8 sps:$4 sm:$0xff]  }
 0x400   :  { %2791 = vrot.lane.b32.xlu0 %v2178_v55, %s9239_s26 }
 0x401   :  { %3081 = vrot.lane.b32.xlu1 %v2450_v7, %s9239_s26 }
 0x404   :  { %3075 = vrot.lane.b32.xlu0 %v2447_v61, %s9239_s26  ;;  %v8850_v61 = vpop.f32.mrf.mxu0 }
 0x405   :  { %8501 = vmatmul.mubr.msk.bf16.gmra.mxu1 %vm15999_vm14, %v10606_v27  ;;  %v10672_v40 = vadd.f32 %v10656_v47, %v8850_v61 }
 0x406   :  { %2754 = vmatprep.mubr.bf16.mxu1 %v16091_v3  ;;  %v198_v37 = vpop.f32.mrf.mxu0 }
 0x407   :  { %v10663_v25 = vadd.f32 %v10656_v47, %v198_v37  ;;  %16175 = vst [vmem:[#allocation19_spill] sm:$0xff] %v10672_v40  ;;  %v681_v52 = vsel %vm16178_vm4, %v10672_v40, -inf  ;;  %v890_v18 = vsel %vm16180_vm11, %v10672_v40, -inf  ;;  %v472_v38 = vsel %vm16182_vm15, %v10672_v40, -inf  ;;  %vm16197_vm11 = vmmov %vm16189_vm5 }
 0x408   :  { %3077 = vrot.lane.b32.xlu0 %v2448_v17, %s9239_s26  ;;  %v8851_v14 = vpop.f32.mrf.mxu0  ;;  %v262_v46 = vsel %vm16186_vm1, %v10672_v40, -inf  ;;  %vm16203_vm1 = vmmov %vm16176_vm0 }
 0x409   :  { %16171 = vst [vmem:[#allocation18_spill] sm:$0xff] %v10663_v25  ;;  %v466_v32 = vsel %vm16173_vm12, %v10663_v25, -inf  ;;  %v675_v51 = vsel %vm16174_vm10, %v10663_v25, -inf  ;;  %v256_v42 = vsel %vm16176_vm0, %v10663_v25, -inf  ;;  %v884_v54 = vsel %vm16177_vm6, %v10663_v25, -inf  ;;  %vm16191_vm12 = vmmov %vm16181_vm3 }
 0x40a   :  { %v201_v58 = vpop.f32.mrf.mxu0  ;;  %v10689_v35 = vadd.f32 %v10656_v47, %v8851_v14  ;;  %vm16192_vm10 = vmmov %vm16181_vm3  ;;  %v10775_v14 = vpack.c.bf16 %v9383_v33, %v9359_v19  ;;  %v16215_v33 = vld [vmem:[#allocation7_spill] sm:$0xff] }
 0x40b   :  { %vm16195_vm6 = vmmov %vm16176_vm0 }
 0x40c   :  { %3079 = vrot.lane.b32.xlu0 %v2449_v45, %s9239_s26  ;;  %v8854_v1 = vpop.f32.mrf.mxu0  ;;  %16183 = vst [vmem:[#allocation20_spill] sm:$0xff] %v10689_v35  ;;  %v684_v21 = vsel %vm16187_vm9, %v10689_v35, -inf  ;;  %v893_v12 = vsel %vm16189_vm5, %v10689_v35, -inf  ;;  %v475_v31 = vsel %vm16191_vm12, %v10689_v35, -inf  ;;  %v265_v60 = vsel %vm16176_vm0, %v10689_v35, -inf  ;;  %vm16199_vm15 = vmmov %vm16192_vm10 }
 0x40d   :  { %8502 = vmatmul.mubr.msk.bf16.gmra.mxu1 %vm15999_vm14, %v10619_v56  ;;  %v10714_v62 = vadd.f32 %v10656_v47, %v8854_v1  ;;  %vm16204_vm9 = vmmov %vm16176_vm0 }
 0x40e   :  { %v10629_v34 = vpop.permute.xlu1 %2930  ;;  %2837 = vmatprep.mubr.bf16.mxu1 %v16091_v3  ;;  %v10637_v29 = vpop.permute.xlu0 %2785  ;;  %vm16210_vm12 = vmmov %vm16176_vm0 }
 0x40f   :  { %8507 = vmatmul.mubr.msk.bf16.vlgmr.msra.gmra.mxu0 %vm15999_vm14, %v10629_v34  ;;  %v214_v53 = vpop.f32.mrf.mxu0  ;;  %16194 = vst [vmem:[#allocation23_spill] sm:$0xff] %v10714_v62  ;;  %v274_v0 = vsel %vm16204_vm9, %v10714_v62, -inf }
 0x410   :  { %2992 = vmatprep.mubr.bf16.mxu0 %v16091_v3  ;;  %3255 = vmatpush1.bf16.msra.mxu0 %v10081_v44  ;;  %v10694_v28 = vadd.f32 %v10656_v47, %v214_v53 }
 0x411   :  { %3476 = vmatprep.subr.bf16.mxu0 %v10627_v13  ;;  %v8855_v22 = vpop.f32.mrf.mxu0 }
 0x412   :  { %v10641_v17 = vpop.permute.xlu1 %2932  ;;  %16185 = vst [vmem:[#allocation21_spill] sm:$0xff] %v10694_v28  ;;  %v687_v23 = vsel %vm16188_vm13, %v10694_v28, -inf  ;;  %v478_v63 = vsel %vm16192_vm10, %v10694_v28, -inf  ;;  %v268_v6 = vsel %vm16195_vm6, %v10694_v28, -inf  ;;  %v10738_v50 = vadd.f32 %v10656_v47, %v8855_v22 }
 0x413   :  { %16169 = vst [vmem:[#allocation16_spill] sm:$0xff] %v10641_v17  ;;  %v217_v41 = vpop.f32.mrf.mxu0 }
 0x414   :  { %v10711_v48 = vadd.f32 %v10656_v47, %v217_v41  ;;  %16202 = vst [vmem:[#allocation25_spill] sm:$0xff] %v10738_v50  ;;  %v277_v37 = vsel %vm16210_vm12, %v10738_v50, -inf }
 0x415   :  { %8503 = vmatmul.mubr.msk.bf16.vlgmr.msra.gmra.mxu1 %vm15999_vm14, %v10637_v29 }
 0x416   :  { %2847 = vmatprep.mubr.bf16.mxu1 %v16091_v3  ;;  %3110 = vmatpush1.bf16.msra.mxu1 %v10081_v44  ;;  %v10659_v44 = vadd.f32 %v10656_v47, %v201_v58  ;;  %16193 = vst [vmem:[#allocation22_spill] sm:$0xff] %v10711_v48  ;;  %v690_v10 = vsel %vm16178_vm4, %v10711_v48, -inf  ;;  %v899_v24 = vsel %vm16197_vm11, %v10711_v48, -inf  ;;  %v481_v45 = vsel %vm16199_vm15, %v10711_v48, -inf  ;;  %v16212_v47 = vld [vmem:[#allocation9_spill] sm:$0xff] }
 0x417   :  { %8508 = vmatmul.mubr.msk.bf16.gmra.mxu0 %vm15999_vm14, %v10641_v17  ;;  %3387 = vmatprep.subr.bf16.mxu1 %v10627_v13  ;;  %v271_v5 = vsel %vm16203_vm1, %v10711_v48, -inf }
 0x418   :  { %3002 = vmatprep.mubr.bf16.mxu0 %v16091_v3  ;;  %16170 = vst [vmem:[#allocation17_spill] sm:$0xff] %v10659_v44  ;;  %v678_v2 = vsel %vm16172_vm7, %v10659_v44, -inf  ;;  %v887_v36 = vsel %vm16179_vm2, %v10659_v44, -inf  ;;  %v469_v8 = vsel %vm16181_vm3, %v10659_v44, -inf  ;;  %v259_v15 = vsel %vm16184_vm8, %v10659_v44, -inf  ;;  %vm16190_vm7 = vmmov %vm16179_vm2 }
 0x419   :  { %v10649_v9 = vpop.permute.xlu0 %2787  ;;  %v896_v20 = vsel %vm16190_vm7, %v10694_v28, -inf  ;;  %vm16196_vm2 = vmmov %vm16178_vm4 }
 0x41a   :  { %v693_v11 = vsel %vm16196_vm2, %v10714_v62, -inf  ;;  %vm16198_vm3 = vmmov %vm16189_vm5 }
 0x41b   :  { %v902_v49 = vsel %vm16198_vm3, %v10714_v62, -inf  ;;  %vm16201_vm8 = vmmov %vm16192_vm10 }
 0x41c   :  { %v484_v4 = vsel %vm16201_vm8, %v10714_v62, -inf  ;;  %vm16205_vm13 = vmmov %vm16196_vm2 }
 0x41d   :  { %8504 = vmatmul.mubr.msk.bf16.gmra.mxu1 %vm15999_vm14, %v10649_v9  ;;  %v696_v30 = vsel %vm16205_vm13, %v10738_v50, -inf  ;;  %vm16207_vm5 = vmmov %vm16198_vm3 }
 0x41e   :  { %2857 = vmatprep.mubr.bf16.mxu1 %v16091_v3  ;;  %v905_v39 = vsel %vm16207_vm5, %v10738_v50, -inf  ;;  %vm16208_vm7 = vmmov %vm16201_vm8 }
 0x41f   :  { %v487_v55 = vsel %vm16208_vm7, %v10738_v50, -inf }
 0x425   :  { %679 = vmax.xlane.f32.xlu1 %v678_v2  ;;  %v16213_v2 = vld [vmem:[#allocation10_spill] sm:$0xff] }
 0x429   :  { %467 = vmax.xlane.f32.xlu1 %v466_v32  ;;  %v10786_v32 = vpack.c.bf16 %v16213_v2, %v16212_v47 }
 0x42b   :  { %676 = vmax.xlane.f32.xlu0 %v675_v51  ;;  %16214 = vst [vmem:[#allocation9_spill] sm:$0xff] %v10786_v32  ;;  %v16216_v51 = vld [vmem:[#allocation8_spill] sm:$0xff] }
 0x42d   :  { %257 = vmax.xlane.f32.xlu1 %v256_v42  ;;  %v10797_v42 = vpack.c.bf16 %v16216_v51, %v16215_v33 }
 0x42f   :  { %885 = vmax.xlane.f32.xlu0 %v884_v54  ;;  %16217 = vst [vmem:[#allocation10_spill] sm:$0xff] %v10797_v42 }
 0x431   :  { %682 = vmax.xlane.f32.xlu1 %v681_v52  ;;  %v16219_v52 = vld [vmem:[#allocation5_spill] sm:$0xff] }
 0x433   :  { %888 = vmax.xlane.f32.xlu0 %v887_v36  ;;  %v16220_v36 = vld [vmem:[#allocation6_spill] sm:$0xff] }
 0x434   :  { %v10808_v1 = vpack.c.bf16 %v16220_v36, %v16219_v52 }
 0x435   :  { %891 = vmax.xlane.f32.xlu1 %v890_v18 }
 0x436   :  { %16221 = vst [vmem:[#allocation8_spill] sm:$0xff] %v10808_v1 }
 0x437   :  { %470 = vmax.xlane.f32.xlu0 %v469_v8 }
 0x439   :  { %473 = vmax.xlane.f32.xlu1 %v472_v38  ;;  %v10837_v38 = vld [vmem:[%s15870_s6 + $0x24] ss:$8 sps:$4 sm:$0xff]  }
 0x43b   :  { %260 = vmax.xlane.f32.xlu0 %v259_v15 }
 0x43d   :  { %263 = vmax.xlane.f32.xlu1 %v262_v46 }
 0x43f   :  { %685 = vmax.xlane.f32.xlu0 %v684_v21  ;;  %v10874_v21 = vld [vmem:[%s15870_s6 + $0x20] ss:$8 sps:$4 sm:$0xff]  }
 0x441   :  { %688 = vmax.xlane.f32.xlu1 %v687_v23 }
 0x443   :  { %894 = vmax.xlane.f32.xlu0 %v893_v12 }
 0x445   :  { %897 = vmax.xlane.f32.xlu1 %v896_v20 }
 0x447   :  { %476 = vmax.xlane.f32.xlu0 %v475_v31 }
 0x449   :  { %479 = vmax.xlane.f32.xlu1 %v478_v63  ;;  %v16226_v63 = vld [vmem:[#allocation11_spill] sm:$0xff] }
 0x44b   :  { %266 = vmax.xlane.f32.xlu0 %v265_v60  ;;  %v10903_v60 = vadd.s32 128, %v16226_v63 }
 0x44d   :  { %269 = vmax.xlane.f32.xlu1 %v268_v6 }
 0x44f   :  { %691 = vmax.xlane.f32.xlu0 %v690_v10 }
 0x451   :  { %694 = vmax.xlane.f32.xlu1 %v693_v11  ;;  %v2632_v11 = vcvt.s32.f32 %v16226_v63 }
 0x453   :  { %900 = vmax.xlane.f32.xlu0 %v899_v24 }
 0x455   :  { %903 = vmax.xlane.f32.xlu1 %v902_v49 }
 0x457   :  { %v10730_v57 = vpop.permute.xlu1 %2934  ;;  %482 = vmax.xlane.f32.xlu0 %v481_v45 }
 0x458   :  { %16200 = vst [vmem:[#allocation24_spill] sm:$0xff] %v10730_v57  ;;  %8509 = vmatmul.mubr.msk.bf16.gmra.mxu0 %vm15999_vm14, %v10730_v57 }
 0x459   :  { %485 = vmax.xlane.f32.xlu1 %v484_v4  ;;  %3012 = vmatprep.mubr.bf16.mxu0 %v16091_v3 }
 0x45b   :  { %272 = vmax.xlane.f32.xlu0 %v271_v5  ;;  %v2633_v5 = vcvt.s32.f32 %v10903_v60 }
 0x45d   :  { %275 = vmax.xlane.f32.xlu1 %v274_v0  ;;  %v2635_v51 = vmul.f32 0.015625, %v2633_v5 }
 0x45f   :  { %v10746_v16 = vpop.permute.xlu1 %2936  ;;  %697 = vmax.xlane.f32.xlu0 %v696_v30 }
 0x460   :  { %16206 = vst [vmem:[#allocation26_spill] sm:$0xff] %v10746_v16  ;;  %8510 = vmatmul.mubr.msk.bf16.gmra.mxu0 %vm15999_vm14, %v10746_v16 }
 0x461   :  { %3272 = vmatprep.mubr.bf16.mxu0 %v16091_v3 }
 0x463   :  { %906 = vmax.xlane.f32.xlu0 %v905_v39  ;;  %v10760_v7 = vpop.permute.xlu1 %3220  ;;  %v2634_v39 = vmul.f32 0.015625, %v2632_v11 }
 0x464   :  { %16209 = vst [vmem:[#allocation27_spill] sm:$0xff] %v10760_v7 }
 0x467   :  { %488 = vmax.xlane.f32.xlu0 %v487_v55  ;;  %v10780_v58 = vpop.permute.xlu1 %3222 }
 0x468   :  { %8515 = vmatmul.mubr.msk.bf16.vlgmr.msra.gmra.mxu0 %vm15999_vm14, %v10760_v7  ;;  %16211 = vst [vmem:[#allocation28_spill] sm:$0xff] %v10780_v58 }
 0x469   :  { %3282 = vmatprep.mubr.bf16.mxu0 %v16091_v3  ;;  %3477 = vmatpush1.bf16.msra.mxu0 %v10756_v59 }
 0x46a   :  { %v10766_v61 = vpop.permute.xlu0 %2789  ;;  %3718 = vmatprep.subr.bf16.mxu0 %v10627_v13 }
 0x46b   :  { %278 = vmax.xlane.f32.xlu0 %v277_v37  ;;  %8505 = vmatmul.mubr.msk.bf16.gmra.mxu1 %vm15999_vm14, %v10766_v61  ;;  %v10802_v54 = vpop.permute.xlu1 %3224 }
 0x46c   :  { %2867 = vmatprep.mubr.bf16.mxu1 %v16091_v3  ;;  %16218 = vst [vmem:[#allocation7_spill] sm:$0xff] %v10802_v54 }
 0x46e   :  { %5206 = vrot.lane.b32.xlu1 %v10775_v14, %s9240_s14 }
 0x46f   :  { %v10820_v8 = vpop.permute.xlu1 %3226 }
 0x470   :  { %8516 = vmatmul.mubr.msk.bf16.gmra.mxu0 %vm15999_vm14, %v10780_v58  ;;  %16222 = vst [vmem:[#allocation5_spill] sm:$0xff] %v10820_v8 }
 0x471   :  { %3292 = vmatprep.mubr.bf16.mxu0 %v16091_v3 }
 0x472   :  { %5210 = vrot.lane.b32.xlu1 %v10786_v32, %s9240_s14  ;;  %v10791_v19 = vpop.permute.xlu0 %2791 }
 0x473   :  { %8506 = vmatmul.mubr.msk.bf16.gmra.mxu1 %vm15999_vm14, %v10791_v19  ;;  %v10852_v46 = vpop.permute.xlu1 %3081 }
 0x474   :  { %3127 = vmatprep.mubr.bf16.mxu1 %v16091_v3 }
 0x476   :  { %5212 = vrot.lane.b32.xlu1 %v10797_v42, %s9240_s14  ;;  %v10811_v18 = vpop.permute.xlu0 %3075 }
 0x478   :  { %8517 = vmatmul.mubr.msk.bf16.gmra.mxu0 %vm15999_vm14, %v10802_v54 }
 0x479   :  { %3302 = vmatprep.mubr.bf16.mxu0 %v16091_v3 }
 0x47a   :  { %5392 = vrot.lane.b32.xlu1 %v10808_v1, %s9241_s15  ;;  %v10827_v53 = vpop.permute.xlu0 %3077 }
 0x47b   :  { %8511 = vmatmul.mubr.msk.bf16.vlgmr.msra.gmra.mxu1 %vm15999_vm14, %v10811_v18 }
 0x47c   :  { %3137 = vmatprep.mubr.bf16.mxu1 %v16091_v3  ;;  %3388 = vmatpush1.bf16.msra.mxu1 %v10756_v59 }
 0x47d   :  { %3597 = vmatprep.subr.bf16.mxu1 %v10627_v13 }
 0x47e   :  { %v10843_v15 = vpop.permute.xlu0 %3079 }
 0x480   :  { %8518 = vmatmul.mubr.msk.bf16.gmra.mxu0 %vm15999_vm14, %v10820_v8 }
 0x481   :  { %5208 = vrot.lane.b32.xlu0 %v10808_v1, %s9240_s14  ;;  %3494 = vmatprep.mubr.bf16.mxu0 %v16091_v3 }
 0x483   :  { %8512 = vmatmul.mubr.msk.bf16.gmra.mxu1 %vm15999_vm14, %v10827_v53 }
 0x484   :  { %3147 = vmatprep.mubr.bf16.mxu1 %v16091_v3 }
 0x485   :  { %5390 = vrot.lane.b32.xlu0 %v10775_v14, %s9241_s15  ;;  %v10886_v23 = vpop.f32.mrf.mxu1 }
 0x487   :  { %v10895_v41 = vpop.f32.mrf.mxu1 }
 0x488   :  { %8525 = vmatmul.mubr.msk.bf16.vlgmr.msra.gmra.mxu0 %vm15999_vm14, %v10637_v29 }
 0x489   :  { %3504 = vmatprep.mubr.bf16.mxu0 %v16091_v3  ;;  %3719 = vmatpush1.bf16.msra.mxu0 %v10756_v59  ;;  %v10910_v24 = vpop.f32.mrf.mxu1 }
 0x48a   :  { %3972 = vmatprep.subr.bf16.mxu0 %v10837_v38 }
 0x48b   :  { %8513 = vmatmul.mubr.msk.bf16.gmra.mxu1 %vm15999_vm14, %v10843_v15  ;;  %v10924_v55 = vpop.f32.mrf.mxu1 }
 0x48c   :  { %3157 = vmatprep.mubr.bf16.mxu1 %v16091_v3  ;;  %16230 = vst [vmem:[#allocation34_spill] sm:$0xff] %v10924_v55 }
 0x490   :  { %8526 = vmatmul.mubr.msk.bf16.gmra.mxu0 %vm15999_vm14, %v10649_v9 }
 0x491   :  { %3514 = vmatprep.mubr.bf16.mxu0 %v16091_v3 }
 0x493   :  { %8514 = vmatmul.mubr.msk.bf16.gmra.mxu1 %vm15999_vm14, %v10852_v46 }
 0x494   :  { %3405 = vmatprep.mubr.bf16.mxu1 %v16091_v3 }
 0x498   :  { %8527 = vmatmul.mubr.msk.bf16.gmra.mxu0 %vm15999_vm14, %v10766_v61 }
 0x499   :  { %3524 = vmatprep.mubr.bf16.mxu0 %v16091_v3 }
 0x49b   :  { %8521 = vmatmul.mubr.msk.bf16.vlgmr.msra.gmra.mxu1 %vm15999_vm14, %v10517_v26 }
 0x49c   :  { %3415 = vmatprep.mubr.bf16.mxu1 %v16091_v3  ;;  %3598 = vmatpush1.bf16.msra.mxu1 %v10756_v59 }
 0x49d   :  { %3839 = vmatprep.subr.bf16.mxu1 %v10627_v13 }
 0x4a0   :  { %8528 = vmatmul.mubr.msk.bf16.gmra.mxu0 %vm15999_vm14, %v10791_v19 }
 0x4a1   :  { %3736 = vmatprep.mubr.bf16.mxu0 %v16091_v3 }
 0x4a3   :  { %8522 = vmatmul.mubr.msk.bf16.gmra.mxu1 %vm15999_vm14, %v10598_v43 }
 0x4a4   :  { %3425 = vmatprep.mubr.bf16.mxu1 %v16091_v3 }
 0x4a8   :  { %8533 = vmatmul.mubr.msk.bf16.vlgmr.msra.gmra.mxu0 %vm15999_vm14, %v10811_v18 }
 0x4a9   :  { %3746 = vmatprep.mubr.bf16.mxu0 %v16091_v3  ;;  %3973 = vmatpush1.bf16.msra.mxu0 %v10874_v21 }
 0x4aa   :  { %4182 = vmatprep.subr.bf16.mxu0 %v10837_v38 }
 0x4ab   :  { %8523 = vmatmul.mubr.msk.bf16.gmra.mxu1 %vm15999_vm14, %v10606_v27 }
 0x4ac   :  { %3435 = vmatprep.mubr.bf16.mxu1 %v16091_v3 }
 0x4ae   :  { %v10884_v13 = vpop.xlane.xlu1 %679 }
 0x4af   :  { %16223 = vst [vmem:[#allocation6_spill] sm:$0xff] %v10884_v13  ;;  %v708_v22 = vsub.f32 %v10659_v44, %v10884_v13 }
 0x4b0   :  { %8534 = vmatmul.mubr.msk.bf16.gmra.mxu0 %vm15999_vm14, %v10827_v53 }
 0x4b1   :  { %v733_v12 = vmul.f32 1.442695, %v708_v22  ;;  %3756 = vmatprep.mubr.bf16.mxu0 %v16091_v3 }
 0x4b2   :  { %v10893_v20 = vpop.xlane.xlu1 %467 }
 0x4b3   :  { %16224 = vst [vmem:[#allocation29_spill] sm:$0xff] %v10893_v20  ;;  %9097 = vpow2.f32 %v733_v12  ;;  %8524 = vmatmul.mubr.msk.bf16.gmra.mxu1 %vm15999_vm14, %v10619_v56  ;;  %v498_v45 = vsub.f32 %v10663_v25, %v10893_v20  ;;  %v2636_v12 = vfloor.f32 %v2634_v39 }
 0x4b4   :  { %v10899_v31 = vpop.xlane.xlu0 %676  ;;  %3615 = vmatprep.mubr.bf16.mxu1 %v16091_v3 }
 0x4b5   :  { %16225 = vst [vmem:[#allocation30_spill] sm:$0xff] %v10899_v31  ;;  %v707_v6 = vsub.f32 %v10663_v25, %v10899_v31  ;;  %v522_v47 = vmul.f32 1.442695, %v498_v45 }
 0x4b6   :  { %v10907_v10 = vpop.xlane.xlu1 %257 }
 0x4b7   :  { %16227 = vst [vmem:[#allocation31_spill] sm:$0xff] %v10907_v10  ;;  %v731_v49 = vmul.f32 1.442695, %v707_v6  ;;  %v288_v2 = vsub.f32 %v10663_v25, %v10907_v10 }
 0x4b8   :  { %8535 = vmatmul.mubr.msk.bf16.gmra.mxu0 %vm15999_vm14, %v10843_v15  ;;  %v10916_v4 = vpop.xlane.xlu0 %885 }
 0x4b9   :  { %16228 = vst [vmem:[#allocation32_spill] sm:$0xff] %v10916_v4  ;;  %9099 = vpow2.f32 %v731_v49  ;;  %v916_v0 = vsub.f32 %v10663_v25, %v10916_v4  ;;  %3766 = vmatprep.mubr.bf16.mxu0 %v16091_v3  ;;  %v312_v45 = vmul.f32 1.442695, %v288_v2 }
 0x4ba   :  { %v10922_v30 = vpop.xlane.xlu1 %682 }
 0x4bb   :  { %16229 = vst [vmem:[#allocation33_spill] sm:$0xff] %v10922_v30  ;;  %v940_v37 = vmul.f32 1.442695, %v916_v0  ;;  %8529 = vmatmul.mubr.msk.bf16.vlgmr.msra.gmra.mxu1 %vm15999_vm14, %v10629_v34  ;;  %v2637_v0 = vfloor.f32 %v2635_v51 }
 0x4bc   :  { %v10930_v33 = vpop.xlane.xlu0 %888  ;;  %3625 = vmatprep.mubr.bf16.mxu1 %v16091_v3  ;;  %3840 = vmatpush1.bf16.msra.mxu1 %v10756_v59 }
 0x4bd   :  { %16231 = vst [vmem:[#allocation35_spill] sm:$0xff] %v10930_v33  ;;  %9101 = vpow2.f32 %v940_v37  ;;  %v917_v52 = vsub.f32 %v10659_v44, %v10930_v33  ;;  %v10936_v36 = vpop.f32.mrf.mxu1  ;;  %4061 = vmatprep.subr.bf16.mxu1 %v10837_v38 }
 0x4be   :  { %v10939_v22 = vpop.xlane.xlu1 %891  ;;  %9103 = vpow2.f32 %v522_v47  ;;  %v2638_v47 = vmul.f32 64.0, %v2636_v12 }
 0x4bf   :  { %16232 = vst [vmem:[#allocation36_spill] sm:$0xff] %v10939_v22  ;;  %v942_v60 = vmul.f32 1.442695, %v917_v52  ;;  %v10941_v6 = vpop.f32.mrf.mxu1 }
 0x4c0   :  { %v9098_v49 = vpop.eup %9097  ;;  %8536 = vmatmul.mubr.msk.bf16.gmra.mxu0 %vm15999_vm14, %v10852_v46  ;;  %v10945_v59 = vpop.xlane.xlu0 %470  ;;  %v10970_v33 = vsub.f32 %v2632_v11, %v2638_v47 }
 0x4c1   :  { %16233 = vst [vmem:[#allocation37_spill] sm:$0xff] %v10945_v59  ;;  %9105 = vpow2.f32 %v942_v60  ;;  %v499_v37 = vsub.f32 %v10659_v44, %v10945_v59  ;;  %781 = vrot.lane.b32.xlu1 %v9098_v49, %s9233_s29  ;;  %v10950_v25 = vpop.f32.mrf.mxu1  ;;  %3990 = vmatprep.mubr.bf16.mxu0 %v16091_v3  ;;  %v2639_v60 = vmul.f32 64.0, %v2637_v0  ;;  %v709_v49 = vsub.f32 %v10672_v40, %v10922_v30 }
 0x4c2   :  { %v10953_v39 = vpop.xlane.xlu1 %473  ;;  %9107 = vpow2.f32 %v312_v45  ;;  %16238 = vst [vmem:[#allocation42_spill] sm:$0xff] %v10970_v33  ;;  %v918_v30 = vsub.f32 %v10672_v40, %v10939_v22  ;;  %v11016_v31 = vsub.f32 %v10970_v33, %v10910_v24 }
 0x4c3   :  { %16234 = vst [vmem:[#allocation38_spill] sm:$0xff] %v10953_v39  ;;  %v524_v2 = vmul.f32 1.442695, %v499_v37  ;;  %v10955_v52 = vpop.f32.mrf.mxu1  ;;  %8530 = vmatmul.mubr.msk.bf16.gmra.mxu1 %vm15999_vm14, %v10641_v17  ;;  %v500_v22 = vsub.f32 %v10672_v40, %v10953_v39 }
 0x4c4   :  { %16235 = vst [vmem:[#allocation39_spill] sm:$0xff] %v10955_v52  ;;  %v10959_v51 = vpop.xlane.xlu0 %260  ;;  %3635 = vmatprep.mubr.bf16.mxu1 %v16091_v3  ;;  %vm3025_vm6 = vcmp.eq.f32.partialorder %v11016_v31, 1.0  ;;  %vm2880_vm3 = vcmp.eq.f32.partialorder %v11016_v31, 0.0 }
 0x4c5   :  { %16236 = vst [vmem:[#allocation40_spill] sm:$0xff] %v10959_v51  ;;  %9109 = vpow2.f32 %v524_v2  ;;  %v289_v59 = vsub.f32 %v10659_v44, %v10959_v51  ;;  %v10966_v12 = vpop.f32.mrf.mxu1  ;;  %v10979_v2 = vsub.f32 %v2633_v5, %v2639_v60  ;;  %v735_v44 = vmul.f32 1.442695, %v709_v49 }
 0x4c6   :  { %v9100_v37 = vpop.eup %9099  ;;  %v10968_v13 = vpop.xlane.xlu1 %263  ;;  %v10992_v5 = vsub.f32 %v10970_v33, %v10886_v23  ;;  %v944_v23 = vmul.f32 1.442695, %v918_v30  ;;  %v526_v39 = vmul.f32 1.442695, %v500_v22  ;;  %v11039_v22 = vsub.f32 %v10970_v33, %v10936_v36 }
 0x4c7   :  { %16237 = vst [vmem:[#allocation41_spill] sm:$0xff] %v10968_v13  ;;  %v314_v45 = vmul.f32 1.442695, %v289_v59  ;;  %v10972_v10 = vpop.f32.mrf.mxu1  ;;  %779 = vrot.lane.b32.xlu0 %v9100_v37, %s9233_s29  ;;  %16240 = vst [vmem:[#allocation44_spill] sm:$0xff] %v10979_v2  ;;  %v290_v24 = vsub.f32 %v10672_v40, %v10968_v13  ;;  %v11053_v36 = vsub.f32 %v10979_v2, %v10941_v6 }
 0x4c8   :  { %8543 = vmatmul.mubr.msk.bf16.vlgmr.msra.gmra.mxu0 %vm15999_vm14, %v10517_v26  ;;  %v10977_v0 = vpop.xlane.xlu0 %685  ;;  %vm3023_vm10 = vcmp.eq.f32.partialorder %v10992_v5, 1.0  ;;  %vm2878_vm4 = vcmp.eq.f32.partialorder %v10992_v5, 0.0  ;;  %vm3027_vm11 = vcmp.eq.f32.partialorder %v11039_v22, 1.0  ;;  %vm2882_vm1 = vcmp.eq.f32.partialorder %v11039_v22, 0.0 }
 0x4c9   :  { %16239 = vst [vmem:[#allocation43_spill] sm:$0xff] %v10977_v0  ;;  %9111 = vpow2.f32 %v314_v45  ;;  %v10983_v51 = vpop.f32.mrf.mxu1  ;;  %4000 = vmatprep.mubr.bf16.mxu0 %v16091_v3  ;;  %4183 = vmatpush1.bf16.msra.mxu0 %v10874_v21  ;;  %v710_v59 = vsub.f32 %v10689_v35, %v10977_v0  ;;  %v11006_v45 = vsub.f32 %v10979_v2, %v10895_v41  ;;  %vm3028_vm15 = vcmp.eq.f32.partialorder %v11053_v36, 1.0 }
 0x4ca   :  { %v9102_v11 = vpop.eup %9101  ;;  %4424 = vmatprep.subr.bf16.mxu0 %v10837_v38  ;;  %v10999_v60 = vpop.xlane.xlu1 %688  ;;  %9113 = vpow2.f32 %v735_v44  ;;  %vm2883_vm9 = vcmp.eq.f32.partialorder %v11053_v36, 0.0 }
 0x4cb   :  { %v10994_v47 = vpop.f32.mrf.mxu1  ;;  %8531 = vmatmul.mubr.msk.bf16.gmra.mxu1 %vm15999_vm14, %v10730_v57  ;;  %988 = vrot.lane.b32.xlu0 %v9102_v11, %s9234_s30  ;;  %16241 = vst [vmem:[#allocation45_spill] sm:$0xff] %v10999_v60  ;;  %v9104_v37 = vpop.eup %9103  ;;  %v737_v11 = vmul.f32 1.442695, %v710_v59  ;;  %9115 = vpow2.f32 %v944_v23  ;;  %vm3024_vm0 = vcmp.eq.f32.partialorder %v11006_v45, 1.0  ;;  %vm2879_vm2 = vcmp.eq.f32.partialorder %v11006_v45, 0.0 }
 0x4cc   :  { %v11001_v49 = vpop.xlane.xlu0 %894  ;;  %3645 = vmatprep.mubr.bf16.mxu1 %v16091_v3 }
 0x4cd   :  { %16242 = vst [vmem:[#allocation46_spill] sm:$0xff] %v11001_v49  ;;  %v11010_v0 = vpop.f32.mrf.mxu1  ;;  %v919_v63 = vsub.f32 %v10689_v35, %v11001_v49  ;;  %9117 = vpow2.f32 %v737_v11 }
 0x4ce   :  { %v9106_v20 = vpop.eup %9105  ;;  %9119 = vpow2.f32 %v526_v39 }
 0x4cf   :  { %v11018_v4 = vpop.f32.mrf.mxu1  ;;  %v2984_v41 = vpop.f32.mrf.mxu0  ;;  %570 = vrot.lane.b32.xlu0 %v9104_v37, %s9235_s8  ;;  %990 = vrot.lane.b32.xlu1 %v9106_v20, %s9234_s30  ;;  %v946_v37 = vmul.f32 1.442695, %v919_v63 }
 0x4d0   :  { %v3039_v44 = vsel %vm3023_vm10, %v2984_v41, 0.0  ;;  %8544 = vmatmul.mubr.msk.bf16.gmra.mxu0 %vm15999_vm14, %v10598_v43  ;;  %v11025_v30 = vpop.xlane.xlu0 %476  ;;  %v9108_v59 = vpop.eup %9107 }
 0x4d1   :  { %16243 = vst [vmem:[#allocation47_spill] sm:$0xff] %v11025_v30  ;;  %v11029_v49 = vpop.f32.mrf.mxu1  ;;  %v2986_v52 = vpop.f32.mrf.mxu0  ;;  %4010 = vmatprep.mubr.bf16.mxu0 %v16091_v3  ;;  %v501_v43 = vsub.f32 %v10689_v35, %v11025_v30  ;;  %9121 = vpow2.f32 %v946_v37 }
 0x4d2   :  { %v9110_v20 = vpop.eup %9109  ;;  %v11033_v41 = vpop.xlane.xlu1 %897  ;;  %v3040_v23 = vsel %vm3024_vm0, %v2986_v52, 0.0  ;;  %v316_v52 = vmul.f32 1.442695, %v290_v24 }
 0x4d3   :  { %16244 = vst [vmem:[#allocation48_spill] sm:$0xff] %v11033_v41  ;;  %v11041_v40 = vpop.f32.mrf.mxu1  ;;  %v2988_v13 = vpop.f32.mrf.mxu0  ;;  %8532 = vmatmul.mubr.msk.bf16.gmra.mxu1 %vm15999_vm14, %v10746_v16  ;;  %360 = vrot.lane.b32.xlu0 %v9108_v59, %s9236_s9 }
 0x4d4   :  { %16245 = vst [vmem:[#allocation49_spill] sm:$0xff] %v11041_v40  ;;  %v3041_v63 = vsel %vm3025_vm6, %v2988_v13, 0.0  ;;  %572 = vrot.lane.b32.xlu1 %v9110_v20, %s9235_s8  ;;  %v11048_v11 = vpop.xlane.xlu0 %266  ;;  %3857 = vmatprep.mubr.bf16.mxu1 %v16091_v3  ;;  %v528_v13 = vmul.f32 1.442695, %v501_v43  ;;  %v11062_v40 = vsub.f32 %v10970_v33, %v10950_v25  ;;  %9123 = vpow2.f32 %v316_v52 }
 0x4d5   :  { %16246 = vst [vmem:[#allocation50_spill] sm:$0xff] %v11048_v11  ;;  %v2839_v30 = vpop.f32.mrf.mxu1  ;;  %v11056_v26 = vpop.f32.mrf.mxu0  ;;  %v291_v59 = vsub.f32 %v10689_v35, %v11048_v11 }
 0x4d6   :  { %16247 = vst [vmem:[#allocation51_spill] sm:$0xff] %v11056_v26  ;;  %v9112_v55 = vpop.eup %9111  ;;  %v2894_v20 = vsel %vm2878_vm4, %v2839_v30, 0.0  ;;  %v11070_v43 = vpop.xlane.xlu1 %479  ;;  %9125 = vpow2.f32 %v528_v13  ;;  %vm3029_vm8 = vcmp.eq.f32.partialorder %v11062_v40, 1.0  ;;  %vm2884_vm13 = vcmp.eq.f32.partialorder %v11062_v40, 0.0 }
 0x4d7   :  { %v11064_v6 = vadd.f32 %v3039_v44, %v2894_v20  ;;  %v2841_v39 = vpop.f32.mrf.mxu1  ;;  %v2994_v24 = vpop.f32.mrf.mxu0  ;;  %5394 = vrot.lane.b32.xlu0 %v10786_v32, %s9241_s15  ;;  %16249 = vst [vmem:[#allocation53_spill] sm:$0xff] %v11070_v43  ;;  %v711_v44 = vsub.f32 %v10694_v28, %v10999_v60  ;;  %vm15998_vm4 = vcmask 1043456  }
 0x4d8   :  { %v2895_v37 = vsel %vm2879_vm2, %v2841_v39, 0.0  ;;  %v3043_v35 = vsel %vm3027_vm11, %v2994_v24, 0.0  ;;  %362 = vrot.lane.b32.xlu1 %v9112_v55, %s9236_s9  ;;  %8545 = vmatmul.mubr.msk.bf16.gmra.mxu0 %vm15999_vm14, %v10606_v27  ;;  %v11075_v25 = vpop.xlane.xlu0 %691  ;;  %v9114_v55 = vpop.eup %9113  ;;  %v318_v39 = vmul.f32 1.442695, %v291_v59  ;;  %vm3313_vm2 = vcmp.eq.f32.partialorder %v10992_v5, 9.0 }
 0x4d9   :  { %16248 = vst [vmem:[#allocation52_spill] sm:$0xff] %v11064_v6  ;;  %16250 = vst [vmem:[#allocation54_spill] sm:$0xff] %v11075_v25  ;;  %v11080_v30 = vadd.f32 %v3040_v23, %v2895_v37  ;;  %v2843_v20 = vpop.f32.mrf.mxu1  ;;  %v2996_v11 = vpop.f32.mrf.mxu0  ;;  %4020 = vmatprep.mubr.bf16.mxu0 %v16091_v3  ;;  %vm3314_vm11 = vcmp.eq.f32.partialorder %v11006_v45, 9.0 }
 0x4da   :  { %v2896_v24 = vsel %vm2880_vm3, %v2843_v20, 0.0  ;;  %v3044_v27 = vsel %vm3028_vm15, %v2996_v11, 0.0  ;;  %v920_v11 = vsub.f32 %v10694_v28, %v11033_v41  ;;  %v9116_v37 = vpop.eup %9115  ;;  %9127 = vpow2.f32 %v318_v39  ;;  %v11101_v20 = vpop.xlane.xlu1 %269 }
 0x4db   :  { %v11084_v26 = vadd.f32 %v3041_v63, %v2896_v24  ;;  %v11086_v6 = vpop.f32.mrf.mxu1  ;;  %v2998_v52 = vpop.f32.mrf.mxu0  ;;  %8537 = vmatmul.mubr.msk.bf16.vlgmr.msra.gmra.mxu1 %vm15999_vm14, %v10760_v7  ;;  %783 = vrot.lane.b32.xlu0 %v9114_v55, %s9233_s29  ;;  %v739_v63 = vmul.f32 1.442695, %v711_v44  ;;  %16252 = vst [vmem:[#allocation56_spill] sm:$0xff] %v11101_v20  ;;  %v712_v55 = vsub.f32 %v10711_v48, %v11075_v25  ;;  %vm3315_vm15 = vcmp.eq.f32.partialorder %v11016_v31, 9.0 }
 0x4dc   :  { %v3045_v23 = vsel %vm3029_vm8, %v2998_v52, 0.0  ;;  %5396 = vrot.lane.b32.xlu1 %v10797_v42, %s9241_s15  ;;  %v11094_v13 = vpop.xlane.xlu0 %900  ;;  %3867 = vmatprep.mubr.bf16.mxu1 %v16091_v3  ;;  %v9118_v52 = vpop.eup %9117 }
 0x4dd   :  { %16251 = vst [vmem:[#allocation55_spill] sm:$0xff] %v11094_v13  ;;  %v2849_v59 = vpop.f32.mrf.mxu1  ;;  %4062 = vmatpush1.bf16.msra.mxu1 %v10874_v21  ;;  %9129 = vpow2.f32 %v739_v63 }
 0x4de   :  { %v2898_v24 = vsel %vm2882_vm1, %v2849_v59, 0.0  ;;  %4303 = vmatprep.subr.bf16.mxu1 %v10837_v38  ;;  %v948_v38 = vmul.f32 1.442695, %v920_v11  ;;  %v11128_v63 = vpop.xlane.xlu1 %694  ;;  %v292_v11 = vsub.f32 %v10694_v28, %v11101_v20 }
 0x4df   :  { %v11106_v44 = vadd.f32 %v3043_v35, %v2898_v24  ;;  %v2851_v60 = vpop.f32.mrf.mxu1  ;;  %992 = vrot.lane.b32.xlu0 %v9116_v37, %s9234_s30  ;;  %v502_v35 = vsub.f32 %v10694_v28, %v11070_v43  ;;  %v741_v37 = vmul.f32 1.442695, %v712_v55  ;;  %16255 = vst [vmem:[#allocation59_spill] sm:$0xff] %v11128_v63 }
 0x4e0   :  { %v2899_v41 = vsel %vm2883_vm9, %v2851_v60, 0.0  ;;  %785 = vrot.lane.b32.xlu1 %v9118_v52, %s9233_s29  ;;  %8546 = vmatmul.mubr.msk.bf16.gmra.mxu0 %vm15999_vm14, %v10619_v56  ;;  %v11113_v39 = vpop.xlane.xlu0 %482  ;;  %v9120_v60 = vpop.eup %9119  ;;  %v921_v52 = vsub.f32 %v10711_v48, %v11094_v13  ;;  %9131 = vpow2.f32 %v948_v38  ;;  %v320_v38 = vmul.f32 1.442695, %v292_v11 }
 0x4e1   :  { %16253 = vst [vmem:[#allocation57_spill] sm:$0xff] %v11106_v44  ;;  %16254 = vst [vmem:[#allocation58_spill] sm:$0xff] %v11113_v39  ;;  %v11118_v59 = vadd.f32 %v3044_v27, %v2899_v41  ;;  %v2853_v24 = vpop.f32.mrf.mxu1  ;;  %4200 = vmatprep.mubr.bf16.mxu0 %v16091_v3  ;;  %v9122_v56 = vpop.eup %9121  ;;  %v530_v41 = vmul.f32 1.442695, %v502_v35  ;;  %9133 = vpow2.f32 %v741_v37  ;;  %v503_v55 = vsub.f32 %v10711_v48, %v11113_v39 }
 0x4e2   :  { %v2900_v25 = vsel %vm2884_vm13, %v2853_v24, 0.0  ;;  %v11141_v24 = vld [vmem:[%s15870_s6 + $0x34] ss:$8 sps:$4 sm:$0xff]   ;;  %v11335_v13 = vsub.f32 %v10979_v2, %v10994_v47  ;;  %vm3317_vm9 = vcmp.eq.f32.partialorder %v11039_v22, 9.0 }
 0x4e3   :  { %v11123_v44 = vadd.f32 %v3045_v23, %v2900_v25  ;;  %8538 = vmatmul.mubr.msk.bf16.gmra.mxu1 %vm15999_vm14, %v10780_v58  ;;  %574 = vrot.lane.b32.xlu0 %v9120_v60, %s9235_s8  ;;  %v9124_v25 = vpop.eup %9123  ;;  %v950_v23 = vmul.f32 1.442695, %v921_v52  ;;  %9135 = vpow2.f32 %v530_v41  ;;  %v11151_v60 = vpop.xlane.xlu1 %903  ;;  %v532_v37 = vmul.f32 1.442695, %v503_v55 }
 0x4e4   :  { %994 = vrot.lane.b32.xlu1 %v9122_v56, %s9234_s30  ;;  %v11131_v27 = vpop.xlane.xlu0 %272  ;;  %3877 = vmatprep.mubr.bf16.mxu1 %v16091_v3  ;;  %v9126_v56 = vpop.eup %9125  ;;  %16258 = vst [vmem:[#allocation62_spill] sm:$0xff] %v11151_v60  ;;  %v713_v41 = vsub.f32 %v10714_v62, %v11128_v63  ;;  %vm3034_vm13 = vcmp.eq.f32.partialorder %v11335_v13, 1.0 }
 0x4e5   :  { %16256 = vst [vmem:[#allocation60_spill] sm:$0xff] %v11131_v27  ;;  %9137 = vpow2.f32 %v950_v23  ;;  %v293_v52 = vsub.f32 %v10711_v48, %v11131_v27 }
 0x4e6   :  { %9139 = vpow2.f32 %v320_v38  ;;  %v922_v38 = vsub.f32 %v10714_v62, %v11151_v60 }
 0x4e7   :  { %364 = vrot.lane.b32.xlu0 %v9124_v25, %s9236_s9  ;;  %v9128_v25 = vpop.eup %9127  ;;  %9141 = vpow2.f32 %v532_v37  ;;  %v322_v23 = vmul.f32 1.442695, %v293_v52 }
 0x4e8   :  { %576 = vrot.lane.b32.xlu1 %v9126_v56, %s9235_s8  ;;  %8551 = vmatmul.mubr.msk.bf16.vlgmr.msra.gmra.mxu0 %vm15999_vm14, %v10629_v34  ;;  %v11147_v35 = vpop.xlane.xlu0 %697  ;;  %v11167_v56 = vpop.xlane.xlu1 %485 }
 0x4e9   :  { %16257 = vst [vmem:[#allocation61_spill] sm:$0xff] %v11147_v35  ;;  %4210 = vmatprep.mubr.bf16.mxu0 %v16091_v3  ;;  %4425 = vmatpush1.bf16.msra.mxu0 %v10874_v21  ;;  %16260 = vst [vmem:[#allocation64_spill] sm:$0xff] %v11167_v56  ;;  %9143 = vpow2.f32 %v322_v23  ;;  %v714_v52 = vsub.f32 %v10738_v50, %v11147_v35  ;;  %v504_v48 = vsub.f32 %v10714_v62, %v11167_v56 }
 0x4ea   :  { %4646 = vmatprep.subr.bf16.mxu0 %v11141_v24  ;;  %v9130_v11 = vpop.eup %9129 }
 0x4eb   :  { %8539 = vmatmul.mubr.msk.bf16.gmra.mxu1 %vm15999_vm14, %v10802_v54  ;;  %5298 = vrot.lane.b32.xlu0 %v10775_v14, %s9237_s11  ;;  %v745_v35 = vmul.f32 1.442695, %v714_v52 }
 0x4ec   :  { %366 = vrot.lane.b32.xlu1 %v9128_v25, %s9236_s9  ;;  %3887 = vmatprep.mubr.bf16.mxu1 %v16091_v3  ;;  %v11164_v55 = vpop.xlane.xlu0 %906  ;;  %v743_v25 = vmul.f32 1.442695, %v713_v41  ;;  %v952_v41 = vmul.f32 1.442695, %v922_v38  ;;  %v11187_v63 = vpop.xlane.xlu1 %275 }
 0x4ed   :  { %16259 = vst [vmem:[#allocation63_spill] sm:$0xff] %v11164_v55  ;;  %v9132_v37 = vpop.eup %9131  ;;  %16262 = vst [vmem:[#allocation66_spill] sm:$0xff] %v11187_v63  ;;  %v923_v60 = vsub.f32 %v10738_v50, %v11164_v55  ;;  %v294_v38 = vsub.f32 %v10714_v62, %v11187_v63 }
 0x4ee   :  { %9145 = vpow2.f32 %v743_v25  ;;  %v534_v25 = vmul.f32 1.442695, %v504_v48 }
 0x4ef   :  { %787 = vrot.lane.b32.xlu0 %v9130_v11, %s9233_s29  ;;  %v9134_v11 = vpop.eup %9133  ;;  %9147 = vpow2.f32 %v952_v41  ;;  %v954_v52 = vmul.f32 1.442695, %v923_v60  ;;  %v324_v48 = vmul.f32 1.442695, %v294_v38  ;;  %v11226_v41 = vld [vmem:[%s15870_s6 + $0x30] ss:$8 sps:$4 sm:$0xff]  }
 0x4f0   :  { %5300 = vrot.lane.b32.xlu1 %v10808_v1, %s9237_s11  ;;  %8552 = vmatmul.mubr.msk.bf16.gmra.mxu0 %vm15999_vm14, %v10641_v17  ;;  %v11185_v28 = vpop.xlane.xlu0 %488  ;;  %v9136_v23 = vpop.eup %9135  ;;  %9149 = vpow2.f32 %v745_v35 }
 0x4f1   :  { %4220 = vmatprep.mubr.bf16.mxu0 %v16091_v3  ;;  %16261 = vst [vmem:[#allocation65_spill] sm:$0xff] %v11185_v28  ;;  %9151 = vpow2.f32 %v534_v25 }
 0x4f2   :  { %v9138_v27 = vpop.eup %9137  ;;  %9153 = vpow2.f32 %v954_v52 }
 0x4f3   :  { %8540 = vmatmul.mubr.msk.bf16.gmra.mxu1 %vm15999_vm14, %v10820_v8  ;;  %996 = vrot.lane.b32.xlu0 %v9132_v37, %s9234_s30  ;;  %v9140_v37 = vpop.eup %9139  ;;  %9155 = vpow2.f32 %v324_v48 }
 0x4f4   :  { %789 = vrot.lane.b32.xlu1 %v9134_v11, %s9233_s29  ;;  %4079 = vmatprep.mubr.bf16.mxu1 %v16091_v3  ;;  %v505_v11 = vsub.f32 %v10738_v50, %v11185_v28  ;;  %v9142_v55 = vpop.eup %9141  ;;  %v11315_v28 = vpop.f32.mrf.mxu1 }
 0x4f6   :  { %v9144_v60 = vpop.eup %9143 }
 0x4f7   :  { %578 = vrot.lane.b32.xlu0 %v9136_v23, %s9235_s8  ;;  %v11200_v23 = vpop.xlane.xlu0 %278 }
 0x4f8   :  { %998 = vrot.lane.b32.xlu1 %v9138_v27, %s9234_s30  ;;  %8553 = vmatmul.mubr.msk.bf16.gmra.mxu0 %vm15999_vm14, %v10730_v57  ;;  %16263 = vst [vmem:[#allocation67_spill] sm:$0xff] %v11200_v23  ;;  %v536_v27 = vmul.f32 1.442695, %v505_v11  ;;  %v295_v35 = vsub.f32 %v10738_v50, %v11200_v23  ;;  %v11310_v23 = vld [vmem:[%s15867_s3] sm:$0xf] }
 0x4f9   :  { %4230 = vmatprep.mubr.bf16.mxu0 %v16091_v3 }
 0x4fa   :  { %9157 = vpow2.f32 %v536_v27 }
 0x4fb   :  { %8547 = vmatmul.mubr.msk.bf16.vlgmr.msra.gmra.mxu1 %vm15999_vm14, %v10637_v29  ;;  %368 = vrot.lane.b32.xlu0 %v9140_v37, %s9236_s9 }
 0x4fc   :  { %580 = vrot.lane.b32.xlu1 %v9142_v55, %s9235_s8  ;;  %4089 = vmatprep.mubr.bf16.mxu1 %v16091_v3  ;;  %v326_v55 = vmul.f32 1.442695, %v295_v35  ;;  %v11249_v35 = vsub.f32 %v10970_v33, %v10966_v12 }
 0x4fd   :  { %4304 = vmatpush1.bf16.msra.mxu1 %v10874_v21  ;;  %v9146_v21 = vpop.eup %9145 }
 0x4fe   :  { %4557 = vmatprep.subr.bf16.mxu1 %v11141_v24  ;;  %v9148_v25 = vpop.eup %9147  ;;  %9159 = vpow2.f32 %v326_v55  ;;  %v11261_v55 = vsub.f32 %v10970_v33, %v10983_v51  ;;  %vm3031_vm5 = vcmp.eq.f32.partialorder %v11249_v35, 1.0  ;;  %v11272_v51 = vsub.f32 %v10970_v33, %v11010_v0 }
 0x4ff   :  { %5302 = vrot.lane.b32.xlu0 %v10786_v32, %s9237_s11  ;;  %v9150_v38 = vpop.eup %9149  ;;  %v11286_v0 = vsub.f32 %v10970_v33, %v11029_v49  ;;  %vm2886_vm3 = vcmp.eq.f32.partialorder %v11249_v35, 0.0 }
 0x500   :  { %370 = vrot.lane.b32.xlu1 %v9144_v60, %s9236_s9  ;;  %8554 = vmatmul.mubr.msk.bf16.gmra.mxu0 %vm15999_vm14, %v10746_v16  ;;  %v9152_v37 = vpop.eup %9151  ;;  %v11255_v60 = vsub.f32 %v10979_v2, %v10972_v10  ;;  %vm3033_vm12 = vcmp.eq.f32.partialorder %v11261_v55, 1.0  ;;  %vm3035_vm10 = vcmp.eq.f32.partialorder %v11272_v51, 1.0  ;;  %vm2888_vm1 = vcmp.eq.f32.partialorder %v11261_v55, 0.0 }
 0x501   :  { %4442 = vmatprep.mubr.bf16.mxu0 %v16091_v3  ;;  %v9154_v52 = vpop.eup %9153  ;;  %vm3037_vm6 = vcmp.eq.f32.partialorder %v11286_v0, 1.0 }
 0x502   :  { %v9156_v11 = vpop.eup %9155  ;;  %vm3032_vm7 = vcmp.eq.f32.partialorder %v11255_v60, 1.0  ;;  %vm2887_vm8 = vcmp.eq.f32.partialorder %v11255_v60, 0.0 }
 0x503   :  { %8548 = vmatmul.mubr.msk.bf16.gmra.mxu1 %vm15999_vm14, %v10649_v9  ;;  %791 = vrot.lane.b32.xlu0 %v9146_v21, %s9233_s29  ;;  %v11257_v21 = vpop.f32.mrf.mxu0 }
 0x504   :  { %5304 = vrot.lane.b32.xlu1 %v10797_v42, %s9237_s11  ;;  %4099 = vmatprep.mubr.bf16.mxu1 %v16091_v3 }
 0x507   :  { %1000 = vrot.lane.b32.xlu0 %v9148_v25, %s9234_s30  ;;  %v9158_v48 = vpop.eup %9157 }
 0x508   :  { %793 = vrot.lane.b32.xlu1 %v9150_v38, %s9233_s29  ;;  %8559 = vmatmul.mubr.msk.bf16.vlgmr.msra.gmra.mxu0 %vm15999_vm14, %v10760_v7 }
 0x509   :  { %4452 = vmatprep.mubr.bf16.mxu0 %v16091_v3  ;;  %4647 = vmatpush1.bf16.msra.mxu0 %v11226_v41 }
 0x50a   :  { %4888 = vmatprep.subr.bf16.mxu0 %v11141_v24 }
 0x50b   :  { %8549 = vmatmul.mubr.msk.bf16.gmra.mxu1 %vm15999_vm14, %v10766_v61  ;;  %582 = vrot.lane.b32.xlu0 %v9152_v37, %s9235_s8  ;;  %v9160_v27 = vpop.eup %9159 }
 0x50c   :  { %1002 = vrot.lane.b32.xlu1 %v9154_v52, %s9234_s30  ;;  %4109 = vmatprep.mubr.bf16.mxu1 %v16091_v3 }
 0x50f   :  { %372 = vrot.lane.b32.xlu0 %v9156_v11, %s9236_s9  ;;  %v11280_v11 = vsub.f32 %v10979_v2, %v11018_v4 }
 0x510   :  { %584 = vrot.lane.b32.xlu1 %v9158_v48, %s9235_s8  ;;  %8560 = vmatmul.mubr.msk.bf16.gmra.mxu0 %vm15999_vm14, %v10780_v58  ;;  %v11282_v48 = vpop.permute.xlu1 %5206 }
 0x511   :  { %4462 = vmatprep.mubr.bf16.mxu0 %v16091_v3  ;;  %16264 = vst [vmem:[#allocation68_spill] sm:$0xff] %v11282_v48  ;;  %vm3036_vm0 = vcmp.eq.f32.partialorder %v11280_v11, 1.0 }
 0x513   :  { %8550 = vmatmul.mubr.msk.bf16.gmra.mxu1 %vm15999_vm14, %v10791_v19 }
 0x514   :  { %374 = vrot.lane.b32.xlu1 %v9160_v27, %s9236_s9  ;;  %4321 = vmatprep.mubr.bf16.mxu1 %v16091_v3  ;;  %v11299_v49 = vpop.permute.xlu1 %5210 }
 0x515   :  { %16265 = vst [vmem:[#allocation69_spill] sm:$0xff] %v11299_v49 }
 0x518   :  { %v3004_v25 = vpop.f32.mrf.mxu0  ;;  %8561 = vmatmul.mubr.msk.bf16.gmra.mxu0 %vm15999_vm14, %v10802_v54 }
 0x519   :  { %v3047_v12 = vsel %vm3031_vm5, %v3004_v25, 0.0  ;;  %4472 = vmatprep.mubr.bf16.mxu0 %v16091_v3  ;;  %vm2889_vm5 = vcmp.eq.f32.partialorder %v11335_v13, 0.0 }
 0x51a   :  { %v3006_v38 = vpop.f32.mrf.mxu0 }
 0x51b   :  { %v3048_v10 = vsel %vm3032_vm7, %v3006_v38, 0.0  ;;  %8555 = vmatmul.mubr.msk.bf16.vlgmr.msra.gmra.mxu1 %vm15999_vm14, %v10811_v18  ;;  %vm3318_vm7 = vcmp.eq.f32.partialorder %v11053_v36, 9.0 }
 0x51c   :  { %v3008_v37 = vpop.f32.mrf.mxu0  ;;  %4331 = vmatprep.mubr.bf16.mxu1 %v16091_v3  ;;  %4558 = vmatpush1.bf16.msra.mxu1 %v11226_v41 }
 0x51d   :  { %v3049_v52 = vsel %vm3033_vm12, %v3008_v37, 0.0  ;;  %4767 = vmatprep.subr.bf16.mxu1 %v11141_v24  ;;  %vm2890_vm12 = vcmp.eq.f32.partialorder %v11272_v51, 0.0 }
 0x51e   :  { %v3010_v27 = vpop.f32.mrf.mxu0 }
 0x520   :  { %v3014_v25 = vpop.f32.mrf.mxu0  ;;  %8562 = vmatmul.mubr.msk.bf16.gmra.mxu0 %vm15999_vm14, %v10820_v8 }
 0x521   :  { %v11291_v38 = vsel %vm3035_vm10, %v3014_v25, 0.0  ;;  %4664 = vmatprep.mubr.bf16.mxu0 %v16091_v3  ;;  %vm3319_vm10 = vcmp.eq.f32.partialorder %v11062_v40, 9.0 }
 0x522   :  { %v3016_v37 = vpop.f32.mrf.mxu0 }
 0x523   :  { %v11295_v4 = vsel %vm3036_vm0, %v3016_v37, 0.0  ;;  %8556 = vmatmul.mubr.msk.bf16.gmra.mxu1 %vm15999_vm14, %v10827_v53  ;;  %vm2891_vm0 = vcmp.eq.f32.partialorder %v11280_v11, 0.0 }
 0x524   :  { %v3018_v50 = vpop.f32.mrf.mxu0  ;;  %4341 = vmatprep.mubr.bf16.mxu1 %v16091_v3 }
 0x525   :  { %v11303_v62 = vsel %vm3037_vm6, %v3018_v50, 0.0  ;;  %v11321_v50 = vpop.permute.xlu1 %5212  ;;  %vm2892_vm6 = vcmp.eq.f32.partialorder %v11286_v0, 0.0 }
 0x526   :  { %v11305_v25 = vpop.f32.mrf.mxu0  ;;  %16266 = vst [vmem:[#allocation70_spill] sm:$0xff] %v11321_v50 }
 0x528   :  { %v3274_v37 = vpop.f32.mrf.mxu0  ;;  %8569 = vmatmul.mubr.msk.bf16.vlgmr.msra.gmra.mxu0 %vm15999_vm14, %v10637_v29 }
 0x529   :  { %v11317_v63 = vsel %vm3313_vm2, %v3274_v37, 0.0  ;;  %4674 = vmatprep.mubr.bf16.mxu0 %v16091_v3  ;;  %4889 = vmatpush1.bf16.msra.mxu0 %v11226_v41  ;;  %v11349_v49 = vpop.permute.xlu1 %5392  ;;  %vm16271_vm2 = vcmask 31744  }
 0x52a   :  { %v3276_v56 = vpop.f32.mrf.mxu0  ;;  %8936 = vmatprep.subr.msk.bf16.mxu0 %vm15998_vm4, %v11310_v23  ;;  %16268 = vst [vmem:[#allocation72_spill] sm:$0xff] %v11349_v49 }
 0x52b   :  { %v11326_v20 = vsel %vm3314_vm11, %v3276_v56, 0.0  ;;  %v2859_v39 = vpop.f32.mrf.mxu1  ;;  %8557 = vmatmul.mubr.msk.bf16.gmra.mxu1 %vm15999_vm14, %v10843_v15  ;;  %vm3321_vm11 = vcmp.eq.f32.partialorder %v11249_v35, 9.0 }
 0x52c   :  { %v2902_v29 = vsel %vm2886_vm3, %v2859_v39, 0.0  ;;  %v3278_v37 = vpop.f32.mrf.mxu0  ;;  %4351 = vmatprep.mubr.bf16.mxu1 %v16091_v3  ;;  %v11344_v39 = vpop.permute.xlu0 %5208 }
 0x52d   :  { %v11337_v43 = vadd.f32 %v3047_v12, %v2902_v29  ;;  %v11339_v56 = vsel %vm3315_vm15, %v3278_v37, 0.0  ;;  %v2861_v8 = vpop.f32.mrf.mxu1  ;;  %16267 = vst [vmem:[#allocation71_spill] sm:$0xff] %v11344_v39 }
 0x52e   :  { %v2903_v54 = vsel %vm2887_vm8, %v2861_v8, 0.0  ;;  %v11342_v58 = vpop.f32.mrf.mxu0  ;;  %vm3322_vm8 = vcmp.eq.f32.partialorder %v11255_v60, 9.0 }
 0x52f   :  { %v11346_v50 = vadd.f32 %v3048_v10, %v2903_v54  ;;  %v2863_v7 = vpop.f32.mrf.mxu1  ;;  %v3050_v10 = vsel %vm3034_vm13, %v3010_v27, 0.0  ;;  %v16269_v27 = vld [vmem:[#allocation49_spill] sm:$0xff]  ;;  %vm3323_vm13 = vcmp.eq.f32.partialorder %v11261_v55, 9.0 }
 0x530   :  { %v2904_v47 = vsel %vm2888_vm1, %v2863_v7, 0.0  ;;  %v3284_v12 = vpop.f32.mrf.mxu0  ;;  %8570 = vmatmul.mubr.msk.bf16.gmra.mxu0 %vm15999_vm14, %v10649_v9  ;;  %vm16273_vm1 = vmmov %vm16271_vm2 }
 0x531   :  { %v11355_v8 = vadd.f32 %v3049_v52, %v2904_v47  ;;  %v11357_v29 = vsel %vm3317_vm9, %v3284_v12, 0.0  ;;  %v2865_v54 = vpop.f32.mrf.mxu1  ;;  %4684 = vmatprep.mubr.bf16.mxu0 %v16091_v3  ;;  %vm3168_vm9 = vcmp.eq.f32.partialorder %v10992_v5, 8.0  ;;  %v16275_v5 = vld [vmem:[#allocation52_spill] sm:$0xff] }
 0x532   :  { %v2905_v37 = vsel %vm2889_vm5, %v2865_v54, 0.0  ;;  %v3286_v7 = vpop.f32.mrf.mxu0  ;;  %v11373_v54 = vsub.f32 %v10979_v2, %v16269_v27  ;;  %vm3169_vm5 = vcmp.eq.f32.partialorder %v11006_v45, 8.0 }
 0x533   :  { %v11362_v49 = vadd.f32 %v3050_v10, %v2905_v37  ;;  %v11364_v39 = vsel %vm3318_vm7, %v3286_v7, 0.0  ;;  %v2869_v9 = vpop.f32.mrf.mxu1  ;;  %8558 = vmatmul.mubr.msk.bf16.gmra.mxu1 %vm15999_vm14, %v10852_v46  ;;  %v782_v52 = vpop.permute.xlu1 %781  ;;  %vm3170_vm7 = vcmp.eq.f32.partialorder %v11016_v31, 8.0 }
 0x534   :  { %v2906_v47 = vsel %vm2890_vm12, %v2869_v9, 0.0  ;;  %v3288_v12 = vpop.f32.mrf.mxu0  ;;  %4575 = vmatprep.mubr.bf16.mxu1 %v16091_v3  ;;  %v11375_v10 = vpop.permute.xlu0 %5390  ;;  %v838_v27 = vsel %vm16271_vm2, %v782_v52, 0.0  ;;  %vm3038_vm3 = vcmp.eq.f32.partialorder %v11373_v54, 1.0  ;;  %vm2893_vm15 = vcmp.eq.f32.partialorder %v11373_v54, 0.0 }
 0x535   :  { %16270 = vst [vmem:[#allocation49_spill] sm:$0xff] %v11375_v10  ;;  %v11378_v37 = vadd.f32 %v11291_v38, %v2906_v47  ;;  %v11380_v7 = vsel %vm3319_vm10, %v3288_v12, 0.0  ;;  %v2871_v16 = vpop.f32.mrf.mxu1  ;;  %v16272_v10 = vld [vmem:[#allocation34_spill] sm:$0xff] }
 0x536   :  { %v2907_v9 = vsel %vm2891_vm0, %v2871_v16, 0.0  ;;  %v11383_v48 = vpop.f32.mrf.mxu0  ;;  %v11392_v38 = vsub.f32 %v10979_v2, %v16272_v10  ;;  %vm16277_vm0 = vmmov %vm16273_vm1 }
 0x537   :  { %v11386_v42 = vadd.f32 %v11295_v4, %v2907_v9  ;;  %v2873_v57 = vpop.f32.mrf.mxu1 }
 0x538   :  { %v2908_v47 = vsel %vm2892_vm6, %v2873_v57, 0.0  ;;  %839 = vadd.xlane.f32.xlu1 %v838_v27  ;;  %v3294_v12 = vpop.f32.mrf.mxu0  ;;  %8571 = vmatmul.mubr.msk.bf16.gmra.mxu0 %vm15999_vm14, %v10766_v61  ;;  %v3054_v57 = vsel %vm3038_vm3, %v11305_v25, 0.0  ;;  %vm3026_vm12 = vcmp.eq.f32.partialorder %v11392_v38, 1.0  ;;  %vm2881_vm10 = vcmp.eq.f32.partialorder %v11392_v38, 0.0 }
 0x539   :  { %v11399_v16 = vadd.f32 %v11303_v62, %v2908_v47  ;;  %v11401_v4 = vsel %vm3321_vm11, %v3294_v12, 0.0  ;;  %v2875_v52 = vpop.f32.mrf.mxu1  ;;  %v780_v10 = vpop.permute.xlu0 %779  ;;  %4694 = vmatprep.mubr.bf16.mxu0 %v16091_v3  ;;  %v16274_v12 = vld [vmem:[#allocation12_spill] sm:$0xff]  ;;  %vm3316_vm6 = vcmp.eq.f32.partialorder %v11392_v38, 9.0  ;;  %vm3171_vm2 = vcmp.eq.f32.partialorder %v11392_v38, 8.0 }
 0x53a   :  { %v2909_v9 = vsel %vm2893_vm15, %v2875_v52, 0.0  ;;  %v3296_v27 = vpop.f32.mrf.mxu0  ;;  %v835_v61 = vsel %vm16273_vm1, %v780_v10, 0.0  ;;  %vm3325_vm11 = vcmp.eq.f32.partialorder %v11272_v51, 9.0  ;;  %vm3172_vm3 = vcmp.eq.f32.partialorder %v11039_v22, 8.0  ;;  %vm16279_vm1 = vmmov %vm16277_vm0 }
 0x53b   :  { %v11408_v32 = vadd.f32 %v3054_v57, %v2909_v9  ;;  %v11410_v62 = vsel %vm3322_vm8, %v3296_v27, 0.0  ;;  %v3129_v47 = vpop.f32.mrf.mxu1  ;;  %8565 = vmatmul.mubr.msk.bf16.vlgmr.msra.gmra.mxu1 %vm15999_vm14, %v16274_v12  ;;  %836 = vadd.xlane.f32.xlu0 %v835_v61  ;;  %v16276_v9 = vld [vmem:[#allocation39_spill] sm:$0xff]  ;;  %v2897_v27 = vsel %vm2881_vm10, %v11086_v6, 0.0  ;;  %vm3326_vm8 = vcmp.eq.f32.partialorder %v11280_v11, 9.0  ;;  %vm16284_vm10 = vmmov %vm16277_vm0 }
 0x53c   :  { %v3184_v1 = vsel %vm3168_vm9, %v3129_v47, 0.0  ;;  %v3298_v17 = vpop.f32.mrf.mxu0  ;;  %4585 = vmatprep.mubr.bf16.mxu1 %v16091_v3  ;;  %4768 = vmatpush1.bf16.msra.mxu1 %v11226_v41  ;;  %v11428_v45 = vsub.f32 %v10979_v2, %v16276_v9  ;;  %vm16281_vm9 = vmmov %vm16277_vm0 }
 0x53d   :  { %v3200_v25 = vadd.f32 %v3184_v1, %v16275_v5  ;;  %v11423_v52 = vsel %vm3323_vm13, %v3298_v17, 0.0  ;;  %v3131_v10 = vpop.f32.mrf.mxu1  ;;  %v989_v57 = vpop.permute.xlu0 %988  ;;  %5009 = vmatprep.subr.bf16.mxu1 %v11141_v24  ;;  %v16278_v24 = vld [vmem:[#allocation51_spill] sm:$0xff] }
 0x53e   :  { %v3185_v61 = vsel %vm3169_vm5, %v3131_v10, 0.0  ;;  %v11431_v47 = vpop.f32.mrf.mxu0  ;;  %v1044_v12 = vsel %vm16277_vm0, %v989_v57, 0.0  ;;  %v3042_v6 = vsel %vm3026_vm12, %v16278_v24, 0.0  ;;  %vm3030_vm15 = vcmp.eq.f32.partialorder %v11428_v45, 1.0 }
 0x53f   :  { %v11436_v17 = vadd.f32 %v11317_v63, %v3200_v25  ;;  %v3201_v1 = vadd.f32 %v3185_v61, %v11080_v30  ;;  %v3133_v5 = vpop.f32.mrf.mxu1  ;;  %1045 = vadd.xlane.f32.xlu0 %v1044_v12  ;;  %v3058_v30 = vadd.f32 %v3042_v6, %v2897_v27  ;;  %v16280_v6 = vld [vmem:[#allocation13_spill] sm:$0xff]  ;;  %vm2885_vm13 = vcmp.eq.f32.partialorder %v11428_v45, 0.0 }
 0x540   :  { %v3186_v10 = vsel %vm3170_vm7, %v3133_v5, 0.0  ;;  %v3304_v9 = vpop.f32.mrf.mxu0  ;;  %8572 = vmatmul.mubr.msk.bf16.gmra.mxu0 %vm15999_vm14, %v10791_v19  ;;  %vm3327_vm5 = vcmp.eq.f32.partialorder %v11286_v0, 9.0  ;;  %vm3173_vm7 = vcmp.eq.f32.partialorder %v11053_v36, 8.0  ;;  %vm3174_vm12 = vcmp.eq.f32.partialorder %v11062_v40, 8.0 }
 0x541   :  { %v11450_v63 = vadd.f32 %v11326_v20, %v3201_v1  ;;  %v3202_v25 = vadd.f32 %v3186_v10, %v11084_v26  ;;  %v11453_v57 = vsel %vm3325_vm11, %v3304_v9, 0.0  ;;  %v3135_v61 = vpop.f32.mrf.mxu1  ;;  %v991_v12 = vpop.permute.xlu1 %990  ;;  %4906 = vmatprep.mubr.bf16.mxu0 %v16091_v3  ;;  %v3332_v9 = vsel %vm3316_vm6, %v11342_v58, 0.0 }
 0x542   :  { %v3187_v31 = vsel %vm3171_vm2, %v3135_v61, 0.0  ;;  %v571_v5 = vpop.permute.xlu0 %570  ;;  %v3306_v24 = vpop.f32.mrf.mxu0  ;;  %v1047_v19 = vsel %vm16279_vm1, %v991_v12, 0.0  ;;  %v16282_v61 = vld [vmem:[#allocation57_spill] sm:$0xff]  ;;  %v2901_v58 = vsel %vm2885_vm13, %v11315_v28, 0.0  ;;  %v3046_v40 = vsel %vm3030_vm15, %v11257_v21, 0.0  ;;  %vm16287_vm1 = vmmov %vm16277_vm0 }
 0x543   :  { %v11460_v20 = vadd.f32 %v11339_v56, %v3202_v25  ;;  %v3203_v27 = vadd.f32 %v3187_v31, %v3058_v30  ;;  %v11462_v26 = vsel %vm3326_vm8, %v3306_v24, 0.0  ;;  %v3139_v1 = vpop.f32.mrf.mxu1  ;;  %8566 = vmatmul.mubr.msk.bf16.gmra.mxu1 %vm15999_vm14, %v16280_v6  ;;  %1048 = vadd.xlane.f32.xlu0 %v1047_v19  ;;  %v626_v10 = vsel %vm16281_vm9, %v571_v5, 0.0 }
 0x544   :  { %v3188_v56 = vsel %vm3172_vm3, %v3139_v1, 0.0  ;;  %627 = vadd.xlane.f32.xlu1 %v626_v10  ;;  %v3308_v30 = vpop.f32.mrf.mxu0  ;;  %4595 = vmatprep.mubr.bf16.mxu1 %v16091_v3  ;;  %v11485_v19 = vsel %vm15998_vm4, %v11310_v23, 0  ;;  %v11501_v23 = vld [vmem:[%s15867_s3 + $0x4] sm:$0xf]  ;;  %vm3175_vm6 = vcmp.eq.f32.partialorder %v11428_v45, 8.0  ;;  %vm3320_vm2 = vcmp.eq.f32.partialorder %v11428_v45, 9.0  ;;  %vm16286_vm3 = vmmov %vm16277_vm0 }
 0x545   :  { %v11475_v25 = vadd.f32 %v3332_v9, %v3203_v27  ;;  %v3204_v12 = vadd.f32 %v3188_v56, %v16282_v61  ;;  %v11478_v31 = vsel %vm3327_vm5, %v3308_v30, 0.0  ;;  %v3141_v5 = vpop.f32.mrf.mxu1  ;;  %16283 = vst [vmem:[#allocation34_spill] sm:$0xff] %v11485_v19  ;;  %vm3176_vm11 = vcmp.eq.f32.partialorder %v11249_v35, 8.0 }
 0x546   :  { %v3189_v38 = vsel %vm3173_vm7, %v3141_v5, 0.0  ;;  %v573_v22 = vpop.permute.xlu1 %572  ;;  %v361_v24 = vpop.permute.xlu0 %360  ;;  %vm3177_vm15 = vcmp.eq.f32.partialorder %v11255_v60, 8.0  ;;  %vm3178_vm8 = vcmp.eq.f32.partialorder %v11261_v55, 8.0  ;;  %vm3179_vm9 = vcmp.eq.f32.partialorder %v11335_v13, 8.0  ;;  %vm16289_vm7 = vmmov %vm16277_vm0 }
 0x547   :  { %v11488_v27 = vadd.f32 %v11357_v29, %v3204_v12  ;;  %v3205_v1 = vadd.f32 %v3189_v38, %v11118_v59  ;;  %v11491_v6 = vpop.f32.mrf.mxu0  ;;  %v3143_v10 = vpop.f32.mrf.mxu1  ;;  %v629_v36 = vsel %vm16284_vm10, %v573_v22, 0.0  ;;  %v417_v28 = vsel %vm16277_vm0, %v361_v24, 0.0  ;;  %v16285_v38 = vld [vmem:[#allocation14_spill] sm:$0xff] }
 0x548   :  { %v3190_v9 = vsel %vm3174_vm12, %v3143_v10, 0.0  ;;  %630 = vadd.xlane.f32.xlu0 %v629_v36  ;;  %418 = vadd.xlane.f32.xlu1 %v417_v28  ;;  %v3062_v59 = vadd.f32 %v3046_v40, %v2901_v58  ;;  %v3336_v22 = vsel %vm3320_vm2, %v11383_v48, 0.0  ;;  %vm3324_vm13 = vcmp.eq.f32.partialorder %v11335_v13, 9.0  ;;  %vm16290_vm12 = vmmov %vm16277_vm0 }
 0x549   :  { %v11504_v29 = vadd.f32 %v11364_v39, %v3205_v1  ;;  %v3206_v56 = vadd.f32 %v3190_v9, %v11123_v44  ;;  %v11507_v30 = vpop.f32.mrf.mxu0  ;;  %8577 = vmatmul.mubr.msk.bf16.vlgmr.msra.gmra.mxu0 %vm15999_vm14, %v10811_v18  ;;  %v3145_v21 = vpop.f32.mrf.mxu1  ;;  %vm3180_vm5 = vcmp.eq.f32.partialorder %v11272_v51, 8.0  ;;  %vm3181_vm10 = vcmp.eq.f32.partialorder %v11280_v11, 8.0  ;;  %vm16292_vm2 = vmmov %vm16287_vm1 }
 0x54a   :  { %v3191_v61 = vsel %vm3175_vm6, %v3145_v21, 0.0  ;;  %v363_v12 = vpop.permute.xlu1 %362  ;;  %v11513_v5 = vpop.permute.xlu0 %5394  ;;  %4916 = vmatprep.mubr.bf16.mxu0 %v16091_v3  ;;  %8857 = vmatpush3.bf16.msra.mxu0 %v11485_v19  ;;  %vm3182_vm0 = vcmp.eq.f32.partialorder %v11286_v0, 8.0  ;;  %vm16291_vm6 = vmmov %vm16287_vm1  ;;  %v16316_v19 = vld [vmem:[#allocation27_spill] sm:$0xff] }
 0x54b   :  { %v11518_v44 = vadd.f32 %v11380_v7, %v3206_v56  ;;  %v3207_v39 = vadd.f32 %v3191_v61, %v3062_v59  ;;  %v11520_v58 = vpop.f32.mrf.mxu0  ;;  %v3149_v18 = vpop.f32.mrf.mxu1  ;;  %8567 = vmatmul.mubr.msk.bf16.gmra.mxu1 %vm15999_vm14, %v16285_v38  ;;  %v420_v45 = vsel %vm16286_vm3, %v363_v12, 0.0  ;;  %8937 = vmatprep.subr.msk.bf16.mxu0 %vm15998_vm4, %v11501_v23  ;;  %v16288_v38 = vld [vmem:[#allocation15_spill] sm:$0xff]  ;;  %vm3328_vm3 = vcmp.eq.f32.partialorder %v11373_v54, 9.0 }
 0x54c   :  { %v3192_v24 = vsel %vm3176_vm11, %v3149_v18, 0.0  ;;  %421 = vadd.xlane.f32.xlu0 %v420_v45  ;;  %4605 = vmatprep.mubr.bf16.mxu1 %v16091_v3  ;;  %vm3183_vm11 = vcmp.eq.f32.partialorder %v11373_v54, 8.0 }
 0x54d   :  { %v11530_v7 = vadd.f32 %v3336_v22, %v3207_v39  ;;  %v3208_v1 = vadd.f32 %v3192_v24, %v11337_v43  ;;  %v11533_v10 = vpop.f32.mrf.mxu0  ;;  %v3151_v35 = vpop.f32.mrf.mxu1  ;;  %v3340_v22 = vsel %vm3324_vm13, %v11431_v47, 0.0  ;;  %vm15997_vm13 = vcmask 64512  }
 0x54e   :  { %v3193_v36 = vsel %vm3177_vm15, %v3151_v35, 0.0  ;;  %v11536_v28 = vpop.permute.xlu1 %5396  ;;  %v784_v40 = vpop.permute.xlu0 %783  ;;  %vm16293_vm15 = vmmov %vm16287_vm1 }
 0x54f   :  { %v11539_v9 = vadd.f32 %v11401_v4, %v3208_v1  ;;  %v3209_v48 = vadd.f32 %v3193_v36, %v11346_v50  ;;  %v11542_v59 = vpop.f32.mrf.mxu0  ;;  %v3153_v56 = vpop.f32.mrf.mxu1  ;;  %v841_v43 = vsel %vm16287_vm1, %v784_v40, 0.0 }
 0x550   :  { %v3194_v21 = vsel %vm3178_vm8, %v3153_v56, 0.0  ;;  %842 = vadd.xlane.f32.xlu1 %v841_v43  ;;  %vm16294_vm8 = vmmov %vm16287_vm1 }
 0x551   :  { %v11547_v60 = vadd.f32 %v11410_v62, %v3209_v48  ;;  %v3210_v61 = vadd.f32 %v3194_v21, %v11355_v8  ;;  %v11550_v12 = vpop.f32.mrf.mxu0  ;;  %8578 = vmatmul.mubr.msk.bf16.gmra.mxu0 %vm15999_vm14, %v10827_v53  ;;  %v3155_v50 = vpop.f32.mrf.mxu1 }
 0x552   :  { %v3195_v55 = vsel %vm3179_vm9, %v3155_v50, 0.0  ;;  %v786_v4 = vpop.permute.xlu1 %785  ;;  %v993_v39 = vpop.permute.xlu0 %992  ;;  %4926 = vmatprep.mubr.bf16.mxu0 %v16091_v3  ;;  %vm16295_vm9 = vmmov %vm16292_vm2 }
 0x553   :  { %v11559_v62 = vadd.f32 %v11423_v52, %v3210_v61  ;;  %v3211_v8 = vadd.f32 %v3195_v55, %v11362_v49  ;;  %v11562_v18 = vpop.f32.mrf.mxu0  ;;  %v3159_v53 = vpop.f32.mrf.mxu1  ;;  %8568 = vmatmul.mubr.msk.bf16.gmra.mxu1 %vm15999_vm14, %v16288_v38  ;;  %v844_v13 = vsel %vm16289_vm7, %v786_v4, 0.0  ;;  %v1050_v45 = vsel %vm16290_vm12, %v993_v39, 0.0  ;;  %vm16297_vm12 = vmmov %vm16292_vm2 }
 0x554   :  { %v3196_v51 = vsel %vm3180_vm5, %v3159_v53, 0.0  ;;  %845 = vadd.xlane.f32.xlu0 %v844_v13  ;;  %1051 = vadd.xlane.f32.xlu1 %v1050_v45  ;;  %v11609_v53 = vld [vmem:[%s15867_s3 + $0x8] sm:$0xf] }
 0x555   :  { %v11569_v24 = vadd.f32 %v3340_v22, %v3211_v8  ;;  %v3212_v52 = vadd.f32 %v3196_v51, %v11378_v37  ;;  %v11572_v49 = vpop.f32.mrf.mxu0  ;;  %v3161_v1 = vpop.f32.mrf.mxu1  ;;  %4785 = vmatprep.mubr.bf16.mxu1 %v16091_v3 }
 0x556   :  { %v3197_v35 = vsel %vm3181_vm10, %v3161_v1, 0.0  ;;  %v995_v36 = vpop.permute.xlu1 %994  ;;  %v575_v40 = vpop.permute.xlu0 %574 }
 0x557   :  { %v11578_v47 = vadd.f32 %v11453_v57, %v3212_v52  ;;  %v3213_v48 = vadd.f32 %v3197_v35, %v11386_v42  ;;  %v11581_v56 = vpop.f32.mrf.mxu0  ;;  %v3163_v37 = vpop.f32.mrf.mxu1  ;;  %v1053_v43 = vsel %vm16291_vm6, %v995_v36, 0.0  ;;  %v632_v21 = vsel %vm16292_vm2, %v575_v40, 0.0  ;;  %vm16298_vm6 = vmmov %vm16292_vm2 }
 0x558   :  { %v3198_v11 = vsel %vm3182_vm0, %v3163_v37, 0.0  ;;  %1054 = vadd.xlane.f32.xlu0 %v1053_v43  ;;  %633 = vadd.xlane.f32.xlu1 %v632_v21 }
 0x559   :  { %v11586_v61 = vadd.f32 %v11462_v26, %v3213_v48  ;;  %v3214_v0 = vadd.f32 %v3198_v11, %v11399_v16  ;;  %v11589_v50 = vpop.f32.mrf.mxu0  ;;  %8579 = vmatmul.mubr.msk.bf16.gmra.mxu0 %vm15999_vm14, %v10843_v15  ;;  %v3165_v42 = vpop.f32.mrf.mxu1 }
 0x55a   :  { %v3199_v57 = vsel %vm3183_vm11, %v3165_v42, 0.0  ;;  %v577_v55 = vpop.permute.xlu1 %576  ;;  %v365_v4 = vpop.permute.xlu0 %364  ;;  %4936 = vmatprep.mubr.bf16.mxu0 %v16091_v3 }
 0x55b   :  { %v11597_v26 = vadd.f32 %v11478_v31, %v3214_v0  ;;  %v3215_v16 = vadd.f32 %v3199_v57, %v11408_v32  ;;  %v11600_v39 = vpop.f32.mrf.mxu0  ;;  %v3407_v8 = vpop.f32.mrf.mxu1  ;;  %8573 = vmatmul.mubr.msk.bf16.vlgmr.msra.gmra.mxu1 %vm15999_vm14, %v10629_v34  ;;  %v635_v15 = vsel %vm16293_vm15, %v577_v55, 0.0  ;;  %v423_v54 = vsel %vm16294_vm8, %v365_v4, 0.0  ;;  %v16296_v0 = vld [vmem:[#allocation16_spill] sm:$0xff]  ;;  %vm16303_vm8 = vmmov %vm16292_vm2 }
 0x55c   :  { %v3344_v31 = vsel %vm3328_vm3, %v11491_v6, 0.0  ;;  %v11613_v38 = vsub.f32 %v10970_v33, %v3407_v8  ;;  %636 = vadd.xlane.f32.xlu0 %v635_v15  ;;  %424 = vadd.xlane.f32.xlu1 %v423_v54 }
 0x55d   :  { %v11615_v32 = vadd.f32 %v3344_v31, %v3215_v16  ;;  %v11617_v13 = vpop.f32.mrf.mxu0  ;;  %v3409_v34 = vpop.f32.mrf.mxu1  ;;  %4795 = vmatprep.mubr.bf16.mxu1 %v16091_v3  ;;  %5010 = vmatpush1.bf16.msra.mxu1 %v11226_v41 }
 0x55e   :  { %v11622_v45 = vsub.f32 %v10979_v2, %v3409_v34  ;;  %v367_v22 = vpop.permute.xlu1 %366  ;;  %v11624_v51 = vpop.permute.xlu0 %5298  ;;  %vm3535_vm1 = vcmp.eq.f32.partialorder %v11613_v38, 0.0  ;;  %8938 = vmatprep.subr.msk.bf16.mxu1 %vm15998_vm4, %v11609_v53  ;;  %vm3777_vm3 = vcmp.eq.f32.partialorder %v11613_v38, 8.0 }
 0x55f   :  { %v11629_v6 = vpop.f32.mrf.mxu0  ;;  %v3411_v52 = vpop.f32.mrf.mxu1  ;;  %v426_v1 = vsel %vm16295_vm9, %v367_v22, 0.0  ;;  %v3551_v35 = vsel %vm3535_vm1, %v11507_v30, 0.0  ;;  %vm16304_vm1 = vmmov %vm16292_vm2 }
 0x560   :  { %v11634_v41 = vsub.f32 %v10970_v33, %v3411_v52  ;;  %427 = vadd.xlane.f32.xlu0 %v426_v1  ;;  %v11637_v36 = vadd.f32 %v3551_v35, %v11436_v17  ;;  %vm3536_vm5 = vcmp.eq.f32.partialorder %v11622_v45, 0.0  ;;  %v11698_v1 = vld [vmem:[%s15867_s3 + $0xc] sm:$0xf]  ;;  %vm3778_vm15 = vcmp.eq.f32.partialorder %v11622_v45, 8.0 }
 0x561   :  { %v11640_v40 = vpop.f32.mrf.mxu0  ;;  %8580 = vmatmul.mubr.msk.bf16.gmra.mxu0 %vm15999_vm14, %v10852_v46  ;;  %v3413_v48 = vpop.f32.mrf.mxu1  ;;  %v3552_v37 = vsel %vm3536_vm5, %v11520_v58, 0.0 }
 0x562   :  { %v11646_v43 = vsub.f32 %v10979_v2, %v3413_v48  ;;  %8858 = vmatprep.mubr.msk.bf16.mxu0 %vm15997_vm13, %v10775_v14  ;;  %v11650_v30 = vpop.permute.xlu1 %5300  ;;  %v788_v17 = vpop.permute.xlu0 %787  ;;  %v11653_v21 = vadd.f32 %v3552_v37, %v11450_v63  ;;  %vm3537_vm7 = vcmp.eq.f32.partialorder %v11634_v41, 0.0  ;;  %vm3779_vm5 = vcmp.eq.f32.partialorder %v11634_v41, 8.0 }
 0x563   :  { %v11656_v11 = vpop.f32.mrf.mxu0  ;;  %v3417_v46 = vpop.f32.mrf.mxu1  ;;  %8574 = vmatmul.mubr.msk.bf16.gmra.mxu1 %vm15999_vm14, %v16296_v0  ;;  %v847_v58 = vsel %vm16297_vm12, %v788_v17, 0.0  ;;  %v3553_v42 = vsel %vm3537_vm7, %v11533_v10, 0.0  ;;  %v16301_v17 = vld [vmem:[#allocation9_spill] sm:$0xff] }
 0x564   :  { %v11663_v14 = vsub.f32 %v10970_v33, %v3417_v46  ;;  %848 = vadd.xlane.f32.xlu1 %v847_v58  ;;  %4805 = vmatprep.mubr.bf16.mxu1 %v16091_v3  ;;  %v11667_v63 = vadd.f32 %v3553_v42, %v11460_v20  ;;  %vm3538_vm10 = vcmp.eq.f32.partialorder %v11646_v43, 0.0  ;;  %vm3780_vm12 = vcmp.eq.f32.partialorder %v11646_v43, 8.0 }
 0x565   :  { %v11670_v57 = vpop.f32.mrf.mxu0  ;;  %v3419_v55 = vpop.f32.mrf.mxu1  ;;  %v3554_v4 = vsel %vm3538_vm10, %v11542_v59, 0.0  ;;  %v11686_v59 = vsel %vm15998_vm4, %v11501_v23, 0  ;;  %v16300_v23 = vld [vmem:[#allocation8_spill] sm:$0xff]  ;;  %vm16305_vm10 = vmmov %vm16304_vm1 }
 0x566   :  { %v11674_v16 = vsub.f32 %v10979_v2, %v3419_v55  ;;  %v790_v10 = vpop.permute.xlu1 %789  ;;  %v997_v8 = vpop.permute.xlu0 %996  ;;  %v11677_v15 = vadd.f32 %v3554_v4, %v11475_v25  ;;  %vm3539_vm0 = vcmp.eq.f32.partialorder %v11663_v14, 0.0  ;;  %16299 = vst [vmem:[#allocation12_spill] sm:$0xff] %v11686_v59 }
 0x567   :  { %v11680_v54 = vpop.f32.mrf.mxu0  ;;  %v3421_v20 = vpop.f32.mrf.mxu1  ;;  %v850_v31 = vsel %vm16298_vm6, %v790_v10, 0.0  ;;  %v1056_v34 = vsel %vm16292_vm2, %v997_v8, 0.0  ;;  %v3555_v22 = vsel %vm3539_vm0, %v11550_v12, 0.0  ;;  %vm16306_vm0 = vmmov %vm16304_vm1  ;;  %vm3781_vm2 = vcmp.eq.f32.partialorder %v11663_v14, 8.0 }
 0x568   :  { %v11690_v52 = vsub.f32 %v10970_v33, %v3421_v20  ;;  %851 = vadd.xlane.f32.xlu0 %v850_v31  ;;  %1057 = vadd.xlane.f32.xlu1 %v1056_v34  ;;  %v11693_v25 = vadd.f32 %v3555_v22, %v11488_v27  ;;  %vm3540_vm11 = vcmp.eq.f32.partialorder %v11674_v16, 0.0 }
 0x569   :  { %v3738_v35 = vpop.f32.mrf.mxu0  ;;  %8859 = vmatmul.mubr.msk.bf16.vlgmr.msra.gmra.mxu0 %vm15997_vm13, %v16300_v23  ;;  %v3423_v12 = vpop.f32.mrf.mxu1  ;;  %v3556_v48 = vsel %vm3540_vm11, %v11562_v18, 0.0  ;;  %v16302_v18 = vld [vmem:[#allocation24_spill] sm:$0xff] }
 0x56a   :  { %v11705_v37 = vsel %vm3777_vm3, %v3738_v35, 0.0  ;;  %v11708_v27 = vsub.f32 %v10979_v2, %v3423_v12  ;;  %8862 = vmatprep.mubr.msk.bf16.mxu0 %vm15997_vm13, %v16301_v17  ;;  %v999_v46 = vpop.permute.xlu1 %998  ;;  %v579_v0 = vpop.permute.xlu0 %578  ;;  %8867 = vmatpush3.bf16.msra.mxu0 %v11686_v59  ;;  %v11714_v58 = vadd.f32 %v3556_v48, %v11504_v29  ;;  %vm3541_vm9 = vcmp.eq.f32.partialorder %v11690_v52, 0.0 }
 0x56b   :  { %v3740_v42 = vpop.f32.mrf.mxu0  ;;  %v3427_v55 = vpop.f32.mrf.mxu1  ;;  %8575 = vmatmul.mubr.msk.bf16.gmra.mxu1 %vm15999_vm14, %v16302_v18  ;;  %v1059_v4 = vsel %vm16303_vm8, %v999_v46, 0.0  ;;  %v638_v10 = vsel %vm16304_vm1, %v579_v0, 0.0  ;;  %8939 = vmatprep.subr.msk.bf16.mxu0 %vm15998_vm4, %v11698_v1  ;;  %v3557_v20 = vsel %vm3541_vm9, %v11572_v49, 0.0  ;;  %vm3782_vm3 = vcmp.eq.f32.partialorder %v11674_v16, 8.0 }
 0x56c   :  { %v11724_v8 = vsel %vm3778_vm15, %v3740_v42, 0.0  ;;  %v11727_v29 = vsub.f32 %v10970_v33, %v3427_v55  ;;  %1060 = vadd.xlane.f32.xlu0 %v1059_v4  ;;  %639 = vadd.xlane.f32.xlu1 %v638_v10  ;;  %v11733_v22 = vadd.f32 %v3557_v20, %v11518_v44  ;;  %vm3542_vm7 = vcmp.eq.f32.partialorder %v11708_v27, 0.0  ;;  %v16307_v10 = vld [vmem:[#allocation10_spill] sm:$0xff]  ;;  %vm16310_vm15 = vmmov %vm16306_vm0 }
 0x56d   :  { %v3742_v31 = vpop.f32.mrf.mxu0  ;;  %v3429_v34 = vpop.f32.mrf.mxu1  ;;  %4815 = vmatprep.mubr.bf16.mxu1 %v16091_v3  ;;  %v3558_v49 = vsel %vm3542_vm7, %v11581_v56, 0.0  ;;  %vm3783_vm1 = vcmp.eq.f32.partialorder %v11690_v52, 8.0  ;;  %vm16312_vm7 = vmmov %vm16306_vm0 }
 0x56e   :  { %v11736_v35 = vsel %vm3779_vm5, %v3742_v31, 0.0  ;;  %v11739_v23 = vsub.f32 %v10979_v2, %v3429_v34  ;;  %v581_v12 = vpop.permute.xlu1 %580  ;;  %v369_v48 = vpop.permute.xlu0 %368  ;;  %v11746_v42 = vadd.f32 %v3558_v49, %v11530_v7  ;;  %vm3543_vm6 = vcmp.eq.f32.partialorder %v11727_v29, 0.0 }
 0x56f   :  { %v3744_v17 = vpop.f32.mrf.mxu0  ;;  %v3431_v46 = vpop.f32.mrf.mxu1  ;;  %v641_v0 = vsel %vm16305_vm10, %v581_v12, 0.0  ;;  %v429_v44 = vsel %vm16306_vm0, %v369_v48, 0.0  ;;  %v3559_v56 = vsel %vm3543_vm6, %v11589_v50, 0.0  ;;  %v16308_v12 = vld [vmem:[#allocation68_spill] sm:$0xff]  ;;  %vm3784_vm5 = vcmp.eq.f32.partialorder %v11708_v27, 8.0 }
 0x570   :  { %v11749_v55 = vsel %vm3780_vm12, %v3744_v17, 0.0  ;;  %v11752_v18 = vsub.f32 %v10970_v33, %v3431_v46  ;;  %642 = vadd.xlane.f32.xlu0 %v641_v0  ;;  %430 = vadd.xlane.f32.xlu1 %v429_v44  ;;  %v11759_v7 = vadd.f32 %v3559_v56, %v11539_v9  ;;  %vm3544_vm11 = vcmp.eq.f32.partialorder %v11739_v23, 0.0  ;;  %v16309_v46 = vld [vmem:[#allocation26_spill] sm:$0xff] }
 0x571   :  { %v3748_v4 = vpop.f32.mrf.mxu0  ;;  %8863 = vmatmul.mubr.msk.bf16.gmra.mxu0 %vm15997_vm13, %v16307_v10  ;;  %v3433_v20 = vpop.f32.mrf.mxu1  ;;  %v3560_v49 = vsel %vm3544_vm11, %v11600_v39, 0.0  ;;  %vm3785_vm10 = vcmp.eq.f32.partialorder %v11727_v29, 8.0  ;;  %vm3656_vm0 = vcmp.eq.f32.partialorder %v11613_v38, 1.0  ;;  %vm16317_vm11 = vmmov %vm16312_vm7 }
 0x572   :  { %v11762_v31 = vsel %vm3781_vm2, %v3748_v4, 0.0  ;;  %v11765_v34 = vsub.f32 %v10979_v2, %v3433_v20  ;;  %8868 = vmatprep.mubr.msk.bf16.mxu0 %vm15997_vm13, %v16308_v12  ;;  %v371_v50 = vpop.permute.xlu1 %370  ;;  %v11769_v48 = vpop.permute.xlu0 %5302  ;;  %v11777_v44 = vadd.f32 %v3560_v49, %v11547_v60  ;;  %vm3545_vm8 = vcmp.eq.f32.partialorder %v11752_v18, 0.0 }
 0x573   :  { %v3750_v17 = vpop.f32.mrf.mxu0  ;;  %v3437_v9 = vpop.f32.mrf.mxu1  ;;  %8576 = vmatmul.mubr.msk.bf16.gmra.mxu1 %vm15999_vm14, %v16309_v46  ;;  %v432_v0 = vsel %vm16310_vm15, %v371_v50, 0.0  ;;  %v3561_v39 = vsel %vm3545_vm8, %v11617_v13, 0.0  ;;  %v11801_v13 = vsel %vm15998_vm4, %v11698_v1, 0  ;;  %vm3786_vm2 = vcmp.eq.f32.partialorder %v11739_v23, 8.0 }
 0x574   :  { %v11780_v56 = vsel %vm3782_vm3, %v3750_v17, 0.0  ;;  %v11783_v4 = vsub.f32 %v10970_v33, %v3437_v9  ;;  %433 = vadd.xlane.f32.xlu0 %v432_v0  ;;  %5027 = vmatprep.mubr.bf16.mxu1 %v16091_v3  ;;  %v11789_v12 = vadd.f32 %v3561_v39, %v11559_v62  ;;  %vm3546_vm9 = vcmp.eq.f32.partialorder %v11765_v34, 0.0  ;;  %16311 = vst [vmem:[#allocation52_spill] sm:$0xff] %v11801_v13  ;;  %vm16318_vm3 = vmmov %vm16312_vm7 }
 0x575   :  { %v3752_v10 = vpop.f32.mrf.mxu0  ;;  %v3439_v20 = vpop.f32.mrf.mxu1  ;;  %v3562_v9 = vsel %vm3546_vm9, %v11629_v6, 0.0  ;;  %v11818_v6 = vsel %vm15998_vm4, %v11609_v53, 0  ;;  %vm3657_vm8 = vcmp.eq.f32.partialorder %v11622_v45, 1.0 }
 0x576   :  { %v11792_v60 = vsel %vm3783_vm1, %v3752_v10, 0.0  ;;  %v11795_v50 = vsub.f32 %v10979_v2, %v3439_v20  ;;  %v11797_v49 = vpop.permute.xlu1 %5304  ;;  %v792_v17 = vpop.permute.xlu0 %791  ;;  %v11807_v39 = vadd.f32 %v3562_v9, %v11569_v24  ;;  %vm3547_vm12 = vcmp.eq.f32.partialorder %v11783_v4, 0.0  ;;  %16313 = vst [vmem:[#allocation39_spill] sm:$0xff] %v11818_v6 }
 0x577   :  { %v3754_v46 = vpop.f32.mrf.mxu0  ;;  %v3441_v62 = vpop.f32.mrf.mxu1  ;;  %v853_v0 = vsel %vm16312_vm7, %v792_v17, 0.0  ;;  %v3563_v1 = vsel %vm3547_vm12, %v11640_v40, 0.0  ;;  %v16314_v17 = vld [vmem:[#allocation71_spill] sm:$0xff]  ;;  %vm3787_vm1 = vcmp.eq.f32.partialorder %v11752_v18, 8.0  ;;  %vm16319_vm7 = vmmov %vm16318_vm3 }
 0x578   :  { %v11810_v10 = vsel %vm3784_vm5, %v3754_v46, 0.0  ;;  %v11813_v20 = vsub.f32 %v10970_v33, %v3441_v62  ;;  %854 = vadd.xlane.f32.xlu1 %v853_v0  ;;  %v11825_v9 = vadd.f32 %v3563_v1, %v11578_v47  ;;  %vm3548_vm6 = vcmp.eq.f32.partialorder %v11795_v50, 0.0  ;;  %v16315_v62 = vld [vmem:[#allocation69_spill] sm:$0xff]  ;;  %vm16320_vm12 = vmmov %vm16318_vm3 }
 0x579   :  { %v3758_v59 = vpop.f32.mrf.mxu0  ;;  %8869 = vmatmul.mubr.msk.bf16.vlgmr.msra.gmra.mxu0 %vm15997_vm13, %v16314_v17  ;;  %v3443_v24 = vpop.f32.mrf.mxu1  ;;  %v3564_v17 = vsel %vm3548_vm6, %v11656_v11, 0.0  ;;  %vm3658_vm5 = vcmp.eq.f32.partialorder %v11634_v41, 1.0  ;;  %vm3790_vm6 = vcmp.eq.f32.partialorder %v11795_v50, 8.0 }
 0x57a   :  { %v11828_v46 = vsel %vm3785_vm10, %v3758_v59, 0.0  ;;  %v11831_v40 = vsub.f32 %v10979_v2, %v3443_v24  ;;  %v794_v53 = vpop.permute.xlu1 %793  ;;  %8872 = vmatprep.mubr.msk.bf16.mxu0 %vm15997_vm13, %v16315_v62  ;;  %v1001_v0 = vpop.permute.xlu0 %1000  ;;  %8887 = vmatpush3.bf16.msra.mxu0 %v11801_v13  ;;  %v11843_v2 = vadd.f32 %v3564_v17, %v11586_v61  ;;  %vm3549_vm15 = vcmp.eq.f32.partialorder %v11813_v20, 0.0 }
 0x57b   :  { %v3760_v47 = vpop.f32.mrf.mxu0  ;;  %v3617_v1 = vpop.f32.mrf.mxu1  ;;  %8581 = vmatmul.mubr.msk.bf16.vlgmr.msra.gmra.mxu1 %vm15999_vm14, %v16316_v19  ;;  %v856_v59 = vsel %vm16317_vm11, %v794_v53, 0.0  ;;  %v1062_v24 = vsel %vm16318_vm3, %v1001_v0, 0.0  ;;  %v3565_v19 = vsel %vm3549_vm15, %v11670_v57, 0.0  ;;  %vm3789_vm10 = vcmp.eq.f32.partialorder %v11783_v4, 8.0  ;;  %vm16324_vm11 = vmmov %vm16318_vm3 }
 0x57c   :  { %v11846_v62 = vsel %vm3786_vm2, %v3760_v47, 0.0  ;;  %v3672_v13 = vsel %vm3656_vm0, %v3617_v1, 0.0  ;;  %857 = vadd.xlane.f32.xlu0 %v856_v59  ;;  %1063 = vadd.xlane.f32.xlu1 %v1062_v24  ;;  %v11856_v0 = vadd.f32 %v3565_v19, %v11597_v26  ;;  %vm3550_vm9 = vcmp.eq.f32.partialorder %v11831_v40, 0.0 }
 0x57d   :  { %v3688_v11 = vadd.f32 %v3672_v13, %v11637_v36  ;;  %v3762_v53 = vpop.f32.mrf.mxu0  ;;  %v3619_v61 = vpop.f32.mrf.mxu1  ;;  %5037 = vmatprep.mubr.bf16.mxu1 %v16091_v3  ;;  %8877 = vmatpush3.bf16.msra.mxu1 %v11818_v6  ;;  %v3566_v36 = vsel %vm3550_vm9, %v11680_v54, 0.0  ;;  %vm3659_vm0 = vcmp.eq.f32.partialorder %v11646_v43, 1.0  ;;  %vm3660_vm2 = vcmp.eq.f32.partialorder %v11663_v14, 1.0  ;;  %vm16325_vm9 = vmmov %vm16318_vm3 }
 0x57e   :  { %v11860_v17 = vsel %vm3787_vm1, %v3762_v53, 0.0  ;;  %v3673_v47 = vsel %vm3657_vm8, %v3619_v61, 0.0  ;;  %v1003_v1 = vpop.permute.xlu1 %1002  ;;  %v583_v57 = vpop.permute.xlu0 %582  ;;  %v11870_v6 = vadd.f32 %v3566_v36, %v11615_v32  ;;  %vm3791_vm15 = vcmp.eq.f32.partialorder %v11813_v20, 8.0 }
 0x57f   :  { %v3689_v13 = vadd.f32 %v3673_v47, %v11653_v21  ;;  %v11865_v59 = vpop.f32.mrf.mxu0  ;;  %v3621_v24 = vpop.f32.mrf.mxu1  ;;  %v1065_v26 = vsel %vm16319_vm7, %v1003_v1, 0.0  ;;  %v644_v19 = vsel %vm16320_vm12, %v583_v57, 0.0  ;;  %v11873_v61 = vadd.f32 %v11705_v37, %v3688_v11  ;;  %v16321_v21 = vld [vmem:[#allocation70_spill] sm:$0xff]  ;;  %v16322_v37 = vld [vmem:[#allocation49_spill] sm:$0xff] }
 0x580   :  { %v3674_v53 = vsel %vm3658_vm5, %v3621_v24, 0.0  ;;  %1066 = vadd.xlane.f32.xlu0 %v1065_v26  ;;  %645 = vadd.xlane.f32.xlu1 %v644_v19  ;;  %v16323_v19 = vld [vmem:[#allocation28_spill] sm:$0xff]  ;;  %vm3661_vm8 = vcmp.eq.f32.partialorder %v11674_v16, 1.0  ;;  %vm3662_vm1 = vcmp.eq.f32.partialorder %v11690_v52, 1.0  ;;  %vm3663_vm5 = vcmp.eq.f32.partialorder %v11708_v27, 1.0 }
 0x581   :  { %v3690_v54 = vadd.f32 %v3674_v53, %v11667_v63  ;;  %v3768_v33 = vpop.f32.mrf.mxu0  ;;  %8873 = vmatmul.mubr.msk.bf16.gmra.mxu0 %vm15997_vm13, %v16321_v21  ;;  %v3623_v47 = vpop.f32.mrf.mxu1  ;;  %v11881_v32 = vadd.f32 %v11724_v8, %v3689_v13  ;;  %vm3664_vm7 = vcmp.eq.f32.partialorder %v11727_v29, 1.0  ;;  %vm3665_vm12 = vcmp.eq.f32.partialorder %v11739_v23, 1.0 }
 0x582   :  { %v11883_v1 = vsel %vm3789_vm10, %v3768_v33, 0.0  ;;  %v3675_v57 = vsel %vm3659_vm0, %v3623_v47, 0.0  ;;  %v585_v36 = vpop.permute.xlu1 %584  ;;  %8888 = vmatprep.mubr.msk.bf16.mxu0 %vm15997_vm13, %v16322_v37  ;;  %v373_v63 = vpop.permute.xlu0 %372  ;;  %vm3666_vm0 = vcmp.eq.f32.partialorder %v11752_v18, 1.0 }
 0x583   :  { %v3691_v11 = vadd.f32 %v3675_v57, %v11677_v15  ;;  %v3770_v24 = vpop.f32.mrf.mxu0  ;;  %v3627_v26 = vpop.f32.mrf.mxu1  ;;  %8582 = vmatmul.mubr.msk.bf16.gmra.mxu1 %vm15999_vm14, %v16323_v19  ;;  %v647_v33 = vsel %vm16324_vm11, %v585_v36, 0.0  ;;  %v435_v8 = vsel %vm16318_vm3, %v373_v63, 0.0  ;;  %v11895_v13 = vadd.f32 %v11736_v35, %v3690_v54 }
 0x584   :  { %v11897_v53 = vsel %vm3790_vm6, %v3770_v24, 0.0  ;;  %v3676_v21 = vsel %vm3660_vm2, %v3627_v26, 0.0  ;;  %648 = vadd.xlane.f32.xlu0 %v647_v33  ;;  %436 = vadd.xlane.f32.xlu1 %v435_v8  ;;  %v16326_v8 = vld [vmem:[#allocation72_spill] sm:$0xff]  ;;  %vm3667_vm6 = vcmp.eq.f32.partialorder %v11765_v34, 1.0  ;;  %vm3788_vm11 = vcmp.eq.f32.partialorder %v11765_v34, 8.0 }
 0x585   :  { %v3692_v47 = vadd.f32 %v3676_v21, %v11693_v25  ;;  %v3772_v15 = vpop.f32.mrf.mxu0  ;;  %v3629_v57 = vpop.f32.mrf.mxu1  ;;  %5047 = vmatprep.mubr.bf16.mxu1 %v16091_v3  ;;  %v11904_v36 = vadd.f32 %v11749_v55, %v3691_v11  ;;  %vm3668_vm3 = vcmp.eq.f32.partialorder %v11783_v4, 1.0 }
 0x586   :  { %v11906_v35 = vsel %vm3791_vm15, %v3772_v15, 0.0  ;;  %v3677_v54 = vsel %vm3661_vm8, %v3629_v57, 0.0  ;;  %v375_v37 = vpop.permute.xlu1 %374  ;;  %v16327_v57 = vld [vmem:[#allocation7_spill] sm:$0xff]  ;;  %vm3669_vm8 = vcmp.eq.f32.partialorder %v11795_v50, 1.0 }
 0x587   :  { %v3693_v63 = vadd.f32 %v3677_v54, %v11714_v58  ;;  %v11909_v24 = vpop.f32.mrf.mxu0  ;;  %v3631_v25 = vpop.f32.mrf.mxu1  ;;  %v438_v26 = vsel %vm16325_vm9, %v375_v37, 0.0  ;;  %v11914_v19 = vadd.f32 %v11762_v31, %v3692_v47  ;;  %vm3671_vm9 = vcmp.eq.f32.partialorder %v11831_v40, 1.0 }
 0x588   :  { %v3678_v33 = vsel %vm3662_vm1, %v3631_v25, 0.0  ;;  %439 = vadd.xlane.f32.xlu0 %v438_v26  ;;  %v16328_v25 = vld [vmem:[#allocation32_spill] sm:$0xff]  ;;  %v16329_v26 = vld [vmem:[#allocation30_spill] sm:$0xff]  ;;  %vm3670_vm1 = vcmp.eq.f32.partialorder %v11813_v20, 1.0 }
 0x589   :  { %v3694_v55 = vadd.f32 %v3678_v33, %v11733_v22  ;;  %v11917_v11 = vpop.f32.mrf.mxu0  ;;  %8889 = vmatmul.mubr.msk.bf16.vlgmr.msra.gmra.mxu0 %vm15997_vm13, %v16326_v8  ;;  %v3633_v58 = vpop.f32.mrf.mxu1  ;;  %v11923_v21 = vadd.f32 %v11780_v56, %v3693_v63  ;;  %v16330_v33 = vld [vmem:[#allocation11_spill] sm:$0xff] }
 0x58a   :  { %v3679_v15 = vsel %vm3663_vm5, %v3633_v58, 0.0  ;;  %8892 = vmatprep.mubr.msk.bf16.mxu0 %vm15997_vm13, %v11513_v5  ;;  %vm16331_vm10 = vcmp.lt.s32.totalorder %v16330_v33, 12  ;;  %vm16333_vm2 = vcmp.lt.s32.totalorder %v16330_v33, 8  ;;  %vm16336_vm15 = vcmp.lt.s32.totalorder %v16330_v33, 4 }
 0x58b   :  { %v3695_v31 = vadd.f32 %v3679_v15, %v11746_v42  ;;  %v11928_v47 = vpop.f32.mrf.mxu0  ;;  %v3637_v22 = vpop.f32.mrf.mxu1  ;;  %8583 = vmatmul.mubr.msk.bf16.gmra.mxu1 %vm15999_vm14, %v16327_v57  ;;  %v11934_v54 = vadd.f32 %v11792_v60, %v3694_v55  ;;  %v1077_v8 = vsel %vm16331_vm10, %v16329_v26, %v16328_v25  ;;  %v16334_v25 = vld [vmem:[#allocation5_spill] sm:$0xff]  ;;  %vm16339_vm5 = vmmov %vm16331_vm10 }
 0x58c   :  { %v3680_v37 = vsel %vm3664_vm7, %v3637_v22, 0.0  ;;  %5057 = vmatprep.mubr.bf16.mxu1 %v16091_v3  ;;  %vm3792_vm7 = vcmp.eq.f32.partialorder %v11831_v40, 8.0  ;;  %vm16341_vm10 = vmmov %vm16333_vm2 }
 0x58d   :  { %v3696_v56 = vadd.f32 %v3680_v37, %v11759_v7  ;;  %v11938_v63 = vpop.f32.mrf.mxu0  ;;  %v3639_v5 = vpop.f32.mrf.mxu1  ;;  %v11942_v42 = vadd.f32 %v11810_v10, %v3695_v31 }
 0x58e   :  { %v3681_v60 = vsel %vm3665_vm12, %v3639_v5, 0.0  ;;  %vm3898_vm12 = vcmp.eq.f32.partialorder %v11613_v38, 9.0 }
 0x58f   :  { %v3697_v55 = vadd.f32 %v3681_v60, %v11777_v44  ;;  %v11949_v58 = vpop.f32.mrf.mxu0  ;;  %v3641_v15 = vpop.f32.mrf.mxu1  ;;  %v11953_v7 = vadd.f32 %v11828_v46, %v3696_v56  ;;  %v16332_v44 = vld [vmem:[#allocation29_spill] sm:$0xff]  ;;  %v16335_v60 = vld [vmem:[#allocation31_spill] sm:$0xff] }
 0x590   :  { %v3682_v22 = vsel %vm3666_vm0, %v3641_v15, 0.0  ;;  %v1094_v37 = vsel %vm16333_vm2, %v16332_v44, %v1077_v8  ;;  %vm3899_vm0 = vcmp.eq.f32.partialorder %v11622_v45, 9.0  ;;  %vm16346_vm2 = vmmov %vm16339_vm5  ;;  %v16350_v45 = vld [vmem:[#allocation47_spill] sm:$0xff] }
 0x591   :  { %v3698_v10 = vadd.f32 %v3682_v22, %v11789_v12  ;;  %v11956_v31 = vpop.f32.mrf.mxu0  ;;  %8893 = vmatmul.mubr.msk.bf16.gmra.mxu0 %vm15997_vm13, %v11536_v28  ;;  %v3643_v57 = vpop.f32.mrf.mxu1  ;;  %v11965_v5 = vadd.f32 %v11846_v62, %v3697_v55  ;;  %v3804_v62 = vsel %vm3788_vm11, %v11865_v59, 0.0  ;;  %vm16349_vm11 = vmmov %vm16346_vm2 }
 0x592   :  { %v3683_v46 = vsel %vm3667_vm6, %v3643_v57, 0.0  ;;  %5637 = vmatprep.mubr.bf16.mxu0 %v16091_v3  ;;  %vm16343_vm6 = vmmov %vm16336_vm15 }
 0x593   :  { %v3699_v12 = vadd.f32 %v3683_v46, %v11807_v39  ;;  %v11970_v56 = vpop.f32.mrf.mxu0  ;;  %v3647_v28 = vpop.f32.mrf.mxu1  ;;  %8584 = vmatmul.mubr.msk.bf16.gmra.mxu1 %vm15999_vm14, %v16334_v25  ;;  %v11976_v26 = vadd.f32 %v11860_v17, %v3698_v10  ;;  %v1111_v39 = vsel %vm16336_vm15, %v16335_v60, %v1094_v37  ;;  %vm3900_vm15 = vcmp.eq.f32.partialorder %v11634_v41, 9.0  ;;  %v16356_v41 = vld [vmem:[#allocation41_spill] sm:$0xff] }
 0x594   :  { %v3684_v8 = vsel %vm3668_vm3, %v3647_v28, 0.0  ;;  %8878 = vmatprep.mubr.msk.bf16.mxu1 %vm15997_vm13, %v11624_v51  ;;  %v1383_v51 = vld [vmem:[%s15869_s5 + $0x40] sm:$0xff]  ;;  %vm16351_vm3 = vmmov %vm16341_vm10 }
 0x595   :  { %v3700_v55 = vadd.f32 %v3684_v8, %v11825_v9  ;;  %v11985_v15 = vpop.f32.mrf.mxu0  ;;  %1151 = vrot.lane.b32.xlu1 %v1111_v39, %s9232_s28  ;;  %v3649_v22 = vpop.f32.mrf.mxu1  ;;  %v11989_v17 = vadd.f32 %v3804_v62, %v3699_v12  ;;  %v16338_v62 = vld [vmem:[#allocation6_spill] sm:$0xff] }
 0x596   :  { %v3685_v59 = vsel %vm3669_vm8, %v3649_v22, 0.0  ;;  %v16340_v22 = vld [vmem:[#allocation37_spill] sm:$0xff]  ;;  %vm16353_vm8 = vmmov %vm16351_vm3 }
 0x597   :  { %v3701_v10 = vadd.f32 %v3685_v59, %v11843_v2  ;;  %v11995_v57 = vpop.f32.mrf.mxu0  ;;  %v3651_v44 = vpop.f32.mrf.mxu1  ;;  %v11999_v9 = vadd.f32 %v11883_v1, %v3700_v55  ;;  %v16337_v2 = vld [vmem:[#allocation35_spill] sm:$0xff]  ;;  %v1384_v1 = vld [vmem:[%s15869_s5 + $0x48] sm:$0xff] }
 0x598   :  { %v3686_v37 = vsel %vm3670_vm1, %v3651_v44, 0.0  ;;  %v1078_v8 = vsel %vm16339_vm5, %v16338_v62, %v16337_v2  ;;  %v16348_v2 = vld [vmem:[#allocation33_spill] sm:$0xff]  ;;  %vm16355_vm1 = vmmov %vm16343_vm6 }
 0x599   :  { %v3702_v46 = vadd.f32 %v3686_v37, %v11856_v0  ;;  %v12002_v12 = vpop.f32.mrf.mxu0  ;;  %1552 = vperm.xlu1 %8963, %v1383_v51   ;;  %v3653_v28 = vpop.f32.mrf.mxu1  ;;  %v12006_v25 = vadd.f32 %v11897_v53, %v3701_v10  ;;  %v1095_v59 = vsel %vm16341_vm10, %v16340_v22, %v1078_v8  ;;  %v3808_v51 = vsel %vm3792_vm7, %v11909_v24, 0.0  ;;  %v16344_v24 = vld [vmem:[#allocation46_spill] sm:$0xff]  ;;  %vm16357_vm5 = vmmov %vm16355_vm1 }
 0x59a   :  { %v3687_v60 = vsel %vm3671_vm9, %v3653_v28, 0.0  ;;  %vm3901_vm9 = vcmp.eq.f32.partialorder %v11646_v43, 9.0  ;;  %vm16360_vm7 = vmmov %vm16346_vm2 }
 0x59b   :  { %v3703_v0 = vadd.f32 %v3687_v60, %v11870_v6  ;;  %v12017_v39 = vpop.f32.mrf.mxu0  ;;  %v3859_v55 = vpop.f32.mrf.mxu1  ;;  %8879 = vmatmul.mubr.msk.bf16.vlgmr.msra.gmra.mxu1 %vm15997_vm13, %v11650_v30  ;;  %v12023_v53 = vadd.f32 %v11906_v35, %v3702_v46  ;;  %v16342_v35 = vld [vmem:[#allocation40_spill] sm:$0xff]  ;;  %v16345_v46 = vld [vmem:[#allocation43_spill] sm:$0xff]  ;;  %vm16362_vm10 = vmmov %vm16351_vm3 }
 0x59c   :  { %v3914_v10 = vsel %vm3898_vm12, %v3859_v55, 0.0  ;;  %8882 = vmatprep.mubr.msk.bf16.mxu1 %vm15997_vm13, %v11769_v48  ;;  %v1112_v44 = vsel %vm16343_vm6, %v16342_v35, %v1095_v59  ;;  %v1080_v48 = vsel %vm16346_vm2, %v16345_v46, %v16344_v24  ;;  %v16352_v55 = vld [vmem:[#allocation38_spill] sm:$0xff]  ;;  %v16358_v24 = vld [vmem:[#allocation48_spill] sm:$0xff]  ;;  %v16359_v46 = vld [vmem:[#allocation45_spill] sm:$0xff]  ;;  %vm3902_vm12 = vcmp.eq.f32.partialorder %v11663_v14, 9.0 }
 0x59d   :  { %v12032_v6 = vadd.f32 %v3914_v10, %v11873_v61  ;;  %v12034_v38 = vpop.f32.mrf.mxu0  ;;  %1556 = vperm.xlu1 %8963, %v1384_v1   ;;  %v3861_v30 = vpop.f32.mrf.mxu1  ;;  %v12040_v37 = vadd.f32 %v3808_v51, %v3703_v0  ;;  %v16347_v61 = vld [vmem:[#allocation36_spill] sm:$0xff]  ;;  %v1097_v8 = vsel %vm16351_vm3, %v16350_v45, %v1080_v48  ;;  %v16354_v51 = vld [vmem:[#allocation50_spill] sm:$0xff]  ;;  %v1081_v48 = vsel %vm16360_vm7, %v16359_v46, %v16358_v24  ;;  %vm16366_vm6 = vmmov %vm16346_vm2 }
 0x59e   :  { %v3915_v28 = vsel %vm3899_vm0, %v3861_v30, 0.0  ;;  %1153 = vrot.lane.b32.xlu0 %v1112_v44, %s9232_s28  ;;  %v1079_v62 = vsel %vm16349_vm11, %v16348_v2, %v16347_v61  ;;  %v1114_v10 = vsel %vm16355_vm1, %v16354_v51, %v1097_v8  ;;  %v16361_v8 = vld [vmem:[#allocation53_spill] sm:$0xff]  ;;  %vm3903_vm0 = vcmp.eq.f32.partialorder %v11674_v16, 9.0  ;;  %v16365_v51 = vld [vmem:[#allocation54_spill] sm:$0xff]  ;;  %vm16368_vm2 = vmmov %vm16351_vm3 }
 0x59f   :  { %v12055_v60 = vadd.f32 %v3915_v28, %v11881_v32  ;;  %v12057_v1 = vpop.f32.mrf.mxu0  ;;  %v3863_v0 = vpop.f32.mrf.mxu1  ;;  %v1096_v22 = vsel %vm16353_vm8, %v16352_v55, %v1079_v62  ;;  %v1385_v62 = vld [vmem:[%s15869_s5 + $0x50] sm:$0xff]  ;;  %vm3904_vm11 = vcmp.eq.f32.partialorder %v11690_v52, 9.0  ;;  %vm16371_vm3 = vmmov %vm16355_vm1 }
 0x5a0   :  { %v3916_v59 = vsel %vm3900_vm15, %v3863_v0, 0.0  ;;  %v1113_v44 = vsel %vm16357_vm5, %v16356_v41, %v1096_v22  ;;  %v1098_v0 = vsel %vm16362_vm10, %v16361_v8, %v1081_v48  ;;  %v16367_v41 = vld [vmem:[#allocation58_spill] sm:$0xff]  ;;  %vm16373_vm15 = vmmov %vm16355_vm1  ;;  %vm3905_vm1 = vcmp.eq.f32.partialorder %v11708_v27, 9.0 }
 0x5a1   :  { %v12067_v30 = vadd.f32 %v3916_v59, %v11895_v13  ;;  %v12069_v35 = vpop.f32.mrf.mxu0  ;;  %1157 = vrot.lane.b32.xlu1 %v1114_v10, %s9232_s28  ;;  %v3865_v32 = vpop.f32.mrf.mxu1  ;;  %v1386_v13 = vld [vmem:[%s15869_s5 + $0x58] sm:$0xff]  ;;  %v16364_v59 = vld [vmem:[#allocation55_spill] sm:$0xff]  ;;  %vm3906_vm5 = vcmp.eq.f32.partialorder %v11727_v29, 9.0  ;;  %v1388_v27 = vld [vmem:[%s15869_s5 + $0x68] sm:$0xff]  ;;  %vm3908_vm10 = vcmp.eq.f32.partialorder %v11752_v18, 9.0 }
 0x5a2   :  { %v3917_v28 = vsel %vm3901_vm9, %v3865_v32, 0.0  ;;  %1155 = vrot.lane.b32.xlu0 %v1113_v44, %s9232_s28  ;;  %v1082_v10 = vsel %vm16366_vm6, %v16365_v51, %v16364_v59  ;;  %vm3909_vm6 = vcmp.eq.f32.partialorder %v11765_v34, 9.0 }
 0x5a3   :  { %v12085_v61 = vadd.f32 %v3917_v28, %v11904_v36  ;;  %v12087_v43 = vpop.f32.mrf.mxu0  ;;  %v3869_v2 = vpop.f32.mrf.mxu1  ;;  %8883 = vmatmul.mubr.msk.bf16.gmra.mxu1 %vm15997_vm13, %v11797_v49  ;;  %v16363_v36 = vld [vmem:[#allocation42_spill] sm:$0xff]  ;;  %v16370_v28 = vld [vmem:[#allocation56_spill] sm:$0xff] }
 0x5a4   :  { %v3918_v45 = vsel %vm3902_vm12, %v3869_v2, 0.0  ;;  %v12100_v55 = vsub.f32 %v16363_v36, %v11917_v11  ;;  %v1099_v11 = vsel %vm16368_vm2, %v16367_v41, %v1082_v10  ;;  %v16372_v2 = vld [vmem:[#allocation60_spill] sm:$0xff]  ;;  %vm3907_vm12 = vcmp.eq.f32.partialorder %v11739_v23, 9.0 }
 0x5a5   :  { %v12103_v22 = vadd.f32 %v3918_v45, %v11914_v19  ;;  %v12105_v14 = vpop.f32.mrf.mxu0  ;;  %1564 = vperm.xlu1 %8963, %v1386_v13   ;;  %v3871_v49 = vpop.f32.mrf.mxu1  ;;  %v16369_v19 = vld [vmem:[#allocation44_spill] sm:$0xff]  ;;  %v1115_v13 = vsel %vm16371_vm3, %v16370_v28, %v1098_v0  ;;  %v12180_v23 = vsub.f32 %v16363_v36, %v11985_v15 }
 0x5a6   :  { %v3919_v32 = vsel %vm3903_vm0, %v3871_v49, 0.0  ;;  %1560 = vperm.xlu0 %8964, %v1385_v62   ;;  %v12117_v44 = vsub.f32 %v16369_v19, %v11928_v47  ;;  %v1116_v62 = vsel %vm16373_vm15, %v16372_v2, %v1099_v11  ;;  %v12133_v47 = vsub.f32 %v16363_v36, %v11938_v63  ;;  %v1387_v63 = vld [vmem:[%s15869_s5 + $0x60] sm:$0xff] }
 0x5a7   :  { %v12120_v24 = vadd.f32 %v3919_v32, %v11923_v21  ;;  %v12122_v46 = vpop.f32.mrf.mxu0  ;;  %v3873_v16 = vpop.f32.mrf.mxu1  ;;  %vm4241_vm8 = vcmp.eq.f32.partialorder %v12100_v55, 1.0  ;;  %v12159_v32 = vsub.f32 %v16363_v36, %v11956_v31  ;;  %vm4247_vm3 = vcmp.eq.f32.partialorder %v12180_v23, 1.0 }
 0x5a8   :  { %v3920_v48 = vsel %vm3904_vm11, %v3873_v16, 0.0  ;;  %vm4242_vm9 = vcmp.eq.f32.partialorder %v12117_v44, 1.0  ;;  %vm4243_vm7 = vcmp.eq.f32.partialorder %v12133_v47, 1.0  ;;  %vm3910_vm11 = vcmp.eq.f32.partialorder %v11783_v4, 9.0 }
 0x5a9   :  { %v12136_v21 = vadd.f32 %v3920_v48, %v11934_v54  ;;  %v4202_v45 = vpop.f32.mrf.mxu0  ;;  %1159 = vrot.lane.b32.xlu1 %v1115_v13, %s9232_s28  ;;  %v3875_v52 = vpop.f32.mrf.mxu1  ;;  %v12170_v48 = vsub.f32 %v16369_v19, %v11970_v56  ;;  %vm4245_vm0 = vcmp.eq.f32.partialorder %v12159_v32, 1.0  ;;  %vm3911_vm15 = vcmp.eq.f32.partialorder %v11795_v50, 9.0 }
 0x5aa   :  { %v12141_v8 = vsel %vm4241_vm8, %v4202_v45, 0.0  ;;  %v3921_v0 = vsel %vm3905_vm1, %v3875_v52, 0.0  ;;  %1161 = vrot.lane.b32.xlu0 %v1116_v62, %s9232_s28  ;;  %v12209_v4 = vsub.f32 %v16369_v19, %v12017_v39  ;;  %vm3912_vm8 = vcmp.eq.f32.partialorder %v11813_v20, 9.0 }
 0x5ab   :  { %v12148_v54 = vadd.f32 %v3921_v0, %v11942_v42  ;;  %v4204_v49 = vpop.f32.mrf.mxu0  ;;  %v3879_v59 = vpop.f32.mrf.mxu1  ;;  %vm4246_vm2 = vcmp.eq.f32.partialorder %v12170_v48, 1.0 }
 0x5ac   :  { %v12155_v51 = vsel %vm4242_vm9, %v4204_v49, 0.0  ;;  %v3922_v10 = vsel %vm3906_vm5, %v3879_v59, 0.0  ;;  %vm3913_vm9 = vcmp.eq.f32.partialorder %v11831_v40, 9.0  ;;  %vm4250_vm5 = vcmp.eq.f32.partialorder %v12209_v4, 1.0 }
 0x5ad   :  { %16374 = vst [vmem:[#allocation51_spill] sm:$0xff] %v12148_v54  ;;  %v12162_v42 = vadd.f32 %v3922_v10, %v11953_v7  ;;  %v4206_v41 = vpop.f32.mrf.mxu0  ;;  %v3881_v11 = vpop.f32.mrf.mxu1  ;;  %1568 = vperm.xlu1 %8963, %v1387_v63   ;;  %v12198_v63 = vsub.f32 %v16363_v36, %v12002_v12 }
 0x5ae   :  { %v12166_v29 = vsel %vm4243_vm7, %v4206_v41, 0.0  ;;  %v3923_v16 = vsel %vm3907_vm12, %v3881_v11, 0.0  ;;  %1572 = vperm.xlu0 %8964, %v1388_v27   ;;  %v12219_v11 = vsub.f32 %v16363_v36, %v12034_v38  ;;  %vm4120_vm7 = vcmp.eq.f32.partialorder %v12100_v55, 0.0 }
 0x5af   :  { %v12173_v31 = vadd.f32 %v3923_v16, %v11965_v5  ;;  %v12175_v7 = vpop.f32.mrf.mxu0  ;;  %v3883_v28 = vpop.f32.mrf.mxu1  ;;  %vm4249_vm1 = vcmp.eq.f32.partialorder %v12198_v63, 1.0 }
 0x5b0   :  { %v3924_v13 = vsel %vm3908_vm10, %v3883_v28, 0.0  ;;  %vm4251_vm12 = vcmp.eq.f32.partialorder %v12219_v11, 1.0  ;;  %vm4121_vm10 = vcmp.eq.f32.partialorder %v12117_v44, 0.0 }
 0x5b1   :  { %v12183_v2 = vadd.f32 %v3924_v13, %v11976_v26  ;;  %v4212_v62 = vpop.f32.mrf.mxu0  ;;  %v3885_v56 = vpop.f32.mrf.mxu1 }
 0x5b2   :  { %v12187_v5 = vsel %vm4245_vm0, %v4212_v62, 0.0  ;;  %v3925_v45 = vsel %vm3909_vm6, %v3885_v56, 0.0  ;;  %v12237_v56 = vsub.f32 %v16363_v36, %v12069_v35  ;;  %vm4122_vm0 = vcmp.eq.f32.partialorder %v12133_v47, 0.0 }
 0x5b3   :  { %v12190_v52 = vadd.f32 %v3925_v45, %v11989_v17  ;;  %v4214_v18 = vpop.f32.mrf.mxu0  ;;  %v3889_v15 = vpop.f32.mrf.mxu1 }
 0x5b4   :  { %v12194_v26 = vsel %vm4246_vm2, %v4214_v18, 0.0  ;;  %v3926_v0 = vsel %vm3910_vm11, %v3889_v15, 0.0  ;;  %vm4253_vm6 = vcmp.eq.f32.partialorder %v12237_v56, 1.0  ;;  %vm4124_vm11 = vcmp.eq.f32.partialorder %v12159_v32, 0.0 }
 0x5b5   :  { %16375 = vst [vmem:[#allocation13_spill] sm:$0xff] %v12190_v52  ;;  %v12201_v34 = vadd.f32 %v3926_v0, %v11999_v9  ;;  %v4216_v49 = vpop.f32.mrf.mxu0  ;;  %v3891_v17 = vpop.f32.mrf.mxu1  ;;  %v12246_v0 = vsub.f32 %v16369_v19, %v12087_v43 }
 0x5b6   :  { %v12205_v59 = vsel %vm4247_vm3, %v4216_v49, 0.0  ;;  %v3927_v27 = vsel %vm3911_vm15, %v3891_v17, 0.0  ;;  %vm4125_vm15 = vcmp.eq.f32.partialorder %v12170_v48, 0.0 }
 0x5b7   :  { %v12212_v10 = vadd.f32 %v3927_v27, %v12006_v25  ;;  %v12214_v12 = vpop.f32.mrf.mxu0  ;;  %v3893_v9 = vpop.f32.mrf.mxu1  ;;  %vm4254_vm2 = vcmp.eq.f32.partialorder %v12246_v0, 1.0 }
 0x5b8   :  { %v3928_v41 = vsel %vm3912_vm8, %v3893_v9, 0.0  ;;  %v12257_v9 = vsub.f32 %v16363_v36, %v12105_v14  ;;  %vm4126_vm8 = vcmp.eq.f32.partialorder %v12180_v23, 0.0 }
 0x5b9   :  { %v12222_v50 = vadd.f32 %v3928_v41, %v12023_v53  ;;  %v4222_v16 = vpop.f32.mrf.mxu0  ;;  %v3895_v39 = vpop.f32.mrf.mxu1 }
 0x5ba   :  { %v12226_v25 = vsel %vm4249_vm1, %v4222_v16, 0.0  ;;  %v3929_v28 = vsel %vm3913_vm9, %v3895_v39, 0.0  ;;  %vm4255_vm3 = vcmp.eq.f32.partialorder %v12257_v9, 1.0  ;;  %vm4483_vm1 = vcmp.eq.f32.partialorder %v12100_v55, 9.0 }
 0x5bb   :  { %v12229_v13 = vadd.f32 %v3929_v28, %v12040_v37  ;;  %v4224_v20 = vpop.f32.mrf.mxu0  ;;  %v4081_v38 = vpop.f32.mrf.mxu1  ;;  %vm4484_vm9 = vcmp.eq.f32.partialorder %v12117_v44, 9.0 }
 0x5bc   :  { %v12233_v53 = vsel %vm4250_vm5, %v4224_v20, 0.0  ;;  %v4136_v62 = vsel %vm4120_vm7, %v4081_v38, 0.0  ;;  %vm4128_vm5 = vcmp.eq.f32.partialorder %v12198_v63, 0.0  ;;  %vm4485_vm7 = vcmp.eq.f32.partialorder %v12133_v47, 9.0 }
 0x5bd   :  { %16376 = vst [vmem:[#allocation57_spill] sm:$0xff] %v12229_v13  ;;  %v4152_v40 = vadd.f32 %v4136_v62, %v12032_v6  ;;  %v4226_v45 = vpop.f32.mrf.mxu0  ;;  %v4083_v37 = vpop.f32.mrf.mxu1 }
 0x5be   :  { %v12242_v18 = vsel %vm4251_vm12, %v4226_v45, 0.0  ;;  %v4137_v15 = vsel %vm4121_vm10, %v4083_v37, 0.0  ;;  %vm4129_vm12 = vcmp.eq.f32.partialorder %v12209_v4, 0.0  ;;  %vm16378_vm10 = vcmp.lt.s32.totalorder %v16330_v33, 12 }
 0x5bf   :  { %v4153_v49 = vadd.f32 %v4137_v15, %v12055_v60  ;;  %v12249_v17 = vpop.f32.mrf.mxu0  ;;  %v4085_v35 = vpop.f32.mrf.mxu1  ;;  %v12253_v6 = vadd.f32 %v12141_v8, %v4152_v40 }
 0x5c0   :  { %v4138_v27 = vsel %vm4122_vm0, %v4085_v35, 0.0  ;;  %vm4130_vm0 = vcmp.eq.f32.partialorder %v12219_v11, 0.0 }
 0x5c1   :  { %v4154_v41 = vadd.f32 %v4138_v27, %v12067_v30  ;;  %v4232_v16 = vpop.f32.mrf.mxu0  ;;  %v12262_v60 = vadd.f32 %v12155_v51, %v4153_v49  ;;  %v12266_v39 = vpop.f32.mrf.mxu1 }
 0x5c2   :  { %v12264_v43 = vsel %vm4253_vm6, %v4232_v16, 0.0  ;;  %vm16379_vm6 = vcmp.lt.s32.totalorder %v16330_v33, 8 }
 0x5c3   :  { %v4234_v28 = vpop.f32.mrf.mxu0  ;;  %v12270_v8 = vadd.f32 %v12166_v29, %v4154_v41  ;;  %v4091_v20 = vpop.f32.mrf.mxu1 }
 0x5c4   :  { %v12272_v14 = vsel %vm4254_vm2, %v4234_v28, 0.0  ;;  %v837_v30 = vpop.xlane.xlu0 %836  ;;  %v4140_v38 = vsel %vm4124_vm11, %v4091_v20, 0.0  ;;  %v840_v41 = vpop.xlane.xlu1 %839  ;;  %vm4487_vm2 = vcmp.eq.f32.partialorder %v12159_v32, 9.0  ;;  %vm16380_vm11 = vcmp.lt.s32.totalorder %v16330_v33, 4 }
 0x5c5   :  { %v4236_v62 = vpop.f32.mrf.mxu0  ;;  %v4156_v51 = vadd.f32 %v4140_v38, %v12103_v22  ;;  %v4093_v45 = vpop.f32.mrf.mxu1 }
 0x5c6   :  { %v12277_v40 = vsel %vm4255_vm3, %v4236_v62, 0.0  ;;  %v4141_v37 = vsel %vm4125_vm15, %v4093_v45, 0.0  ;;  %vm4488_vm3 = vcmp.eq.f32.partialorder %v12170_v48, 9.0  ;;  %vm4132_vm15 = vcmp.eq.f32.partialorder %v12237_v56, 0.0 }
 0x5c7   :  { %v12280_v29 = vpop.f32.mrf.mxu0  ;;  %v4157_v15 = vadd.f32 %v4141_v37, %v12120_v24  ;;  %v4095_v49 = vpop.f32.mrf.mxu1  ;;  %v12285_v27 = vadd.f32 %v12187_v5, %v4156_v51 }
 0x5c8   :  { %v1046_v35 = vpop.xlane.xlu0 %1045  ;;  %v4142_v16 = vsel %vm4126_vm8, %v4095_v49, 0.0  ;;  %vm16381_vm8 = vmmov %vm16378_vm10 }
 0x5c9   :  { %v4444_v22 = vpop.f32.mrf.mxu0  ;;  %v4158_v28 = vadd.f32 %v4142_v16, %v12136_v21  ;;  %v12291_v38 = vpop.f32.mrf.mxu1  ;;  %v12294_v24 = vadd.f32 %v12194_v26, %v4157_v15  ;;  %v1239_v52 = vsel %vm16378_vm10, %v837_v30, %v1046_v35  ;;  %vm4491_vm10 = vcmp.eq.f32.partialorder %v12198_v63, 9.0 }
 0x5ca   :  { %v12289_v20 = vsel %vm4483_vm1, %v4444_v22, 0.0  ;;  %vm4489_vm1 = vcmp.eq.f32.partialorder %v12180_v23, 9.0 }
 0x5cb   :  { %v4446_v62 = vpop.f32.mrf.mxu0  ;;  %v4101_v5 = vpop.f32.mrf.mxu1  ;;  %v12301_v37 = vadd.f32 %v12205_v59, %v4158_v28 }
 0x5cc   :  { %v12297_v45 = vsel %vm4484_vm9, %v4446_v62, 0.0  ;;  %v1049_v51 = vpop.xlane.xlu0 %1048  ;;  %v4144_v21 = vsel %vm4128_vm5, %v4101_v5, 0.0  ;;  %vm16382_vm9 = vmmov %vm16379_vm6  ;;  %vm4133_vm5 = vcmp.eq.f32.partialorder %v12246_v0, 0.0 }
 0x5cd   :  { %v4448_v49 = vpop.f32.mrf.mxu0  ;;  %v628_v16 = vpop.xlane.xlu1 %627  ;;  %v4160_v26 = vadd.f32 %v4144_v21, %v12162_v42 }
 0x5ce   :  { %v12305_v15 = vsel %vm4485_vm7, %v4448_v49, 0.0  ;;  %v4103_v22 = vpop.f32.mrf.mxu1  ;;  %v1255_v42 = vsel %vm16379_vm6, %v628_v16, %v1239_v52  ;;  %vm16383_vm7 = vmmov %vm16380_vm11  ;;  %vm4362_vm6 = vcmp.eq.f32.partialorder %v12100_v55, 8.0 }
 0x5cf   :  { %v4145_v62 = vsel %vm4129_vm12, %v4103_v22, 0.0  ;;  %v12308_v13 = vpop.f32.mrf.mxu0  ;;  %v12315_v5 = vadd.f32 %v12226_v25, %v4160_v26  ;;  %vm4134_vm12 = vcmp.eq.f32.partialorder %v12257_v9, 0.0 }
 0x5d0   :  { %16377 = vst [vmem:[#allocation14_spill] sm:$0xff] %v12308_v13  ;;  %v4161_v59 = vadd.f32 %v4145_v62, %v12173_v31  ;;  %v4105_v28 = vpop.f32.mrf.mxu1  ;;  %v1240_v62 = vsel %vm16381_vm8, %v840_v41, %v1049_v51 }
 0x5d1   :  { %v4146_v21 = vsel %vm4130_vm0, %v4105_v28, 0.0  ;;  %v4454_v49 = vpop.f32.mrf.mxu0  ;;  %v419_v22 = vpop.xlane.xlu1 %418  ;;  %vm4492_vm0 = vcmp.eq.f32.partialorder %v12209_v4, 9.0 }
 0x5d2   :  { %v4162_v13 = vadd.f32 %v4146_v21, %v12183_v2  ;;  %v12321_v54 = vsel %vm4487_vm2, %v4454_v49, 0.0  ;;  %v1271_v31 = vsel %vm16380_vm11, %v419_v22, %v1255_v42  ;;  %v631_v30 = vpop.xlane.xlu0 %630  ;;  %v12325_v35 = vpop.f32.mrf.mxu1  ;;  %v12328_v25 = vadd.f32 %v12233_v53, %v4161_v59 }
 0x5d3   :  { %9161 = vrcp.f32 %v1271_v31  ;;  %v4456_v52 = vpop.f32.mrf.mxu0  ;;  %v1256_v53 = vsel %vm16382_vm9, %v631_v30, %v1240_v62  ;;  %vm4493_vm2 = vcmp.eq.f32.partialorder %v12219_v11, 9.0  ;;  %vm4363_vm11 = vcmp.eq.f32.partialorder %v12117_v44, 8.0 }
 0x5d4   :  { %v12331_v16 = vsel %vm4488_vm3, %v4456_v52, 0.0  ;;  %v4111_v26 = vpop.f32.mrf.mxu1  ;;  %v12335_v2 = vadd.f32 %v12242_v18, %v4162_v13  ;;  %vm4364_vm3 = vcmp.eq.f32.partialorder %v12133_v47, 8.0 }
 0x5d5   :  { %v4148_v28 = vsel %vm4132_vm15, %v4111_v26, 0.0  ;;  %v4458_v42 = vpop.f32.mrf.mxu0  ;;  %vm16388_vm15 = vmmov %vm16381_vm8  ;;  %vm4495_vm8 = vcmp.eq.f32.partialorder %v12237_v56, 9.0 }
 0x5d6   :  { %v4164_v59 = vadd.f32 %v4148_v28, %v12201_v34  ;;  %v12343_v21 = vsel %vm4489_vm1, %v4458_v42, 0.0  ;;  %v422_v49 = vpop.xlane.xlu0 %421  ;;  %v4113_v22 = vpop.f32.mrf.mxu1  ;;  %vm16390_vm1 = vmmov %vm16382_vm9  ;;  %vm4496_vm9 = vcmp.eq.f32.partialorder %v12246_v0, 9.0 }
 0x5d7   :  { %v1272_v13 = vsel %vm16383_vm7, %v422_v49, %v1256_v53  ;;  %v4149_v18 = vsel %vm4133_vm5, %v4113_v22, 0.0  ;;  %v12348_v41 = vpop.f32.mrf.mxu0  ;;  %vm16392_vm5 = vmmov %vm16383_vm7 }
 0x5d8   :  { %16384 = vst [vmem:[#allocation15_spill] sm:$0xff] %v12348_v41  ;;  %9163 = vrcp.f32 %v1272_v13  ;;  %v4165_v51 = vadd.f32 %v4149_v18, %v12212_v10  ;;  %v4115_v31 = vpop.f32.mrf.mxu1  ;;  %v12353_v34 = vadd.f32 %v12264_v43, %v4164_v59  ;;  %vm16393_vm7 = vmmov %vm16388_vm15 }
 0x5d9   :  { %v4150_v30 = vsel %vm4134_vm12, %v4115_v31, 0.0  ;;  %v4464_v52 = vpop.f32.mrf.mxu0  ;;  %v843_v26 = vpop.xlane.xlu1 %842  ;;  %vm4366_vm12 = vcmp.eq.f32.partialorder %v12159_v32, 8.0 }
 0x5da   :  { %v4166_v62 = vadd.f32 %v4150_v30, %v12222_v50  ;;  %v12357_v28 = vsel %vm4491_vm10, %v4464_v52, 0.0  ;;  %v12359_v42 = vpop.f32.mrf.mxu1  ;;  %v12362_v53 = vadd.f32 %v12272_v14, %v4165_v51  ;;  %vm16394_vm10 = vmmov %vm16390_vm1 }
 0x5db   :  { %v4466_v10 = vpop.f32.mrf.mxu0 }
 0x5dc   :  { %v12365_v49 = vsel %vm4492_vm0, %v4466_v10, 0.0  ;;  %v4323_v43 = vpop.f32.mrf.mxu1  ;;  %v12369_v59 = vadd.f32 %v12277_v40, %v4166_v62  ;;  %vm4497_vm0 = vcmp.eq.f32.partialorder %v12257_v9, 9.0 }
 0x5dd   :  { %v4378_v22 = vsel %vm4362_vm6, %v4323_v43, 0.0  ;;  %v4468_v50 = vpop.f32.mrf.mxu0  ;;  %v1052_v13 = vpop.xlane.xlu1 %1051  ;;  %v16386_v43 = vld [vmem:[#allocation62_spill] sm:$0xff]  ;;  %vm16395_vm6 = vmmov %vm16392_vm5 }
 0x5de   :  { %v4394_v18 = vadd.f32 %v4378_v22, %v12253_v6  ;;  %v12373_v14 = vsel %vm4493_vm2, %v4468_v50, 0.0  ;;  %v846_v51 = vpop.xlane.xlu0 %845  ;;  %v4325_v31 = vpop.f32.mrf.mxu1  ;;  %v16387_v6 = vld [vmem:[#allocation59_spill] sm:$0xff]  ;;  %vm4367_vm2 = vcmp.eq.f32.partialorder %v12170_v48, 8.0 }
 0x5df   :  { %v4379_v30 = vsel %vm4363_vm11, %v4325_v31, 0.0  ;;  %v12376_v52 = vpop.f32.mrf.mxu0  ;;  %v1083_v22 = vsel %vm16388_vm15, %v16387_v6, %v16386_v43  ;;  %v16389_v31 = vld [vmem:[#allocation64_spill] sm:$0xff]  ;;  %v16391_v6 = vld [vmem:[#allocation66_spill] sm:$0xff]  ;;  %vm16398_vm11 = vmmov %vm16393_vm7  ;;  %vm4368_vm15 = vcmp.eq.f32.partialorder %v12180_v23, 8.0 }
 0x5e0   :  { %16385 = vst [vmem:[#allocation16_spill] sm:$0xff] %v12376_v52  ;;  %v9162_v55 = vpop.eup %9161  ;;  %v12379_v40 = vadd.f32 %v12289_v20, %v4394_v18  ;;  %v4395_v62 = vadd.f32 %v4379_v30, %v12262_v60  ;;  %v4327_v10 = vpop.f32.mrf.mxu1  ;;  %v1100_v20 = vsel %vm16390_vm1, %v16389_v31, %v1083_v22  ;;  %v1241_v22 = vsel %vm16393_vm7, %v843_v26, %v1052_v13 }
 0x5e1   :  { %v4380_v50 = vsel %vm4364_vm3, %v4327_v10, 0.0  ;;  %v4474_v41 = vpop.f32.mrf.mxu0  ;;  %v634_v44 = vpop.xlane.xlu1 %633  ;;  %1327 = vrot.lane.b32.xlu1 %v9162_v55, %s9232_s28  ;;  %v1117_v55 = vsel %vm16392_vm5, %v16391_v6, %v1100_v20  ;;  %v16397_v6 = vld [vmem:[#allocation61_spill] sm:$0xff]  ;;  %vm16401_vm3 = vmmov %vm16390_vm1 }
 0x5e2   :  { %v12393_v60 = vadd.f32 %v12297_v45, %v4395_v62  ;;  %v4396_v47 = vadd.f32 %v4380_v50, %v12270_v8  ;;  %v12396_v18 = vsel %vm4495_vm8, %v4474_v41, 0.0  ;;  %v1055_v30 = vpop.xlane.xlu0 %1054  ;;  %v12398_v43 = vpop.f32.mrf.mxu1  ;;  %v1257_v50 = vsel %vm16394_vm10, %v634_v44, %v1241_v22  ;;  %v1389_v44 = vld [vmem:[%s15869_s5 + $0x70] sm:$0xff]  ;;  %v16400_v22 = vld [vmem:[#allocation65_spill] sm:$0xff]  ;;  %vm16402_vm8 = vmmov %vm16393_vm7 }
 0x5e3   :  { %v4476_v10 = vpop.f32.mrf.mxu0  ;;  %vm16404_vm1 = vmmov %vm16392_vm5  ;;  %vm4370_vm7 = vcmp.eq.f32.partialorder %v12198_v63, 8.0  ;;  %vm4372_vm10 = vcmp.eq.f32.partialorder %v12219_v11, 8.0 }
 0x5e4   :  { %v12407_v45 = vadd.f32 %v12305_v15, %v4396_v47  ;;  %v12409_v62 = vsel %vm4496_vm9, %v4476_v10, 0.0  ;;  %v4333_v8 = vpop.f32.mrf.mxu1  ;;  %v16396_v10 = vld [vmem:[#allocation63_spill] sm:$0xff]  ;;  %vm16405_vm9 = vmmov %vm16401_vm3 }
 0x5e5   :  { %v9164_v41 = vpop.eup %9163  ;;  %v4382_v31 = vsel %vm4366_vm12, %v4333_v8, 0.0  ;;  %v4478_v52 = vpop.f32.mrf.mxu0  ;;  %1163 = vrot.lane.b32.xlu1 %v1117_v55, %s9232_s28  ;;  %vm16406_vm5 = vmmov %vm16404_vm1  ;;  %vm4371_vm12 = vcmp.eq.f32.partialorder %v12209_v4, 8.0 }
 0x5e6   :  { %v425_v20 = vpop.xlane.xlu1 %424  ;;  %v4398_v26 = vadd.f32 %v4382_v31, %v12285_v27  ;;  %v12417_v15 = vsel %vm4497_vm0, %v4478_v52, 0.0  ;;  %1329 = vrot.lane.b32.xlu0 %v9164_v41, %s9232_s28  ;;  %v637_v32 = vpop.xlane.xlu0 %636  ;;  %v1084_v27 = vsel %vm16398_vm11, %v16397_v6, %v16396_v10  ;;  %v1242_v31 = vsel %vm16402_vm8, %v846_v51, %v1055_v30  ;;  %v1390_v6 = vld [vmem:[%s15869_s5 + $0x78] sm:$0xff] }
 0x5e7   :  { %v1273_v13 = vsel %vm16395_vm6, %v425_v20, %v1257_v50  ;;  %v4335_v47 = vpop.f32.mrf.mxu1  ;;  %v12430_v55 = vpop.f32.mrf.mxu0  ;;  %v1101_v8 = vsel %vm16401_vm3, %v16400_v22, %v1084_v27  ;;  %vm4374_vm0 = vcmp.eq.f32.partialorder %v12237_v56, 8.0  ;;  %vm4375_vm6 = vcmp.eq.f32.partialorder %v12246_v0, 8.0 }
 0x5e8   :  { %9165 = vrcp.f32 %v1273_v13  ;;  %v4383_v52 = vsel %vm4367_vm2, %v4335_v47, 0.0  ;;  %16399 = vst [vmem:[#allocation8_spill] sm:$0xff] %v12430_v55  ;;  %v12436_v41 = vadd.f32 %v12321_v54, %v4398_v26  ;;  %v16403_v47 = vld [vmem:[#allocation67_spill] sm:$0xff]  ;;  %v1258_v54 = vsel %vm16405_vm9, %v637_v32, %v1242_v31  ;;  %vm16409_vm2 = vmmov %vm16402_vm8 }
 0x5e9   :  { %v4399_v48 = vadd.f32 %v4383_v52, %v12294_v24  ;;  %v4337_v50 = vpop.f32.mrf.mxu1  ;;  %v12442_v13 = vpop.f32.mrf.mxu0  ;;  %1576 = vperm.xlu1 %8963, %v1389_v44   ;;  %v1118_v10 = vsel %vm16404_vm1, %v16403_v47, %v1101_v8  ;;  %vm4376_vm11 = vcmp.eq.f32.partialorder %v12257_v9, 8.0  ;;  %vm16412_vm8 = vmmov %vm16409_vm2 }
 0x5ea   :  { %v4384_v20 = vsel %vm4368_vm15, %v4337_v50, 0.0  ;;  %1165 = vrot.lane.b32.xlu0 %v1118_v10, %s9232_s28  ;;  %v428_v23 = vpop.xlane.xlu0 %427  ;;  %vm16410_vm15 = vmmov %vm16404_vm1 }
 0x5eb   :  { %v12450_v26 = vadd.f32 %v12331_v16, %v4399_v48  ;;  %v4400_v24 = vadd.f32 %v4384_v20, %v12301_v37  ;;  %v12454_v51 = vpop.f32.mrf.mxu1  ;;  %v1274_v30 = vsel %vm16406_vm5, %v428_v23, %v1258_v54  ;;  %v12458_v44 = vpop.f32.mrf.mxu0  ;;  %vm16414_vm1 = vmmov %vm16401_vm3 }
 0x5ec   :  { %9167 = vrcp.f32 %v1274_v30  ;;  %vm16415_vm9 = vmmov %vm16406_vm5 }
 0x5ed   :  { %v12464_v32 = vadd.f32 %v12343_v21, %v4400_v24  ;;  %v4343_v16 = vpop.f32.mrf.mxu1  ;;  %v12467_v27 = vpop.f32.mrf.mxu0  ;;  %8965 = vset.pattern.permute.xlu1 %v16091_v3 }
 0x5ee   :  { %v4386_v37 = vsel %vm4370_vm7, %v4343_v16, 0.0  ;;  %v849_v52 = vpop.xlane.xlu1 %848  ;;  %1580 = vperm.xlu0 %8964, %v1390_v6  }
 0x5ef   :  { %v4402_v22 = vadd.f32 %v4386_v37, %v12315_v5  ;;  %v4345_v8 = vpop.f32.mrf.mxu1  ;;  %v12472_v50 = vpop.f32.mrf.mxu0 }
 0x5f0   :  { %v4387_v48 = vsel %vm4371_vm12, %v4345_v8, 0.0  ;;  %16407 = vst [vmem:[#allocation9_spill] sm:$0xff] %v12472_v50 }
 0x5f1   :  { %v12475_v21 = vadd.f32 %v12357_v28, %v4402_v22  ;;  %v4403_v63 = vadd.f32 %v4387_v48, %v12328_v25  ;;  %v4347_v31 = vpop.f32.mrf.mxu1  ;;  %v12479_v47 = vpop.f32.mrf.mxu0 }
 0x5f2   :  { %v4388_v20 = vsel %vm4372_vm10, %v4347_v31, 0.0  ;;  %v1058_v10 = vpop.xlane.xlu1 %1057  ;;  %v852_v54 = vpop.xlane.xlu0 %851  ;;  %8966 = vset.pattern.permute.xlu0 %v16091_v3 }
 0x5f3   :  { %v12482_v5 = vadd.f32 %v12365_v49, %v4403_v63  ;;  %v4404_v4 = vadd.f32 %v4388_v20, %v12335_v2  ;;  %v12485_v24 = vpop.f32.mrf.mxu1  ;;  %v12488_v28 = vpop.f32.mrf.mxu0 }
 0x5f5   :  { %v9166_v25 = vpop.eup %9165  ;;  %v12491_v23 = vadd.f32 %v12373_v14, %v4404_v4  ;;  %v4353_v11 = vpop.f32.mrf.mxu1  ;;  %v1243_v14 = vsel %vm16409_vm2, %v849_v52, %v1058_v10 }
 0x5f6   :  { %v4390_v30 = vsel %vm4374_vm0, %v4353_v11, 0.0  ;;  %v12494_v6 = vpop.f32.mrf.mxu0  ;;  %v640_v49 = vpop.xlane.xlu1 %639  ;;  %1331 = vrot.lane.b32.xlu1 %v9166_v25, %s9232_s28 }
 0x5f7   :  { %v4406_v2 = vadd.f32 %v4390_v30, %v12353_v34  ;;  %v1061_v16 = vpop.xlane.xlu0 %1060  ;;  %v4355_v37 = vpop.f32.mrf.mxu1  ;;  %v1259_v34 = vsel %vm16401_vm3, %v640_v49, %v1243_v14  ;;  %vm16426_vm3 = vmmov %vm16414_vm1 }
 0x5f8   :  { %v4391_v22 = vsel %vm4375_vm6, %v4355_v37, 0.0  ;;  %v12499_v8 = vpop.f32.mrf.mxu0 }
 0x5f9   :  { %16408 = vst [vmem:[#allocation24_spill] sm:$0xff] %v12499_v8  ;;  %v12504_v56 = vadd.f32 %v12396_v18, %v4406_v2  ;;  %v4407_v48 = vadd.f32 %v4391_v22, %v12362_v53  ;;  %v4357_v63 = vpop.f32.mrf.mxu1  ;;  %v9168_v31 = vpop.eup %9167 }
 0x5fa   :  { %v4392_v20 = vsel %vm4376_vm11, %v4357_v63, 0.0  ;;  %v12510_v0 = vpop.f32.mrf.mxu0  ;;  %v431_v4 = vpop.xlane.xlu1 %430  ;;  %1333 = vrot.lane.b32.xlu0 %v9168_v31, %s9232_s28 }
 0x5fb   :  { %v12513_v25 = vadd.f32 %v12409_v62, %v4407_v48  ;;  %v4408_v52 = vadd.f32 %v4392_v20, %v12369_v59  ;;  %v1275_v18 = vsel %vm16410_vm15, %v431_v4, %v1259_v34  ;;  %v643_v53 = vpop.xlane.xlu0 %642  ;;  %v12519_v9 = vpop.f32.mrf.mxu1  ;;  %v1244_v62 = vsel %vm16412_vm8, %v852_v54, %v1061_v16  ;;  %vm16427_vm8 = vmmov %vm16415_vm9 }
 0x5fc   :  { %16411 = vst [vmem:[#allocation10_spill] sm:$0xff] %v12519_v9  ;;  %9169 = vrcp.f32 %v1275_v18  ;;  %v12521_v10 = vpop.f32.mrf.mxu0  ;;  %v1260_v2 = vsel %vm16414_vm1, %v643_v53, %v1244_v62 }
 0x5fd   :  { %v12524_v11 = vadd.f32 %v12417_v15, %v4408_v52  ;;  %v4577_v30 = vpop.f32.mrf.mxu1 }
 0x5fe   :  { %v12529_v59 = vsub.f32 %v16363_v36, %v4577_v30  ;;  %v12531_v49 = vpop.f32.mrf.mxu0 }
 0x5ff   :  { %v434_v37 = vpop.xlane.xlu0 %433  ;;  %v4579_v22 = vpop.f32.mrf.mxu1 }
 0x600   :  { %16413 = vst [vmem:[#allocation68_spill] sm:$0xff] %v12529_v59  ;;  %v1276_v14 = vsel %vm16415_vm9, %v434_v37, %v1260_v2  ;;  %v12538_v15 = vsub.f32 %v16369_v19, %v4579_v22  ;;  %v12540_v48 = vpop.f32.mrf.mxu0  ;;  %vm4705_vm5 = vcmp.eq.f32.partialorder %v12529_v59, 0.0  ;;  %vm4947_vm0 = vcmp.eq.f32.partialorder %v12529_v59, 8.0  ;;  %vm16429_vm9 = vmmov %vm16409_vm2 }
 0x601   :  { %16417 = vst [vmem:[#allocation71_spill] sm:$0xff] %v12540_v48  ;;  %9171 = vrcp.f32 %v1276_v14  ;;  %v4581_v54 = vpop.f32.mrf.mxu1  ;;  %v4721_v16 = vsel %vm4705_vm5, %v12442_v13, 0.0  ;;  %v855_v34 = vpop.xlane.xlu1 %854 }
 0x602   :  { %16416 = vst [vmem:[#allocation26_spill] sm:$0xff] %v12538_v15  ;;  %v12545_v63 = vsub.f32 %v16363_v36, %v4581_v54  ;;  %v12547_v31 = vpop.f32.mrf.mxu0  ;;  %v12550_v20 = vadd.f32 %v4721_v16, %v12379_v40  ;;  %vm4706_vm7 = vcmp.eq.f32.partialorder %v12538_v15, 0.0  ;;  %v16436_v15 = vld [vmem:[#allocation17_spill] sm:$0xff] }
 0x603   :  { %v12553_v4 = vpop.f32.mrf.mxu1  ;;  %v4722_v52 = vsel %vm4706_vm7, %v12458_v44, 0.0  ;;  %vm16431_vm7 = vmmov %vm16426_vm3 }
 0x604   :  { %16418 = vst [vmem:[#allocation69_spill] sm:$0xff] %v12545_v63  ;;  %v12556_v18 = vpop.f32.mrf.mxu0  ;;  %v12559_v53 = vadd.f32 %v4722_v52, %v12393_v60  ;;  %vm4707_vm12 = vcmp.eq.f32.partialorder %v12545_v63, 0.0  ;;  %vm4949_vm15 = vcmp.eq.f32.partialorder %v12545_v63, 8.0 }
 0x605   :  { %v4587_v13 = vpop.f32.mrf.mxu1  ;;  %v4723_v30 = vsel %vm4707_vm12, %v12467_v27, 0.0  ;;  %v1064_v2 = vpop.xlane.xlu1 %1063 }
 0x606   :  { %16419 = vst [vmem:[#allocation27_spill] sm:$0xff] %v12559_v53  ;;  %v12564_v62 = vsub.f32 %v16363_v36, %v4587_v13  ;;  %v12566_v40 = vpop.f32.mrf.mxu0  ;;  %v12569_v37 = vadd.f32 %v4723_v30, %v12407_v45  ;;  %v858_v44 = vpop.xlane.xlu0 %857 }
 0x607   :  { %v4589_v22 = vpop.f32.mrf.mxu1 }
 0x608   :  { %16420 = vst [vmem:[#allocation70_spill] sm:$0xff] %v12564_v62  ;;  %v12572_v14 = vsub.f32 %v16369_v19, %v4589_v22  ;;  %v12574_v60 = vpop.f32.mrf.mxu0  ;;  %vm4709_vm10 = vcmp.eq.f32.partialorder %v12564_v62, 0.0  ;;  %vm4951_vm5 = vcmp.eq.f32.partialorder %v12564_v62, 8.0 }
 0x609   :  { %16422 = vst [vmem:[#allocation28_spill] sm:$0xff] %v12574_v60  ;;  %v9170_v54 = vpop.eup %9169  ;;  %v4591_v27 = vpop.f32.mrf.mxu1  ;;  %v4725_v16 = vsel %vm4709_vm10, %v12479_v47, 0.0  ;;  %vm16433_vm10 = vmmov %vm16427_vm8 }
 0x60a   :  { %16421 = vst [vmem:[#allocation49_spill] sm:$0xff] %v12572_v14  ;;  %v12579_v52 = vsub.f32 %v16363_v36, %v4591_v27  ;;  %v4908_v13 = vpop.f32.mrf.mxu0  ;;  %v646_v45 = vpop.xlane.xlu1 %645  ;;  %1335 = vrot.lane.b32.xlu1 %v9170_v54, %s9232_s28  ;;  %v12584_v30 = vadd.f32 %v4725_v16, %v12436_v41  ;;  %vm4710_vm6 = vcmp.eq.f32.partialorder %v12572_v14, 0.0  ;;  %v1245_v54 = vsel %vm16409_vm2, %v855_v34, %v1064_v2 }
 0x60b   :  { %v12587_v22 = vsel %vm4947_vm0, %v4908_v13, 0.0  ;;  %v1067_v60 = vpop.xlane.xlu0 %1066  ;;  %v12589_v55 = vpop.f32.mrf.mxu1  ;;  %v4726_v47 = vsel %vm4710_vm6, %v12488_v28, 0.0  ;;  %v1261_v16 = vsel %vm16426_vm3, %v646_v45, %v1245_v54  ;;  %vm4952_vm0 = vcmp.eq.f32.partialorder %v12572_v14, 8.0 }
 0x60c   :  { %16423 = vst [vmem:[#allocation72_spill] sm:$0xff] %v12579_v52  ;;  %16424 = vst [vmem:[#allocation7_spill] sm:$0xff] %v12589_v55  ;;  %v12592_v27 = vpop.f32.mrf.mxu0  ;;  %v12595_v48 = vadd.f32 %v4726_v47, %v12450_v26  ;;  %vm4711_vm11 = vcmp.eq.f32.partialorder %v12579_v52, 0.0  ;;  %vm4953_vm6 = vcmp.eq.f32.partialorder %v12579_v52, 8.0 }
 0x60d   :  { %16425 = vst [vmem:[#allocation32_spill] sm:$0xff] %v12592_v27  ;;  %v4597_v9 = vpop.f32.mrf.mxu1  ;;  %v4727_v26 = vsel %vm4711_vm11, %v12494_v6, 0.0  ;;  %v1246_v6 = vsel %vm16429_vm9, %v858_v44, %v1067_v60 }
 0x60e   :  { %v9172_v41 = vpop.eup %9171  ;;  %v12603_v13 = vsub.f32 %v16363_v36, %v4597_v9  ;;  %v4912_v8 = vpop.f32.mrf.mxu0  ;;  %v12613_v45 = vadd.f32 %v4727_v26, %v12464_v32 }
 0x60f   :  { %v437_v28 = vpop.xlane.xlu1 %436  ;;  %v12607_v47 = vsel %vm4949_vm15, %v4912_v8, 0.0  ;;  %1337 = vrot.lane.b32.xlu0 %v9172_v41, %s9232_s28  ;;  %v649_v2 = vpop.xlane.xlu0 %648  ;;  %vm4826_vm15 = vcmp.eq.f32.partialorder %v12529_v59, 1.0 }
 0x610   :  { %v1277_v34 = vsel %vm16427_vm8, %v437_v28, %v1261_v16  ;;  %v4599_v27 = vpop.f32.mrf.mxu1  ;;  %v12618_v54 = vpop.f32.mrf.mxu0  ;;  %vm4713_vm1 = vcmp.eq.f32.partialorder %v12603_v13, 0.0  ;;  %vm4955_vm11 = vcmp.eq.f32.partialorder %v12603_v13, 8.0 }
 0x611   :  { %9173 = vrcp.f32 %v1277_v34  ;;  %v12616_v9 = vsub.f32 %v16369_v19, %v4599_v27  ;;  %16428 = vst [vmem:[#allocation30_spill] sm:$0xff] %v12618_v54  ;;  %v4729_v16 = vsel %vm4713_vm1, %v12510_v0, 0.0  ;;  %v1262_v27 = vsel %vm16431_vm7, %v649_v2, %v1246_v6 }
 0x612   :  { %v4601_v53 = vpop.f32.mrf.mxu1  ;;  %v4918_v41 = vpop.f32.mrf.mxu0  ;;  %v12637_v44 = vadd.f32 %v4729_v16, %v12475_v21 }
 0x613   :  { %v12624_v8 = vsub.f32 %v16363_v36, %v4601_v53  ;;  %v12627_v32 = vpop.permute.xlu1 %1151  ;;  %v12632_v28 = vsel %vm4951_vm5, %v4918_v41, 0.0  ;;  %v440_v26 = vpop.xlane.xlu0 %439  ;;  %vm4714_vm12 = vcmp.eq.f32.partialorder %v12616_v9, 0.0  ;;  %vm4956_vm3 = vcmp.eq.f32.partialorder %v12616_v9, 8.0 }
 0x614   :  { %16430 = vst [vmem:[#allocation11_spill] sm:$0xff] %v12627_v32  ;;  %v12634_v34 = vpop.f32.mrf.mxu1  ;;  %v1278_v53 = vsel %vm16433_vm10, %v440_v26, %v1262_v27  ;;  %v4920_v60 = vpop.f32.mrf.mxu0  ;;  %v4730_v0 = vsel %vm4714_vm12, %v12521_v10, 0.0  ;;  %v16434_v26 = vld [vmem:[#allocation18_spill] sm:$0xff]  ;;  %vm4828_vm5 = vcmp.eq.f32.partialorder %v12545_v63, 1.0 }
 0x615   :  { %16432 = vst [vmem:[#allocation29_spill] sm:$0xff] %v12634_v34  ;;  %9175 = vrcp.f32 %v1278_v53  ;;  %v12644_v2 = vsel %vm4952_vm0, %v4920_v60, 0.0  ;;  %v12647_v41 = vadd.f32 %v4730_v0, %v12482_v5  ;;  %vm4715_vm2 = vcmp.eq.f32.partialorder %v12624_v8, 0.0 }
 0x616   :  { %v4607_v6 = vpop.f32.mrf.mxu1  ;;  %v4922_v54 = vpop.f32.mrf.mxu0  ;;  %v4731_v27 = vsel %vm4715_vm2, %v12531_v49, 0.0  ;;  %vm4957_vm8 = vcmp.eq.f32.partialorder %v12624_v8, 8.0  ;;  %vm4830_vm2 = vcmp.eq.f32.partialorder %v12564_v62, 1.0 }
 0x617   :  { %v1553_v21 = vpop.permute.xlu1 %1552  ;;  %v12651_v33 = vsel %vm4953_vm6, %v4922_v54, 0.0  ;;  %v12658_v60 = vadd.f32 %v4731_v27, %v12491_v23  ;;  %v12662_v32 = vsub.f32 %v16363_v36, %v4607_v6  ;;  %v12672_v27 = vsub.f32 %v16369_v19, %v11949_v58 }
 0x618   :  { %v4609_v16 = vpop.f32.mrf.mxu1  ;;  %v1591_v10 = vadd.f32 %v1553_v21, %v16434_v26  ;;  %v12655_v53 = vpop.f32.mrf.mxu0  ;;  %v12689_v58 = vsub.f32 %v16369_v19, %v11995_v57 }
 0x619   :  { %16435 = vst [vmem:[#allocation5_spill] sm:$0xff] %v12655_v53  ;;  %vm4717_vm1 = vcmp.eq.f32.partialorder %v12662_v32, 0.0  ;;  %vm4244_vm9 = vcmp.eq.f32.partialorder %v12672_v27, 1.0  ;;  %vm4959_vm7 = vcmp.eq.f32.partialorder %v12662_v32, 8.0  ;;  %vm4123_vm12 = vcmp.eq.f32.partialorder %v12672_v27, 0.0 }
 0x61a   :  { %v4611_v5 = vpop.f32.mrf.mxu1  ;;  %v4928_v0 = vpop.f32.mrf.mxu0  ;;  %v1607_v21 = vadd.f32 1.0, %v1591_v10  ;;  %vm4248_vm10 = vcmp.eq.f32.partialorder %v12689_v58, 1.0  ;;  %vm4127_vm0 = vcmp.eq.f32.partialorder %v12689_v58, 0.0 }
 0x61b   :  { %v1557_v34 = vpop.permute.xlu1 %1556  ;;  %v12664_v54 = vsel %vm4955_vm11, %v4928_v0, 0.0  ;;  %v12705_v57 = vsub.f32 %v16363_v36, %v4611_v5 }
 0x61c   :  { %v1592_v55 = vadd.f32 %v1557_v34, %v16436_v15  ;;  %v12667_v49 = vpop.f32.mrf.mxu1  ;;  %v4930_v26 = vpop.f32.mrf.mxu0 }
 0x61d   :  { %16437 = vst [vmem:[#allocation31_spill] sm:$0xff] %v12667_v49  ;;  %v12674_v53 = vsel %vm4956_vm3, %v4930_v26, 0.0  ;;  %v12694_v26 = vsub.f32 %v16369_v19, %v4609_v16  ;;  %v9195_v16 = vld [vmem:[%s15869_s5 + $0x40] sm:$0xff] }
 0x61e   :  { %v9174_v23 = vpop.eup %9173  ;;  %v4787_v50 = vpop.f32.mrf.mxu1  ;;  %v1608_v34 = vadd.f32 1.0, %v1592_v55  ;;  %v12700_v55 = vsub.f32 %v16369_v19, %v12057_v1  ;;  %v4733_v1 = vsel %vm4717_vm1, %v12547_v31, 0.0  ;;  %vm4831_vm1 = vcmp.eq.f32.partialorder %v12572_v14, 1.0 }
 0x61f   :  { %v4842_v6 = vsel %vm4826_vm15, %v4787_v50, 0.0  ;;  %v4932_v0 = vpop.f32.mrf.mxu0  ;;  %1339 = vrot.lane.b32.xlu1 %v9174_v23, %s9232_s28  ;;  %v12691_v50 = vmul.f32 3.5, %v1607_v21  ;;  %vm4960_vm6 = vcmp.eq.f32.partialorder %v12694_v26, 8.0  ;;  %vm4961_vm15 = vcmp.eq.f32.partialorder %v12705_v57, 8.0 }
 0x620   :  { %v12680_v10 = vadd.f32 %v4842_v6, %v12550_v20  ;;  %v12682_v49 = vsel %vm4957_vm8, %v4932_v0, 0.0  ;;  %v12684_v15 = vpop.f32.mrf.mxu1  ;;  %vm4252_vm11 = vcmp.eq.f32.partialorder %v12700_v55, 1.0  ;;  %vm4131_vm3 = vcmp.eq.f32.partialorder %v12700_v55, 0.0 }
 0x621   :  { %v12696_v23 = vpop.f32.mrf.mxu0  ;;  %vm4365_vm8 = vcmp.eq.f32.partialorder %v12672_v27, 8.0 }
 0x622   :  { %16438 = vst [vmem:[#allocation35_spill] sm:$0xff] %v12696_v23  ;;  %v4791_v20 = vpop.f32.mrf.mxu1  ;;  %v9176_v6 = vpop.eup %9175  ;;  %v12715_v23 = vmul.f32 3.5, %v1608_v34  ;;  %v4139_v34 = vsel %vm4123_vm12, %v12266_v39, 0.0 }
 0x623   :  { %v4844_v21 = vsel %vm4828_vm5, %v4791_v20, 0.0  ;;  %v4938_v0 = vpop.f32.mrf.mxu0  ;;  %1433 = vperm.xlu1 %8965, %v9195_v16   ;;  %1341 = vrot.lane.b32.xlu0 %v9176_v6, %s9232_s28  ;;  %v12728_v16 = vfloor.f32 %v12691_v50 }
 0x624   :  { %v12718_v5 = vadd.f32 %v4844_v21, %v12569_v37  ;;  %v12720_v20 = vsel %vm4959_vm7, %v4938_v0, 0.0  ;;  %v12723_v36 = vpop.f32.mrf.mxu1  ;;  %v12733_v37 = vsub.f32 %v16369_v19, %v12122_v46  ;;  %v9196_v46 = vld [vmem:[%s15869_s5 + $0x50] sm:$0xff]  ;;  %v12747_v39 = vfloor.f32 %v12715_v23 }
 0x625   :  { %16439 = vst [vmem:[#allocation6_spill] sm:$0xff] %v12720_v20  ;;  %16440 = vst [vmem:[#allocation37_spill] sm:$0xff] %v12728_v16  ;;  %v4940_v31 = vpop.f32.mrf.mxu0  ;;  %vm1879_vm5 = vcmp.ge.f32.partialorder %v12728_v16, -1.0  ;;  %vm1895_vm7 = vcmp.le.f32.partialorder %v12728_v16, 6.0 }
 0x626   :  { %16441 = vst [vmem:[#allocation40_spill] sm:$0xff] %v12733_v37  ;;  %v12736_v21 = vsel %vm4960_vm6, %v4940_v31, 0.0  ;;  %v4797_v6 = vpop.f32.mrf.mxu1  ;;  %16443 = vst [vmem:[#allocation43_spill] sm:$0xff] %v12747_v39  ;;  %vm4135_vm12 = vcmp.eq.f32.partialorder %v12733_v37, 0.0  ;;  %vm4832_vm6 = vcmp.eq.f32.partialorder %v12579_v52, 1.0  ;;  %v16451_v52 = vld [vmem:[#allocation13_spill] sm:$0xff] }
 0x627   :  { %16442 = vst [vmem:[#allocation46_spill] sm:$0xff] %v12736_v21  ;;  %v4846_v0 = vsel %vm4830_vm2, %v4797_v6, 0.0  ;;  %v4942_v63 = vpop.f32.mrf.mxu0  ;;  %1443 = vperm.xlu1 %8965, %v9196_v46   ;;  %v9197_v6 = vld [vmem:[%s15869_s5 + $0x48] sm:$0xff]  ;;  %v4155_v46 = vadd.f32 %v4139_v34, %v12085_v61  ;;  %v4143_v61 = vsel %vm4127_vm0, %v12291_v38, 0.0  ;;  %vm4486_vm2 = vcmp.eq.f32.partialorder %v12672_v27, 9.0  ;;  %vm12800_vm0 = vmand %vm1879_vm5, %vm1895_vm7 }
 0x628   :  { %v12750_v31 = vadd.f32 %v4846_v0, %v12584_v30  ;;  %v12752_v62 = vsel %vm4961_vm15, %v4942_v63, 0.0  ;;  %1438 = vperm.xlu0 %8966, %v9197_v6   ;;  %v4799_v21 = vpop.f32.mrf.mxu1  ;;  %v4260_v63 = vsel %vm4244_vm9, %v12175_v7, 0.0  ;;  %v4147_v34 = vsel %vm4131_vm3, %v12325_v35, 0.0  ;;  %v9199_v35 = vld [vmem:[%s15869_s5 + $0x60] sm:$0xff] }
 0x629   :  { %16444 = vst [vmem:[#allocation36_spill] sm:$0xff] %v12752_v62  ;;  %v4847_v59 = vsel %vm4831_vm1, %v4799_v21, 0.0  ;;  %v12759_v20 = vpop.f32.mrf.mxu0  ;;  %vm4490_vm9 = vcmp.eq.f32.partialorder %v12689_v58, 9.0  ;;  %v4151_v38 = vsel %vm4135_vm12, %v12359_v42, 0.0  ;;  %vm1880_vm3 = vcmp.ge.f32.partialorder %v12747_v39, -1.0 }
 0x62a   :  { %16445 = vst [vmem:[#allocation33_spill] sm:$0xff] %v12759_v20  ;;  %v12768_v30 = vadd.f32 %v4847_v59, %v12595_v48  ;;  %v4801_v0 = vpop.f32.mrf.mxu1  ;;  %v9198_v59 = vld [vmem:[%s15869_s5 + $0x58] sm:$0xff]  ;;  %v12784_v48 = vadd.f32 %v4733_v1, %v12504_v56  ;;  %vm1896_vm15 = vcmp.le.f32.partialorder %v12747_v39, 6.0  ;;  %v4264_v42 = vsel %vm4248_vm10, %v12214_v12, 0.0 }
 0x62b   :  { %v4848_v21 = vsel %vm4832_vm6, %v4801_v0, 0.0  ;;  %v12778_v7 = vpop.f32.mrf.mxu0  ;;  %1448 = vperm.xlu1 %8965, %v9198_v59   ;;  %vm4256_vm1 = vcmp.eq.f32.partialorder %v12733_v37, 1.0  ;;  %vm4494_vm12 = vcmp.eq.f32.partialorder %v12700_v55, 9.0  ;;  %v4276_v1 = vadd.f32 %v4260_v63, %v4155_v46  ;;  %v9200_v46 = vld [vmem:[%s15869_s5 + $0x68] sm:$0xff]  ;;  %vm12835_vm7 = vmand %vm1880_vm3, %vm1896_vm15 }
 0x62c   :  { %v12789_v6 = vadd.f32 %v4848_v21, %v12613_v45  ;;  %1453 = vperm.xlu0 %8966, %v9199_v35   ;;  %v12794_v0 = vpop.f32.mrf.mxu1  ;;  %v4268_v45 = vsel %vm4252_vm11, %v12249_v17, 0.0  ;;  %vm4369_vm5 = vcmp.eq.f32.partialorder %v12689_v58, 8.0  ;;  %v4272_v59 = vsel %vm4256_vm1, %v12280_v29, 0.0  ;;  %v16450_v35 = vld [vmem:[#allocation51_spill] sm:$0xff]  ;;  %v16452_v17 = vld [vmem:[#allocation57_spill] sm:$0xff] }
 0x62d   :  { %16446 = vst [vmem:[#allocation47_spill] sm:$0xff] %v12794_v0  ;;  %v12815_v21 = vpop.f32.mrf.mxu0  ;;  %v4159_v20 = vadd.f32 %v4143_v61, %v16450_v35  ;;  %v4163_v14 = vadd.f32 %v4147_v34, %v16451_v52  ;;  %vm4373_vm10 = vcmp.eq.f32.partialorder %v12700_v55, 8.0  ;;  %vm4834_vm11 = vcmp.eq.f32.partialorder %v12603_v13, 1.0 }
 0x62e   :  { %16449 = vst [vmem:[#allocation38_spill] sm:$0xff] %v12815_v21  ;;  %v4807_v12 = vpop.f32.mrf.mxu1  ;;  %v4167_v0 = vadd.f32 %v4151_v38, %v16452_v17  ;;  %v2191_v29 = vsel %vm12800_vm0, 1, %v16091_v3  ;;  %vm4718_vm6 = vcmp.eq.f32.partialorder %v12694_v26, 0.0  ;;  %vm4835_vm0 = vcmp.eq.f32.partialorder %v12616_v9, 1.0 }
 0x62f   :  { %v4850_v62 = vsel %vm4834_vm11, %v4807_v12, 0.0  ;;  %v12823_v37 = vpop.f32.mrf.mxu0  ;;  %1458 = vperm.xlu1 %8965, %v9200_v46   ;;  %v4734_v38 = vsel %vm4718_vm6, %v12556_v18, 0.0  ;;  %v4381_v56 = vsel %vm4365_vm8, %v12398_v43, 0.0  ;;  %vm4836_vm3 = vcmp.eq.f32.partialorder %v12624_v8, 1.0 }
 0x630   :  { %v4866_v63 = vadd.f32 %v4850_v62, %v12637_v44  ;;  %2215 = vrot.lane.b32.xlu0 %v2191_v29, %s9237_s11  ;;  %v4809_v34 = vpop.f32.mrf.mxu1  ;;  %v4750_v62 = vadd.f32 %v4734_v38, %v12513_v25  ;;  %v12855_v44 = vsub.f32 %v12691_v50, %v12728_v16  ;;  %v2192_v18 = vsel %vm12835_vm7, 1, %v16091_v3 }
 0x631   :  { %v4851_v35 = vsel %vm4835_vm0, %v4809_v34, 0.0  ;;  %v12849_v12 = vpop.f32.mrf.mxu0  ;;  %vm4719_vm8 = vcmp.eq.f32.partialorder %v12705_v57, 0.0  ;;  %v4280_v43 = vadd.f32 %v4264_v42, %v4159_v20  ;;  %v12864_v29 = vsub.f32 %v16369_v19, %v12553_v4  ;;  %v16458_v42 = vld [vmem:[#allocation15_spill] sm:$0xff] }
 0x632   :  { %16455 = vst [vmem:[#allocation50_spill] sm:$0xff] %v12849_v12  ;;  %16456 = vst [vmem:[#allocation41_spill] sm:$0xff] %v12855_v44  ;;  %v4867_v17 = vadd.f32 %v4851_v35, %v12647_v41  ;;  %v4811_v46 = vpop.f32.mrf.mxu1  ;;  %v4735_v50 = vsel %vm4719_vm8, %v12566_v40, 0.0  ;;  %v16457_v41 = vld [vmem:[#allocation14_spill] sm:$0xff]  ;;  %v4397_v52 = vadd.f32 %v4381_v56, %v4276_v1  ;;  %v12882_v40 = vadd.f32 %v4272_v59, %v4167_v0 }
 0x633   :  { %v4852_v34 = vsel %vm4836_vm3, %v4811_v46, 0.0  ;;  %v12866_v25 = vpop.f32.mrf.mxu0  ;;  %2217 = vrot.lane.b32.xlu1 %v2192_v18, %s9237_s11  ;;  %v4502_v38 = vsel %vm4486_vm2, %v16457_v41, 0.0  ;;  %v4751_v4 = vadd.f32 %v4735_v50, %v12524_v11  ;;  %v4506_v46 = vsel %vm4490_vm9, %v16458_v42, 0.0 }
 0x634   :  { %v4868_v35 = vadd.f32 %v4852_v34, %v12658_v60  ;;  %2295 = vrot.lane.b32.xlu0 %v12855_v44, %s9237_s11  ;;  %v12876_v20 = vpop.f32.mrf.mxu1  ;;  %v4284_v18 = vadd.f32 %v4268_v45, %v4163_v14  ;;  %v12886_v27 = vsub.f32 %v12715_v23, %v12747_v39  ;;  %v16460_v60 = vld [vmem:[#allocation16_spill] sm:$0xff]  ;;  %v4385_v11 = vsel %vm4369_vm5, %v12454_v51, 0.0  ;;  %v16478_v44 = vld [vmem:[#allocation17_spill] sm:$0xff]  ;;  %v16479_v12 = vld [vmem:[#allocation47_spill] sm:$0xff] }
 0x635   :  { %v12888_v1 = vpop.f32.mrf.mxu0  ;;  %v4510_v56 = vsel %vm4494_vm12, %v16460_v60, 0.0  ;;  %vm4838_vm2 = vcmp.eq.f32.partialorder %v12662_v32, 1.0  ;;  %v4979_v14 = vadd.f32 %v12587_v22, %v12680_v10  ;;  %v4389_v23 = vsel %vm4373_vm10, %v12485_v24, 0.0 }
 0x636   :  { %16459 = vst [vmem:[#allocation48_spill] sm:$0xff] %v12886_v27  ;;  %v4817_v34 = vpop.f32.mrf.mxu1  ;;  %vm4708_vm9 = vcmp.eq.f32.partialorder %v12864_v29, 0.0  ;;  %v12909_v51 = vadd.f32 %v12607_v47, %v12718_v5  ;;  %v4518_v58 = vadd.f32 %v4502_v38, %v4397_v52  ;;  %vm4839_vm15 = vcmp.eq.f32.partialorder %v12694_v26, 1.0 }
 0x637   :  { %v4854_v0 = vsel %vm4838_vm2, %v4817_v34, 0.0  ;;  %v12903_v45 = vpop.f32.mrf.mxu0  ;;  %2297 = vrot.lane.b32.xlu1 %v12886_v27, %s9237_s11  ;;  %v12915_v24 = vadd.f32 %v12632_v28, %v12750_v31  ;;  %v4401_v10 = vadd.f32 %v4385_v11, %v4280_v43  ;;  %v12921_v41 = vadd.f32 %v12644_v2, %v12768_v30  ;;  %v16462_v31 = vld [vmem:[#allocation7_spill] sm:$0xff] }
 0x638   :  { %v4870_v59 = vadd.f32 %v4854_v0, %v12784_v48  ;;  %v4819_v22 = vpop.f32.mrf.mxu1  ;;  %v12925_v47 = vadd.f32 %v12651_v33, %v12789_v6  ;;  %v4405_v5 = vadd.f32 %v4389_v23, %v4284_v18  ;;  %v16461_v48 = vld [vmem:[#allocation9_spill] sm:$0xff]  ;;  %vm4840_vm1 = vcmp.eq.f32.partialorder %v12705_v57, 1.0  ;;  %v12943_v6 = vpop.permute.xlu0 %1153  ;;  %v16463_v18 = vld [vmem:[#allocation26_spill] sm:$0xff] }
 0x639   :  { %v4855_v55 = vsel %vm4839_vm15, %v4819_v22, 0.0  ;;  %v12917_v50 = vpop.f32.mrf.mxu0  ;;  %v4724_v38 = vsel %vm4708_vm9, %v16461_v48, 0.0  ;;  %v12933_v43 = vsub.f32 %v16369_v19, %v16462_v31  ;;  %v12938_v30 = vadd.f32 %v12664_v54, %v4866_v63  ;;  %v16465_v22 = vld [vmem:[#allocation40_spill] sm:$0xff] }
 0x63a   :  { %v4871_v52 = vadd.f32 %v4855_v55, %v4750_v62  ;;  %v4821_v28 = vpop.f32.mrf.mxu1  ;;  %v12941_v33 = vadd.f32 %v12674_v53, %v4867_v17  ;;  %vm4827_vm12 = vcmp.eq.f32.partialorder %v16463_v18, 1.0  ;;  %vm4829_vm5 = vcmp.eq.f32.partialorder %v12864_v29, 1.0  ;;  %v16464_v53 = vld [vmem:[#allocation6_spill] sm:$0xff]  ;;  %v16466_v48 = vld [vmem:[#allocation68_spill] sm:$0xff] }
 0x63b   :  { %v4856_v42 = vsel %vm4840_vm1, %v4821_v28, 0.0  ;;  %v12935_v2 = vpop.f32.mrf.mxu0  ;;  %v12950_v11 = vadd.f32 %v12682_v49, %v4868_v35  ;;  %v4522_v34 = vadd.f32 %v4506_v46, %v4401_v10  ;;  %v4843_v23 = vsel %vm4827_vm12, %v12684_v15, 0.0  ;;  %v16467_v49 = vld [vmem:[#allocation46_spill] sm:$0xff]  ;;  %v16468_v46 = vld [vmem:[#allocation11_spill] sm:$0xff] }
 0x63c   :  { %v4872_v62 = vadd.f32 %v4856_v42, %v4751_v4  ;;  %v12947_v60 = vpop.f32.mrf.mxu1  ;;  %v4845_v54 = vsel %vm4829_vm5, %v12723_v36, 0.0  ;;  %v12957_v17 = vadd.f32 %v16464_v53, %v4870_v59  ;;  %v12959_v0 = vadd.f32 %v4510_v56, %v4405_v5  ;;  %v16469_v15 = vld [vmem:[#allocation18_spill] sm:$0xff]  ;;  %v12968_v36 = vpop.permute.xlu1 %1157  ;;  %v16470_v56 = vld [vmem:[#allocation36_spill] sm:$0xff]  ;;  %v16472_v53 = vld [vmem:[#allocation29_spill] sm:$0xff] }
 0x63d   :  { %v12954_v63 = vpop.f32.mrf.mxu0  ;;  %vm4377_vm10 = vcmp.eq.f32.partialorder %v16465_v22, 8.0  ;;  %v4740_v4 = vadd.f32 %v4724_v38, %v4518_v58  ;;  %vm5068_vm11 = vcmp.eq.f32.partialorder %v16466_v48, 9.0  ;;  %v12964_v35 = vadd.f32 %v16467_v49, %v4871_v52  ;;  %v16471_v58 = vld [vmem:[#allocation27_spill] sm:$0xff]  ;;  %v16474_v49 = vld [vmem:[#allocation32_spill] sm:$0xff] }
 0x63e   :  { %v5029_v55 = vpop.f32.mrf.mxu1  ;;  %v1191_v10 = vsub.f32 %v16469_v15, %v16468_v46  ;;  %vm4712_vm7 = vcmp.eq.f32.partialorder %v12933_v43, 0.0  ;;  %v12974_v5 = vadd.f32 %v16470_v56, %v4872_v62  ;;  %vm4948_vm6 = vcmp.eq.f32.partialorder %v16463_v18, 8.0  ;;  %v16473_v62 = vld [vmem:[#allocation69_spill] sm:$0xff]  ;;  %v12990_v56 = vpop.permute.xlu0 %1155 }
 0x63f   :  { %v5084_v59 = vsel %vm5068_vm11, %v5029_v55, 0.0  ;;  %v12971_v28 = vpop.f32.mrf.mxu0  ;;  %v4859_v38 = vadd.f32 %v4843_v23, %v16471_v58  ;;  %v4861_v31 = vadd.f32 %v4845_v54, %v4740_v4  ;;  %vm4950_vm0 = vcmp.eq.f32.partialorder %v12864_v29, 8.0  ;;  %v16475_v23 = vld [vmem:[#allocation24_spill] sm:$0xff]  ;;  %v16476_v4 = vld [vmem:[#allocation70_spill] sm:$0xff] }
 0x640   :  { %v12978_v52 = vadd.f32 %v5084_v59, %v4979_v14  ;;  %v5031_v42 = vpop.f32.mrf.mxu1  ;;  %v12983_v48 = vsub.f32 %v16369_v19, %v16472_v53  ;;  %vm5069_vm3 = vcmp.eq.f32.partialorder %v16463_v18, 9.0  ;;  %vm5070_vm8 = vcmp.eq.f32.partialorder %v16473_v62, 9.0  ;;  %v16477_v59 = vld [vmem:[#allocation30_spill] sm:$0xff]  ;;  %v1565_v16 = vpop.permute.xlu1 %1564 }
 0x641   :  { %v12986_v55 = vpop.f32.mrf.mxu0  ;;  %v4964_v46 = vsel %vm4948_vm6, %v16474_v49, 0.0  ;;  %v4728_v14 = vsel %vm4712_vm7, %v16475_v23, 0.0  ;;  %vm5071_vm2 = vcmp.eq.f32.partialorder %v12864_v29, 9.0  ;;  %vm5072_vm9 = vcmp.eq.f32.partialorder %v16476_v4, 9.0 }
 0x642   :  { %v5033_v54 = vpop.f32.mrf.mxu1  ;;  %v4966_v58 = vsel %vm4950_vm0, %v16477_v59, 0.0  ;;  %v1215_v18 = vmul.f32 1.442695, %v1191_v10  ;;  %v5085_v53 = vsel %vm5069_vm3, %v5031_v42, 0.0  ;;  %vm4833_vm15 = vcmp.eq.f32.partialorder %v12933_v43, 1.0 }
 0x643   :  { %v5086_v61 = vsel %vm5070_vm8, %v5033_v54, 0.0  ;;  %v12998_v15 = vpop.f32.mrf.mxu0  ;;  %v4980_v62 = vadd.f32 %v4964_v46, %v4859_v38  ;;  %v4982_v27 = vadd.f32 %v4966_v58, %v4861_v31  ;;  %v1192_v39 = vsub.f32 %v16478_v44, %v12943_v6  ;;  %v1561_v38 = vpop.permute.xlu0 %1560  ;;  %v16480_v54 = vld [vmem:[#allocation10_spill] sm:$0xff]  ;;  %v16481_v58 = vld [vmem:[#allocation49_spill] sm:$0xff] }
 0x644   :  { %v13002_v49 = vadd.f32 %v5086_v61, %v12909_v51  ;;  %v5035_v23 = vpop.f32.mrf.mxu1  ;;  %v4849_v21 = vsel %vm4833_vm15, %v16479_v12, 0.0  ;;  %vm4716_vm1 = vcmp.eq.f32.partialorder %v12983_v48, 0.0  ;;  %vm4498_vm12 = vcmp.eq.f32.partialorder %v16465_v22, 9.0 }
 0x645   :  { %v5087_v10 = vsel %vm5071_vm2, %v5035_v23, 0.0  ;;  %v13010_v42 = vpop.f32.mrf.mxu0  ;;  %v4744_v61 = vadd.f32 %v4728_v14, %v4522_v34  ;;  %v5101_v51 = vadd.f32 %v5085_v53, %v4980_v62  ;;  %v4393_v12 = vsel %vm4377_vm10, %v16480_v54, 0.0  ;;  %v16482_v34 = vld [vmem:[#allocation71_spill] sm:$0xff] }
 0x646   :  { %v5103_v46 = vadd.f32 %v5087_v10, %v4982_v27  ;;  %v5039_v6 = vpop.f32.mrf.mxu1  ;;  %9177 = vpow2.f32 %v1215_v18  ;;  %vm5073_vm5 = vcmp.eq.f32.partialorder %v16481_v58, 9.0  ;;  %v4732_v14 = vsel %vm4716_vm1, %v16482_v34, 0.0  ;;  %v16484_v18 = vld [vmem:[#allocation19_spill] sm:$0xff] }
 0x647   :  { %v5088_v29 = vsel %vm5072_vm9, %v5039_v6, 0.0  ;;  %v13020_v59 = vpop.f32.mrf.mxu0  ;;  %v4865_v23 = vadd.f32 %v4849_v21, %v4744_v61  ;;  %v1217_v10 = vmul.f32 1.442695, %v1192_v39  ;;  %vm4954_vm10 = vcmp.eq.f32.partialorder %v12933_v43, 8.0  ;;  %v16485_v21 = vld [vmem:[#allocation5_spill] sm:$0xff] }
 0x648   :  { %v13027_v27 = vadd.f32 %v5088_v29, %v12915_v24  ;;  %v5041_v53 = vpop.f32.mrf.mxu1  ;;  %v5483_v62 = vpack.c.bf16 %v5103_v46, %v5101_v51  ;;  %v1593_v4 = vadd.f32 %v1561_v38, %v16484_v18  ;;  %v4409_v58 = vadd.f32 %v4393_v12, %v12882_v40  ;;  %v16486_v24 = vld [vmem:[#allocation72_spill] sm:$0xff]  ;;  %v16487_v51 = vld [vmem:[#allocation31_spill] sm:$0xff]  ;;  %v13044_v29 = vpop.permute.xlu1 %1159 }
 0x649   :  { %v5089_v6 = vsel %vm5073_vm5, %v5041_v53, 0.0  ;;  %v13031_v54 = vpop.f32.mrf.mxu0  ;;  %v4970_v61 = vsel %vm4954_vm10, %v16485_v21, 0.0  ;;  %vm5074_vm11 = vcmp.eq.f32.partialorder %v16486_v24, 9.0  ;;  %v13041_v39 = vsub.f32 %v16369_v19, %v16487_v51  ;;  %v16488_v46 = vld [vmem:[#allocation20_spill] sm:$0xff] }
 0x64a   :  { %16483 = vst [vmem:[#allocation45_spill] sm:$0xff] %v13027_v27  ;;  %v13036_v31 = vadd.f32 %v5089_v6, %v12921_v41  ;;  %v5043_v34 = vpop.f32.mrf.mxu1  ;;  %5528 = vmatprep.mubr.bf16.mxu1 %v5483_v62  ;;  %v1594_v38 = vadd.f32 %v1565_v16, %v16488_v46  ;;  %v4748_v53 = vadd.f32 %v4732_v14, %v12959_v0  ;;  %vm4837_vm7 = vcmp.eq.f32.partialorder %v12983_v48, 1.0 }
 0x64b   :  { %v5090_v40 = vsel %vm5074_vm11, %v5043_v34, 0.0  ;;  %v13047_v12 = vpop.f32.mrf.mxu0  ;;  %v4986_v6 = vadd.f32 %v4970_v61, %v4865_v23  ;;  %vm5075_vm6 = vcmp.eq.f32.partialorder %v12933_v43, 9.0  ;;  %9179 = vpow2.f32 %v1217_v10  ;;  %v16489_v23 = vld [vmem:[#allocation8_spill] sm:$0xff]  ;;  %v13070_v61 = vpop.permute.xlu0 %1161 }
 0x64c   :  { %v13051_v41 = vadd.f32 %v5090_v40, %v12925_v47  ;;  %v5045_v62 = vpop.f32.mrf.mxu1  ;;  %v1609_v21 = vadd.f32 1.0, %v1593_v4  ;;  %v4853_v16 = vsel %vm4837_vm7, %v12876_v20, 0.0  ;;  %v1193_v0 = vsub.f32 %v16484_v18, %v12990_v56 }
 0x64d   :  { %v5091_v24 = vsel %vm5075_vm6, %v5045_v62, 0.0  ;;  %v13055_v51 = vpop.f32.mrf.mxu0  ;;  %vm5076_vm0 = vcmp.eq.f32.partialorder %v12603_v13, 9.0  ;;  %v4514_v43 = vsel %vm4498_vm12, %v16489_v23, 0.0  ;;  %v1610_v10 = vadd.f32 1.0, %v1594_v38  ;;  %v1569_v62 = vpop.permute.xlu1 %1568 }
 0x64e   :  { %v13061_v34 = vadd.f32 %v5091_v24, %v4986_v6  ;;  %v5049_v47 = vpop.f32.mrf.mxu1  ;;  %vm4720_vm3 = vcmp.eq.f32.partialorder %v13041_v39, 0.0  ;;  %v4869_v56 = vadd.f32 %v4853_v16, %v4748_v53  ;;  %vm5077_vm8 = vcmp.eq.f32.partialorder %v12616_v9, 9.0  ;;  %v16490_v53 = vld [vmem:[#allocation28_spill] sm:$0xff] }
 0x64f   :  { %v5092_v20 = vsel %vm5076_vm0, %v5049_v47, 0.0  ;;  %v13068_v4 = vpop.f32.mrf.mxu0  ;;  %v4530_v22 = vadd.f32 %v4514_v43, %v4409_v58  ;;  %vm4958_vm2 = vcmp.eq.f32.partialorder %v12983_v48, 8.0  ;;  %v13079_v38 = vmul.f32 3.5, %v1609_v21  ;;  %v16491_v58 = vld [vmem:[#allocation35_spill] sm:$0xff]  ;;  %v1573_v18 = vpop.permute.xlu0 %1572 }
 0x650   :  { %v13073_v40 = vadd.f32 %v5092_v20, %v12938_v30  ;;  %v5051_v6 = vpop.f32.mrf.mxu1  ;;  %v1219_v23 = vmul.f32 1.442695, %v1193_v0  ;;  %v4736_v30 = vsel %vm4720_vm3, %v16490_v53, 0.0  ;;  %vm5078_vm9 = vcmp.eq.f32.partialorder %v12624_v8, 9.0 }
 0x651   :  { %v5093_v24 = vsel %vm5077_vm8, %v5051_v6, 0.0  ;;  %v13081_v47 = vpop.f32.mrf.mxu0  ;;  %v4974_v43 = vsel %vm4958_vm2, %v16491_v58, 0.0  ;;  %v13091_v20 = vmul.f32 3.5, %v1610_v10  ;;  %vm4841_vm15 = vcmp.eq.f32.partialorder %v13041_v39, 1.0 }
 0x652   :  { %v13087_v16 = vadd.f32 %v5093_v24, %v12941_v33  ;;  %v5053_v9 = vpop.f32.mrf.mxu1  ;;  %v4857_v0 = vsel %vm4841_vm15, %v12947_v60, 0.0  ;;  %v4990_v53 = vadd.f32 %v4974_v43, %v4869_v56  ;;  %vm5079_vm1 = vcmp.eq.f32.partialorder %v12983_v48, 9.0 }
 0x653   :  { %v5094_v21 = vsel %vm5078_vm9, %v5053_v9, 0.0  ;;  %v8894_v6 = vpop.f32.mrf.mxu0  ;;  %v9178_v14 = vpop.eup %9177  ;;  %v1194_v8 = vsub.f32 %v16488_v46, %v12968_v36  ;;  %v13102_v10 = vfloor.f32 %v13079_v38  ;;  %v4752_v24 = vadd.f32 %v4736_v30, %v4530_v22  ;;  %v16492_v36 = vld [vmem:[#allocation21_spill] sm:$0xff] }
 0x654   :  { %v13096_v13 = vadd.f32 %v5094_v21, %v12950_v11  ;;  %v5055_v33 = vpop.f32.mrf.mxu1  ;;  %v1328_v19 = vpop.permute.xlu1 %1327  ;;  %vm5080_vm12 = vcmp.eq.f32.partialorder %v12662_v32, 9.0  ;;  %v13110_v48 = vfloor.f32 %v13091_v20  ;;  %v1595_v21 = vadd.f32 %v1569_v62, %v16492_v36 }
 0x655   :  { %v5095_v58 = vsel %vm5079_vm1, %v5055_v33, 0.0  ;;  %v5463_v9 = vpop.f32.mrf.mxu0  ;;  %v1367_v56 = vmul.f32 %v9178_v14, %v1328_v19  ;;  %v4873_v46 = vadd.f32 %v4857_v0, %v4752_v24  ;;  %vm5081_vm5 = vcmp.eq.f32.partialorder %v12694_v26, 9.0 }
 0x656   :  { %v5486_v60 = vpack.c.bf16 %v13096_v13, %v13073_v40  ;;  %v13106_v11 = vadd.f32 %v5095_v58, %v4990_v53  ;;  %v5059_v43 = vpop.f32.mrf.mxu1  ;;  %v5297_v32 = vpack.c.bf16 %v13020_v59, %v12998_v15  ;;  %vm1881_vm10 = vcmp.ge.f32.partialorder %v13102_v10, -1.0  ;;  %v16493_v15 = vld [vmem:[#allocation33_spill] sm:$0xff]  ;;  %v16506_v13 = vld [vmem:[#allocation43_spill] sm:$0xff] }
 0x657   :  { %v5096_v22 = vsel %vm5080_vm12, %v5059_v43, 0.0  ;;  %v8895_v30 = vpop.f32.mrf.mxu0  ;;  %2127 = vrot.lane.b32.xlu0 %v1367_v56, %s9238_s0  ;;  %vm1897_vm11 = vcmp.le.f32.partialorder %v13102_v10, 6.0  ;;  %vm4962_vm7 = vcmp.eq.f32.partialorder %v13041_v39, 8.0  ;;  %vm5082_vm6 = vcmp.eq.f32.partialorder %v12705_v57, 9.0  ;;  %v9201_v57 = vld [vmem:[%s15869_s5 + $0x70] sm:$0xff]  ;;  %v16505_v40 = vld [vmem:[#allocation37_spill] sm:$0xff] }
 0x658   :  { %v13114_v33 = vadd.f32 %v5096_v22, %v12957_v17  ;;  %v5481_v44 = vpack.c.bf16 %v8895_v30, %v8894_v6  ;;  %v5061_v27 = vpop.f32.mrf.mxu1  ;;  %v5487_v19 = vpack.c.bf16 %v13106_v11, %v13087_v16  ;;  %v9180_v17 = vpop.eup %9179  ;;  %9181 = vpow2.f32 %v1219_v23  ;;  %vm1913_vm3 = vmand %vm1881_vm10, %vm1897_vm11  ;;  %v9202_v30 = vld [vmem:[%s15869_s5 + $0x78] sm:$0xff] }
 0x659   :  { %v5097_v14 = vsel %vm5081_vm5, %v5061_v27, 0.0  ;;  %v5466_v62 = vpop.f32.mrf.mxu0  ;;  %v1330_v0 = vpop.permute.xlu0 %1329  ;;  %v4978_v59 = vsel %vm4962_vm7, %v16493_v15, 0.0  ;;  %v1221_v58 = vmul.f32 1.442695, %v1194_v8  ;;  %vm5083_vm0 = vcmp.eq.f32.partialorder %v13041_v39, 9.0 }
 0x65a   :  { %v13126_v6 = vadd.f32 %v5097_v14, %v12964_v35  ;;  %v5480_v26 = vpack.c.bf16 %v5466_v62, %v5463_v9  ;;  %v5063_v53 = vpop.f32.mrf.mxu1  ;;  %8736 = vmatprep.subr.bf16.mxu1 %v5481_v44  ;;  %v1368_v27 = vmul.f32 %v9180_v17, %v1330_v0  ;;  %v4994_v43 = vadd.f32 %v4978_v59, %v4873_v46  ;;  %v16494_v9 = vld [vmem:[#allocation22_spill] sm:$0xff] }
 0x65b   :  { %v5098_v24 = vsel %vm5082_vm6, %v5063_v53, 0.0  ;;  %8737 = vmatpush3.bf16.msra.mxu1 %v5297_v32  ;;  %1463 = vperm.xlu0 %8966, %v9201_v57   ;;  %v1611_v44 = vadd.f32 1.0, %v1595_v21  ;;  %v5296_v35 = vpack.c.bf16 %v13031_v54, %v13010_v42  ;;  %vm1882_vm8 = vcmp.ge.f32.partialorder %v13110_v48, -1.0 }
 0x65c   :  { %v13131_v56 = vadd.f32 %v5098_v24, %v12974_v5  ;;  %v5065_v22 = vpop.f32.mrf.mxu1  ;;  %8738 = vmatprep.subr.bf16.mxu1 %v5480_v26  ;;  %2129 = vrot.lane.b32.xlu1 %v1368_v27, %s9238_s0  ;;  %v5479_v39 = vpack.c.bf16 %v13068_v4, %v13047_v12  ;;  %vm1898_vm2 = vcmp.le.f32.partialorder %v13110_v48, 6.0  ;;  %v1596_v21 = vadd.f32 %v1573_v18, %v16494_v9 }
 0x65d   :  { %v5099_v5 = vsel %vm5083_vm0, %v5065_v22, 0.0  ;;  %v2193_v42 = vsel %vm1913_vm3, 1, %v16091_v3  ;;  %v5295_v4 = vpack.c.bf16 %v12971_v28, %v12935_v2  ;;  %vm1914_vm9 = vmand %vm1882_vm8, %vm1898_vm2  ;;  %v16495_v18 = vmov 1   ;;  %v13175_v2 = vpop.permute.xlu1 %1163  ;;  %v13189_v27 = vpop.permute.xlu0 %1165 }
 0x65e   :  { %v5488_v46 = vpack.c.bf16 %v13131_v56, %v13114_v33  ;;  %v13149_v23 = vadd.f32 %v5099_v5, %v4994_v43  ;;  %v13151_v8 = vpop.f32.mrf.mxu1  ;;  %9183 = vpow2.f32 %v1221_v58  ;;  %v13171_v32 = vsub.f32 %v13079_v38, %v13102_v10  ;;  %v16507_v33 = vld [vmem:[#allocation41_spill] sm:$0xff] }
 0x65f   :  { %8739 = vmatpush3.bf16.msra.mxu1 %v5296_v35  ;;  %2219 = vrot.lane.b32.xlu0 %v2193_v42, %s9237_s11  ;;  %v1627_v14 = vmul.f32 3.5, %v1611_v44  ;;  %v5478_v62 = vpack.c.bf16 %v13081_v47, %v13055_v51  ;;  %v1612_v17 = vadd.f32 1.0, %v1596_v21  ;;  %v2194_v0 = vsel %vm1914_vm9, 1, %v16091_v3  ;;  %v16496_v21 = vld [vmem:[#allocation23_spill] sm:$0xff] }
 0x660   :  { %v13156_v54 = vpop.f32.mrf.mxu1  ;;  %8740 = vmatprep.subr.bf16.mxu1 %v5479_v39  ;;  %v5489_v12 = vpack.c.bf16 %v13149_v23, %v13126_v6  ;;  %1468 = vperm.xlu1 %8965, %v9202_v30   ;;  %v5294_v38 = vpack.c.bf16 %v12986_v55, %v12954_v63  ;;  %v13187_v15 = vsub.f32 %v13091_v20, %v13110_v48  ;;  %vm1831_vm9 = vcmp.ge.f32.partialorder %v16505_v40, 0.0 }
 0x661   :  { %8967 = vset.pattern.permute.xlu0 %v16495_v18  ;;  %v13183_v53 = vfloor.f32 %v1627_v14  ;;  %v1628_v59 = vmul.f32 3.5, %v1612_v17  ;;  %v1195_v58 = vsub.f32 %v16492_v36, %v13044_v29  ;;  %v5201_v5 = vpack.c.bf16 %v12903_v45, %v12866_v25 }
 0x662   :  { %v8881_v28 = vpop.f32.mrf.mxu1  ;;  %v1196_v39 = vsub.f32 %v16494_v9, %v13070_v61  ;;  %v5200_v25 = vpack.c.bf16 %v12917_v50, %v12888_v1  ;;  %v1719_v6 = vsub.f32 1.0, %v16507_v33 }
 0x663   :  { %8741 = vmatpush3.bf16.msra.mxu1 %v5295_v4  ;;  %2299 = vrot.lane.b32.xlu0 %v13171_v32, %s9237_s11  ;;  %vm1883_vm15 = vcmp.ge.f32.partialorder %v13183_v53, -1.0  ;;  %vm1899_vm1 = vcmp.le.f32.partialorder %v13183_v53, 6.0  ;;  %v13197_v20 = vfloor.f32 %v1628_v59  ;;  %v1223_v35 = vmul.f32 1.442695, %v1195_v58  ;;  %v16499_v58 = vld [vmem:[#allocation38_spill] sm:$0xff] }
 0x664   :  { %v5358_v26 = vpop.f32.mrf.mxu1  ;;  %8742 = vmatprep.subr.bf16.mxu1 %v5478_v62  ;;  %2221 = vrot.lane.b32.xlu1 %v2194_v0, %s9237_s11  ;;  %v1577_v47 = vpop.permute.xlu1 %1576  ;;  %vm1915_vm12 = vmand %vm1883_vm15, %vm1899_vm1  ;;  %v1225_v62 = vmul.f32 1.442695, %v1196_v39  ;;  %v5387_v17 = vpack.c.bf16 %v8881_v28, %v13151_v8  ;;  %vm1847_vm15 = vcmp.le.f32.partialorder %v16505_v40, 7.0 }
 0x665   :  { %v9182_v24 = vpop.eup %9181  ;;  %v1597_v42 = vadd.f32 %v1577_v47, %v16496_v21  ;;  %vm1884_vm5 = vcmp.ge.f32.partialorder %v13197_v20, -1.0  ;;  %vm1900_vm10 = vcmp.le.f32.partialorder %v13197_v20, 6.0  ;;  %9185 = vpow2.f32 %v1223_v35  ;;  %vm1863_vm1 = vmand %vm1831_vm9, %vm1847_vm15 }
 0x666   :  { %v8884_v51 = vpop.f32.mrf.mxu1  ;;  %v2195_v61 = vsel %vm1915_vm12, 1, %v16091_v3  ;;  %vm1916_vm11 = vmand %vm1884_vm5, %vm1900_vm10  ;;  %v13215_v47 = vsub.f32 %v1627_v14, %v13183_v53  ;;  %9187 = vpow2.f32 %v1225_v62  ;;  %v5386_v1 = vpack.c.bf16 %v5358_v26, %v13156_v54 }
 0x667   :  { %8743 = vmatpush3.bf16.msra.mxu1 %v5294_v38  ;;  %v1613_v0 = vadd.f32 1.0, %v1597_v42  ;;  %v16497_v38 = vld [vmem:[#allocation25_spill] sm:$0xff]  ;;  %v2196_v8 = vsel %vm1916_vm11, 1, %v16091_v3  ;;  %v13226_v14 = vsub.f32 %v1628_v59, %v13197_v20  ;;  %vm1832_vm12 = vcmp.ge.f32.partialorder %v16506_v13, 0.0 }
 0x668   :  { %v5371_v43 = vpop.f32.mrf.mxu1  ;;  %2301 = vrot.lane.b32.xlu1 %v13187_v15, %s9237_s11  ;;  %v1332_v55 = vpop.permute.xlu1 %1331  ;;  %vm1848_vm5 = vcmp.le.f32.partialorder %v16506_v13, 7.0  ;;  %vm1833_vm11 = vcmp.ge.f32.partialorder %v13102_v10, 0.0  ;;  %v1721_v62 = vsub.f32 1.0, %v13171_v32 }
 0x669   :  { %v1369_v57 = vmul.f32 %v9182_v24, %v1332_v55  ;;  %v1581_v44 = vpop.permute.xlu0 %1580  ;;  %v1629_v50 = vmul.f32 3.5, %v1613_v0  ;;  %v16498_v24 = vpack.c.bf16 %v12823_v37, %v12778_v7  ;;  %v1197_v55 = vsub.f32 %v16496_v21, %v13175_v2  ;;  %vm1864_vm10 = vmand %vm1832_vm12, %vm1848_vm5 }
 0x66a   :  { %v8885_v63 = vpop.f32.mrf.mxu1  ;;  %v16501_v37 = vpack.c.bf16 %v13002_v49, %v12978_v52  ;;  %v1198_v52 = vsub.f32 %v16497_v38, %v13189_v27  ;;  %v1928_v56 = vsel %vm1864_vm10, 1, %v16091_v3 }
 0x66b   :  { %v5389_v22 = vpack.c.bf16 %v8885_v63, %v8884_v51  ;;  %2131 = vrot.lane.b32.xlu0 %v1369_v57, %s9238_s0  ;;  %v9184_v30 = vpop.eup %9183  ;;  %v1598_v51 = vadd.f32 %v1581_v44, %v16497_v38  ;;  %v13230_v26 = vfloor.f32 %v1629_v50  ;;  %v16502_v44 = vpack.c.bf16 %v13061_v34, %v13036_v31  ;;  %v16503_v34 = vld [vmem:[#allocation45_spill] sm:$0xff] }
 0x66c   :  { %v5374_v29 = vpop.f32.mrf.mxu1  ;;  %v1227_v35 = vmul.f32 1.442695, %v1197_v55  ;;  %v1229_v31 = vmul.f32 1.442695, %v1198_v52  ;;  %v16504_v39 = vpack.c.bf16 %v13051_v41, %v16503_v34 }
 0x66d   :  { %v5388_v4 = vpack.c.bf16 %v5374_v29, %v5371_v43  ;;  %8744 = vmatprep.subr.bf16.mxu1 %v5389_v22  ;;  %v1334_v18 = vpop.permute.xlu0 %1333  ;;  %v1614_v28 = vadd.f32 1.0, %v1598_v51  ;;  %v16500_v43 = vld [vmem:[#allocation50_spill] sm:$0xff]  ;;  %vm1885_vm7 = vcmp.ge.f32.partialorder %v13230_v26, -1.0  ;;  %vm1901_vm6 = vcmp.le.f32.partialorder %v13230_v26, 6.0  ;;  %v16510_v51 = vld [vmem:[#allocation17_spill] sm:$0xff] }
 0x66e   :  { %8745 = vmatpush3.bf16.msra.mxu1 %v5201_v5  ;;  %v1370_v45 = vmul.f32 %v9184_v30, %v1334_v18  ;;  %v5198_v54 = vpack.c.bf16 %v16500_v43, %v16499_v58  ;;  %vm1917_vm0 = vmand %vm1885_vm7, %vm1901_vm6  ;;  %9189 = vpow2.f32 %v1227_v35  ;;  %v13258_v27 = vsub.f32 %v1629_v50, %v13230_v26 }
 0x66f   :  { %8746 = vmatprep.subr.bf16.mxu1 %v5388_v4  ;;  %2223 = vrot.lane.b32.xlu0 %v2195_v61, %s9237_s11  ;;  %v1630_v63 = vmul.f32 3.5, %v1614_v28  ;;  %v2197_v29 = vsel %vm1917_vm0, 1, %v16091_v3  ;;  %9191 = vpow2.f32 %v1229_v31  ;;  %vm1849_vm7 = vcmp.le.f32.partialorder %v13102_v10, 7.0 }
 0x670   :  { %2133 = vrot.lane.b32.xlu1 %v1370_v45, %s9238_s0  ;;  %vm1865_vm6 = vmand %vm1833_vm11, %vm1849_vm7  ;;  %vm1834_vm11 = vcmp.ge.f32.partialorder %v13110_v48, 0.0  ;;  %vm1850_vm7 = vcmp.le.f32.partialorder %v13110_v48, 7.0 }
 0x671   :  { %v13241_v59 = vfloor.f32 %v1630_v63  ;;  %v1929_v45 = vsel %vm1865_vm6, 1, %v16091_v3  ;;  %vm1866_vm6 = vmand %vm1834_vm11, %vm1850_vm7 }
 0x672   :  { %8747 = vmatpush3.bf16.msra.mxu1 %v5200_v25  ;;  %v9186_v22 = vpop.eup %9185 }
 0x673   :  { %8748 = vmatprep.subr.bf16.mxu1 %v5387_v17  ;;  %2303 = vrot.lane.b32.xlu0 %v13215_v47, %s9237_s11  ;;  %v9188_v49 = vpop.eup %9187  ;;  %vm1886_vm3 = vcmp.ge.f32.partialorder %v13241_v59, -1.0  ;;  %vm1902_vm8 = vcmp.le.f32.partialorder %v13241_v59, 6.0  ;;  %v13268_v4 = vsub.f32 %v1630_v63, %v13241_v59  ;;  %v16509_v17 = vld [vmem:[#allocation18_spill] sm:$0xff] }
 0x674   :  { %2225 = vrot.lane.b32.xlu1 %v2196_v8, %s9237_s11  ;;  %vm1918_vm2 = vmand %vm1886_vm3, %vm1902_vm8 }
 0x675   :  { %v2198_v42 = vsel %vm1918_vm2, 1, %v16091_v3 }
 0x676   :  { %8749 = vmatpush3.bf16.msra.mxu1 %v16498_v24 }
 0x677   :  { %8750 = vmatprep.subr.bf16.mxu1 %v5386_v1 }
 0x678   :  { %2305 = vrot.lane.b32.xlu1 %v13226_v14, %s9237_s11 }
 0x67a   :  { %8751 = vmatpush3.bf16.msra.mxu1 %v5198_v54 }
 0x67b   :  { %v9190_v41 = vpop.eup %9189 }
 0x67c   :  { %v1336_v7 = vpop.permute.xlu1 %1335 }
 0x67d   :  { %5529 = vmatmul.mubr.bf16.vlgmr.msra.gmra.mxu1 %v16501_v37  ;;  %v1371_v57 = vmul.f32 %v9186_v22, %v1336_v7  ;;  %v13325_v22 = vld [vmem:[%s15870_s6 + $0x4] ss:$8 sps:$4 sm:$0xff]  }
 0x67e   :  { %5536 = vmatprep.mubr.bf16.mxu1 %v16502_v44  ;;  %16511 = vst [vmem:[#allocation53_spill] sm:$0xff] %v13325_v22  ;;  %v5570_v44 = vld [vmem:[%s15870_s6 + $0x8] sm:$0xff]  ;;  %5877 = vmatprep.subr.bf16.mxu1 %v13325_v22 }
 0x67f   :  { %2135 = vrot.lane.b32.xlu0 %v1371_v57, %s9238_s0  ;;  %v5569_v57 = vld [vmem:[%s15870_s6] sm:$0xff]  ;;  %5619 = vmatprep.subr.bf16.mxu0 %v13325_v22 }
 0x681   :  { %v1338_v2 = vpop.permute.xlu0 %1337 }
 0x682   :  { %v1372_v5 = vmul.f32 %v9188_v49, %v1338_v2  ;;  %v13347_v49 = vcombine.low %v5569_v57, %v5570_v44  ;;  %v16518_v57 = vmov 0 }
 0x683   :  { %2227 = vrot.lane.b32.xlu0 %v2197_v29, %s9237_s11  ;;  %v16512_v29 = vmov 0 }
 0x684   :  { %2137 = vrot.lane.b32.xlu1 %v1372_v5, %s9238_s0  ;;  %5878 = vmatpush1.bf16.msra.mxu1 %v13347_v49 }
 0x685   :  { %5537 = vmatmul.mubr.bf16.gmra.mxu1 %v16504_v39  ;;  %5620 = vmatpush1.bf16.msra.mxu0 %v13347_v49  ;;  %v16514_v39 = vld [vmem:[#allocation19_spill] sm:$0xff] }
 0x686   :  { %5544 = vmatprep.mubr.bf16.mxu1 %v5487_v19  ;;  %v9192_v19 = vpop.eup %9191  ;;  %6167 = vmatprep.subr.bf16.mxu1 %v13325_v22 }
 0x687   :  { %2307 = vrot.lane.b32.xlu0 %v13258_v27, %s9237_s11  ;;  %5732 = vmatprep.subr.bf16.mxu0 %v13325_v22 }
 0x688   :  { %2229 = vrot.lane.b32.xlu1 %v2198_v42, %s9237_s11 }
 0x68c   :  { %2309 = vrot.lane.b32.xlu1 %v13268_v4, %s9237_s11 }
 0x68d   :  { %5545 = vmatmul.mubr.bf16.gmra.mxu1 %v5486_v60  ;;  %v1927_v60 = vsel %vm1863_vm1, 1, %v16091_v3 }
 0x68e   :  { %5552 = vmatprep.mubr.bf16.mxu1 %v5489_v12 }
 0x691   :  { %v1340_v16 = vpop.permute.xlu1 %1339 }
 0x692   :  { %v1373_v11 = vmul.f32 %v9190_v41, %v1340_v16  ;;  %v16515_v41 = vmov 0 }
 0x694   :  { %2139 = vrot.lane.b32.xlu0 %v1373_v11, %s9238_s0  ;;  %v16517_v11 = vld [vmem:[#allocation20_spill] sm:$0xff] }
 0x695   :  { %5553 = vmatmul.mubr.bf16.gmra.mxu1 %v5488_v46  ;;  %v1342_v30 = vpop.permute.xlu0 %1341  ;;  %v16508_v46 = vld [vmem:[#allocation48_spill] sm:$0xff] }
 0x696   :  { %5895 = vmatprep.mubr.bf16.mxu1 %v16091_v3  ;;  %v1374_v18 = vmul.f32 %v9192_v19, %v1342_v30  ;;  %v1720_v23 = vsub.f32 1.0, %v16508_v46 }
 0x698   :  { %2575 = vrot.lane.b32.xlu0 %v16505_v40, %s9237_s11  ;;  %2141 = vrot.lane.b32.xlu1 %v1374_v18, %s9238_s0 }
 0x69c   :  { %2579 = vrot.lane.b32.xlu0 %v13102_v10, %s9237_s11  ;;  %2577 = vrot.lane.b32.xlu1 %v16506_v13, %s9237_s11 }
 0x69e   :  { %v1434_v12 = vpop.permute.xlu1 %1433 }
 0x69f   :  { %v1479_v0 = vadd.f32 %v1434_v12, %v16509_v17 }
 0x6a0   :  { %1951 = vrot.lane.b32.xlu0 %v1927_v60, %s9237_s11  ;;  %2581 = vrot.lane.b32.xlu1 %v13110_v48, %s9237_s11 }
 0x6a1   :  { %v1495_v10 = vadd.f32 1.0, %v1479_v0 }
 0x6a2   :  { %v1444_v25 = vpop.permute.xlu1 %1443 }
 0x6a3   :  { %v1439_v61 = vpop.permute.xlu0 %1438  ;;  %v1511_v58 = vmul.f32 3.5, %v1495_v10  ;;  %v1481_v42 = vadd.f32 %v1444_v25, %v16514_v39  ;;  %v1722_v10 = vsub.f32 1.0, %v13187_v15 }
 0x6a4   :  { %2031 = vrot.lane.b32.xlu0 %v1719_v6, %s9237_s11  ;;  %1953 = vrot.lane.b32.xlu1 %v1928_v56, %s9237_s11  ;;  %v1480_v1 = vadd.f32 %v1439_v61, %v16510_v51  ;;  %v1930_v61 = vsel %vm1866_vm6, 1, %v16091_v3 }
 0x6a5   :  { %v13314_v54 = vfloor.f32 %v1511_v58  ;;  %v1497_v13 = vadd.f32 1.0, %v1481_v42 }
 0x6a6   :  { %v1449_v50 = vpop.permute.xlu1 %1448  ;;  %v1496_v8 = vadd.f32 1.0, %v1480_v1 }
 0x6a7   :  { %v1454_v28 = vpop.permute.xlu0 %1453  ;;  %v13328_v37 = vsub.f32 %v1511_v58, %v13314_v54  ;;  %vm1735_vm0 = vcmp.ge.f32.partialorder %v13314_v54, 0.0  ;;  %vm1751_vm3 = vcmp.le.f32.partialorder %v13314_v54, 7.0  ;;  %v1482_v19 = vadd.f32 %v1449_v50, %v16517_v11 }
 0x6a8   :  { %2033 = vrot.lane.b32.xlu1 %v1720_v23, %s9237_s11  ;;  %v1512_v43 = vmul.f32 3.5, %v1496_v8  ;;  %vm13356_vm15 = vmand %vm1735_vm0, %vm1751_vm3  ;;  %v1513_v46 = vmul.f32 3.5, %v1497_v13  ;;  %v1483_v48 = vadd.f32 %v1454_v28, %v16492_v36  ;;  %vm1835_vm0 = vcmp.ge.f32.partialorder %v13183_v53, 0.0 }
 0x6a9   :  { %v16018_v2 = vsub.f32 1.0, %v13328_v37  ;;  %v16513_v29 = vsel %vm13356_vm15, 4294967295, %v16512_v29  ;;  %v1498_v56 = vadd.f32 1.0, %v1482_v19  ;;  %vm1851_vm3 = vcmp.le.f32.partialorder %v13183_v53, 7.0 }
 0x6aa   :  { %v1459_v24 = vpop.permute.xlu1 %1458  ;;  %v13316_v63 = vfloor.f32 %v1512_v43  ;;  %v13392_v25 = vfloor.f32 %v1513_v46  ;;  %v1499_v15 = vadd.f32 1.0, %v1483_v48  ;;  %vm1867_vm7 = vmand %vm1835_vm0, %vm1851_vm3  ;;  %v1723_v48 = vsub.f32 1.0, %v13215_v47 }
 0x6ab   :  { %v13318_v55 = vpop.permute.xlu0 %2215  ;;  %v1514_v23 = vmul.f32 3.5, %v1498_v56  ;;  %v1484_v50 = vadd.f32 %v1459_v24, %v16494_v9 }
 0x6ac   :  { %2583 = vrot.lane.b32.xlu1 %v13183_v53, %s9237_s11  ;;  %v13331_v7 = vsub.f32 %v1512_v43, %v13316_v63  ;;  %vm16009_vm8 = vcmp.ne.s32.totalorder %v13318_v55, 0  ;;  %vm1736_vm2 = vcmp.ge.f32.partialorder %v13316_v63, 0.0  ;;  %vm1752_vm9 = vcmp.le.f32.partialorder %v13316_v63, 7.0 }
 0x6ad   :  { %vm2255_vm12 = vmand %vm13356_vm15, %vm16009_vm8  ;;  %v13402_v0 = vsub.f32 %v1513_v46, %v13392_v25  ;;  %v1500_v24 = vadd.f32 1.0, %v1484_v50  ;;  %v1515_v19 = vmul.f32 3.5, %v1499_v15  ;;  %vm1784_vm8 = vcmp.ge.f32.partialorder %v13316_v63, -1.0 }
 0x6ae   :  { %v13320_v32 = vpop.permute.xlu1 %2217  ;;  %v16015_v5 = vsub.f32 1.0, %v13331_v7  ;;  %vm13374_vm5 = vmand %vm1736_vm2, %vm1752_vm9  ;;  %vm1737_vm2 = vcmp.ge.f32.partialorder %v13392_v25, 0.0  ;;  %vm1753_vm9 = vcmp.le.f32.partialorder %v13392_v25, 7.0 }
 0x6af   :  { %v13343_v35 = vpop.permute.xlu0 %2295  ;;  %vm16002_vm1 = vcmp.ne.s32.totalorder %v13320_v32, 0  ;;  %v16516_v41 = vsel %vm13374_vm5, 4294967295, %v16515_v41  ;;  %v16007_v28 = vsub.f32 1.0, %v13402_v0  ;;  %vm13427_vm6 = vmand %vm1737_vm2, %vm1753_vm9  ;;  %v13458_v56 = vfloor.f32 %v1515_v19 }
 0x6b0   :  { %1955 = vrot.lane.b32.xlu1 %v1929_v45, %s9237_s11  ;;  %v2335_v31 = vmul.f32 %v13343_v35, %v16018_v2  ;;  %vm2256_vm10 = vmand %vm13374_vm5, %vm16002_vm1  ;;  %v13396_v45 = vfloor.f32 %v1514_v23  ;;  %v16519_v57 = vsel %vm13427_vm6, 4294967295, %v16518_v57  ;;  %vm1836_vm2 = vcmp.ge.f32.partialorder %v13197_v20, 0.0 }
 0x6b1   :  { %vm1852_vm9 = vcmp.le.f32.partialorder %v13197_v20, 7.0 }
 0x6b2   :  { %v13345_v52 = vpop.permute.xlu1 %2297  ;;  %v2351_v30 = vsel %vm2255_vm12, %v2335_v31, 0.0  ;;  %v13409_v8 = vsub.f32 %v1514_v23, %v13396_v45  ;;  %vm1738_vm12 = vcmp.ge.f32.partialorder %v13396_v45, 0.0  ;;  %v16520_v31 = vmov 0 }
 0x6b3   :  { %v2336_v34 = vmul.f32 %v13345_v52, %v16015_v5 }
 0x6b4   :  { %2035 = vrot.lane.b32.xlu1 %v1721_v62, %s9237_s11  ;;  %v16006_v44 = vsub.f32 1.0, %v13409_v8 }
 0x6b5   :  { %v2352_v18 = vsel %vm2256_vm10, %v2336_v34, 0.0  ;;  %vm1754_vm10 = vcmp.le.f32.partialorder %v13396_v45, 7.0 }
 0x6b6   :  { %vm13433_vm4 = vmand %vm1738_vm12, %vm1754_vm10  ;;  %vm1739_vm12 = vcmp.ge.f32.partialorder %v13458_v56, 0.0  ;;  %vm1755_vm10 = vcmp.le.f32.partialorder %v13458_v56, 7.0 }
 0x6b7   :  { %v16521_v31 = vsel %vm13433_vm4, 4294967295, %v16520_v31 }
 0x6c9   :  { %v13378_v16 = vpop.permute.xlu0 %2127 }
 0x6ca   :  { %v2367_v60 = vmul.f32 %v2351_v30, %v13378_v16  ;;  %v1516_v30 = vmul.f32 3.5, %v1500_v24  ;;  %v13471_v24 = vsub.f32 %v1515_v19, %v13458_v56 }
 0x6cc   :  { %v13460_v46 = vfloor.f32 %v1516_v30 }
 0x6ce   :  { %v13385_v40 = vpop.permute.xlu1 %2129 }
 0x6cf   :  { %v2368_v33 = vmul.f32 %v2352_v18, %v13385_v40 }
 0x6d1   :  { %v2379_v6 = vpack.c.bf16 %v2368_v33, %v2367_v60  ;;  %v1931_v33 = vsel %vm1867_vm7, 1, %v16091_v3  ;;  %vm1740_vm7 = vcmp.ge.f32.partialorder %v13460_v46, 0.0 }
 0x6d3   :  { %5843 = vrot.lane.b32.xlu0 %v2379_v6, %s9239_s26 }
 0x6d6   :  { %v1464_v12 = vpop.permute.xlu0 %1463 }
 0x6d7   :  { %2585 = vrot.lane.b32.xlu0 %v13197_v20, %s9237_s11 }
 0x6da   :  { %v13399_v62 = vpop.permute.xlu0 %2219 }
 0x6db   :  { %v1469_v1 = vpop.permute.xlu1 %1468  ;;  %1957 = vrot.lane.b32.xlu0 %v1930_v61, %s9237_s11  ;;  %vm16000_vm11 = vcmp.ne.s32.totalorder %v13399_v62, 0 }
 0x6dc   :  { %vm2257_vm0 = vmand %vm13427_vm6, %vm16000_vm11  ;;  %v1486_v47 = vadd.f32 %v1469_v1, %v16497_v38  ;;  %v16522_v1 = vmov 0 }
 0x6dd   :  { %vm13494_vm11 = vmand %vm1739_vm12, %vm1755_vm10  ;;  %vm1853_vm12 = vcmp.le.f32.partialorder %v13230_v26, 7.0 }
 0x6de   :  { %v13411_v58 = vpop.permute.xlu0 %2299  ;;  %v16523_v1 = vsel %vm13494_vm11, 4294967295, %v16522_v1 }
 0x6df   :  { %v13417_v43 = vpop.permute.xlu1 %2221  ;;  %2037 = vrot.lane.b32.xlu0 %v1722_v10, %s9237_s11  ;;  %v2337_v53 = vmul.f32 %v13411_v58, %v16007_v28 }
 0x6e0   :  { %vm16001_vm13 = vcmp.ne.s32.totalorder %v13417_v43, 0 }
 0x6e1   :  { %vm2258_vm3 = vmand %vm13433_vm4, %vm16001_vm13  ;;  %v2353_v13 = vsel %vm2257_vm0, %v2337_v53, 0.0  ;;  %v13474_v53 = vsub.f32 %v1516_v30, %v13460_v46  ;;  %vm1756_vm0 = vcmp.le.f32.partialorder %v13460_v46, 7.0 }
 0x6e2   :  { %v13441_v42 = vpop.permute.xlu0 %2131  ;;  %vm13505_vm1 = vmand %vm1740_vm7, %vm1756_vm0  ;;  %vm1838_vm7 = vcmp.ge.f32.partialorder %v13241_v59, 0.0  ;;  %vm1854_vm0 = vcmp.le.f32.partialorder %v13241_v59, 7.0 }
 0x6e3   :  { %v13437_v34 = vpop.permute.xlu1 %2301  ;;  %2587 = vrot.lane.b32.xlu0 %v13230_v26, %s9237_s11  ;;  %v2369_v23 = vmul.f32 %v2353_v13, %v13441_v42  ;;  %v16003_v30 = vsub.f32 1.0, %v13474_v53 }
 0x6e4   :  { %v2338_v18 = vmul.f32 %v13437_v34, %v16006_v44 }
 0x6e6   :  { %v2354_v60 = vsel %vm2258_vm3, %v2338_v18, 0.0  ;;  %v13465_v50 = vpop.permute.xlu0 %2223  ;;  %v1485_v18 = vadd.f32 %v1464_v12, %v16496_v21  ;;  %v16005_v12 = vsub.f32 1.0, %v13471_v24  ;;  %vm1868_vm3 = vmand %vm1836_vm2, %vm1852_vm9  ;;  %vm1837_vm9 = vcmp.ge.f32.partialorder %v13230_v26, 0.0 }
 0x6e7   :  { %v13455_v6 = vpop.permute.xlu1 %2133  ;;  %1959 = vrot.lane.b32.xlu0 %v1931_v33, %s9237_s11  ;;  %vm16004_vm14 = vcmp.ne.s32.totalorder %v13465_v50, 0  ;;  %v2482_v21 = vmul.f32 %v13437_v34, %v13409_v8 }
 0x6e8   :  { %v2370_v61 = vmul.f32 %v2354_v60, %v13455_v6  ;;  %v1501_v20 = vadd.f32 1.0, %v1485_v18  ;;  %vm13514_vm2 = vmand %vm13494_vm11, %vm16004_vm14  ;;  %vm1799_vm14 = vcmp.le.f32.partialorder %v13314_v54, 6.0 }
 0x6e9   :  { %vm13543_vm11 = vmand %vm1838_vm7, %vm1854_vm0  ;;  %vm1802_vm7 = vcmp.le.f32.partialorder %v13396_v45, 6.0  ;;  %vm1787_vm0 = vcmp.ge.f32.partialorder %v13458_v56, -1.0 }
 0x6ea   :  { %v2380_v10 = vpack.c.bf16 %v2370_v61, %v2369_v23  ;;  %v13483_v13 = vpop.permute.xlu0 %2303  ;;  %v1502_v23 = vadd.f32 1.0, %v1486_v47  ;;  %v16524_v61 = vmov 0  ;;  %v1724_v47 = vsub.f32 1.0, %v13226_v14 }
 0x6eb   :  { %v13467_v15 = vpop.permute.xlu1 %2225  ;;  %2039 = vrot.lane.b32.xlu0 %v1723_v48, %s9237_s11  ;;  %v2339_v60 = vmul.f32 %v13483_v13, %v16005_v12  ;;  %v16525_v61 = vsel %vm13505_vm1, 4294967295, %v16524_v61  ;;  %v1932_v48 = vsel %vm1868_vm3, 1, %v16091_v3  ;;  %vm1783_vm3 = vcmp.ge.f32.partialorder %v13314_v54, -1.0 }
 0x6ec   :  { %5845 = vrot.lane.b32.xlu1 %v2380_v10, %s9239_s26  ;;  %vm16008_vm13 = vcmp.ne.s32.totalorder %v13467_v15, 0  ;;  %v1518_v14 = vmul.f32 3.5, %v1502_v23  ;;  %v16535_v10 = vmov 0 }
 0x6ed   :  { %vm2260_vm10 = vmand %vm13505_vm1, %vm16008_vm13  ;;  %vm1800_vm1 = vcmp.le.f32.partialorder %v13316_v63, 6.0 }
 0x6ee   :  { %vm1869_vm13 = vmand %vm1837_vm9, %vm1853_vm12  ;;  %vm1786_vm12 = vcmp.ge.f32.partialorder %v13396_v45, -1.0 }
 0x6ef   :  { %v13485_v19 = vpop.permute.xlu1 %2305  ;;  %v1933_v23 = vsel %vm1869_vm13, 1, %v16091_v3  ;;  %vm13590_vm4 = vmand %vm1786_vm12, %vm1802_vm7 }
 0x6f0   :  { %2589 = vrot.lane.b32.xlu1 %v13241_v59, %s9237_s11  ;;  %v2340_v33 = vmul.f32 %v13485_v19, %v16003_v30  ;;  %v1517_v30 = vmul.f32 3.5, %v1501_v20 }
 0x6f1   :  { %v13518_v18 = vpop.permute.xlu0 %2135 }
 0x6f2   :  { %v2356_v12 = vsel %vm2260_vm10, %v2340_v33, 0.0  ;;  %v13551_v33 = vfloor.f32 %v1517_v30  ;;  %vm16532_vm10 = vcmp.ne.s32.totalorder %v13318_v55, 0  ;;  %v13570_v55 = vfloor.f32 %v1518_v14 }
 0x6f4   :  { %1961 = vrot.lane.b32.xlu1 %v1932_v48, %s9237_s11  ;;  %v2355_v48 = vsel %vm13514_vm2, %v2339_v60, 0.0  ;;  %vm13547_vm2 = vmand %vm1783_vm3, %vm1799_vm14  ;;  %vm1803_vm3 = vcmp.le.f32.partialorder %v13458_v56, 6.0  ;;  %vm1757_vm6 = vcmp.le.f32.partialorder %v13551_v33, 7.0  ;;  %vm1789_vm5 = vcmp.ge.f32.partialorder %v13551_v33, -1.0 }
 0x6f5   :  { %v2371_v20 = vmul.f32 %v2355_v48, %v13518_v18  ;;  %vm13557_vm9 = vmand %vm13547_vm2, %vm16532_vm10  ;;  %vm16537_vm10 = vcmp.ne.s32.totalorder %v13320_v32, 0  ;;  %vm1805_vm15 = vcmp.le.f32.partialorder %v13551_v33, 6.0  ;;  %vm1742_vm7 = vcmp.ge.f32.partialorder %v13570_v55, 0.0 }
 0x6f6   :  { %v13534_v44 = vpop.permute.xlu1 %2137  ;;  %vm13564_vm14 = vmand %vm1784_vm8, %vm1800_vm1  ;;  %vm1788_vm8 = vcmp.ge.f32.partialorder %v13460_v46, -1.0  ;;  %vm1804_vm1 = vcmp.le.f32.partialorder %v13460_v46, 6.0  ;;  %v13617_v22 = vsub.f32 %v1517_v30, %v13551_v33  ;;  %v13620_v59 = vsub.f32 %v1518_v14, %v13570_v55 }
 0x6f7   :  { %v2372_v28 = vmul.f32 %v2356_v12, %v13534_v44  ;;  %v16536_v10 = vsel %vm13564_vm14, 4294967295, %v16535_v10  ;;  %vm13579_vm13 = vmand %vm13564_vm14, %vm16537_vm10  ;;  %vm1741_vm10 = vcmp.ge.f32.partialorder %v13551_v33, 0.0  ;;  %v2484_v48 = vmul.f32 %v13485_v19, %v13474_v53 }
 0x6f8   :  { %2041 = vrot.lane.b32.xlu1 %v1724_v47, %s9237_s11  ;;  %v2228_v47 = vpop.permute.xlu0 %2227  ;;  %vm13597_vm14 = vmand %vm1787_vm0, %vm1803_vm3  ;;  %vm1758_vm0 = vcmp.le.f32.partialorder %v13570_v55, 7.0  ;;  %v16551_v19 = vmov 0 }
 0x6f9   :  { %v2381_v12 = vpack.c.bf16 %v2372_v28, %v2371_v20  ;;  %v2480_v28 = vmul.f32 %v13345_v52, %v13331_v7  ;;  %v2479_v52 = vmul.f32 %v13343_v35, %v13328_v37  ;;  %v16540_v20 = vmov 0  ;;  %vm13608_vm12 = vmand %vm1788_vm8, %vm1804_vm1 }
 0x6fa   :  { %v16541_v20 = vsel %vm13590_vm4, 4294967295, %v16540_v20  ;;  %v2230_v32 = vpop.permute.xlu1 %2229  ;;  %v1934_v35 = vsel %vm13543_vm11, 1, %v16091_v3  ;;  %vm16546_vm11 = vcmp.ne.s32.totalorder %v13417_v43, 0  ;;  %v1726_v43 = vsub.f32 1.0, %v13268_v4  ;;  %vm13650_vm8 = vmand %vm1789_vm5, %vm1805_vm15 }
 0x6fb   :  { %5847 = vrot.lane.b32.xlu0 %v2381_v12, %s9239_s26  ;;  %v1725_v12 = vsub.f32 1.0, %v13258_v27  ;;  %vm13626_vm3 = vmand %vm13590_vm4, %vm16546_vm11  ;;  %v2495_v14 = vsel %vm13557_vm9, %v2479_v52, 0.0  ;;  %v16552_v19 = vsel %vm13650_vm8, 4294967295, %v16551_v19  ;;  %vm1790_vm9 = vcmp.ge.f32.partialorder %v13570_v55, -1.0 }
 0x6fc   :  { %1963 = vrot.lane.b32.xlu1 %v1933_v23, %s9237_s11  ;;  %v2496_v23 = vsel %vm13579_vm13, %v2480_v28, 0.0  ;;  %vm13636_vm13 = vmand %vm1741_vm10, %vm1757_vm6  ;;  %16553 = vst [vmem:[#allocation55_spill] sm:$0xff] %v16552_v19  ;;  %v2511_v38 = vmul.f32 %v2495_v14, %v13378_v16  ;;  %vm1806_vm1 = vcmp.le.f32.partialorder %v13570_v55, 6.0  ;;  %vm16556_vm15 = vcmp.ne.s32.totalorder %v13467_v15, 0 }
 0x6fd   :  { %v2512_v27 = vmul.f32 %v2496_v23, %v13385_v40  ;;  %v2308_v23 = vpop.permute.xlu0 %2307  ;;  %vm13659_vm6 = vmand %vm1742_vm7, %vm1758_vm0  ;;  %vm2245_vm10 = vcmp.ne.s32.totalorder %v2228_v47, 0  ;;  %vm16557_vm11 = vcmp.ne.s32.totalorder %v13465_v50, 0  ;;  %v16023_v15 = vsub.f32 1.0, %v13620_v59 }
 0x6fe   :  { %vm2468_vm5 = vmand %vm13608_vm12, %vm16556_vm15  ;;  %vm2246_vm15 = vcmp.ne.s32.totalorder %v2230_v32, 0 }
 0x6ff   :  { %1965 = vrot.lane.b32.xlu0 %v1934_v35, %s9237_s11  ;;  %v2483_v35 = vmul.f32 %v13483_v13, %v13471_v24  ;;  %v2310_v13 = vpop.permute.xlu1 %2309  ;;  %vm13674_vm7 = vmand %vm13597_vm14, %vm16557_vm11  ;;  %v2500_v52 = vsel %vm2468_vm5, %v2484_v48, 0.0  ;;  %v2523_v14 = vpack.c.bf16 %v2512_v27, %v2511_v38  ;;  %v2485_v27 = vmul.f32 %v2308_v23, %v13617_v22 }
 0x700   :  { %2043 = vrot.lane.b32.xlu1 %v1725_v12, %s9237_s11  ;;  %v16024_v12 = vsub.f32 1.0, %v13617_v22  ;;  %v2516_v50 = vmul.f32 %v2500_v52, %v13534_v44  ;;  %vm13685_vm0 = vmand %vm1790_vm9, %vm1806_vm1  ;;  %v2342_v48 = vmul.f32 %v2310_v13, %v16023_v15  ;;  %vm1785_vm9 = vcmp.ge.f32.partialorder %v13392_v25, -1.0 }
 0x701   :  { %vm13694_vm5 = vmand %vm13636_vm13, %vm2245_vm10  ;;  %vm1801_vm1 = vcmp.le.f32.partialorder %v13392_v25, 6.0  ;;  %v13928_v15 = vpack.c.bf16 %v16510_v51, %v16509_v17 }
 0x702   :  { %v2341_v34 = vmul.f32 %v2308_v23, %v16024_v12  ;;  %vm13710_vm11 = vmand %vm13650_vm8, %vm2245_vm10  ;;  %v2481_v23 = vmul.f32 %v13411_v58, %v13402_v0 }
 0x703   :  { %2045 = vrot.lane.b32.xlu0 %v1726_v43, %s9237_s11  ;;  %v2499_v43 = vsel %vm13674_vm7, %v2483_v35, 0.0  ;;  %v2486_v35 = vmul.f32 %v2310_v13, %v13620_v59  ;;  %vm2262_vm7 = vmand %vm13659_vm6, %vm2246_vm15  ;;  %v2498_v13 = vsel %vm13626_vm3, %v2482_v21, 0.0  ;;  %vm16568_vm3 = vcmp.ne.s32.totalorder %v13399_v62, 0 }
 0x704   :  { %v2515_v26 = vmul.f32 %v2499_v43, %v13518_v18  ;;  %vm2470_vm4 = vmand %vm13685_vm0, %vm2246_vm15  ;;  %v2357_v58 = vsel %vm13694_vm5, %v2341_v34, 0.0  ;;  %v2358_v12 = vsel %vm2262_vm7, %v2342_v48, 0.0  ;;  %v2514_v48 = vmul.f32 %v2498_v13, %v13455_v6 }
 0x705   :  { %vm13725_vm10 = vmand %vm1785_vm9, %vm1801_vm1  ;;  %v2502_v9 = vsel %vm2470_vm4, %v2486_v35, 0.0  ;;  %v2536_v62 = vmul.f32 8.0, %v13316_v63  ;;  %v2538_v13 = vmul.f32 8.0, %v13396_v45  ;;  %v2537_v63 = vmul.f32 8.0, %v13392_v25 }
 0x706   :  { %v13689_v39 = vpop.permute.xlu0 %2139  ;;  %v2525_v43 = vpack.c.bf16 %v2516_v50, %v2515_v26  ;;  %vm2465_vm15 = vmand %vm13725_vm10, %vm16568_vm3  ;;  %vm16572_vm1 = vnez %v16513_v29  ;;  %vm16573_vm7 = vnez %v16516_v41  ;;  %vm16575_vm3 = vnez %v16536_v10 }
 0x707   :  { %6133 = vrot.lane.b32.xlu0 %v2523_v14, %s9239_s26  ;;  %v2501_v14 = vsel %vm13710_vm11, %v2485_v27, 0.0  ;;  %v2373_v21 = vmul.f32 %v2357_v58, %v13689_v39  ;;  %v2497_v34 = vsel %vm2465_vm15, %v2481_v23, 0.0  ;;  %v2535_v27 = vmul.f32 8.0, %v13314_v54 }
 0x708   :  { %v2517_v32 = vmul.f32 %v2501_v14, %v13689_v39  ;;  %v2513_v58 = vmul.f32 %v2497_v34, %v13441_v42 }
 0x70a   :  { %v2576_v47 = vpop.permute.xlu0 %2575  ;;  %v13733_v28 = vpop.permute.xlu1 %2141  ;;  %v2524_v23 = vpack.c.bf16 %v2514_v48, %v2513_v58 }
 0x70b   :  { %v2374_v50 = vmul.f32 %v2358_v12, %v13733_v28  ;;  %v2518_v38 = vmul.f32 %v2502_v9, %v13733_v28  ;;  %6137 = vrot.lane.b32.xlu0 %v2525_v43, %s9239_s26  ;;  %v2615_v14 = vadd.f32 %v2576_v47, %v2535_v27  ;;  %v16574_v27 = vsub.f32 1.0, %v13331_v7 }
 0x70d   :  { %v2526_v26 = vpack.c.bf16 %v2518_v38, %v2517_v32  ;;  %v2382_v52 = vpack.c.bf16 %v2374_v50, %v2373_v21  ;;  %v16571_v50 = vsub.f32 1.0, %v13328_v37 }
 0x70e   :  { %v2580_v35 = vpop.permute.xlu0 %2579  ;;  %v2578_v36 = vpop.permute.xlu1 %2577 }
 0x70f   :  { %v2616_v19 = vadd.f32 %v2578_v36, %v2536_v62  ;;  %6139 = vrot.lane.b32.xlu0 %v2526_v26, %s9239_s26  ;;  %5849 = vrot.lane.b32.xlu1 %v2382_v52, %s9239_s26  ;;  %v2617_v47 = vadd.f32 %v2580_v35, %v2537_v63 }
 0x711   :  { %v2627_v9 = vpack.c.bf16 %v2616_v19, %v2615_v14  ;;  %v13789_v14 = vld [vmem:[%s15868_s4] ss:$0 sm:$0xff] }
 0x712   :  { %v1952_v12 = vpop.permute.xlu0 %1951  ;;  %v2582_v54 = vpop.permute.xlu1 %2581 }
 0x713   :  { %6135 = vrot.lane.b32.xlu1 %v2524_v23, %s9239_s26  ;;  %vm1975_vm4 = vcmp.ne.s32.totalorder %v1952_v12, 0  ;;  %v2618_v43 = vadd.f32 %v2582_v54, %v2538_v13 }
 0x714   :  { %vm13756_vm5 = vmand %vm13547_vm2, %vm1975_vm4 }
 0x715   :  { %v2628_v38 = vpack.c.bf16 %v2618_v43, %v2617_v47  ;;  %vm1991_vm11 = vmand %vm16572_vm1, %vm1975_vm4  ;;  %vm16576_vm4 = vcmask 261120   ;;  %v13796_v43 = vld [vmem:[%s15870_s6 + $0x14] ss:$8 sps:$4 sm:$0xff]  }
 0x716   :  { %v2032_v21 = vpop.permute.xlu0 %2031  ;;  %v1954_v32 = vpop.permute.xlu1 %1953  ;;  %vm16580_vm1 = vmmov %vm16576_vm4 }
 0x717   :  { %v2407_v36 = vmul.f32 %v2032_v21, %v13328_v37  ;;  %v2071_v45 = vmul.f32 %v2032_v21, %v16571_v50  ;;  %5575 = vrot.lane.b32.xlu1 %v2627_v9, %s9239_s26  ;;  %vm1976_vm9 = vcmp.ne.s32.totalorder %v1954_v32, 0  ;;  %v2539_v50 = vmul.f32 8.0, %v13458_v56 }
 0x718   :  { %vm1992_vm2 = vmand %vm16573_vm7, %vm1976_vm9 }
 0x719   :  { %v2423_v25 = vsel %vm13756_vm5, %v2407_v36, 0.0  ;;  %v2087_v60 = vsel %vm1991_vm11, %v2071_v45, 0.0  ;;  %vm2392_vm15 = vmand %vm16575_vm3, %vm1976_vm9  ;;  %vm16578_vm5 = vcmask 130048   ;;  %vm16583_vm3 = vnez %v16519_v57 }
 0x71a   :  { %v2034_v34 = vpop.permute.xlu1 %2033  ;;  %v2167_v29 = vmul.f32 %v13378_v16, %v2087_v60  ;;  %v13777_v26 = vmul.f32 %v2423_v25, %v13378_v16  ;;  %vm16579_vm9 = vmmov %vm16576_vm4  ;;  %v2540_v25 = vmul.f32 8.0, %v13460_v46  ;;  %v16581_v46 = vsub.f32 1.0, %v13402_v0 }
 0x71b   :  { %v2072_v48 = vmul.f32 %v2034_v34, %v16574_v27  ;;  %v2408_v37 = vmul.f32 %v2034_v34, %v13331_v7  ;;  %5577 = vrot.lane.b32.xlu1 %v2628_v38, %s9239_s26  ;;  %vm16582_vm7 = vmmov %vm16580_vm1 }
 0x71d   :  { %v2088_v62 = vsel %vm1992_vm2, %v2072_v48, 0.0  ;;  %v2424_v35 = vsel %vm2392_vm15, %v2408_v37, 0.0 }
 0x71e   :  { %v2168_v41 = vmul.f32 %v13385_v40, %v2088_v62  ;;  %v13781_v52 = vmul.f32 %v2424_v35, %v13385_v40  ;;  %v2584_v16 = vpop.permute.xlu1 %2583 }
 0x71f   :  { %v2619_v60 = vadd.f32 %v2584_v16, %v2539_v50 }
 0x720   :  { %v2179_v58 = vpack.c.bf16 %v2168_v41, %v2167_v29  ;;  %v2451_v7 = vpack.c.bf16 %v13781_v52, %v13777_v26 }
 0x722   :  { %5698 = vrot.lane.b32.xlu0 %v2179_v58, %s9239_s26  ;;  %v13798_v21 = vpop.permute.xlu1 %1955 }
 0x723   :  { %vm1977_vm11 = vcmp.ne.s32.totalorder %v13798_v21, 0 }
 0x724   :  { %vm1993_vm15 = vmand %vm16583_vm3, %vm1977_vm11 }
 0x725   :  { %vm16589_vm3 = vmmov %vm16580_vm1 }
 0x726   :  { %v13812_v37 = vpop.permute.xlu1 %2035 }
 0x727   :  { %v2073_v58 = vmul.f32 %v13812_v37, %v16581_v46  ;;  %v2541_v46 = vmul.f32 8.0, %v13551_v33 }
 0x73d   :  { %v8752_v10 = vpop.f32.mrf.mxu1 }
 0x73f   :  { %v8753_v9 = vpop.f32.mrf.mxu1 }
 0x740   :  { %v8754_v12 = vadd.f32 %v8753_v9, %v8752_v10 }
 0x741   :  { %v8755_v23 = vpop.f32.mrf.mxu1 }
 0x742   :  { %v5531_v54 = vadd.f32 %v8754_v12, %v13789_v14 }
 0x743   :  { %v8756_v40 = vpop.f32.mrf.mxu1 }
 0x744   :  { %5561 = vst.msk [vmem:[#allocation2] sm:$0xff] %vm16576_vm4, %v5531_v54  ;;  %v8757_v13 = vadd.f32 %v8756_v40, %v8755_v23  ;;  %v2089_v54 = vsel %vm1993_vm15, %v2073_v58, 0.0  ;;  %v16584_v40 = vsub.f32 1.0, %v13409_v8  ;;  %vm16585_vm4 = vnez %v16521_v31 }
 0x745   :  { %v8758_v63 = vpop.f32.mrf.mxu1  ;;  %v13801_v36 = vpop.permute.xlu0 %5843  ;;  %vm16590_vm15 = vcmask 130048   ;;  %v2542_v58 = vmul.f32 8.0, %v13570_v55  ;;  %v16593_v55 = vsub.f32 1.0, %v13474_v53 }
 0x746   :  { %v5534_v32 = vadd.f32 %v8757_v13, %v13789_v14  ;;  %16577 = vst [vmem:[#allocation54_spill] sm:$0xff] %v13801_v36  ;;  %8612 = vmatmul.mubr.msk.bf16.vlgmr.msra.gmra.mxu1 %vm16578_vm5, %v13801_v36 }
 0x747   :  { %v8759_v47 = vpop.f32.mrf.mxu1  ;;  %5905 = vmatprep.mubr.bf16.mxu1 %v16091_v3  ;;  %6168 = vmatpush1.bf16.msra.mxu1 %v13347_v49 }
 0x748   :  { %5562 = vst.msk [vmem:[#allocation2 + $0x8] sm:$0xff] %vm16579_vm9, %v5534_v32  ;;  %v8760_v19 = vadd.f32 %v8759_v47, %v8758_v63  ;;  %6389 = vmatprep.subr.bf16.mxu1 %v13796_v43  ;;  %vm16586_vm9 = vmmov %vm16580_vm1 }
 0x749   :  { %v8761_v45 = vpop.f32.mrf.mxu1  ;;  %v2586_v34 = vpop.permute.xlu0 %2585 }
 0x74a   :  { %v5539_v38 = vadd.f32 %v8760_v19, %v13789_v14  ;;  %v2620_v27 = vadd.f32 %v2586_v34, %v2540_v25  ;;  %v2169_v19 = vmul.f32 %v13441_v42, %v2089_v54 }
 0x74b   :  { %v8762_v48 = vpop.f32.mrf.mxu1 }
 0x74c   :  { %5563 = vst.msk [vmem:[#allocation2 + $0x10] sm:$0xff] %vm16580_vm1, %v5539_v38  ;;  %v8763_v62 = vadd.f32 %v8762_v48, %v8761_v45  ;;  %v2629_v35 = vpack.c.bf16 %v2620_v27, %v2619_v60 }
 0x74d   :  { %v8764_v29 = vpop.f32.mrf.mxu1  ;;  %v13816_v41 = vpop.permute.xlu0 %1957 }
 0x74e   :  { %v5542_v56 = vadd.f32 %v8763_v62, %v13789_v14  ;;  %5579 = vrot.lane.b32.xlu1 %v2629_v35, %s9239_s26  ;;  %vm1978_vm2 = vcmp.ne.s32.totalorder %v13816_v41, 0 }
 0x74f   :  { %v8765_v10 = vpop.f32.mrf.mxu1  ;;  %vm1994_vm5 = vmand %vm16585_vm4, %vm1978_vm2 }
 0x750   :  { %5564 = vst.msk [vmem:[#allocation2 + $0x18] sm:$0xff] %vm16582_vm7, %v5542_v56  ;;  %v8766_v9 = vadd.f32 %v8765_v10, %v8764_v29  ;;  %vm16587_vm7 = vmmov %vm16580_vm1 }
 0x751   :  { %v8767_v16 = vpop.f32.mrf.mxu1  ;;  %v13830_v23 = vpop.permute.xlu0 %2037 }
 0x752   :  { %v5547_v12 = vadd.f32 %v8766_v9, %v13789_v14  ;;  %v2074_v13 = vmul.f32 %v13830_v23, %v16584_v40  ;;  %v16591_v40 = vsub.f32 1.0, %v13471_v24 }
 0x753   :  { %v8768_v63 = vpop.f32.mrf.mxu1 }
 0x754   :  { %5565 = vst.msk [vmem:[#allocation2 + $0x20] sm:$0xff] %vm16586_vm9, %v5547_v12  ;;  %v8769_v32 = vadd.f32 %v8768_v63, %v8767_v16  ;;  %v2090_v57 = vsel %vm1994_vm5, %v2074_v13, 0.0  ;;  %vm16592_vm9 = vnez %v16523_v1 }
 0x755   :  { %v8770_v47 = vpop.f32.mrf.mxu1  ;;  %v2170_v50 = vmul.f32 %v13455_v6, %v2090_v57  ;;  %v2588_v60 = vpop.permute.xlu0 %2587 }
 0x756   :  { %v5550_v45 = vadd.f32 %v8769_v32, %v13789_v14  ;;  %v2621_v9 = vadd.f32 %v2588_v60, %v2541_v46  ;;  %v16602_v46 = vld [vmem:[#allocation21_spill] sm:$0xff] }
 0x757   :  { %v8771_v25 = vpop.f32.mrf.mxu1  ;;  %v2180_v38 = vpack.c.bf16 %v2170_v50, %v2169_v19 }
 0x758   :  { %5566 = vst.msk [vmem:[#allocation2 + $0x28] sm:$0xff] %vm16580_vm1, %v5550_v45  ;;  %v8772_v34 = vadd.f32 %v8771_v25, %v8770_v47 }
 0x759   :  { %v8773_v27 = vpop.f32.mrf.mxu1  ;;  %5700 = vrot.lane.b32.xlu0 %v2180_v38, %s9239_s26  ;;  %v1960_v29 = vpop.permute.xlu0 %1959 }
 0x75a   :  { %v5555_v31 = vadd.f32 %v8772_v34, %v13789_v14  ;;  %vm1979_vm4 = vcmp.ne.s32.totalorder %v1960_v29, 0 }
 0x75b   :  { %v8774_v48 = vpop.f32.mrf.mxu1  ;;  %vm1995_vm1 = vmand %vm16592_vm9, %vm1979_vm4 }
 0x75c   :  { %5567 = vst.msk [vmem:[#allocation2 + $0x30] sm:$0xff] %vm16587_vm7, %v5555_v31  ;;  %v8775_v62 = vadd.f32 %v8774_v48, %v8773_v27  ;;  %vm16594_vm7 = vnez %v16525_v61  ;;  %v2410_v31 = vmul.f32 %v13830_v23, %v13409_v8  ;;  %v2409_v48 = vmul.f32 %v13812_v37, %v13402_v0 }
 0x75d   :  { %v2040_v12 = vpop.permute.xlu0 %2039  ;;  %v16600_v23 = vsub.f32 1.0, %v13620_v59 }
 0x75e   :  { %v5558_v35 = vadd.f32 %v8775_v62, %v13789_v14  ;;  %v13848_v56 = vpop.permute.xlu1 %5845  ;;  %v2075_v13 = vmul.f32 %v2040_v12, %v16591_v40  ;;  %v2411_v25 = vmul.f32 %v2040_v12, %v13471_v24  ;;  %v16596_v24 = vsub.f32 1.0, %v13617_v22  ;;  %v13963_v12 = vld [vmem:[%s15870_s6 + $0x10] ss:$8 sps:$4 sm:$0xff]  }
 0x75f   :  { %16588 = vst [vmem:[#allocation58_spill] sm:$0xff] %v13848_v56  ;;  %8613 = vmatmul.mubr.msk.bf16.gmra.mxu1 %vm16590_vm15, %v13848_v56  ;;  %v16612_v40 = vld [vmem:[#allocation23_spill] sm:$0xff] }
 0x760   :  { %5568 = vst.msk [vmem:[#allocation2 + $0x38] sm:$0xff] %vm16589_vm3, %v5558_v35  ;;  %5915 = vmatprep.mubr.bf16.mxu1 %v16091_v3  ;;  %v2091_v63 = vsel %vm1995_vm1, %v2075_v13, 0.0  ;;  %vm2395_vm1 = vmand %vm13597_vm14, %vm1979_vm4  ;;  %vm16597_vm14 = vnez %v16541_v20  ;;  %v16613_v13 = vld [vmem:[#allocation25_spill] sm:$0xff] }
 0x761   :  { %v2171_v50 = vmul.f32 %v13518_v18, %v2091_v63  ;;  %v2427_v60 = vsel %vm2395_vm1, %v2411_v25, 0.0  ;;  %vm13897_vm4 = vmand %vm16597_vm14, %vm1978_vm2  ;;  %v16614_v63 = vld [vmem:[#allocation53_spill] sm:$0xff] }
 0x762   :  { %v2590_v10 = vpop.permute.xlu1 %2589  ;;  %v2443_v8 = vmul.f32 %v2427_v60, %v13518_v18  ;;  %v2426_v0 = vsel %vm13897_vm4, %v2410_v31, 0.0  ;;  %vm2393_vm2 = vmand %vm13725_vm10, %vm1977_vm11 }
 0x763   :  { %v2622_v16 = vadd.f32 %v2590_v10, %v2542_v58  ;;  %v2425_v52 = vsel %vm2393_vm2, %v2409_v48, 0.0  ;;  %v16603_v58 = vld [vmem:[#allocation22_spill] sm:$0xff] }
 0x764   :  { %v2441_v41 = vmul.f32 %v2425_v52, %v13441_v42  ;;  %v13940_v10 = vpack.c.bf16 %v16603_v58, %v16602_v46 }
 0x765   :  { %v2630_v54 = vpack.c.bf16 %v2622_v16, %v2621_v9  ;;  %v16608_v9 = vld [vmem:[#allocation20_spill] sm:$0xff] }
 0x766   :  { %v1962_v14 = vpop.permute.xlu1 %1961 }
 0x767   :  { %5581 = vrot.lane.b32.xlu1 %v2630_v54, %s9239_s26  ;;  %vm1980_vm5 = vcmp.ne.s32.totalorder %v1962_v14, 0 }
 0x768   :  { %vm1996_vm3 = vmand %vm16594_vm7, %vm1980_vm5 }
 0x769   :  { %vm2396_vm9 = vmand %vm13608_vm12, %vm1980_vm5 }
 0x76a   :  { %v2042_v33 = vpop.permute.xlu1 %2041 }
 0x76b   :  { %v2076_v32 = vmul.f32 %v2042_v33, %v16593_v55  ;;  %v2412_v47 = vmul.f32 %v2042_v33, %v13474_v53  ;;  %v13979_v33 = vpack.c.bf16 %v16613_v13, %v16612_v40 }
 0x76d   :  { %v2092_v57 = vsel %vm1996_vm3, %v2076_v32, 0.0  ;;  %v13868_v19 = vpop.permute.xlu0 %5847  ;;  %v2428_v53 = vsel %vm2396_vm9, %v2412_v47, 0.0  ;;  %v14022_v47 = vld [vmem:[%s15870_s6 + $0x24] ss:$8 sps:$4 sm:$0xff]  }
 0x76e   :  { %16595 = vst [vmem:[#allocation56_spill] sm:$0xff] %v13868_v19  ;;  %v2172_v45 = vmul.f32 %v13534_v44, %v2092_v57  ;;  %v1964_v1 = vpop.permute.xlu1 %1963  ;;  %8614 = vmatmul.mubr.msk.bf16.gmra.mxu1 %vm16590_vm15, %v13868_v19  ;;  %v2444_v2 = vmul.f32 %v2428_v53, %v13534_v44 }
 0x76f   :  { %5925 = vmatprep.mubr.bf16.mxu1 %v16091_v3  ;;  %vm1981_vm7 = vcmp.ne.s32.totalorder %v1964_v1, 0 }
 0x770   :  { %v2181_v61 = vpack.c.bf16 %v2172_v45, %v2171_v50  ;;  %vm1997_vm5 = vmand %vm13636_vm13, %vm1981_vm7  ;;  %v2453_v20 = vpack.c.bf16 %v2444_v2, %v2443_v8 }
 0x771   :  { %v1966_v38 = vpop.permute.xlu0 %1965  ;;  %vm2397_vm10 = vmand %vm13650_vm8, %vm1981_vm7 }
 0x772   :  { %v2044_v34 = vpop.permute.xlu1 %2043  ;;  %5702 = vrot.lane.b32.xlu0 %v2181_v61, %s9239_s26  ;;  %vm1982_vm12 = vcmp.ne.s32.totalorder %v1966_v38, 0  ;;  %vm16605_vm8 = vmmov %vm16590_vm15 }
 0x773   :  { %v2077_v27 = vmul.f32 %v2044_v34, %v16596_v24  ;;  %vm1998_vm13 = vmand %vm13659_vm6, %vm1982_vm12  ;;  %v2413_v4 = vmul.f32 %v2044_v34, %v13617_v22 }
 0x774   :  { %vm2398_vm6 = vmand %vm13685_vm0, %vm1982_vm12 }
 0x775   :  { %v2046_v5 = vpop.permute.xlu0 %2045  ;;  %v2093_v44 = vsel %vm1997_vm5, %v2077_v27, 0.0  ;;  %v2429_v22 = vsel %vm2397_vm10, %v2413_v4, 0.0  ;;  %vm16610_vm0 = vmmov %vm16605_vm8  ;;  %v16651_v4 = vld [vmem:[#allocation42_spill] sm:$0xff] }
 0x776   :  { %v2078_v35 = vmul.f32 %v2046_v5, %v16600_v23  ;;  %5988 = vrot.lane.b32.xlu0 %v2451_v7, %s9239_s26  ;;  %v2414_v18 = vmul.f32 %v2046_v5, %v13620_v59  ;;  %v2173_v37 = vmul.f32 %v13689_v39, %v2093_v44  ;;  %v2442_v7 = vmul.f32 %v2426_v0, %v13455_v6  ;;  %vm16611_vm11 = vmmov %vm16610_vm0  ;;  %v14157_v23 = vld [vmem:[%s15870_s6 + $0x34] ss:$8 sps:$4 sm:$0xff]  }
 0x777   :  { %v2445_v17 = vmul.f32 %v2429_v22, %v13689_v39  ;;  %v16607_v39 = vld [vmem:[#allocation19_spill] sm:$0xff]  ;;  %vm16615_vm3 = vmmov %vm16610_vm0 }
 0x778   :  { %v2094_v30 = vsel %vm1998_vm13, %v2078_v35, 0.0  ;;  %v2430_v21 = vsel %vm2398_vm6, %v2414_v18, 0.0  ;;  %v2452_v11 = vpack.c.bf16 %v2442_v7, %v2441_v41  ;;  %v13958_v16 = vpack.c.bf16 %v16608_v9, %v16607_v39  ;;  %vm16616_vm15 = vmmov %vm16610_vm0  ;;  %v16652_v41 = vld [vmem:[#allocation44_spill] sm:$0xff] }
 0x779   :  { %v2174_v26 = vmul.f32 %v13733_v28, %v2094_v30  ;;  %v2446_v6 = vmul.f32 %v2430_v21, %v13733_v28  ;;  %v13969_v14 = vpop.permute.xlu0 %6133  ;;  %vm16618_vm9 = vmmov %vm16610_vm0 }
 0x77a   :  { %5992 = vrot.lane.b32.xlu0 %v2453_v20, %s9239_s26  ;;  %16609 = vst [vmem:[#allocation59_spill] sm:$0xff] %v13969_v14  ;;  %vm16620_vm1 = vmmov %vm16610_vm0 }
 0x77b   :  { %v2182_v59 = vpack.c.bf16 %v2174_v26, %v2173_v37  ;;  %v2454_v42 = vpack.c.bf16 %v2446_v6, %v2445_v17  ;;  %vm16621_vm7 = vmmov %vm16610_vm0 }
 0x77c   :  { %vm16622_vm12 = vmmov %vm16610_vm0 }
 0x77d   :  { %5704 = vrot.lane.b32.xlu1 %v2182_v59, %s9239_s26  ;;  %v14007_v32 = vpop.permute.xlu0 %6137  ;;  %vm16623_vm5 = vmmov %vm16610_vm0 }
 0x77e   :  { %8114 = vrot.lane.b32.xlu0 %v13928_v15, %s9240_s14  ;;  %16617 = vst [vmem:[#allocation64_spill] sm:$0xff] %v14007_v32  ;;  %vm16625_vm14 = vmmov %vm16610_vm0 }
 0x77f   :  { %vm16626_vm4 = vmmov %vm16610_vm0 }
 0x780   :  { %vm16627_vm13 = vmmov %vm16610_vm0 }
 0x781   :  { %v13943_v51 = vpop.permute.xlu1 %5849  ;;  %5990 = vrot.lane.b32.xlu1 %v2452_v11, %s9239_s26  ;;  %v14014_v57 = vpop.permute.xlu0 %6139  ;;  %vm16628_vm2 = vmmov %vm16610_vm0 }
 0x782   :  { %16604 = vst [vmem:[#allocation60_spill] sm:$0xff] %v13943_v51  ;;  %8118 = vrot.lane.b32.xlu0 %v13940_v10, %s9240_s14  ;;  %8615 = vmatmul.mubr.msk.bf16.gmra.mxu1 %vm16605_vm8, %v13943_v51  ;;  %16619 = vst [vmem:[#allocation66_spill] sm:$0xff] %v14014_v57 }
 0x783   :  { %6185 = vmatprep.mubr.bf16.mxu1 %v16091_v3  ;;  %vm16629_vm6 = vmmov %vm16610_vm0 }
 0x784   :  { %vm16630_vm10 = vmmov %vm16610_vm0 }
 0x785   :  { %v13951_v28 = vpop.permute.xlu1 %6135  ;;  %5994 = vrot.lane.b32.xlu1 %v2454_v42, %s9239_s26  ;;  %vm16631_vm8 = vmmov %vm16610_vm0 }
 0x786   :  { %16606 = vst [vmem:[#allocation62_spill] sm:$0xff] %v13951_v28  ;;  %8203 = vrot.lane.b32.xlu0 %v13928_v15, %s9237_s11 }
 0x789   :  { %v13965_v54 = vpop.permute.xlu1 %5575  ;;  %8116 = vrot.lane.b32.xlu1 %v13958_v16, %s9240_s14 }
 0x78a   :  { %8604 = vmatmul.mubr.msk.bf16.vlgmr.msra.gmra.mxu0 %vm16610_vm0, %v13965_v54  ;;  %8207 = vrot.lane.b32.xlu0 %v13940_v10, %s9237_s11 }
 0x78b   :  { %8620 = vmatmul.mubr.msk.bf16.vlgmr.msra.gmra.mxu1 %vm16611_vm11, %v13969_v14  ;;  %5647 = vmatprep.mubr.bf16.mxu0 %v16091_v3  ;;  %vm16632_vm11 = vmmov %vm16610_vm0 }
 0x78c   :  { %6195 = vmatprep.mubr.bf16.mxu1 %v16091_v3  ;;  %6390 = vmatpush1.bf16.msra.mxu1 %v13963_v12 }
 0x78d   :  { %8120 = vrot.lane.b32.xlu1 %v13979_v33, %s9240_s14  ;;  %5733 = vmatpush1.bf16.msra.mxu0 %v13347_v49  ;;  %v13991_v55 = vpop.permute.xlu1 %5577 }
 0x78e   :  { %8292 = vrot.lane.b32.xlu0 %v13928_v15, %s9241_s15  ;;  %6631 = vmatprep.subr.bf16.mxu1 %v13796_v43 }
 0x78f   :  { %6022 = vmatprep.subr.bf16.mxu0 %v16614_v63 }
 0x791   :  { %8205 = vrot.lane.b32.xlu1 %v13958_v16, %s9237_s11 }
 0x792   :  { %8605 = vmatmul.mubr.msk.bf16.gmra.mxu0 %vm16615_vm3, %v13991_v55  ;;  %8296 = vrot.lane.b32.xlu0 %v13940_v10, %s9241_s15  ;;  %vm16633_vm3 = vmmov %vm16610_vm0 }
 0x793   :  { %8621 = vmatmul.mubr.msk.bf16.gmra.mxu1 %vm16616_vm15, %v13951_v28  ;;  %5657 = vmatprep.mubr.bf16.mxu0 %v16091_v3  ;;  %vm16634_vm15 = vmmov %vm16610_vm0 }
 0x794   :  { %6205 = vmatprep.mubr.bf16.mxu1 %v16091_v3  ;;  %v14024_v50 = vpop.permute.xlu0 %5698 }
 0x795   :  { %8209 = vrot.lane.b32.xlu1 %v13979_v33, %s9237_s11 }
 0x799   :  { %8294 = vrot.lane.b32.xlu1 %v13958_v16, %s9241_s15 }
 0x79b   :  { %8622 = vmatmul.mubr.msk.bf16.gmra.mxu1 %vm16618_vm9, %v14007_v32  ;;  %vm16635_vm9 = vmmov %vm16610_vm0 }
 0x79c   :  { %6215 = vmatprep.mubr.bf16.mxu1 %v16091_v3 }
 0x79d   :  { %8298 = vrot.lane.b32.xlu1 %v13979_v33, %s9241_s15 }
 0x7a3   :  { %8623 = vmatmul.mubr.msk.bf16.gmra.mxu1 %vm16620_vm1, %v14014_v57  ;;  %vm16636_vm1 = vmmov %vm16610_vm0 }
 0x7a4   :  { %6407 = vmatprep.mubr.bf16.mxu1 %v16091_v3 }
 0x7ab   :  { %8630 = vmatmul.mubr.msk.bf16.vlgmr.msra.gmra.mxu1 %vm16621_vm7, %v14024_v50  ;;  %vm16637_vm7 = vmmov %vm16610_vm0 }
 0x7ac   :  { %6417 = vmatprep.mubr.bf16.mxu1 %v16091_v3  ;;  %6632 = vmatpush1.bf16.msra.mxu1 %v13963_v12 }
 0x7ad   :  { %6885 = vmatprep.subr.bf16.mxu1 %v14022_v47 }
 0x7c0   :  { %v14031_v45 = vpop.permute.xlu1 %5579 }
 0x7c1   :  { %8606 = vmatmul.mubr.msk.bf16.gmra.mxu0 %vm16622_vm12, %v14031_v45  ;;  %vm16638_vm12 = vmmov %vm16610_vm0 }
 0x7c2   :  { %5667 = vmatprep.mubr.bf16.mxu0 %v16091_v3 }
 0x7cb   :  { %v14036_v1 = vpop.permute.xlu0 %5700 }
 0x7cc   :  { %8631 = vmatmul.mubr.msk.bf16.gmra.mxu1 %vm16623_vm5, %v14036_v1  ;;  %vm16639_vm5 = vmmov %vm16610_vm0 }
 0x7cd   :  { %6427 = vmatprep.mubr.bf16.mxu1 %v16091_v3 }
 0x7d9   :  { %v14041_v25 = vpop.permute.xlu1 %5581 }
 0x7da   :  { %16624 = vst [vmem:[#allocation63_spill] sm:$0xff] %v14041_v25  ;;  %8607 = vmatmul.mubr.msk.bf16.gmra.mxu0 %vm16625_vm14, %v14041_v25  ;;  %vm16640_vm14 = vmmov %vm16610_vm0 }
 0x7db   :  { %5750 = vmatprep.mubr.bf16.mxu0 %v16091_v3 }
 0x7e2   :  { %8608 = vmatmul.mubr.msk.bf16.vlgmr.msra.gmra.mxu0 %vm16626_vm4, %v14024_v50  ;;  %vm16641_vm4 = vmmov %vm16610_vm0 }
 0x7e3   :  { %5760 = vmatprep.mubr.bf16.mxu0 %v16091_v3  ;;  %6023 = vmatpush1.bf16.msra.mxu0 %v13347_v49  ;;  %v14070_v49 = vld [vmem:[%s15870_s6 + $0x20] ss:$8 sps:$4 sm:$0xff]  }
 0x7e4   :  { %v14050_v61 = vpop.permute.xlu0 %5702  ;;  %6300 = vmatprep.subr.bf16.mxu0 %v13796_v43 }
 0x7e5   :  { %8632 = vmatmul.mubr.msk.bf16.gmra.mxu1 %vm16627_vm13, %v14050_v61  ;;  %vm16642_vm13 = vmmov %vm16610_vm0 }
 0x7e6   :  { %6437 = vmatprep.mubr.bf16.mxu1 %v16091_v3 }
 0x7e8   :  { %v14072_v38 = vpop.permute.xlu0 %5988 }
 0x7ea   :  { %8609 = vmatmul.mubr.msk.bf16.gmra.mxu0 %vm16628_vm2, %v14036_v1  ;;  %vm16643_vm2 = vmmov %vm16610_vm0 }
 0x7eb   :  { %5770 = vmatprep.mubr.bf16.mxu0 %v16091_v3 }
 0x7ec   :  { %v14092_v60 = vpop.permute.xlu0 %5992 }
 0x7ef   :  { %v14059_v53 = vpop.permute.xlu1 %5704 }
 0x7f0   :  { %8633 = vmatmul.mubr.msk.bf16.gmra.mxu1 %vm16629_vm6, %v14059_v53  ;;  %vm16644_vm6 = vmmov %vm16610_vm0 }
 0x7f1   :  { %6649 = vmatprep.mubr.bf16.mxu1 %v16091_v3 }
 0x7f2   :  { %8610 = vmatmul.mubr.msk.bf16.gmra.mxu0 %vm16630_vm10, %v14050_v61  ;;  %vm16645_vm10 = vmmov %vm16610_vm0 }
 0x7f3   :  { %5780 = vmatprep.mubr.bf16.mxu0 %v16091_v3  ;;  %v14082_v34 = vpop.permute.xlu1 %5990 }
 0x7f7   :  { %v14100_v24 = vpop.permute.xlu1 %5994 }
 0x7f8   :  { %8638 = vmatmul.mubr.msk.bf16.vlgmr.msra.gmra.mxu1 %vm16631_vm8, %v14072_v38  ;;  %vm16646_vm8 = vmmov %vm16610_vm0 }
 0x7f9   :  { %6886 = vmatpush1.bf16.msra.mxu1 %v14070_v49  ;;  %6659 = vmatprep.mubr.bf16.mxu1 %v16091_v3 }
 0x7fa   :  { %8611 = vmatmul.mubr.msk.bf16.gmra.mxu0 %vm16610_vm0, %v14059_v53  ;;  %7095 = vmatprep.subr.bf16.mxu1 %v14022_v47 }
 0x7fb   :  { %6040 = vmatprep.mubr.bf16.mxu0 %v16091_v3 }
 0x800   :  { %8639 = vmatmul.mubr.msk.bf16.gmra.mxu1 %vm16632_vm11, %v14082_v34  ;;  %vm16647_vm11 = vmmov %vm16610_vm0 }
 0x801   :  { %6669 = vmatprep.mubr.bf16.mxu1 %v16091_v3 }
 0x802   :  { %8616 = vmatmul.mubr.msk.bf16.vlgmr.msra.gmra.mxu0 %vm16633_vm3, %v14072_v38  ;;  %vm16648_vm3 = vmmov %vm16610_vm0 }
 0x803   :  { %6050 = vmatprep.mubr.bf16.mxu0 %v16091_v3  ;;  %6301 = vmatpush1.bf16.msra.mxu0 %v13963_v12 }
 0x804   :  { %6510 = vmatprep.subr.bf16.mxu0 %v13796_v43 }
 0x806   :  { %v14108_v27 = vpop.f32.mrf.mxu1 }
 0x808   :  { %8640 = vmatmul.mubr.msk.bf16.gmra.mxu1 %vm16634_vm15, %v14092_v60  ;;  %v14118_v31 = vpop.f32.mrf.mxu1  ;;  %vm16649_vm15 = vmmov %vm16610_vm0 }
 0x809   :  { %6679 = vmatprep.mubr.bf16.mxu1 %v16091_v3 }
 0x80a   :  { %8617 = vmatmul.mubr.msk.bf16.gmra.mxu0 %vm16635_vm9, %v14082_v34  ;;  %v14120_v2 = vpop.f32.mrf.mxu1  ;;  %vm16650_vm9 = vmmov %vm16610_vm0 }
 0x80b   :  { %6060 = vmatprep.mubr.bf16.mxu0 %v16091_v3 }
 0x80c   :  { %v14129_v5 = vpop.f32.mrf.mxu1 }
 0x810   :  { %8641 = vmatmul.mubr.msk.bf16.gmra.mxu1 %vm16636_vm1, %v14100_v24 }
 0x811   :  { %6903 = vmatprep.mubr.bf16.mxu1 %v16091_v3 }
 0x812   :  { %8618 = vmatmul.mubr.msk.bf16.gmra.mxu0 %vm16637_vm7, %v14092_v60 }
 0x813   :  { %6070 = vmatprep.mubr.bf16.mxu0 %v16091_v3 }
 0x818   :  { %8648 = vmatmul.mubr.msk.bf16.vlgmr.msra.gmra.mxu1 %vm16638_vm12, %v13965_v54  ;;  %vm16653_vm12 = vmmov %vm16610_vm0 }
 0x819   :  { %7096 = vmatpush1.bf16.msra.mxu1 %v14070_v49  ;;  %6913 = vmatprep.mubr.bf16.mxu1 %v16091_v3 }
 0x81a   :  { %8619 = vmatmul.mubr.msk.bf16.gmra.mxu0 %vm16639_vm5, %v14100_v24  ;;  %7337 = vmatprep.subr.bf16.mxu1 %v14022_v47 }
 0x81b   :  { %6318 = vmatprep.mubr.bf16.mxu0 %v16091_v3 }
 0x81f   :  { %v14132_v48 = vpop.f32.mrf.mxu1 }
 0x820   :  { %8649 = vmatmul.mubr.msk.bf16.gmra.mxu1 %vm16640_vm14, %v13991_v55  ;;  %vm16655_vm14 = vmmov %vm16610_vm0 }
 0x821   :  { %6923 = vmatprep.mubr.bf16.mxu1 %v16091_v3  ;;  %v14137_v62 = vpop.f32.mrf.mxu1 }
 0x822   :  { %8626 = vmatmul.mubr.msk.bf16.vlgmr.msra.gmra.mxu0 %vm16641_vm4, %v13965_v54 }
 0x823   :  { %6328 = vmatprep.mubr.bf16.mxu0 %v16091_v3  ;;  %6511 = vmatpush1.bf16.msra.mxu0 %v13963_v12  ;;  %v14142_v8 = vpop.f32.mrf.mxu1 }
 0x824   :  { %6752 = vmatprep.subr.bf16.mxu0 %v13796_v43 }
 0x825   :  { %v14147_v43 = vpop.f32.mrf.mxu1 }
 0x828   :  { %8650 = vmatmul.mubr.msk.bf16.gmra.mxu1 %vm16642_vm13, %v14031_v45 }
 0x829   :  { %6933 = vmatprep.mubr.bf16.mxu1 %v16091_v3 }
 0x82a   :  { %8627 = vmatmul.mubr.msk.bf16.gmra.mxu0 %vm16643_vm2, %v13991_v55 }
 0x82b   :  { %6338 = vmatprep.mubr.bf16.mxu0 %v16091_v3 }
 0x82e   :  { %v14152_v44 = vpop.f32.mrf.mxu1 }
 0x830   :  { %8651 = vmatmul.mubr.msk.bf16.gmra.mxu1 %vm16644_vm6, %v14041_v25  ;;  %v14159_v35 = vpop.f32.mrf.mxu1 }
 0x831   :  { %7113 = vmatprep.mubr.bf16.mxu1 %v16091_v3 }
 0x832   :  { %8628 = vmatmul.mubr.msk.bf16.gmra.mxu0 %vm16645_vm10, %v14031_v45  ;;  %v14169_v0 = vpop.f32.mrf.mxu1  ;;  %vm16656_vm10 = vmmov %vm16610_vm0 }
 0x833   :  { %6348 = vmatprep.mubr.bf16.mxu0 %v16091_v3 }
 0x834   :  { %v14171_v20 = vpop.f32.mrf.mxu1 }
 0x838   :  { %8656 = vmatmul.mubr.msk.bf16.vlgmr.msra.gmra.mxu1 %vm16646_vm8, %v13801_v36 }
 0x839   :  { %7338 = vmatpush1.bf16.msra.mxu1 %v14070_v49  ;;  %7123 = vmatprep.mubr.bf16.mxu1 %v16091_v3 }
 0x83a   :  { %8629 = vmatmul.mubr.msk.bf16.gmra.mxu0 %vm16610_vm0, %v14041_v25  ;;  %7559 = vmatprep.subr.bf16.mxu1 %v14157_v23 }
 0x83b   :  { %6528 = vmatprep.mubr.bf16.mxu0 %v16091_v3 }
 0x840   :  { %8657 = vmatmul.mubr.msk.bf16.gmra.mxu1 %vm16647_vm11, %v13848_v56  ;;  %vm16657_vm11 = vmmov %vm16648_vm3 }
 0x841   :  { %7133 = vmatprep.mubr.bf16.mxu1 %v16091_v3 }
 0x842   :  { %v14176_v30 = vpop.f32.mrf.mxu1  ;;  %8634 = vmatmul.mubr.msk.bf16.vlgmr.msra.gmra.mxu0 %vm16648_vm3, %v13801_v36 }
 0x843   :  { %6538 = vmatprep.mubr.bf16.mxu0 %v16091_v3  ;;  %6753 = vmatpush1.bf16.msra.mxu0 %v13963_v12 }
 0x844   :  { %v14182_v18 = vpop.f32.mrf.mxu1  ;;  %6974 = vmatprep.subr.bf16.mxu0 %v14022_v47 }
 0x846   :  { %v14185_v37 = vpop.f32.mrf.mxu1 }
 0x848   :  { %v14187_v26 = vpop.f32.mrf.mxu1  ;;  %8658 = vmatmul.mubr.msk.bf16.gmra.mxu1 %vm16649_vm15, %v13868_v19  ;;  %vm16658_vm15 = vmmov %vm16648_vm3 }
 0x849   :  { %7143 = vmatprep.mubr.bf16.mxu1 %v16091_v3 }
 0x84a   :  { %v5639_v52 = vpop.f32.mrf.mxu0  ;;  %8635 = vmatmul.mubr.msk.bf16.gmra.mxu0 %vm16650_vm9, %v13848_v56  ;;  %vm16660_vm9 = vmmov %vm16648_vm3 }
 0x84b   :  { %v14195_v7 = vsub.f32 %v16651_v4, %v5639_v52  ;;  %v6187_v59 = vpop.f32.mrf.mxu1  ;;  %6548 = vmatprep.mubr.bf16.mxu0 %v16091_v3 }
 0x84c   :  { %v5641_v21 = vpop.f32.mrf.mxu0 }
 0x84d   :  { %vm6226_vm1 = vcmp.eq.f32.partialorder %v14195_v7, 9.0  ;;  %v14200_v29 = vsub.f32 %v16652_v41, %v5641_v21  ;;  %v6189_v22 = vpop.f32.mrf.mxu1  ;;  %v14233_v21 = vld [vmem:[%s15870_s6 + $0x30] ss:$8 sps:$4 sm:$0xff]  }
 0x84e   :  { %v14202_v11 = vsel %vm6226_vm1, %v6187_v59, 0.0  ;;  %v5643_v6 = vpop.f32.mrf.mxu0  ;;  %vm16661_vm1 = vmmov %vm16648_vm3 }
 0x84f   :  { %vm6227_vm7 = vcmp.eq.f32.partialorder %v14200_v29, 9.0  ;;  %v14206_v46 = vsub.f32 %v16651_v4, %v5643_v6  ;;  %v6191_v58 = vpop.f32.mrf.mxu1 }
 0x850   :  { %v14208_v17 = vsel %vm6227_vm7, %v6189_v22, 0.0  ;;  %v14210_v42 = vpop.f32.mrf.mxu0  ;;  %8659 = vmatmul.mubr.msk.bf16.gmra.mxu1 %vm16653_vm12, %v13943_v51  ;;  %vm16662_vm7 = vmmov %vm16661_vm1 }
 0x851   :  { %vm6228_vm5 = vcmp.eq.f32.partialorder %v14206_v46, 9.0  ;;  %v14215_v39 = vpop.f32.mrf.mxu1  ;;  %7355 = vmatprep.mubr.bf16.mxu1 %v16091_v3  ;;  %vm16663_vm12 = vmmov %vm16661_vm1 }
 0x852   :  { %16654 = vst [vmem:[#allocation61_spill] sm:$0xff] %v14215_v39  ;;  %v14218_v9 = vsel %vm6228_vm5, %v6191_v58, 0.0  ;;  %v5649_v12 = vpop.f32.mrf.mxu0  ;;  %8636 = vmatmul.mubr.msk.bf16.gmra.mxu0 %vm16655_vm14, %v13868_v19  ;;  %vm16665_vm5 = vmmov %vm16661_vm1 }
 0x853   :  { %v14223_v40 = vsub.f32 %v16651_v4, %v5649_v12  ;;  %v6197_v13 = vpop.f32.mrf.mxu1  ;;  %6558 = vmatprep.mubr.bf16.mxu0 %v16091_v3  ;;  %vm16666_vm14 = vmmov %vm16661_vm1 }
 0x854   :  { %v5651_v63 = vpop.f32.mrf.mxu0 }
 0x855   :  { %vm6230_vm4 = vcmp.eq.f32.partialorder %v14223_v40, 9.0  ;;  %v14228_v52 = vsub.f32 %v16652_v41, %v5651_v63  ;;  %v6199_v59 = vpop.f32.mrf.mxu1  ;;  %vm5940_vm13 = vcmp.eq.f32.partialorder %v14223_v40, 1.0 }
 0x856   :  { %v14236_v22 = vsel %vm6230_vm4, %v6197_v13, 0.0  ;;  %v5653_v6 = vpop.f32.mrf.mxu0  ;;  %v14239_v58 = vsel %vm5940_vm13, %v14132_v48, 0.0  ;;  %vm16667_vm4 = vcmask 1043456   ;;  %vm16668_vm13 = vmmov %vm16661_vm1 }
 0x857   :  { %vm6231_vm2 = vcmp.eq.f32.partialorder %v14228_v52, 9.0  ;;  %v14243_v12 = vsub.f32 %v16651_v4, %v5653_v6  ;;  %vm5941_vm6 = vcmp.eq.f32.partialorder %v14228_v52, 1.0  ;;  %v6201_v13 = vpop.f32.mrf.mxu1 }
 0x858   :  { %v14246_v63 = vsel %vm6231_vm2, %v6199_v59, 0.0  ;;  %8664 = vmatmul.mubr.msk.bf16.vlgmr.msra.gmra.mxu1 %vm16656_vm10, %v13969_v14  ;;  %v14251_v19 = vsel %vm5941_vm6, %v14137_v62, 0.0  ;;  %vm16669_vm2 = vmmov %vm16661_vm1 }
 0x859   :  { %vm6232_vm8 = vcmp.eq.f32.partialorder %v14243_v12, 9.0  ;;  %7560 = vmatpush1.bf16.msra.mxu1 %v14233_v21  ;;  %7365 = vmatprep.mubr.bf16.mxu1 %v16091_v3  ;;  %vm5942_vm0 = vcmp.eq.f32.partialorder %v14243_v12, 1.0  ;;  %v14274_v62 = vpop.f32.mrf.mxu1 }
 0x85a   :  { %v14257_v48 = vsel %vm6232_vm8, %v6201_v13, 0.0  ;;  %8637 = vmatmul.mubr.msk.bf16.gmra.mxu0 %vm16657_vm11, %v13943_v51  ;;  %7801 = vmatprep.subr.bf16.mxu1 %v14157_v23  ;;  %v14263_v59 = vsel %vm5942_vm0, %v14142_v8, 0.0  ;;  %16659 = vst [vmem:[#allocation65_spill] sm:$0xff] %v14274_v62  ;;  %v14301_v51 = vpop.f32.mrf.mxu0  ;;  %vm16671_vm8 = vmmov %vm16661_vm1 }
 0x85b   :  { %6770 = vmatprep.mubr.bf16.mxu0 %v16091_v3  ;;  %v6207_v8 = vpop.f32.mrf.mxu1  ;;  %vm16674_vm11 = vmmov %vm16661_vm1 }
 0x85d   :  { %v6209_v6 = vpop.f32.mrf.mxu1 }
 0x85f   :  { %v6211_v13 = vpop.f32.mrf.mxu1 }
 0x860   :  { %8665 = vmatmul.mubr.msk.bf16.gmra.mxu1 %vm16648_vm3, %v13951_v28  ;;  %vm16677_vm3 = vmmov %vm16661_vm1 }
 0x861   :  { %7375 = vmatprep.mubr.bf16.mxu1 %v16091_v3 }
 0x862   :  { %8642 = vmatmul.mubr.msk.bf16.vlgmr.msra.gmra.mxu0 %vm16658_vm15, %v13969_v14  ;;  %v9203_v14 = vld [vmem:[%s15867_s3] sm:$0xf]  ;;  %vm16679_vm15 = vmmov %vm16661_vm1 }
 0x863   :  { %6780 = vmatprep.mubr.bf16.mxu0 %v16091_v3  ;;  %6975 = vmatpush1.bf16.msra.mxu0 %v14070_v49 }
 0x864   :  { %7216 = vmatprep.subr.bf16.mxu0 %v14022_v47  ;;  %v14288_v47 = vpop.f32.mrf.mxu1 }
 0x865   :  { %16664 = vst [vmem:[#allocation67_spill] sm:$0xff] %v14288_v47 }
 0x868   :  { %8666 = vmatmul.mubr.msk.bf16.gmra.mxu1 %vm16660_vm9, %v14007_v32  ;;  %vm16682_vm9 = vmmov %vm16661_vm1 }
 0x869   :  { %7385 = vmatprep.mubr.bf16.mxu1 %v16091_v3 }
 0x86a   :  { %8643 = vmatmul.mubr.msk.bf16.gmra.mxu0 %vm16661_vm1, %v13951_v28  ;;  %v6217_v28 = vpop.f32.mrf.mxu1 }
 0x86b   :  { %6790 = vmatprep.mubr.bf16.mxu0 %v16091_v3 }
 0x870   :  { %8667 = vmatmul.mubr.msk.bf16.gmra.mxu1 %vm16662_vm7, %v14014_v57  ;;  %vm16684_vm7 = vmmov %vm16667_vm4 }
 0x871   :  { %7577 = vmatprep.mubr.bf16.mxu1 %v16091_v3 }
 0x872   :  { %8644 = vmatmul.mubr.msk.bf16.gmra.mxu0 %vm16663_vm12, %v14007_v32  ;;  %v6219_v32 = vpop.f32.mrf.mxu1 }
 0x873   :  { %6800 = vmatprep.mubr.bf16.mxu0 %v16091_v3 }
 0x874   :  { %v14305_v62 = vpop.f32.mrf.mxu1 }
 0x876   :  { %v14319_v36 = vpop.f32.mrf.mxu1 }
 0x877   :  { %16670 = vst [vmem:[#allocation51_spill] sm:$0xff] %v14319_v36 }
 0x878   :  { %8674 = vmatmul.mubr.msk.bf16.vlgmr.msra.gmra.mxu1 %vm16665_vm5, %v14024_v50  ;;  %vm16688_vm5 = vmmov %vm16661_vm1 }
 0x879   :  { %7802 = vmatpush1.bf16.msra.mxu1 %v14233_v21  ;;  %7587 = vmatprep.mubr.bf16.mxu1 %v16091_v3 }
 0x87a   :  { %8645 = vmatmul.mubr.msk.bf16.gmra.mxu0 %vm16666_vm14, %v14014_v57  ;;  %8940 = vmatprep.subr.msk.bf16.mxu1 %vm16667_vm4, %v9203_v14  ;;  %vm5936_vm14 = vcmp.eq.f32.partialorder %v14195_v7, 1.0 }
 0x87b   :  { %6992 = vmatprep.mubr.bf16.mxu0 %v16091_v3 }
 0x880   :  { %8675 = vmatmul.mubr.msk.bf16.gmra.mxu1 %vm16668_vm13, %v14036_v1  ;;  %vm5791_vm13 = vcmp.eq.f32.partialorder %v14195_v7, 0.0 }
 0x881   :  { %v5659_v56 = vpop.f32.mrf.mxu0  ;;  %7597 = vmatprep.mubr.bf16.mxu1 %v16091_v3 }
 0x882   :  { %v14309_v57 = vsub.f32 %v16651_v4, %v5659_v56  ;;  %8652 = vmatmul.mubr.msk.bf16.vlgmr.msra.gmra.mxu0 %vm16669_vm2, %v14024_v50  ;;  %vm16690_vm2 = vmmov %vm16661_vm1 }
 0x883   :  { %v5661_v14 = vpop.f32.mrf.mxu0  ;;  %7002 = vmatprep.mubr.bf16.mxu0 %v16091_v3  ;;  %7217 = vmatpush1.bf16.msra.mxu0 %v14070_v49  ;;  %v14332_v49 = vpop.f32.mrf.mxu1 }
 0x884   :  { %v14316_v39 = vsub.f32 %v16652_v41, %v5661_v14  ;;  %7470 = vmatprep.subr.bf16.mxu0 %v14157_v23  ;;  %vm6234_vm6 = vcmp.eq.f32.partialorder %v14309_v57, 9.0  ;;  %16673 = vst [vmem:[#allocation57_spill] sm:$0xff] %v14332_v49 }
 0x885   :  { %v5663_v47 = vpop.f32.mrf.mxu0  ;;  %v14325_v25 = vsel %vm6234_vm6, %v6207_v8, 0.0  ;;  %v14341_v8 = vpop.f32.mrf.mxu1  ;;  %vm5937_vm6 = vcmp.eq.f32.partialorder %v14200_v29, 1.0 }
 0x886   :  { %v14323_v56 = vsub.f32 %v16651_v4, %v5663_v47  ;;  %vm6235_vm10 = vcmp.eq.f32.partialorder %v14316_v39, 9.0  ;;  %16676 = vst [vmem:[#allocation15_spill] sm:$0xff] %v14341_v8  ;;  %v16683_v8 = vld [vmem:[#allocation34_spill] sm:$0xff] }
 0x887   :  { %v14330_v50 = vsel %vm6235_vm10, %v6209_v6, 0.0  ;;  %v14345_v6 = vpop.f32.mrf.mxu1 }
 0x888   :  { %8676 = vmatmul.mubr.msk.bf16.gmra.mxu1 %vm16671_vm8, %v14050_v61  ;;  %16672 = vst [vmem:[#allocation13_spill] sm:$0xff] %v14330_v50  ;;  %vm6236_vm0 = vcmp.eq.f32.partialorder %v14323_v56, 9.0  ;;  %16678 = vst [vmem:[#allocation16_spill] sm:$0xff] %v14345_v6  ;;  %vm5792_vm8 = vcmp.eq.f32.partialorder %v14200_v29, 0.0 }
 0x889   :  { %7607 = vmatprep.mubr.bf16.mxu1 %v16091_v3  ;;  %v14338_v47 = vsel %vm6236_vm0, %v6211_v13, 0.0  ;;  %v14351_v14 = vpop.f32.mrf.mxu1  ;;  %v14355_v13 = vpop.f32.mrf.mxu0  ;;  %vm5938_vm0 = vcmp.eq.f32.partialorder %v14206_v46, 1.0 }
 0x88a   :  { %8653 = vmatmul.mubr.msk.bf16.gmra.mxu0 %vm16674_vm11, %v14036_v1  ;;  %16675 = vst [vmem:[#allocation14_spill] sm:$0xff] %v14338_v47  ;;  %16680 = vst [vmem:[#allocation9_spill] sm:$0xff] %v14351_v14  ;;  %vm5793_vm11 = vcmp.eq.f32.partialorder %v14206_v46, 0.0 }
 0x88b   :  { %7012 = vmatprep.mubr.bf16.mxu0 %v16091_v3 }
 0x88c   :  { %v14353_v1 = vpop.f32.mrf.mxu1 }
 0x88d   :  { %16681 = vst [vmem:[#allocation7_spill] sm:$0xff] %v14353_v1 }
 0x88e   :  { %v14367_v1 = vpop.f32.mrf.mxu1 }
 0x88f   :  { %16685 = vst [vmem:[#allocation26_spill] sm:$0xff] %v14367_v1 }
 0x890   :  { %8677 = vmatmul.mubr.msk.bf16.gmra.mxu1 %vm16677_vm3, %v14059_v53  ;;  %vm16694_vm3 = vmmov %vm16661_vm1 }
 0x891   :  { %7819 = vmatprep.mubr.bf16.mxu1 %v16091_v3 }
 0x892   :  { %8654 = vmatmul.mubr.msk.bf16.gmra.mxu0 %vm16679_vm15, %v14050_v61  ;;  %v9204_v61 = vld [vmem:[%s15867_s3 + $0x4] sm:$0xf]  ;;  %vm5795_vm15 = vcmp.eq.f32.partialorder %v14223_v40, 0.0 }
 0x893   :  { %7022 = vmatprep.mubr.bf16.mxu0 %v16091_v3 }
 0x898   :  { %8682 = vmatmul.mubr.msk.bf16.vlgmr.msra.gmra.mxu1 %vm16682_vm9, %v14072_v38  ;;  %vm16696_vm9 = vmmov %vm16661_vm1 }
 0x899   :  { %8897 = vmatpush3.bf16.msra.mxu1 %v16683_v8  ;;  %7829 = vmatprep.mubr.bf16.mxu1 %v16091_v3 }
 0x89a   :  { %v5669_v6 = vpop.f32.mrf.mxu0  ;;  %8655 = vmatmul.mubr.msk.bf16.gmra.mxu0 %vm16661_vm1, %v14059_v53  ;;  %8941 = vmatprep.subr.msk.bf16.mxu1 %vm16684_vm7, %v9204_v61  ;;  %v14377_v53 = vpop.f32.mrf.mxu1  ;;  %vm5796_vm1 = vcmp.eq.f32.partialorder %v14228_v52, 0.0  ;;  %vm5797_vm7 = vcmp.eq.f32.partialorder %v14243_v12, 0.0 }
 0x89b   :  { %v14370_v14 = vsub.f32 %v16651_v4, %v5669_v6  ;;  %7234 = vmatprep.mubr.bf16.mxu0 %v16091_v3  ;;  %16686 = vst [vmem:[#allocation6_spill] sm:$0xff] %v14377_v53  ;;  %v5952_v53 = vsel %vm5936_vm14, %v14108_v27, 0.0  ;;  %vm16699_vm14 = vcmask 64512  }
 0x89c   :  { %v5671_v8 = vpop.f32.mrf.mxu0 }
 0x89d   :  { %v14374_v49 = vsub.f32 %v16652_v41, %v5671_v8  ;;  %vm6238_vm12 = vcmp.eq.f32.partialorder %v14370_v14, 9.0 }
 0x89e   :  { %v5673_v36 = vpop.f32.mrf.mxu0  ;;  %v14382_v61 = vsel %vm6238_vm12, %v6217_v28, 0.0  ;;  %vm16698_vm12 = vmmov %vm16690_vm2 }
 0x89f   :  { %v14380_v47 = vsub.f32 %v16651_v4, %v5673_v36  ;;  %16687 = vst [vmem:[#allocation40_spill] sm:$0xff] %v14382_v61  ;;  %vm6239_vm4 = vcmp.eq.f32.partialorder %v14374_v49, 9.0  ;;  %v14398_v36 = vpop.f32.mrf.mxu1 }
 0x8a0   :  { %v14384_v1 = vpop.f32.mrf.mxu0  ;;  %8683 = vmatmul.mubr.msk.bf16.gmra.mxu1 %vm16688_vm5, %v14082_v34  ;;  %v14391_v6 = vsel %vm6239_vm4, %v6219_v32, 0.0  ;;  %16691 = vst [vmem:[#allocation46_spill] sm:$0xff] %v14398_v36  ;;  %vm5944_vm5 = vcmp.eq.f32.partialorder %v14309_v57, 1.0  ;;  %vm5799_vm4 = vcmp.eq.f32.partialorder %v14309_v57, 0.0 }
 0x8a1   :  { %7839 = vmatprep.mubr.bf16.mxu1 %v16091_v3  ;;  %16689 = vst [vmem:[#allocation68_spill] sm:$0xff] %v14391_v6  ;;  %vm6240_vm10 = vcmp.eq.f32.partialorder %v14380_v47, 9.0 }
 0x8a2   :  { %v5752_v8 = vpop.f32.mrf.mxu0  ;;  %8660 = vmatmul.mubr.msk.bf16.vlgmr.msra.gmra.mxu0 %vm16690_vm2, %v14072_v38  ;;  %v14404_v32 = vsel %vm6240_vm10, %v14305_v62, 0.0  ;;  %vm5946_vm10 = vcmp.eq.f32.partialorder %v14323_v56, 1.0 }
 0x8a3   :  { %v5807_v28 = vsel %vm5791_vm13, %v5752_v8, 0.0  ;;  %7244 = vmatprep.mubr.bf16.mxu0 %v16091_v3  ;;  %7471 = vmatpush1.bf16.msra.mxu0 %v14233_v21  ;;  %16692 = vst [vmem:[#allocation11_spill] sm:$0xff] %v14404_v32  ;;  %v5953_v8 = vsel %vm5937_vm6, %v14118_v31, 0.0  ;;  %vm16701_vm13 = vmmov %vm16690_vm2  ;;  %vm5945_vm2 = vcmp.eq.f32.partialorder %v14316_v39, 1.0  ;;  %vm5800_vm6 = vcmp.eq.f32.partialorder %v14316_v39, 0.0 }
 0x8a4   :  { %v14406_v4 = vadd.f32 %v5952_v53, %v5807_v28  ;;  %v5754_v6 = vpop.f32.mrf.mxu0  ;;  %7680 = vmatprep.subr.bf16.mxu0 %v14157_v23  ;;  %v5954_v53 = vsel %vm5938_vm0, %v14120_v2, 0.0 }
 0x8a5   :  { %v5808_v38 = vsel %vm5792_vm8, %v5754_v6, 0.0  ;;  %v14412_v27 = vpop.f32.mrf.mxu1  ;;  %vm5801_vm8 = vcmp.eq.f32.partialorder %v14323_v56, 0.0 }
 0x8a6   :  { %v14414_v36 = vadd.f32 %v5953_v8, %v5808_v38  ;;  %v5756_v61 = vpop.f32.mrf.mxu0 }
 0x8a7   :  { %v5809_v62 = vsel %vm5793_vm11, %v5756_v61, 0.0  ;;  %v14418_v28 = vpop.f32.mrf.mxu1 }
 0x8a8   :  { %16693 = vst [vmem:[#allocation36_spill] sm:$0xff] %v14418_v28  ;;  %v14420_v32 = vadd.f32 %v5954_v53, %v5809_v62  ;;  %v14422_v50 = vpop.f32.mrf.mxu0  ;;  %8684 = vmatmul.mubr.msk.bf16.gmra.mxu1 %vm16694_vm3, %v14092_v60  ;;  %vm16704_vm3 = vmmov %vm16699_vm14 }
 0x8a9   :  { %7849 = vmatprep.mubr.bf16.mxu1 %v16091_v3  ;;  %v14427_v31 = vpop.f32.mrf.mxu1 }
 0x8aa   :  { %16695 = vst [vmem:[#allocation27_spill] sm:$0xff] %v14427_v31  ;;  %v5762_v6 = vpop.f32.mrf.mxu0  ;;  %8661 = vmatmul.mubr.msk.bf16.gmra.mxu0 %vm16696_vm9, %v14082_v34  ;;  %vm16705_vm9 = vmmov %vm16704_vm3 }
 0x8ab   :  { %v5811_v2 = vsel %vm5795_vm15, %v5762_v6, 0.0  ;;  %7254 = vmatprep.mubr.bf16.mxu0 %v16091_v3  ;;  %v14437_v62 = vpop.f32.mrf.mxu1  ;;  %vm5948_vm15 = vcmp.eq.f32.partialorder %v14370_v14, 1.0 }
 0x8ac   :  { %v14434_v61 = vadd.f32 %v14239_v58, %v5811_v2  ;;  %v5764_v38 = vpop.f32.mrf.mxu0  ;;  %v5960_v2 = vsel %vm5944_vm5, %v14152_v44, 0.0  ;;  %vm16708_vm5 = vcmask 1043456  }
 0x8ad   :  { %v5812_v8 = vsel %vm5796_vm1, %v5764_v38, 0.0  ;;  %vm5803_vm1 = vcmp.eq.f32.partialorder %v14370_v14, 0.0 }
 0x8ae   :  { %v14440_v53 = vadd.f32 %v14251_v19, %v5812_v8  ;;  %v5766_v31 = vpop.f32.mrf.mxu0  ;;  %v14457_v19 = vsub.f32 %v16652_v41, %v14355_v13 }
 0x8af   :  { %v5813_v28 = vsel %vm5797_vm7, %v5766_v31, 0.0  ;;  %vm16707_vm7 = vmmov %vm16698_vm12 }
 0x8b0   :  { %v14444_v34 = vadd.f32 %v14263_v59, %v5813_v28  ;;  %v14446_v6 = vpop.f32.mrf.mxu0  ;;  %v14448_v58 = vpop.f32.mrf.mxu1  ;;  %8685 = vmatmul.mubr.msk.bf16.gmra.mxu1 %vm16698_vm12, %v14100_v24  ;;  %vm5947_vm0 = vcmp.eq.f32.partialorder %v14457_v19, 1.0  ;;  %vm5802_vm11 = vcmp.eq.f32.partialorder %v14457_v19, 0.0  ;;  %vm5949_vm12 = vcmp.eq.f32.partialorder %v14374_v49, 1.0 }
 0x8b1   :  { %16697 = vst [vmem:[#allocation29_spill] sm:$0xff] %v14448_v58  ;;  %8898 = vmatprep.mubr.msk.bf16.mxu1 %vm16699_vm14, %v13928_v15  ;;  %vm5804_vm14 = vcmp.eq.f32.partialorder %v14374_v49, 0.0 }
 0x8b2   :  { %v5772_v31 = vpop.f32.mrf.mxu0  ;;  %v14460_v59 = vpop.f32.mrf.mxu1  ;;  %8662 = vmatmul.mubr.msk.bf16.gmra.mxu0 %vm16701_vm13, %v14092_v60  ;;  %vm5805_vm13 = vcmp.eq.f32.partialorder %v14380_v47, 0.0 }
 0x8b3   :  { %16700 = vst [vmem:[#allocation69_spill] sm:$0xff] %v14460_v59  ;;  %v5815_v28 = vsel %vm5799_vm4, %v5772_v31, 0.0  ;;  %7264 = vmatprep.mubr.bf16.mxu0 %v16091_v3  ;;  %v5961_v59 = vsel %vm5945_vm2, %v14159_v35, 0.0  ;;  %vm5950_vm4 = vcmp.eq.f32.partialorder %v14380_v47, 1.0 }
 0x8b4   :  { %v14467_v15 = vadd.f32 %v5960_v2, %v5815_v28  ;;  %v5774_v38 = vpop.f32.mrf.mxu0  ;;  %v14470_v13 = vpop.f32.mrf.mxu1  ;;  %v5962_v28 = vsel %vm5946_vm10, %v14169_v0, 0.0  ;;  %v14495_v0 = vsub.f32 %v16652_v41, %v14384_v1  ;;  %v5964_v1 = vsel %vm5948_vm15, %v14176_v30, 0.0  ;;  %vm16710_vm10 = vmmov %vm16704_vm3 }
 0x8b5   :  { %16702 = vst [vmem:[#allocation32_spill] sm:$0xff] %v14470_v13  ;;  %v5816_v8 = vsel %vm5800_vm6, %v5774_v38, 0.0 }
 0x8b6   :  { %v14474_v60 = vadd.f32 %v5961_v59, %v5816_v8  ;;  %v5776_v58 = vpop.f32.mrf.mxu0  ;;  %v14477_v44 = vpop.f32.mrf.mxu1  ;;  %v5963_v59 = vsel %vm5947_vm0, %v14171_v20, 0.0  ;;  %vm5951_vm2 = vcmp.eq.f32.partialorder %v14495_v0, 1.0  ;;  %vm5806_vm6 = vcmp.eq.f32.partialorder %v14495_v0, 0.0 }
 0x8b7   :  { %16703 = vst [vmem:[#allocation24_spill] sm:$0xff] %v14477_v44  ;;  %v5817_v31 = vsel %vm5801_vm8, %v5776_v58, 0.0  ;;  %v16706_v58 = vld [vmem:[#allocation12_spill] sm:$0xff]  ;;  %v14527_v44 = vsub.f32 %v16652_v41, %v14210_v42  ;;  %vm16711_vm8 = vmmov %vm16704_vm3  ;;  %vm6081_vm0 = vcmp.eq.f32.partialorder %v14195_v7, 8.0 }
 0x8b8   :  { %v14481_v2 = vadd.f32 %v5962_v28, %v5817_v31  ;;  %v5778_v13 = vpop.f32.mrf.mxu0  ;;  %v14484_v38 = vpop.f32.mrf.mxu1  ;;  %8899 = vmatmul.mubr.msk.bf16.vlgmr.msra.gmra.mxu1 %vm16704_vm3, %v13958_v16 }
 0x8b9   :  { %v5818_v35 = vsel %vm5802_vm11, %v5778_v13, 0.0  ;;  %8902 = vmatprep.mubr.msk.bf16.mxu1 %vm16705_vm9, %v13940_v10  ;;  %8907 = vmatpush3.bf16.msra.mxu1 %v16706_v58  ;;  %v9205_v10 = vld [vmem:[%s15867_s3 + $0x8] sm:$0xf]  ;;  %vm16712_vm11 = vmmov %vm16707_vm7  ;;  %vm5794_vm3 = vcmp.eq.f32.partialorder %v14527_v44, 0.0  ;;  %vm5939_vm15 = vcmp.eq.f32.partialorder %v14527_v44, 1.0  ;;  %vm6082_vm9 = vcmp.eq.f32.partialorder %v14200_v29, 8.0 }
 0x8ba   :  { %v14497_v8 = vadd.f32 %v5963_v59, %v5818_v35  ;;  %v5782_v31 = vpop.f32.mrf.mxu0  ;;  %v14500_v16 = vpop.f32.mrf.mxu1  ;;  %8663 = vmatmul.mubr.msk.bf16.gmra.mxu0 %vm16707_vm7, %v14100_v24  ;;  %8942 = vmatprep.subr.msk.bf16.mxu1 %vm16708_vm5, %v9205_v10  ;;  %v5965_v59 = vsel %vm5949_vm12, %v14182_v18, 0.0  ;;  %v5955_v29 = vsel %vm5939_vm15, %v14129_v5, 0.0  ;;  %vm6084_vm7 = vcmp.eq.f32.partialorder %v14527_v44, 8.0  ;;  %vm16714_vm12 = vmmov %vm16711_vm8  ;;  %v16716_v5 = vld [vmem:[#allocation39_spill] sm:$0xff] }
 0x8bb   :  { %v5819_v20 = vsel %vm5803_vm1, %v5782_v31, 0.0  ;;  %7488 = vmatprep.mubr.bf16.mxu0 %v16091_v3  ;;  %v8115_v31 = vpop.permute.xlu0 %8114  ;;  %vm6083_vm1 = vcmp.eq.f32.partialorder %v14206_v46, 8.0  ;;  %vm16715_vm5 = vmmov %vm16711_vm8  ;;  %vm6089_vm15 = vcmp.eq.f32.partialorder %v14309_v57, 8.0 }
 0x8bc   :  { %v14511_v13 = vadd.f32 %v5964_v1, %v5819_v20  ;;  %v5784_v28 = vpop.f32.mrf.mxu0  ;;  %v14514_v35 = vpop.f32.mrf.mxu1  ;;  %v5966_v1 = vsel %vm5950_vm4, %v14185_v37, 0.0  ;;  %vm16718_vm4 = vmmov %vm16712_vm11 }
 0x8bd   :  { %v5820_v24 = vsel %vm5804_vm14, %v5784_v28, 0.0  ;;  %vm6085_vm14 = vcmp.eq.f32.partialorder %v14223_v40, 8.0 }
 0x8be   :  { %v14518_v58 = vadd.f32 %v5965_v59, %v5820_v24  ;;  %v5786_v10 = vpop.f32.mrf.mxu0  ;;  %v14521_v30 = vpop.f32.mrf.mxu1 }
 0x8bf   :  { %16709 = vst [vmem:[#allocation70_spill] sm:$0xff] %v14521_v30  ;;  %v5821_v20 = vsel %vm5805_vm13, %v5786_v10, 0.0  ;;  %v5967_v30 = vsel %vm5951_vm2, %v14187_v26, 0.0  ;;  %vm16719_vm13 = vcmask 1043456  }
 0x8c0   :  { %v14529_v28 = vadd.f32 %v5966_v1, %v5821_v20  ;;  %v5788_v18 = vpop.f32.mrf.mxu0  ;;  %v14532_v24 = vpop.f32.mrf.mxu1  ;;  %8903 = vmatmul.mubr.msk.bf16.gmra.mxu1 %vm16710_vm10, %v13979_v33  ;;  %vm6086_vm10 = vcmp.eq.f32.partialorder %v14228_v52, 8.0 }
 0x8c1   :  { %v5822_v59 = vsel %vm5806_vm6, %v5788_v18, 0.0  ;;  %8908 = vmatprep.mubr.msk.bf16.mxu1 %vm16711_vm8, %v8115_v31  ;;  %vm6087_vm8 = vcmp.eq.f32.partialorder %v14243_v12, 8.0 }
 0x8c2   :  { %v14538_v37 = vadd.f32 %v5967_v30, %v5822_v59  ;;  %v6042_v10 = vpop.f32.mrf.mxu0  ;;  %v14541_v42 = vpop.f32.mrf.mxu1  ;;  %8670 = vmatmul.mubr.msk.bf16.vlgmr.msra.gmra.mxu0 %vm16712_vm11, %v13965_v54  ;;  %v5810_v54 = vsel %vm5794_vm3, %v14422_v50, 0.0  ;;  %vm16723_vm11 = vmmov %vm16715_vm5 }
 0x8c3   :  { %v6097_v20 = vsel %vm6081_vm0, %v6042_v10, 0.0  ;;  %7498 = vmatprep.mubr.bf16.mxu0 %v16091_v3  ;;  %7681 = vmatpush1.bf16.msra.mxu0 %v14233_v21  ;;  %v8117_v10 = vpop.permute.xlu1 %8116  ;;  %vm16724_vm3 = vmmov %vm16715_vm5 }
 0x8c4   :  { %v6113_v33 = vadd.f32 %v6097_v20, %v14406_v4  ;;  %v6044_v26 = vpop.f32.mrf.mxu0  ;;  %v14551_v7 = vpop.f32.mrf.mxu1  ;;  %7922 = vmatprep.subr.bf16.mxu0 %v14157_v23  ;;  %v14566_v23 = vsub.f32 %v16652_v41, %v14301_v51 }
 0x8c5   :  { %v6098_v30 = vsel %vm6082_vm9, %v6044_v26, 0.0  ;;  %v8119_v4 = vpop.permute.xlu0 %8118  ;;  %vm16726_vm9 = vmmov %vm16718_vm4 }
 0x8c6   :  { %v14556_v31 = vadd.f32 %v14202_v11, %v6113_v33  ;;  %v6114_v1 = vadd.f32 %v6098_v30, %v14414_v36  ;;  %v6046_v18 = vpop.f32.mrf.mxu0  ;;  %v14560_v59 = vpop.f32.mrf.mxu1  ;;  %v5971_v11 = vadd.f32 %v5955_v29, %v5810_v54  ;;  %vm5798_vm2 = vcmp.eq.f32.partialorder %v14566_v23, 0.0 }
 0x8c7   :  { %v6099_v20 = vsel %vm6083_vm1, %v6046_v18, 0.0  ;;  %vm5943_vm6 = vcmp.eq.f32.partialorder %v14566_v23, 1.0  ;;  %vm6088_vm0 = vcmp.eq.f32.partialorder %v14566_v23, 8.0  ;;  %vm6090_vm1 = vcmp.eq.f32.partialorder %v14316_v39, 8.0 }
 0x8c8   :  { %v14569_v50 = vadd.f32 %v14208_v17, %v6114_v1  ;;  %v6115_v36 = vadd.f32 %v6099_v20, %v14420_v32  ;;  %v6048_v46 = vpop.f32.mrf.mxu0  ;;  %v14572_v33 = vpop.f32.mrf.mxu1  ;;  %8909 = vmatmul.mubr.msk.bf16.vlgmr.msra.gmra.mxu1 %vm16714_vm12, %v8117_v10  ;;  %v9206_v32 = vld [vmem:[%s15867_s3 + $0xc] sm:$0xf]  ;;  %vm6092_vm12 = vcmp.eq.f32.partialorder %v14457_v19, 8.0 }
 0x8c9   :  { %16713 = vst [vmem:[#allocation30_spill] sm:$0xff] %v14572_v33  ;;  %v6100_v26 = vsel %vm6084_vm7, %v6048_v46, 0.0  ;;  %8912 = vmatprep.mubr.msk.bf16.mxu1 %vm16715_vm5, %v8119_v4  ;;  %8917 = vmatpush3.bf16.msra.mxu1 %v16716_v5  ;;  %v5959_v46 = vsel %vm5943_vm6, %v14147_v43, 0.0  ;;  %vm6091_vm7 = vcmp.eq.f32.partialorder %v14323_v56, 8.0  ;;  %vm6237_vm5 = vcmp.eq.f32.partialorder %v14457_v19, 9.0  ;;  %v16734_v19 = vld [vmem:[#allocation63_spill] sm:$0xff] }
 0x8ca   :  { %v14578_v30 = vadd.f32 %v14218_v9, %v6115_v36  ;;  %v14580_v51 = vadd.f32 %v6100_v26, %v5971_v11  ;;  %v6052_v54 = vpop.f32.mrf.mxu0  ;;  %v14583_v17 = vpop.f32.mrf.mxu1  ;;  %8671 = vmatmul.mubr.msk.bf16.gmra.mxu0 %vm16718_vm4, %v13991_v55  ;;  %8943 = vmatprep.subr.msk.bf16.mxu1 %vm16719_vm13, %v9206_v32  ;;  %v5814_v55 = vsel %vm5798_vm2, %v14446_v6, 0.0  ;;  %vm16731_vm4 = vmmov %vm16724_vm3  ;;  %vm6093_vm13 = vcmp.eq.f32.partialorder %v14370_v14, 8.0  ;;  %v16768_v33 = vld [vmem:[#allocation60_spill] sm:$0xff] }
 0x8cb   :  { %16717 = vst [vmem:[#allocation47_spill] sm:$0xff] %v14583_v17  ;;  %v6101_v1 = vsel %vm6085_vm14, %v6052_v54, 0.0  ;;  %7508 = vmatprep.mubr.bf16.mxu0 %v16091_v3  ;;  %v8204_v36 = vpop.permute.xlu0 %8203  ;;  %v5975_v26 = vadd.f32 %v5959_v46, %v5814_v55  ;;  %vm16730_vm14 = vmmov %vm16724_vm3  ;;  %vm6094_vm6 = vcmp.eq.f32.partialorder %v14374_v49, 8.0 }
 0x8cc   :  { %v6117_v9 = vadd.f32 %v6101_v1, %v14434_v61  ;;  %v6054_v40 = vpop.f32.mrf.mxu0  ;;  %v14596_v18 = vpop.f32.mrf.mxu1  ;;  %vm16735_vm2 = vmmov %vm16726_vm9 }
 0x8cd   :  { %16720 = vst [vmem:[#allocation10_spill] sm:$0xff] %v14596_v18  ;;  %v6102_v4 = vsel %vm6086_vm10, %v6054_v40, 0.0  ;;  %v8121_v61 = vpop.permute.xlu1 %8120  ;;  %vm6095_vm10 = vcmp.eq.f32.partialorder %v14380_v47, 8.0  ;;  %v16758_v18 = vld [vmem:[#allocation56_spill] sm:$0xff] }
 0x8ce   :  { %v14600_v10 = vadd.f32 %v14236_v22, %v6117_v9  ;;  %v6118_v29 = vadd.f32 %v6102_v4, %v14440_v53  ;;  %v6056_v20 = vpop.f32.mrf.mxu0  ;;  %v14604_v11 = vpop.f32.mrf.mxu1 }
 0x8cf   :  { %16721 = vst [vmem:[#allocation49_spill] sm:$0xff] %v14604_v11  ;;  %v6103_v52 = vsel %vm6087_vm8, %v6056_v20, 0.0  ;;  %vm6096_vm8 = vcmp.eq.f32.partialorder %v14495_v0, 8.0 }
 0x8d0   :  { %v14608_v5 = vadd.f32 %v14246_v63, %v6118_v29  ;;  %v6119_v6 = vadd.f32 %v6103_v52, %v14444_v34  ;;  %v6058_v22 = vpop.f32.mrf.mxu0  ;;  %v14612_v53 = vpop.f32.mrf.mxu1  ;;  %8913 = vmatmul.mubr.msk.bf16.gmra.mxu1 %vm16723_vm11, %v8121_v61  ;;  %v16733_v52 = vld [vmem:[#allocation14_spill] sm:$0xff]  ;;  %vm16739_vm11 = vmmov %vm16724_vm3 }
 0x8d1   :  { %16722 = vst [vmem:[#allocation71_spill] sm:$0xff] %v14612_v53  ;;  %v6104_v12 = vsel %vm6088_vm0, %v6058_v22, 0.0  ;;  %8918 = vmatprep.mubr.msk.bf16.mxu1 %vm16724_vm3, %v8204_v36  ;;  %v8208_v29 = vpop.permute.xlu0 %8207  ;;  %v8206_v20 = vpop.permute.xlu1 %8205  ;;  %vm6241_vm0 = vcmp.eq.f32.partialorder %v14495_v0, 9.0 }
 0x8d2   :  { %v14617_v54 = vadd.f32 %v14257_v48, %v6119_v6  ;;  %v14619_v43 = vadd.f32 %v6104_v12, %v5975_v26  ;;  %v6062_v32 = vpop.f32.mrf.mxu0  ;;  %v14622_v63 = vpop.f32.mrf.mxu1  ;;  %8672 = vmatmul.mubr.msk.bf16.gmra.mxu0 %vm16726_vm9, %v14031_v45  ;;  %v16736_v12 = vld [vmem:[#allocation67_spill] sm:$0xff] }
 0x8d3   :  { %16725 = vst [vmem:[#allocation5_spill] sm:$0xff] %v14622_v63  ;;  %v6105_v34 = vsel %vm6089_vm15, %v6062_v32, 0.0  ;;  %7518 = vmatprep.mubr.bf16.mxu0 %v16091_v3  ;;  %v6253_v32 = vsel %vm6237_vm5, %v16736_v12, 0.0  ;;  %vm16742_vm15 = vmmov %vm16735_vm2 }
 0x8d4   :  { %v6121_v1 = vadd.f32 %v6105_v34, %v14467_v15  ;;  %v6064_v9 = vpop.f32.mrf.mxu0  ;;  %v14629_v48 = vpop.f32.mrf.mxu1  ;;  %v16729_v15 = vld [vmem:[#allocation13_spill] sm:$0xff]  ;;  %vm16746_vm5 = vmmov %vm16724_vm3 }
 0x8d5   :  { %16727 = vst [vmem:[#allocation72_spill] sm:$0xff] %v14629_v48  ;;  %v6106_v40 = vsel %vm6090_vm1, %v6064_v9, 0.0 }
 0x8d6   :  { %v14632_v55 = vadd.f32 %v14325_v25, %v6121_v1  ;;  %v6122_v57 = vadd.f32 %v6106_v40, %v14474_v60  ;;  %v6066_v4 = vpop.f32.mrf.mxu0  ;;  %v14636_v45 = vpop.f32.mrf.mxu1  ;;  %v16732_v60 = vld [vmem:[#allocation52_spill] sm:$0xff] }
 0x8d7   :  { %16728 = vst [vmem:[#allocation31_spill] sm:$0xff] %v14636_v45  ;;  %v6107_v36 = vsel %vm6091_vm7, %v6066_v4, 0.0  ;;  %vm6229_vm7 = vcmp.eq.f32.partialorder %v14527_v44, 9.0 }
 0x8d8   :  { %v14639_v61 = vadd.f32 %v16729_v15, %v6122_v57  ;;  %v6123_v39 = vadd.f32 %v6107_v36, %v14481_v2  ;;  %v6068_v46 = vpop.f32.mrf.mxu0  ;;  %v14644_v25 = vpop.f32.mrf.mxu1  ;;  %8919 = vmatmul.mubr.msk.bf16.vlgmr.msra.gmra.mxu1 %vm16730_vm14, %v8206_v20  ;;  %v16737_v57 = vld [vmem:[#allocation40_spill] sm:$0xff]  ;;  %vm16748_vm14 = vmmov %vm16724_vm3 }
 0x8d9   :  { %v6108_v56 = vsel %vm6092_vm12, %v6068_v46, 0.0  ;;  %8922 = vmatprep.mubr.msk.bf16.mxu1 %vm16731_vm4, %v8208_v29  ;;  %8927 = vmatpush3.bf16.msra.mxu1 %v16732_v60  ;;  %v8293_v15 = vpop.permute.xlu0 %8292 }
 0x8da   :  { %v14650_v26 = vadd.f32 %v16733_v52, %v6123_v39  ;;  %v6124_v6 = vadd.f32 %v6108_v56, %v14497_v8  ;;  %v6072_v2 = vpop.f32.mrf.mxu0  ;;  %v14654_v22 = vpop.f32.mrf.mxu1  ;;  %8673 = vmatmul.mubr.msk.bf16.gmra.mxu0 %vm16735_vm2, %v16734_v19 }
 0x8db   :  { %v6109_v34 = vsel %vm6093_vm13, %v6072_v2, 0.0  ;;  %7698 = vmatprep.mubr.bf16.mxu0 %v16091_v3  ;;  %v8210_v39 = vpop.permute.xlu1 %8209  ;;  %vm16751_vm13 = vmmov %vm16735_vm2 }
 0x8dc   :  { %v14660_v1 = vadd.f32 %v6253_v32, %v6124_v6  ;;  %v6125_v9 = vadd.f32 %v6109_v34, %v14511_v13  ;;  %v6074_v40 = vpop.f32.mrf.mxu0  ;;  %v14664_v8 = vpop.f32.mrf.mxu1  ;;  %v16738_v13 = vld [vmem:[#allocation68_spill] sm:$0xff]  ;;  %v16743_v32 = vld [vmem:[#allocation51_spill] sm:$0xff]  ;;  %v16744_v34 = vld [vmem:[#allocation42_spill] sm:$0xff] }
 0x8dd   :  { %v6110_v14 = vsel %vm6094_vm6, %v6074_v40, 0.0  ;;  %v6257_v0 = vsel %vm6241_vm0, %v16743_v32, 0.0 }
 0x8de   :  { %v14667_v4 = vadd.f32 %v16737_v57, %v6125_v9  ;;  %v6126_v29 = vadd.f32 %v6110_v14, %v14518_v58  ;;  %v6076_v20 = vpop.f32.mrf.mxu0  ;;  %v14671_v36 = vpop.f32.mrf.mxu1  ;;  %v16740_v58 = vld [vmem:[#allocation11_spill] sm:$0xff] }
 0x8df   :  { %v6111_v46 = vsel %vm6095_vm10, %v6076_v20, 0.0 }
 0x8e0   :  { %v14674_v56 = vadd.f32 %v16738_v13, %v6126_v29  ;;  %v6127_v49 = vadd.f32 %v6111_v46, %v14529_v28  ;;  %v6078_v60 = vpop.f32.mrf.mxu0  ;;  %v14679_v52 = vpop.f32.mrf.mxu1  ;;  %8923 = vmatmul.mubr.msk.bf16.gmra.mxu1 %vm16739_vm11, %v8210_v39  ;;  %v16741_v28 = vld [vmem:[#allocation54_spill] sm:$0xff]  ;;  %vm16755_vm11 = vmmov %vm16724_vm3 }
 0x8e1   :  { %v6112_v47 = vsel %vm6096_vm8, %v6078_v60, 0.0  ;;  %8928 = vmatprep.mubr.msk.bf16.mxu1 %vm16724_vm3, %v8293_v15  ;;  %v16745_v15 = vld [vmem:[#allocation57_spill] sm:$0xff]  ;;  %v8297_v46 = vpop.permute.xlu0 %8296  ;;  %v8295_v13 = vpop.permute.xlu1 %8294  ;;  %vm6233_vm8 = vcmp.eq.f32.partialorder %v14566_v23, 9.0  ;;  %v16756_v23 = vld [vmem:[#allocation26_spill] sm:$0xff] }
 0x8e2   :  { %v14684_v6 = vadd.f32 %v16740_v58, %v6127_v49  ;;  %v6128_v2 = vadd.f32 %v6112_v47, %v14538_v37  ;;  %v6320_v19 = vpop.f32.mrf.mxu0  ;;  %v14687_v12 = vpop.f32.mrf.mxu1  ;;  %8678 = vmatmul.mubr.msk.bf16.vlgmr.msra.gmra.mxu0 %vm16742_vm15, %v16741_v28  ;;  %v16747_v58 = vld [vmem:[#allocation15_spill] sm:$0xff]  ;;  %v16749_v28 = vld [vmem:[#allocation61_spill] sm:$0xff]  ;;  %vm16759_vm15 = vmmov %vm16751_vm13 }
 0x8e3   :  { %v14693_v9 = vsub.f32 %v16744_v34, %v6320_v19  ;;  %7708 = vmatprep.mubr.bf16.mxu0 %v16091_v3  ;;  %7923 = vmatpush1.bf16.msra.mxu0 %v14233_v21  ;;  %v6245_v32 = vsel %vm6229_vm7, %v16749_v28, 0.0 }
 0x8e4   :  { %v14697_v40 = vadd.f32 %v6257_v0, %v6128_v2  ;;  %v6322_v14 = vpop.f32.mrf.mxu0  ;;  %v14699_v57 = vpop.f32.mrf.mxu1 }
 0x8e5   :  { %v14702_v37 = vsub.f32 %v16652_v41, %v6322_v14  ;;  %vm6448_vm9 = vcmp.eq.f32.partialorder %v14693_v9, 0.0  ;;  %vm6690_vm1 = vcmp.eq.f32.partialorder %v14693_v9, 8.0 }
 0x8e6   :  { %v6324_v29 = vpop.f32.mrf.mxu0  ;;  %v14705_v20 = vpop.f32.mrf.mxu1  ;;  %v6464_v39 = vsel %vm6448_vm9, %v16745_v15, 0.0  ;;  %v14722_v19 = vsel %vm6690_vm1, %v14484_v38, 0.0  ;;  %v16752_v38 = vld [vmem:[#allocation16_spill] sm:$0xff] }
 0x8e7   :  { %v14711_v21 = vsub.f32 %v16744_v34, %v6324_v29  ;;  %v14714_v49 = vadd.f32 %v6464_v39, %v14556_v31  ;;  %vm6449_vm12 = vcmp.eq.f32.partialorder %v14702_v37, 0.0  ;;  %v16750_v29 = vld [vmem:[#allocation58_spill] sm:$0xff]  ;;  %v6261_v39 = vadd.f32 %v6245_v32, %v14580_v51 }
 0x8e8   :  { %v6326_v60 = vpop.f32.mrf.mxu0  ;;  %v14717_v47 = vpop.f32.mrf.mxu1  ;;  %8929 = vmatmul.mubr.msk.bf16.vlgmr.msra.gmra.mxu1 %vm16746_vm5, %v8295_v13  ;;  %v6465_v2 = vsel %vm6449_vm12, %v16747_v58, 0.0  ;;  %v16753_v58 = vld [vmem:[#allocation9_spill] sm:$0xff]  ;;  %vm6691_vm6 = vcmp.eq.f32.partialorder %v14702_v37, 8.0 }
 0x8e9   :  { %v14725_v44 = vsub.f32 %v16652_v41, %v6326_v60  ;;  %8932 = vmatprep.mubr.msk.bf16.mxu1 %vm16748_vm14, %v8297_v46  ;;  %v14729_v31 = vadd.f32 %v6465_v2, %v14569_v50  ;;  %vm6450_vm4 = vcmp.eq.f32.partialorder %v14711_v21, 0.0  ;;  %vm6692_vm1 = vcmp.eq.f32.partialorder %v14711_v21, 8.0 }
 0x8ea   :  { %v6330_v0 = vpop.f32.mrf.mxu0  ;;  %v14733_v14 = vpop.f32.mrf.mxu1  ;;  %8679 = vmatmul.mubr.msk.bf16.gmra.mxu0 %vm16751_vm13, %v16750_v29  ;;  %v6466_v15 = vsel %vm6450_vm4, %v16752_v38, 0.0  ;;  %v14762_v38 = vsel %vm6691_vm6, %v14500_v16, 0.0 }
 0x8eb   :  { %v14740_v13 = vsub.f32 %v16744_v34, %v6330_v0  ;;  %7718 = vmatprep.mubr.bf16.mxu0 %v16091_v3  ;;  %v14744_v50 = vadd.f32 %v6466_v15, %v14578_v30  ;;  %vm6451_vm2 = vcmp.eq.f32.partialorder %v14725_v44, 0.0  ;;  %v16754_v0 = vld [vmem:[#allocation7_spill] sm:$0xff]  ;;  %v8299_v15 = vpop.permute.xlu1 %8298 }
 0x8ec   :  { %v6332_v46 = vpop.f32.mrf.mxu0  ;;  %v14747_v60 = vpop.f32.mrf.mxu1  ;;  %v6467_v2 = vsel %vm6451_vm2, %v16753_v58, 0.0  ;;  %vm16769_vm2 = vmmov %vm16759_vm15 }
 0x8ed   :  { %v14752_v28 = vsub.f32 %v16652_v41, %v6332_v46  ;;  %v14754_v51 = vadd.f32 %v6467_v2, %v6261_v39  ;;  %vm6452_vm10 = vcmp.eq.f32.partialorder %v14740_v13, 0.0 }
 0x8ee   :  { %v6334_v30 = vpop.f32.mrf.mxu0  ;;  %v14758_v32 = vpop.f32.mrf.mxu1  ;;  %v6468_v29 = vsel %vm6452_vm10, %v16754_v0, 0.0  ;;  %v16757_v0 = vld [vmem:[#allocation65_spill] sm:$0xff] }
 0x8ef   :  { %v14765_v58 = vsub.f32 %v16744_v34, %v6334_v30  ;;  %v14768_v46 = vadd.f32 %v6468_v29, %v14600_v10  ;;  %vm6453_vm0 = vcmp.eq.f32.partialorder %v14752_v28, 0.0  ;;  %v6249_v53 = vsel %vm6233_vm8, %v16757_v0, 0.0 }
 0x8f0   :  { %v6336_v39 = vpop.f32.mrf.mxu0  ;;  %v14771_v2 = vpop.f32.mrf.mxu1  ;;  %8933 = vmatmul.mubr.msk.bf16.gmra.mxu1 %vm16755_vm11, %v8299_v15  ;;  %v6469_v63 = vsel %vm6453_vm0, %v16756_v23, 0.0  ;;  %v6265_v10 = vadd.f32 %v6249_v53, %v14619_v43  ;;  %v16760_v15 = vld [vmem:[#allocation6_spill] sm:$0xff]  ;;  %v14791_v0 = vsub.f32 %v16744_v34, %v14644_v25  ;;  %v14803_v53 = vsub.f32 %v16652_v41, %v14654_v22 }
 0x8f1   :  { %v14777_v16 = vsub.f32 %v16652_v41, %v6336_v39  ;;  %v14780_v30 = vadd.f32 %v6469_v63, %v14608_v5  ;;  %vm6454_vm3 = vcmp.eq.f32.partialorder %v14765_v58, 0.0  ;;  %v16762_v25 = vld [vmem:[#allocation46_spill] sm:$0xff]  ;;  %v14821_v22 = vsub.f32 %v16652_v41, %v14671_v36 }
 0x8f2   :  { %v6340_v29 = vpop.f32.mrf.mxu0  ;;  %v14784_v11 = vpop.f32.mrf.mxu1  ;;  %8680 = vmatmul.mubr.msk.bf16.gmra.mxu0 %vm16759_vm15, %v16758_v18  ;;  %v6470_v23 = vsel %vm6454_vm3, %v16760_v15, 0.0  ;;  %16761 = vst [vmem:[#allocation8_spill] sm:$0xff] %v14803_v53  ;;  %v14807_v18 = vsub.f32 %v16744_v34, %v14664_v8  ;;  %v14825_v8 = vsub.f32 %v16744_v34, %v14679_v52  ;;  %vm7154_vm5 = vcmp.eq.f32.partialorder %v14791_v0, 1.0 }
 0x8f3   :  { %v14794_v39 = vsub.f32 %v16744_v34, %v6340_v29  ;;  %7728 = vmatprep.mubr.bf16.mxu0 %v16091_v3  ;;  %v14798_v5 = vadd.f32 %v6470_v23, %v14617_v54  ;;  %vm6455_vm9 = vcmp.eq.f32.partialorder %v14777_v16, 0.0  ;;  %16763 = vst [vmem:[#allocation28_spill] sm:$0xff] %v14821_v22  ;;  %vm7155_vm14 = vcmp.eq.f32.partialorder %v14803_v53, 1.0 }
 0x8f4   :  { %v6342_v43 = vpop.f32.mrf.mxu0  ;;  %v14809_v63 = vpop.f32.mrf.mxu1  ;;  %v6471_v29 = vsel %vm6455_vm9, %v16762_v25, 0.0  ;;  %16764 = vst [vmem:[#allocation35_spill] sm:$0xff] %v14825_v8  ;;  %vm7156_vm4 = vcmp.eq.f32.partialorder %v14807_v18, 1.0  ;;  %vm7157_vm6 = vcmp.eq.f32.partialorder %v14821_v22, 1.0  ;;  %vm7158_vm10 = vcmp.eq.f32.partialorder %v14825_v8, 1.0  ;;  %v16780_v22 = vld [vmem:[#allocation59_spill] sm:$0xff] }
 0x8f5   :  { %v14814_v54 = vsub.f32 %v16652_v41, %v6342_v43  ;;  %v14816_v15 = vadd.f32 %v6471_v29, %v6265_v10  ;;  %vm6456_vm7 = vcmp.eq.f32.partialorder %v14794_v39, 0.0  ;;  %v14831_v43 = vsel %vm6692_vm1, %v14514_v35, 0.0 }
 0x8f6   :  { %v6344_v23 = vpop.f32.mrf.mxu0  ;;  %v14827_v45 = vpop.f32.mrf.mxu1  ;;  %v6472_v25 = vsel %vm6456_vm7, %v14412_v27, 0.0  ;;  %v16765_v27 = vld [vmem:[#allocation36_spill] sm:$0xff]  ;;  %vm6569_vm0 = vcmp.eq.f32.partialorder %v14693_v9, 1.0  ;;  %vm6693_vm11 = vcmp.eq.f32.partialorder %v14725_v44, 8.0  ;;  %vm6570_vm1 = vcmp.eq.f32.partialorder %v14702_v37, 1.0 }
 0x8f7   :  { %v14834_v10 = vsub.f32 %v16744_v34, %v6344_v23  ;;  %v14837_v29 = vadd.f32 %v6472_v25, %v14632_v55  ;;  %vm6457_vm12 = vcmp.eq.f32.partialorder %v14814_v54, 0.0  ;;  %v14855_v25 = vsub.f32 %v16652_v41, %v14687_v12 }
 0x8f8   :  { %v6346_v36 = vpop.f32.mrf.mxu0  ;;  %v7115_v17 = vpop.f32.mrf.mxu1  ;;  %v6473_v52 = vsel %vm6457_vm12, %v16765_v27, 0.0  ;;  %vm6694_vm12 = vcmp.eq.f32.partialorder %v14740_v13, 8.0 }
 0x8f9   :  { %v14845_v35 = vsub.f32 %v16652_v41, %v6346_v36  ;;  %v14847_v23 = vsel %vm7154_vm5, %v7115_v17, 0.0  ;;  %v14850_v55 = vadd.f32 %v6473_v52, %v14639_v61  ;;  %vm6458_vm13 = vcmp.eq.f32.partialorder %v14834_v10, 0.0  ;;  %v16770_v17 = vld [vmem:[#allocation27_spill] sm:$0xff] }
 0x8fa   :  { %16766 = vst [vmem:[#allocation33_spill] sm:$0xff] %v14847_v23  ;;  %v6350_v48 = vpop.f32.mrf.mxu0  ;;  %v7117_v53 = vpop.f32.mrf.mxu1  ;;  %8681 = vmatmul.mubr.msk.bf16.gmra.mxu0 %vm16769_vm2, %v16768_v33  ;;  %v6474_v36 = vsel %vm6458_vm13, %v16770_v17, 0.0  ;;  %v14874_v33 = vsub.f32 %v16744_v34, %v14699_v57  ;;  %v14892_v57 = vsub.f32 %v16652_v41, %v14705_v20  ;;  %vm7159_vm15 = vcmp.eq.f32.partialorder %v14855_v25, 1.0 }
 0x8fb   :  { %16767 = vst [vmem:[#allocation38_spill] sm:$0xff] %v14850_v55  ;;  %v14863_v61 = vsub.f32 %v16744_v34, %v6350_v48  ;;  %v14865_v27 = vsel %vm7155_vm14, %v7117_v53, 0.0  ;;  %7940 = vmatprep.mubr.bf16.mxu0 %v16091_v3  ;;  %v14869_v12 = vadd.f32 %v6474_v36, %v14650_v26  ;;  %vm6459_vm8 = vcmp.eq.f32.partialorder %v14845_v35, 0.0  ;;  %vm16781_vm14 = vmmov %vm16769_vm2 }
 0x8fc   :  { %16771 = vst [vmem:[#allocation50_spill] sm:$0xff] %v14865_v27  ;;  %v6352_v52 = vpop.f32.mrf.mxu0  ;;  %v7119_v23 = vpop.f32.mrf.mxu1  ;;  %v6475_v48 = vsel %vm6459_vm8, %v14437_v62, 0.0  ;;  %16774 = vst [vmem:[#allocation43_spill] sm:$0xff] %v14892_v57  ;;  %v16775_v27 = vld [vmem:[#allocation29_spill] sm:$0xff]  ;;  %vm7160_vm7 = vcmp.eq.f32.partialorder %v14874_v33, 1.0  ;;  %vm7161_vm2 = vcmp.eq.f32.partialorder %v14892_v57, 1.0 }
 0x8fd   :  { %16772 = vst [vmem:[#allocation45_spill] sm:$0xff] %v14869_v12  ;;  %v14880_v53 = vsub.f32 %v16652_v41, %v6352_v52  ;;  %v14884_v26 = vsel %vm7156_vm4, %v7119_v23, 0.0  ;;  %v14887_v17 = vadd.f32 %v6475_v48, %v14660_v1  ;;  %vm6460_vm3 = vcmp.eq.f32.partialorder %v14863_v61, 0.0  ;;  %v16776_v12 = vld [vmem:[#allocation70_spill] sm:$0xff] }
 0x8fe   :  { %16773 = vst [vmem:[#allocation37_spill] sm:$0xff] %v14884_v26  ;;  %v6354_v36 = vpop.f32.mrf.mxu0  ;;  %v7121_v62 = vpop.f32.mrf.mxu1  ;;  %v6476_v52 = vsel %vm6460_vm3, %v16775_v27, 0.0  ;;  %v14897_v55 = vsel %vm6693_vm11, %v16776_v12, 0.0  ;;  %v16778_v27 = vld [vmem:[#allocation69_spill] sm:$0xff]  ;;  %vm6571_vm4 = vcmp.eq.f32.partialorder %v14711_v21, 1.0  ;;  %vm6573_vm8 = vcmp.eq.f32.partialorder %v14740_v13, 1.0 }
 0x8ff   :  { %v14900_v23 = vsub.f32 %v16744_v34, %v6354_v36  ;;  %v14904_v1 = vsel %vm7157_vm6, %v7121_v62, 0.0  ;;  %v14907_v48 = vadd.f32 %v6476_v52, %v14667_v4  ;;  %vm6461_vm9 = vcmp.eq.f32.partialorder %v14880_v53, 0.0 }
 0x900   :  { %16777 = vst [vmem:[#allocation41_spill] sm:$0xff] %v14904_v1  ;;  %v6356_v20 = vpop.f32.mrf.mxu0  ;;  %v7125_v26 = vpop.f32.mrf.mxu1  ;;  %v6477_v12 = vsel %vm6461_vm9, %v16778_v27, 0.0  ;;  %v14927_v52 = vsub.f32 %v16744_v34, %v14717_v47  ;;  %vm6572_vm6 = vcmp.eq.f32.partialorder %v14725_v44, 1.0  ;;  %vm6574_vm11 = vcmp.eq.f32.partialorder %v14752_v28, 1.0 }
 0x901   :  { %v14915_v36 = vsub.f32 %v16652_v41, %v6356_v20  ;;  %v14919_v62 = vsel %vm7158_vm10, %v7125_v26, 0.0  ;;  %v14922_v4 = vadd.f32 %v6477_v12, %v14674_v56  ;;  %vm6462_vm5 = vcmp.eq.f32.partialorder %v14900_v23, 0.0  ;;  %v16782_v20 = vld [vmem:[#allocation32_spill] sm:$0xff] }
 0x902   :  { %16779 = vst [vmem:[#allocation48_spill] sm:$0xff] %v14919_v62  ;;  %v6530_v1 = vpop.f32.mrf.mxu0  ;;  %v7127_v27 = vpop.f32.mrf.mxu1  ;;  %8686 = vmatmul.mubr.msk.bf16.vlgmr.msra.gmra.mxu0 %vm16781_vm14, %v16780_v22  ;;  %v6478_v8 = vsel %vm6462_vm5, %v16782_v20, 0.0  ;;  %v6710_v26 = vsel %vm6694_vm12, %v14532_v24, 0.0  ;;  %v14947_v22 = vsub.f32 %v16652_v41, %v14733_v14  ;;  %vm7162_vm10 = vcmp.eq.f32.partialorder %v14927_v52, 1.0 }
 0x903   :  { %v6585_v56 = vsel %vm6569_vm0, %v6530_v1, 0.0  ;;  %v14938_v12 = vsel %vm7159_vm15, %v7127_v27, 0.0  ;;  %7950 = vmatprep.mubr.bf16.mxu0 %v16091_v3  ;;  %v14942_v47 = vadd.f32 %v6478_v8, %v14684_v6  ;;  %vm6463_vm13 = vcmp.eq.f32.partialorder %v14915_v36, 0.0  ;;  %v16784_v1 = vld [vmem:[#allocation24_spill] sm:$0xff]  ;;  %vm16788_vm15 = vmmov %vm16781_vm14 }
 0x904   :  { %16783 = vst [vmem:[#allocation18_spill] sm:$0xff] %v14938_v12  ;;  %v6601_v24 = vadd.f32 %v6585_v56, %v14714_v49  ;;  %v6532_v20 = vpop.f32.mrf.mxu0  ;;  %v7129_v62 = vpop.f32.mrf.mxu1  ;;  %v6479_v27 = vsel %vm6463_vm13, %v16784_v1, 0.0  ;;  %v14954_v12 = vsub.f32 %v16744_v34, %v14747_v60  ;;  %vm7163_vm0 = vcmp.eq.f32.partialorder %v14947_v22, 1.0 }
 0x905   :  { %v6586_v6 = vsel %vm6570_vm1, %v6532_v20, 0.0  ;;  %v14960_v8 = vsel %vm7160_vm7, %v7129_v62, 0.0  ;;  %v14963_v14 = vadd.f32 %v6479_v27, %v14697_v40  ;;  %v14973_v20 = vsub.f32 %v16652_v41, %v14758_v32 }
 0x906   :  { %v6602_v49 = vadd.f32 %v6586_v6, %v14729_v31  ;;  %v6534_v56 = vpop.f32.mrf.mxu0  ;;  %v7131_v57 = vpop.f32.mrf.mxu1  ;;  %v14969_v60 = vadd.f32 %v14722_v19, %v6601_v24  ;;  %v14982_v31 = vsub.f32 %v16744_v34, %v14771_v2  ;;  %vm7164_vm3 = vcmp.eq.f32.partialorder %v14954_v12, 1.0 }
 0x907   :  { %v6587_v62 = vsel %vm6571_vm4, %v6534_v56, 0.0  ;;  %v14977_v40 = vsel %vm7161_vm2, %v7131_v57, 0.0  ;;  %v14995_v2 = vsub.f32 %v16652_v41, %v14784_v11  ;;  %vm6575_vm9 = vcmp.eq.f32.partialorder %v14765_v58, 1.0 }
 0x908   :  { %16785 = vst [vmem:[#allocation17_spill] sm:$0xff] %v14977_v40  ;;  %v6603_v1 = vadd.f32 %v6587_v62, %v14744_v50  ;;  %v6536_v27 = vpop.f32.mrf.mxu0  ;;  %v7135_v19 = vpop.f32.mrf.mxu1  ;;  %v14987_v32 = vadd.f32 %v14762_v38, %v6602_v49  ;;  %v16787_v62 = vld [vmem:[#allocation62_spill] sm:$0xff]  ;;  %vm7165_vm1 = vcmp.eq.f32.partialorder %v14973_v20, 1.0  ;;  %vm6576_vm7 = vcmp.eq.f32.partialorder %v14777_v16, 1.0 }
 0x909   :  { %v6588_v24 = vsel %vm6572_vm6, %v6536_v27, 0.0  ;;  %v14989_v6 = vsel %vm7162_vm10, %v7135_v19, 0.0  ;;  %vm7166_vm12 = vcmp.eq.f32.partialorder %v14982_v31, 1.0  ;;  %vm6695_vm5 = vcmp.eq.f32.partialorder %v14752_v28, 8.0 }
 0x90a   :  { %16786 = vst [vmem:[#allocation55_spill] sm:$0xff] %v14989_v6  ;;  %v6604_v50 = vadd.f32 %v6588_v24, %v14754_v51  ;;  %v6540_v57 = vpop.f32.mrf.mxu0  ;;  %v7137_v56 = vpop.f32.mrf.mxu1  ;;  %8687 = vmatmul.mubr.msk.bf16.gmra.mxu0 %vm16788_vm15, %v16787_v62  ;;  %v15002_v38 = vadd.f32 %v14831_v43, %v6603_v1  ;;  %v15019_v1 = vsub.f32 %v16744_v34, %v14809_v63  ;;  %vm6577_vm14 = vcmp.eq.f32.partialorder %v14794_v39, 1.0 }
 0x90b   :  { %v6589_v49 = vsel %vm6573_vm8, %v6540_v57, 0.0  ;;  %v15006_v27 = vsel %vm7163_vm0, %v7137_v56, 0.0  ;;  %7960 = vmatprep.mubr.bf16.mxu0 %v16091_v3  ;;  %vm7167_vm4 = vcmp.eq.f32.partialorder %v14995_v2, 1.0  ;;  %vm6696_vm13 = vcmp.eq.f32.partialorder %v14765_v58, 8.0  ;;  %vm16794_vm0 = vmmov %vm16788_vm15 }
 0x90c   :  { %16789 = vst [vmem:[#allocation21_spill] sm:$0xff] %v15006_v27  ;;  %v6605_v11 = vadd.f32 %v6589_v49, %v14768_v46  ;;  %v6542_v51 = vpop.f32.mrf.mxu0  ;;  %v7139_v19 = vpop.f32.mrf.mxu1  ;;  %v15014_v43 = vadd.f32 %v14897_v55, %v6604_v50  ;;  %v15035_v63 = vsub.f32 %v16652_v41, %v14827_v45  ;;  %vm6578_vm2 = vcmp.eq.f32.partialorder %v14814_v54, 1.0 }
 0x90d   :  { %v6590_v24 = vsel %vm6574_vm11, %v6542_v51, 0.0  ;;  %v15025_v57 = vsel %vm7164_vm3, %v7139_v19, 0.0  ;;  %vm7396_vm6 = vcmp.eq.f32.partialorder %v14791_v0, 9.0  ;;  %vm6697_vm10 = vcmp.eq.f32.partialorder %v14777_v16, 8.0 }
 0x90e   :  { %16790 = vst [vmem:[#allocation22_spill] sm:$0xff] %v15025_v57  ;;  %v6606_v46 = vadd.f32 %v6590_v24, %v14780_v30  ;;  %v6544_v56 = vpop.f32.mrf.mxu0  ;;  %v7141_v55 = vpop.f32.mrf.mxu1  ;;  %v15030_v50 = vadd.f32 %v6710_v26, %v6605_v11  ;;  %v6711_v30 = vsel %vm6695_vm5, %v14541_v42, 0.0  ;;  %vm7168_vm8 = vcmp.eq.f32.partialorder %v15019_v1, 1.0 }
 0x90f   :  { %v6591_v62 = vsel %vm6575_vm9, %v6544_v56, 0.0  ;;  %v15041_v49 = vsel %vm7165_vm1, %v7141_v55, 0.0  ;;  %v6712_v42 = vsel %vm6696_vm13, %v14551_v7, 0.0  ;;  %vm6579_vm11 = vcmp.eq.f32.partialorder %v14834_v10, 1.0 }
 0x910   :  { %16791 = vst [vmem:[#allocation19_spill] sm:$0xff] %v15041_v49  ;;  %v6607_v51 = vadd.f32 %v6591_v62, %v14798_v5  ;;  %v6546_v19 = vpop.f32.mrf.mxu0  ;;  %v7145_v26 = vpop.f32.mrf.mxu1  ;;  %v15047_v11 = vadd.f32 %v6711_v30, %v6606_v46  ;;  %v16793_v62 = vld [vmem:[#allocation64_spill] sm:$0xff]  ;;  %vm6698_vm3 = vcmp.eq.f32.partialorder %v14794_v39, 8.0  ;;  %vm7169_vm15 = vcmp.eq.f32.partialorder %v15035_v63, 1.0 }
 0x911   :  { %v6592_v45 = vsel %vm6576_vm7, %v6546_v19, 0.0  ;;  %v15054_v24 = vsel %vm7166_vm12, %v7145_v26, 0.0  ;;  %v6713_v7 = vsel %vm6697_vm10, %v14560_v59, 0.0  ;;  %vm6580_vm9 = vcmp.eq.f32.partialorder %v14845_v35, 1.0  ;;  %v16798_v59 = vld [vmem:[#allocation38_spill] sm:$0xff] }
 0x912   :  { %16792 = vst [vmem:[#allocation20_spill] sm:$0xff] %v15054_v24  ;;  %v6608_v5 = vadd.f32 %v6592_v45, %v14816_v15  ;;  %v6550_v56 = vpop.f32.mrf.mxu0  ;;  %v7147_v55 = vpop.f32.mrf.mxu1  ;;  %8688 = vmatmul.mubr.msk.bf16.gmra.mxu0 %vm16794_vm0, %v16793_v62  ;;  %v15062_v46 = vadd.f32 %v6712_v42, %v6607_v51  ;;  %vm6699_vm1 = vcmp.eq.f32.partialorder %v14814_v54, 8.0  ;;  %vm6704_vm7 = vcmp.eq.f32.partialorder %v14900_v23, 8.0 }
 0x913   :  { %v6593_v30 = vsel %vm6577_vm14, %v6550_v56, 0.0  ;;  %v15069_v19 = vsel %vm7167_vm4, %v7147_v55, 0.0  ;;  %7970 = vmatprep.mubr.bf16.mxu0 %v16091_v3  ;;  %v16797_v56 = vld [vmem:[#allocation30_spill] sm:$0xff]  ;;  %vm6700_vm12 = vcmp.eq.f32.partialorder %v14834_v10, 8.0  ;;  %vm6705_vm5 = vcmp.eq.f32.partialorder %v14915_v36, 8.0 }
 0x914   :  { %16795 = vst [vmem:[#allocation23_spill] sm:$0xff] %v15069_v19  ;;  %v6609_v15 = vadd.f32 %v6593_v30, %v14837_v29  ;;  %v6552_v51 = vpop.f32.mrf.mxu0  ;;  %v7149_v26 = vpop.f32.mrf.mxu1  ;;  %v15078_v45 = vadd.f32 %v6713_v7, %v6608_v5  ;;  %v6714_v55 = vsel %vm6698_vm3, %v16797_v56, 0.0  ;;  %v16799_v5 = vld [vmem:[#allocation72_spill] sm:$0xff]  ;;  %v16801_v56 = vld [vmem:[#allocation47_spill] sm:$0xff]  ;;  %vm6701_vm14 = vcmp.eq.f32.partialorder %v14845_v35, 8.0 }
 0x915   :  { %v6594_v42 = vsel %vm6578_vm2, %v6552_v51, 0.0  ;;  %v15085_v3 = vsel %vm7168_vm8, %v7149_v26, 0.0  ;;  %v6720_v7 = vsel %vm6704_vm7, %v16799_v5, 0.0  ;;  %v6715_v34 = vsel %vm6699_vm1, %v16801_v56, 0.0  ;;  %v16803_v5 = vld [vmem:[#allocation31_spill] sm:$0xff]  ;;  %v16805_v56 = vld [vmem:[#allocation8_spill] sm:$0xff]  ;;  %vm16808_vm2 = vmmov %vm16794_vm0 }
 0x916   :  { %16796 = vst [vmem:[#allocation25_spill] sm:$0xff] %v15085_v3  ;;  %v6610_v29 = vadd.f32 %v6594_v42, %v16798_v59  ;;  %v6554_v62 = vpop.f32.mrf.mxu0  ;;  %v7151_v30 = vpop.f32.mrf.mxu1  ;;  %v15090_v41 = vadd.f32 %v6714_v55, %v6609_v15  ;;  %v16802_v42 = vld [vmem:[#allocation45_spill] sm:$0xff]  ;;  %v6721_v19 = vsel %vm6705_vm5, %v16803_v5, 0.0  ;;  %vm7397_vm4 = vcmp.eq.f32.partialorder %v16805_v56, 9.0 }
 0x917   :  { %v6595_v51 = vsel %vm6579_vm11, %v6554_v62, 0.0  ;;  %v15098_v26 = vsel %vm7169_vm15, %v7151_v30, 0.0  ;;  %vm6581_vm13 = vcmp.eq.f32.partialorder %v14863_v61, 1.0  ;;  %vm6702_vm10 = vcmp.eq.f32.partialorder %v14863_v61, 8.0 }
 0x918   :  { %16800 = vst [vmem:[#allocation53_spill] sm:$0xff] %v15098_v26  ;;  %v6611_v59 = vadd.f32 %v6595_v51, %v16802_v42  ;;  %v6556_v3 = vpop.f32.mrf.mxu0  ;;  %v7357_v15 = vpop.f32.mrf.mxu1  ;;  %v15103_v55 = vadd.f32 %v6715_v34, %v6610_v29  ;;  %v16806_v26 = vld [vmem:[#allocation10_spill] sm:$0xff]  ;;  %vm6582_vm8 = vcmp.eq.f32.partialorder %v14880_v53, 1.0  ;;  %vm6703_vm0 = vcmp.eq.f32.partialorder %v14880_v53, 8.0 }
 0x919   :  { %v6596_v62 = vsel %vm6580_vm9, %v6556_v3, 0.0  ;;  %v15111_v30 = vsel %vm7396_vm6, %v7357_v15, 0.0  ;;  %v6716_v24 = vsel %vm6700_vm12, %v16806_v26, 0.0  ;;  %v16807_v29 = vld [vmem:[#allocation66_spill] sm:$0xff]  ;;  %vm7398_vm6 = vcmp.eq.f32.partialorder %v14807_v18, 9.0 }
 0x91a   :  { %16804 = vst [vmem:[#allocation34_spill] sm:$0xff] %v15111_v30  ;;  %v6612_v51 = vadd.f32 %v6596_v62, %v14887_v17  ;;  %v6560_v42 = vpop.f32.mrf.mxu0  ;;  %v7359_v34 = vpop.f32.mrf.mxu1  ;;  %8689 = vmatmul.mubr.msk.bf16.gmra.mxu0 %vm16808_vm2, %v16807_v29  ;;  %v15119_v5 = vadd.f32 %v6716_v24, %v6611_v59  ;;  %v16810_v30 = vld [vmem:[#allocation49_spill] sm:$0xff]  ;;  %vm6583_vm11 = vcmp.eq.f32.partialorder %v14900_v23, 1.0  ;;  %vm6584_vm15 = vcmp.eq.f32.partialorder %v14915_v36, 1.0 }
 0x91b   :  { %v6597_v3 = vsel %vm6581_vm13, %v6560_v42, 0.0  ;;  %v15122_v15 = vsel %vm7397_vm4, %v7359_v34, 0.0  ;;  %v6717_v17 = vsel %vm6701_vm14, %v16810_v30, 0.0  ;;  %v16812_v42 = vld [vmem:[#allocation71_spill] sm:$0xff]  ;;  %vm6811_vm1 = vcmp.eq.f32.partialorder %v14693_v9, 9.0 }
 0x91c   :  { %16809 = vst [vmem:[#allocation12_spill] sm:$0xff] %v15122_v15  ;;  %v6613_v26 = vadd.f32 %v6597_v3, %v14907_v48  ;;  %v6562_v62 = vpop.f32.mrf.mxu0  ;;  %v7361_v49 = vpop.f32.mrf.mxu1  ;;  %v15130_v29 = vadd.f32 %v6717_v17, %v6612_v51  ;;  %v6718_v34 = vsel %vm6702_vm10, %v16812_v42, 0.0  ;;  %v16813_v48 = vld [vmem:[#allocation28_spill] sm:$0xff]  ;;  %v16814_v17 = vld [vmem:[#allocation5_spill] sm:$0xff]  ;;  %vm7401_vm7 = vcmp.eq.f32.partialorder %v14855_v25, 9.0 }
 0x91d   :  { %v6598_v24 = vsel %vm6582_vm8, %v6562_v62, 0.0  ;;  %v15133_v59 = vsel %vm7398_vm6, %v7361_v49, 0.0  ;;  %vm7399_vm3 = vcmp.eq.f32.partialorder %v16813_v48, 9.0  ;;  %v6719_v6 = vsel %vm6703_vm0, %v16814_v17, 0.0 }
 0x91e   :  { %16811 = vst [vmem:[#allocation39_spill] sm:$0xff] %v15133_v59  ;;  %v6614_v15 = vadd.f32 %v6598_v24, %v14922_v4  ;;  %v6564_v57 = vpop.f32.mrf.mxu0  ;;  %v7363_v30 = vpop.f32.mrf.mxu1  ;;  %v15139_v3 = vadd.f32 %v6718_v34, %v6613_v26  ;;  %v16815_v4 = vld [vmem:[#allocation35_spill] sm:$0xff]  ;;  %vm6812_vm12 = vcmp.eq.f32.partialorder %v14702_v37, 9.0  ;;  %vm7402_vm5 = vcmp.eq.f32.partialorder %v14874_v33, 9.0 }
 0x91f   :  { %v6599_v27 = vsel %vm6583_vm11, %v6564_v57, 0.0  ;;  %v15141_v51 = vsel %vm7399_vm3, %v7363_v30, 0.0  ;;  %vm7400_vm9 = vcmp.eq.f32.partialorder %v16815_v4, 9.0  ;;  %vm6813_vm14 = vcmp.eq.f32.partialorder %v14711_v21, 9.0 }
 0x920   :  { %v6615_v49 = vadd.f32 %v6599_v27, %v14942_v47  ;;  %v6566_v62 = vpop.f32.mrf.mxu0  ;;  %v7367_v42 = vpop.f32.mrf.mxu1  ;;  %v15147_v24 = vadd.f32 %v6719_v6, %v6614_v15  ;;  %vm6814_vm13 = vcmp.eq.f32.partialorder %v14725_v44, 9.0  ;;  %vm7404_vm2 = vcmp.eq.f32.partialorder %v14927_v52, 9.0 }
 0x921   :  { %v6600_v59 = vsel %vm6584_vm15, %v6566_v62, 0.0  ;;  %v15149_v40 = vsel %vm7400_vm9, %v7367_v42, 0.0  ;;  %vm6815_vm10 = vcmp.eq.f32.partialorder %v14740_v13, 9.0  ;;  %vm7405_vm6 = vcmp.eq.f32.partialorder %v14947_v22, 9.0 }
 0x922   :  { %v6616_v26 = vadd.f32 %v6600_v59, %v14963_v14  ;;  %v6772_v57 = vpop.f32.mrf.mxu0  ;;  %v7369_v34 = vpop.f32.mrf.mxu1  ;;  %v15154_v47 = vadd.f32 %v6720_v7, %v6615_v49  ;;  %vm6816_vm8 = vcmp.eq.f32.partialorder %v14752_v28, 9.0  ;;  %vm7406_vm0 = vcmp.eq.f32.partialorder %v14954_v12, 9.0 }
 0x923   :  { %v6827_v27 = vsel %vm6811_vm1, %v6772_v57, 0.0  ;;  %v15156_v30 = vsel %vm7401_vm7, %v7369_v34, 0.0  ;;  %vm6817_vm11 = vcmp.eq.f32.partialorder %v14765_v58, 9.0  ;;  %vm7407_vm3 = vcmp.eq.f32.partialorder %v14973_v20, 9.0 }
 0x924   :  { %v15159_v17 = vadd.f32 %v6827_v27, %v14969_v60  ;;  %v6774_v6 = vpop.f32.mrf.mxu0  ;;  %v7371_v15 = vpop.f32.mrf.mxu1  ;;  %v15163_v14 = vadd.f32 %v6721_v19, %v6616_v26  ;;  %v16816_v60 = vld [vmem:[#allocation43_spill] sm:$0xff]  ;;  %vm6818_vm15 = vcmp.eq.f32.partialorder %v14777_v16, 9.0  ;;  %vm7408_vm9 = vcmp.eq.f32.partialorder %v14982_v31, 9.0 }
 0x925   :  { %v6828_v9 = vsel %vm6812_vm12, %v6774_v6, 0.0  ;;  %v15165_v59 = vsel %vm7402_vm5, %v7371_v15, 0.0  ;;  %vm7403_vm4 = vcmp.eq.f32.partialorder %v16816_v60, 9.0  ;;  %vm6819_vm1 = vcmp.eq.f32.partialorder %v14794_v39, 9.0 }
 0x926   :  { %v15168_v7 = vadd.f32 %v6828_v9, %v14987_v32  ;;  %v6776_v49 = vpop.f32.mrf.mxu0  ;;  %v7373_v62 = vpop.f32.mrf.mxu1  ;;  %vm7409_vm7 = vcmp.eq.f32.partialorder %v14995_v2, 9.0  ;;  %vm6820_vm12 = vcmp.eq.f32.partialorder %v14814_v54, 9.0  ;;  %vm7410_vm5 = vcmp.eq.f32.partialorder %v15019_v1, 9.0 }
 0x927   :  { %v6829_v42 = vsel %vm6813_vm14, %v6776_v49, 0.0  ;;  %v15172_v57 = vsel %vm7403_vm4, %v7373_v62, 0.0  ;;  %vm6821_vm14 = vcmp.eq.f32.partialorder %v14834_v10, 9.0  ;;  %vm7411_vm4 = vcmp.eq.f32.partialorder %v15035_v63, 9.0 }
 0x928   :  { %v15175_v37 = vadd.f32 %v6829_v42, %v15002_v38  ;;  %v6778_v19 = vpop.f32.mrf.mxu0  ;;  %v7377_v26 = vpop.f32.mrf.mxu1 }
 0x929   :  { %v6830_v32 = vsel %vm6814_vm13, %v6778_v19, 0.0  ;;  %v15179_v34 = vsel %vm7404_vm2, %v7377_v26, 0.0  ;;  %vm6822_vm13 = vcmp.eq.f32.partialorder %v14845_v35, 9.0  ;;  %vm6823_vm2 = vcmp.eq.f32.partialorder %v14863_v61, 9.0 }
 0x92a   :  { %v15182_v21 = vadd.f32 %v6830_v32, %v15014_v43  ;;  %v6782_v27 = vpop.f32.mrf.mxu0  ;;  %v7379_v6 = vpop.f32.mrf.mxu1 }
 0x92b   :  { %v6831_v38 = vsel %vm6815_vm10, %v6782_v27, 0.0  ;;  %v15186_v15 = vsel %vm7405_vm6, %v7379_v6, 0.0  ;;  %vm6824_vm10 = vcmp.eq.f32.partialorder %v14880_v53, 9.0  ;;  %vm6825_vm6 = vcmp.eq.f32.partialorder %v14900_v23, 9.0 }
 0x92c   :  { %v15189_v44 = vadd.f32 %v6831_v38, %v15030_v50  ;;  %v6784_v9 = vpop.f32.mrf.mxu0  ;;  %v7381_v49 = vpop.f32.mrf.mxu1 }
 0x92d   :  { %v6832_v43 = vsel %vm6816_vm8, %v6784_v9, 0.0  ;;  %v15193_v62 = vsel %vm7406_vm0, %v7381_v49, 0.0  ;;  %vm6826_vm8 = vcmp.eq.f32.partialorder %v14915_v36, 9.0  ;;  %vm7033_vm0 = vcmp.eq.f32.partialorder %v14791_v0, 0.0 }
 0x92e   :  { %v15196_v13 = vadd.f32 %v6832_v43, %v15047_v11  ;;  %v6786_v42 = vpop.f32.mrf.mxu0  ;;  %v7383_v19 = vpop.f32.mrf.mxu1 }
 0x92f   :  { %v6833_v50 = vsel %vm6817_vm11, %v6786_v42, 0.0  ;;  %v15200_v26 = vsel %vm7407_vm3, %v7383_v19, 0.0  ;;  %vm7034_vm11 = vcmp.eq.f32.partialorder %v16805_v56, 0.0  ;;  %vm7035_vm3 = vcmp.eq.f32.partialorder %v14807_v18, 0.0 }
 0x930   :  { %v15203_v28 = vadd.f32 %v6833_v50, %v15062_v46  ;;  %v6788_v32 = vpop.f32.mrf.mxu0  ;;  %v7387_v27 = vpop.f32.mrf.mxu1 }
 0x931   :  { %v6834_v11 = vsel %vm6818_vm15, %v6788_v32, 0.0  ;;  %v15207_v6 = vsel %vm7408_vm9, %v7387_v27, 0.0  ;;  %vm7036_vm15 = vcmp.eq.f32.partialorder %v16813_v48, 0.0  ;;  %vm7037_vm9 = vcmp.eq.f32.partialorder %v16815_v4, 0.0 }
 0x932   :  { %v15210_v58 = vadd.f32 %v6834_v11, %v15078_v45  ;;  %v6792_v38 = vpop.f32.mrf.mxu0  ;;  %v7389_v9 = vpop.f32.mrf.mxu1 }
 0x933   :  { %v6835_v46 = vsel %vm6819_vm1, %v6792_v38, 0.0  ;;  %v15214_v49 = vsel %vm7409_vm7, %v7389_v9, 0.0  ;;  %vm7038_vm1 = vcmp.eq.f32.partialorder %v14855_v25, 0.0  ;;  %vm7039_vm7 = vcmp.eq.f32.partialorder %v14874_v33, 0.0 }
 0x934   :  { %v15217_v16 = vadd.f32 %v6835_v46, %v15090_v41  ;;  %v6794_v43 = vpop.f32.mrf.mxu0  ;;  %v7391_v42 = vpop.f32.mrf.mxu1 }
 0x935   :  { %v6836_v45 = vsel %vm6820_vm12, %v6794_v43, 0.0  ;;  %v15221_v19 = vsel %vm7410_vm5, %v7391_v42, 0.0  ;;  %vm7040_vm12 = vcmp.eq.f32.partialorder %v16816_v60, 0.0  ;;  %vm7041_vm5 = vcmp.eq.f32.partialorder %v14927_v52, 0.0 }
 0x936   :  { %v15224_v39 = vadd.f32 %v6836_v45, %v15103_v55  ;;  %v6796_v50 = vpop.f32.mrf.mxu0  ;;  %v7393_v32 = vpop.f32.mrf.mxu1 }
 0x937   :  { %v6837_v41 = vsel %vm6821_vm14, %v6796_v50, 0.0  ;;  %v15228_v27 = vsel %vm7411_vm4, %v7393_v32, 0.0  ;;  %vm7042_vm14 = vcmp.eq.f32.partialorder %v14947_v22, 0.0  ;;  %vm7043_vm4 = vcmp.eq.f32.partialorder %v14954_v12, 0.0 }
 0x938   :  { %v15231_v54 = vadd.f32 %v6837_v41, %v15119_v5  ;;  %v6798_v11 = vpop.f32.mrf.mxu0  ;;  %v15234_v38 = vpop.f32.mrf.mxu1 }
 0x939   :  { %v6838_v9 = vsel %vm6822_vm13, %v6798_v11, 0.0  ;;  %vm7044_vm13 = vcmp.eq.f32.partialorder %v14973_v20, 0.0 }
 0x93a   :  { %v15237_v55 = vadd.f32 %v6838_v9, %v15130_v29  ;;  %v6802_v46 = vpop.f32.mrf.mxu0  ;;  %v15240_v10 = vpop.f32.mrf.mxu1 }
 0x93b   :  { %16817 = vst [vmem:[#allocation13_spill] sm:$0xff] %v15240_v10  ;;  %v6839_v43 = vsel %vm6823_vm2, %v6802_v46, 0.0  ;;  %vm7045_vm2 = vcmp.eq.f32.partialorder %v14982_v31, 0.0 }
 0x93c   :  { %v15243_v42 = vadd.f32 %v6839_v43, %v15139_v3  ;;  %v6804_v5 = vpop.f32.mrf.mxu0  ;;  %v15246_v45 = vpop.f32.mrf.mxu1 }
 0x93d   :  { %v6840_v35 = vsel %vm6824_vm10, %v6804_v5, 0.0  ;;  %vm7046_vm10 = vcmp.eq.f32.partialorder %v14995_v2, 0.0 }
 0x93e   :  { %v15249_v50 = vadd.f32 %v6840_v35, %v15147_v24  ;;  %v6806_v29 = vpop.f32.mrf.mxu0  ;;  %v15252_v32 = vpop.f32.mrf.mxu1 }
 0x93f   :  { %16818 = vst [vmem:[#allocation52_spill] sm:$0xff] %v15252_v32  ;;  %v6841_v61 = vsel %vm6825_vm6, %v6806_v29, 0.0  ;;  %vm7047_vm6 = vcmp.eq.f32.partialorder %v15019_v1, 0.0 }
 0x940   :  { %v15255_v41 = vadd.f32 %v6841_v61, %v15154_v47  ;;  %v6808_v3 = vpop.f32.mrf.mxu0  ;;  %v15258_v11 = vpop.f32.mrf.mxu1  ;;  %v16821_v61 = vld [vmem:[#allocation33_spill] sm:$0xff] }
 0x941   :  { %v6842_v53 = vsel %vm6826_vm8, %v6808_v3, 0.0  ;;  %vm7048_vm8 = vcmp.eq.f32.partialorder %v15035_v63, 0.0 }
 0x942   :  { %v15261_v9 = vadd.f32 %v6842_v53, %v15163_v14  ;;  %v6994_v24 = vpop.f32.mrf.mxu0  ;;  %v15264_v46 = vpop.f32.mrf.mxu1 }
 0x943   :  { %16819 = vst [vmem:[#allocation14_spill] sm:$0xff] %v15264_v46  ;;  %v7049_v23 = vsel %vm7033_vm0, %v6994_v24, 0.0  ;;  %v16823_v46 = vld [vmem:[#allocation50_spill] sm:$0xff]  ;;  %vm7275_vm0 = vcmp.eq.f32.partialorder %v14791_v0, 8.0 }
 0x944   :  { %v7065_v43 = vadd.f32 %v7049_v23, %v15159_v17  ;;  %v6996_v5 = vpop.f32.mrf.mxu0  ;;  %v15268_v47 = vpop.f32.mrf.mxu1 }
 0x945   :  { %v7050_v36 = vsel %vm7034_vm11, %v6996_v5, 0.0  ;;  %vm7276_vm11 = vcmp.eq.f32.partialorder %v16805_v56, 8.0 }
 0x946   :  { %v7066_v35 = vadd.f32 %v7050_v36, %v15168_v7  ;;  %v6998_v29 = vpop.f32.mrf.mxu0  ;;  %v15272_v14 = vpop.f32.mrf.mxu1  ;;  %v15275_v3 = vadd.f32 %v16821_v61, %v7065_v43  ;;  %v16825_v43 = vld [vmem:[#allocation37_spill] sm:$0xff] }
 0x947   :  { %16820 = vst [vmem:[#allocation63_spill] sm:$0xff] %v15272_v14  ;;  %v7051_v53 = vsel %vm7035_vm3, %v6998_v29, 0.0  ;;  %vm7277_vm3 = vcmp.eq.f32.partialorder %v14807_v18, 8.0 }
 0x948   :  { %v7067_v24 = vadd.f32 %v7051_v53, %v15175_v37  ;;  %v7000_v17 = vpop.f32.mrf.mxu0  ;;  %v15279_v23 = vpop.f32.mrf.mxu1  ;;  %v15282_v5 = vadd.f32 %v16823_v46, %v7066_v35  ;;  %v16827_v46 = vld [vmem:[#allocation41_spill] sm:$0xff] }
 0x949   :  { %16822 = vst [vmem:[#allocation67_spill] sm:$0xff] %v15279_v23  ;;  %v7052_v7 = vsel %vm7036_vm15, %v7000_v17, 0.0  ;;  %vm7278_vm15 = vcmp.eq.f32.partialorder %v16813_v48, 8.0 }
 0x94a   :  { %v7068_v36 = vadd.f32 %v7052_v7, %v15182_v21  ;;  %v7004_v32 = vpop.f32.mrf.mxu0  ;;  %v15286_v14 = vpop.f32.mrf.mxu1  ;;  %v15289_v29 = vadd.f32 %v16825_v43, %v7067_v24  ;;  %v16829_v24 = vld [vmem:[#allocation48_spill] sm:$0xff] }
 0x94b   :  { %16824 = vst [vmem:[#allocation40_spill] sm:$0xff] %v15286_v14  ;;  %v7053_v37 = vsel %vm7037_vm9, %v7004_v32, 0.0  ;;  %vm7279_vm9 = vcmp.eq.f32.partialorder %v16815_v4, 8.0 }
 0x94c   :  { %v7069_v61 = vadd.f32 %v7053_v37, %v15189_v44  ;;  %v7006_v53 = vpop.f32.mrf.mxu0  ;;  %v15293_v10 = vpop.f32.mrf.mxu1  ;;  %v15296_v35 = vadd.f32 %v16827_v46, %v7068_v36  ;;  %v16831_v36 = vld [vmem:[#allocation18_spill] sm:$0xff] }
 0x94d   :  { %16826 = vst [vmem:[#allocation68_spill] sm:$0xff] %v15293_v10  ;;  %v7054_v21 = vsel %vm7038_vm1, %v7006_v53, 0.0  ;;  %vm7280_vm1 = vcmp.eq.f32.partialorder %v14855_v25, 8.0 }
 0x94e   :  { %v7070_v17 = vadd.f32 %v7054_v21, %v15196_v13  ;;  %v7008_v7 = vpop.f32.mrf.mxu0  ;;  %v15300_v14 = vpop.f32.mrf.mxu1  ;;  %v15303_v32 = vadd.f32 %v16829_v24, %v7069_v61 }
 0x94f   :  { %16828 = vst [vmem:[#allocation11_spill] sm:$0xff] %v15300_v14  ;;  %v7055_v44 = vsel %vm7039_vm7, %v7008_v7, 0.0  ;;  %vm7281_vm7 = vcmp.eq.f32.partialorder %v14874_v33, 8.0 }
 0x950   :  { %v7071_v43 = vadd.f32 %v7055_v44, %v15203_v28  ;;  %v7010_v37 = vpop.f32.mrf.mxu0  ;;  %v15307_v10 = vpop.f32.mrf.mxu1  ;;  %v15310_v53 = vadd.f32 %v16831_v36, %v7070_v17  ;;  %v16834_v17 = vld [vmem:[#allocation17_spill] sm:$0xff] }
 0x951   :  { %16830 = vst [vmem:[#allocation54_spill] sm:$0xff] %v15307_v10  ;;  %v7056_v13 = vsel %vm7040_vm12, %v7010_v37, 0.0  ;;  %vm7282_vm12 = vcmp.eq.f32.partialorder %v16816_v60, 8.0 }
 0x952   :  { %v7072_v46 = vadd.f32 %v7056_v13, %v15210_v58  ;;  %v7014_v21 = vpop.f32.mrf.mxu0  ;;  %v15314_v14 = vpop.f32.mrf.mxu1  ;;  %v15317_v61 = vadd.f32 %v14960_v8, %v7071_v43  ;;  %v16836_v8 = vld [vmem:[#allocation55_spill] sm:$0xff] }
 0x953   :  { %16832 = vst [vmem:[#allocation51_spill] sm:$0xff] %v15314_v14  ;;  %v7057_v28 = vsel %vm7041_vm5, %v7014_v21, 0.0  ;;  %vm7283_vm5 = vcmp.eq.f32.partialorder %v14927_v52, 8.0 }
 0x954   :  { %v7073_v7 = vadd.f32 %v7057_v28, %v15217_v16  ;;  %v7016_v24 = vpop.f32.mrf.mxu0  ;;  %v15321_v44 = vpop.f32.mrf.mxu1  ;;  %v15324_v37 = vadd.f32 %v16834_v17, %v7072_v46  ;;  %v16837_v46 = vld [vmem:[#allocation21_spill] sm:$0xff] }
 0x955   :  { %16833 = vst [vmem:[#allocation57_spill] sm:$0xff] %v15321_v44  ;;  %v7058_v58 = vsel %vm7042_vm14, %v7016_v24, 0.0  ;;  %vm7284_vm14 = vcmp.eq.f32.partialorder %v14947_v22, 8.0 }
 0x956   :  { %v7074_v36 = vadd.f32 %v7058_v58, %v15224_v39  ;;  %v7018_v13 = vpop.f32.mrf.mxu0  ;;  %v15328_v14 = vpop.f32.mrf.mxu1  ;;  %v15331_v43 = vadd.f32 %v16836_v8, %v7073_v7  ;;  %v16839_v7 = vld [vmem:[#allocation22_spill] sm:$0xff] }
 0x957   :  { %16835 = vst [vmem:[#allocation15_spill] sm:$0xff] %v15328_v14  ;;  %v7059_v16 = vsel %vm7043_vm4, %v7018_v13, 0.0  ;;  %vm7285_vm4 = vcmp.eq.f32.partialorder %v14954_v12, 8.0 }
 0x958   :  { %v7075_v21 = vadd.f32 %v7059_v16, %v15231_v54  ;;  %v7020_v28 = vpop.f32.mrf.mxu0  ;;  %v15335_v44 = vpop.f32.mrf.mxu1  ;;  %v15338_v24 = vadd.f32 %v16837_v46, %v7074_v36  ;;  %v16840_v36 = vld [vmem:[#allocation19_spill] sm:$0xff] }
 0x959   :  { %v7060_v39 = vsel %vm7044_vm13, %v7020_v28, 0.0  ;;  %vm7286_vm13 = vcmp.eq.f32.partialorder %v14973_v20, 8.0 }
 0x95a   :  { %v7076_v17 = vadd.f32 %v7060_v39, %v15237_v55  ;;  %v7024_v58 = vpop.f32.mrf.mxu0  ;;  %v15342_v14 = vpop.f32.mrf.mxu1  ;;  %v15345_v13 = vadd.f32 %v16839_v7, %v7075_v21  ;;  %v16842_v21 = vld [vmem:[#allocation20_spill] sm:$0xff] }
 0x95b   :  { %16838 = vst [vmem:[#allocation61_spill] sm:$0xff] %v15342_v14  ;;  %v7061_v54 = vsel %vm7045_vm2, %v7024_v58, 0.0  ;;  %vm7287_vm2 = vcmp.eq.f32.partialorder %v14982_v31, 8.0 }
 0x95c   :  { %v7077_v8 = vadd.f32 %v7061_v54, %v15243_v42  ;;  %v7026_v16 = vpop.f32.mrf.mxu0  ;;  %v15349_v10 = vpop.f32.mrf.mxu1  ;;  %v15352_v28 = vadd.f32 %v16840_v36, %v7076_v17  ;;  %v16844_v17 = vld [vmem:[#allocation23_spill] sm:$0xff] }
 0x95d   :  { %v7062_v55 = vsel %vm7046_vm10, %v7026_v16, 0.0  ;;  %vm7288_vm10 = vcmp.eq.f32.partialorder %v14995_v2, 8.0 }
 0x95e   :  { %v7078_v46 = vadd.f32 %v7062_v55, %v15249_v50  ;;  %v7028_v39 = vpop.f32.mrf.mxu0  ;;  %v15356_v14 = vpop.f32.mrf.mxu1  ;;  %v15359_v58 = vadd.f32 %v16842_v21, %v7077_v8  ;;  %v16846_v8 = vld [vmem:[#allocation25_spill] sm:$0xff] }
 0x95f   :  { %16841 = vst [vmem:[#allocation58_spill] sm:$0xff] %v15356_v14  ;;  %v7063_v42 = vsel %vm7047_vm6, %v7028_v39, 0.0  ;;  %vm7289_vm6 = vcmp.eq.f32.partialorder %v15019_v1, 8.0 }
 0x960   :  { %v7079_v7 = vadd.f32 %v7063_v42, %v15255_v41  ;;  %v7030_v54 = vpop.f32.mrf.mxu0  ;;  %v15363_v23 = vpop.f32.mrf.mxu1  ;;  %v15366_v16 = vadd.f32 %v16844_v17, %v7078_v46  ;;  %v16847_v46 = vld [vmem:[#allocation53_spill] sm:$0xff]  ;;  %v16848_v17 = vld [vmem:[#allocation34_spill] sm:$0xff] }
 0x961   :  { %16843 = vst [vmem:[#allocation16_spill] sm:$0xff] %v15363_v23  ;;  %v7064_v50 = vsel %vm7048_vm8, %v7030_v54, 0.0  ;;  %vm7290_vm8 = vcmp.eq.f32.partialorder %v15035_v63, 8.0 }
 0x962   :  { %v7080_v36 = vadd.f32 %v7064_v50, %v15261_v9  ;;  %v7236_v55 = vpop.f32.mrf.mxu0  ;;  %v15370_v14 = vpop.f32.mrf.mxu1  ;;  %v15373_v39 = vadd.f32 %v16846_v8, %v7079_v7 }
 0x963   :  { %16845 = vst [vmem:[#allocation9_spill] sm:$0xff] %v15370_v14  ;;  %v7291_v41 = vsel %vm7275_vm0, %v7236_v55, 0.0  ;;  %v16849_v55 = vld [vmem:[#allocation12_spill] sm:$0xff] }
 0x964   :  { %v7307_v21 = vadd.f32 %v7291_v41, %v15275_v3  ;;  %v7238_v42 = vpop.f32.mrf.mxu0  ;;  %v15377_v23 = vpop.f32.mrf.mxu1  ;;  %v15380_v54 = vadd.f32 %v16847_v46, %v7080_v36 }
 0x965   :  { %v7292_v9 = vsel %vm7276_vm11, %v7238_v42, 0.0  ;;  %v16850_v42 = vld [vmem:[#allocation39_spill] sm:$0xff] }
 0x966   :  { %v15383_v50 = vadd.f32 %v16848_v17, %v7307_v21  ;;  %v7308_v0 = vadd.f32 %v7292_v9, %v15282_v5  ;;  %v7240_v14 = vpop.f32.mrf.mxu0  ;;  %v15387_v7 = vpop.f32.mrf.mxu1 }
 0x967   :  { %v7293_v3 = vsel %vm7277_vm3, %v7240_v14, 0.0 }
 0x968   :  { %v15390_v8 = vadd.f32 %v16849_v55, %v7308_v0  ;;  %v7309_v56 = vadd.f32 %v7293_v3, %v15289_v29  ;;  %v7242_v41 = vpop.f32.mrf.mxu0  ;;  %v15394_v36 = vpop.f32.mrf.mxu1 }
 0x969   :  { %v7294_v21 = vsel %vm7278_vm15, %v7242_v41, 0.0 }
 0x96a   :  { %v15397_v46 = vadd.f32 %v16850_v42, %v7309_v56  ;;  %v7310_v5 = vadd.f32 %v7294_v21, %v15296_v35  ;;  %v7246_v18 = vpop.f32.mrf.mxu0  ;;  %v15401_v14 = vpop.f32.mrf.mxu1 }
 0x96b   :  { %v7295_v9 = vsel %vm7279_vm9, %v7246_v18, 0.0 }
 0x96c   :  { %v15404_v17 = vadd.f32 %v15141_v51, %v7310_v5  ;;  %v7311_v29 = vadd.f32 %v7295_v9, %v15303_v32  ;;  %v7248_v48 = vpop.f32.mrf.mxu0  ;;  %v15408_v0 = vpop.f32.mrf.mxu1 }
 0x96d   :  { %v7296_v3 = vsel %vm7280_vm1, %v7248_v48, 0.0 }
 0x96e   :  { %v15411_v55 = vadd.f32 %v15149_v40, %v7311_v29  ;;  %v7312_v35 = vadd.f32 %v7296_v3, %v15310_v53  ;;  %v7250_v4 = vpop.f32.mrf.mxu0  ;;  %v15415_v56 = vpop.f32.mrf.mxu1 }
 0x96f   :  { %v7297_v51 = vsel %vm7281_vm7, %v7250_v4, 0.0 }
 0x970   :  { %v15418_v41 = vadd.f32 %v15156_v30, %v7312_v35  ;;  %v7313_v32 = vadd.f32 %v7297_v51, %v15317_v61  ;;  %v7252_v25 = vpop.f32.mrf.mxu0  ;;  %v15422_v21 = vpop.f32.mrf.mxu1 }
 0x971   :  { %v7298_v40 = vsel %vm7282_vm12, %v7252_v25, 0.0 }
 0x972   :  { %v15425_v42 = vadd.f32 %v15165_v59, %v7313_v32  ;;  %v7314_v53 = vadd.f32 %v7298_v40, %v15324_v37  ;;  %v7256_v33 = vpop.f32.mrf.mxu0  ;;  %v15429_v5 = vpop.f32.mrf.mxu1 }
 0x973   :  { %v7299_v30 = vsel %vm7283_vm5, %v7256_v33, 0.0 }
 0x974   :  { %v15432_v18 = vadd.f32 %v15172_v57, %v7314_v53  ;;  %v7315_v61 = vadd.f32 %v7299_v30, %v15331_v43  ;;  %v7258_v60 = vpop.f32.mrf.mxu0  ;;  %v15436_v9 = vpop.f32.mrf.mxu1 }
 0x975   :  { %v7300_v59 = vsel %vm7284_vm14, %v7258_v60, 0.0 }
 0x976   :  { %v15439_v29 = vadd.f32 %v15179_v34, %v7315_v61  ;;  %v7316_v37 = vadd.f32 %v7300_v59, %v15338_v24  ;;  %v7260_v52 = vpop.f32.mrf.mxu0  ;;  %v15443_v48 = vpop.f32.mrf.mxu1 }
 0x977   :  { %16851 = vst [vmem:[#allocation7_spill] sm:$0xff] %v15443_v48  ;;  %v7301_v57 = vsel %vm7285_vm4, %v7260_v52, 0.0  ;;  %v16858_v52 = vld [vmem:[#allocation42_spill] sm:$0xff] }
 0x978   :  { %v15446_v3 = vadd.f32 %v15186_v15, %v7316_v37  ;;  %v7317_v43 = vadd.f32 %v7301_v57, %v15345_v13  ;;  %v7262_v22 = vpop.f32.mrf.mxu0  ;;  %v15450_v35 = vpop.f32.mrf.mxu1 }
 0x979   :  { %16852 = vst [vmem:[#allocation26_spill] sm:$0xff] %v15450_v35  ;;  %v7302_v34 = vsel %vm7286_vm13, %v7262_v22, 0.0 }
 0x97a   :  { %v15453_v4 = vadd.f32 %v15193_v62, %v7317_v43  ;;  %v7318_v24 = vadd.f32 %v7302_v34, %v15352_v28  ;;  %v7266_v12 = vpop.f32.mrf.mxu0  ;;  %v15457_v51 = vpop.f32.mrf.mxu1 }
 0x97b   :  { %16853 = vst [vmem:[#allocation65_spill] sm:$0xff] %v15457_v51  ;;  %v7303_v15 = vsel %vm7287_vm2, %v7266_v12, 0.0  ;;  %v16868_v51 = vld [vmem:[#allocation44_spill] sm:$0xff] }
 0x97c   :  { %v15460_v32 = vadd.f32 %v15200_v26, %v7318_v24  ;;  %v7319_v13 = vadd.f32 %v7303_v15, %v15359_v58  ;;  %v7268_v20 = vpop.f32.mrf.mxu0  ;;  %v15464_v25 = vpop.f32.mrf.mxu1 }
 0x97d   :  { %16854 = vst [vmem:[#allocation56_spill] sm:$0xff] %v15464_v25  ;;  %v7304_v62 = vsel %vm7288_vm10, %v7268_v20, 0.0 }
 0x97e   :  { %v15469_v40 = vadd.f32 %v15207_v6, %v7319_v13  ;;  %v7320_v31 = vadd.f32 %v7304_v62, %v15366_v16  ;;  %v7270_v53 = vpop.f32.mrf.mxu0  ;;  %v15473_v26 = vpop.f32.mrf.mxu1 }
 0x97f   :  { %16855 = vst [vmem:[#allocation6_spill] sm:$0xff] %v15473_v26  ;;  %v7305_v58 = vsel %vm7289_vm6, %v7270_v53, 0.0 }
 0x980   :  { %v15478_v33 = vadd.f32 %v15214_v49, %v7320_v31  ;;  %v7321_v30 = vadd.f32 %v7305_v58, %v15373_v39  ;;  %v7272_v61 = vpop.f32.mrf.mxu0  ;;  %v15482_v6 = vpop.f32.mrf.mxu1 }
 0x981   :  { %16856 = vst [vmem:[#allocation46_spill] sm:$0xff] %v15482_v6  ;;  %v7306_v16 = vsel %vm7290_vm8, %v7272_v61, 0.0 }
 0x982   :  { %v15485_v60 = vadd.f32 %v15221_v19, %v7321_v30  ;;  %v7322_v1 = vadd.f32 %v7306_v16, %v15380_v54  ;;  %v7490_v59 = vpop.f32.mrf.mxu0  ;;  %v15488_v37 = vpop.f32.mrf.mxu1 }
 0x983   :  { %16857 = vst [vmem:[#allocation36_spill] sm:$0xff] %v15488_v37  ;;  %v15491_v57 = vsub.f32 %v16858_v52, %v7490_v59 }
 0x984   :  { %v15494_v49 = vadd.f32 %v15228_v27, %v7322_v1  ;;  %v7492_v39 = vpop.f32.mrf.mxu0  ;;  %v15496_v43 = vpop.f32.mrf.mxu1 }
 0x985   :  { %16859 = vst [vmem:[#allocation60_spill] sm:$0xff] %v15491_v57  ;;  %16860 = vst [vmem:[#allocation27_spill] sm:$0xff] %v15496_v43  ;;  %vm7618_vm0 = vcmp.eq.f32.partialorder %v15491_v57, 0.0  ;;  %vm7860_vm11 = vcmp.eq.f32.partialorder %v15491_v57, 8.0  ;;  %v15586_v26 = vsub.f32 %v16868_v51, %v7492_v39  ;;  %vm7739_vm6 = vcmp.eq.f32.partialorder %v15491_v57, 1.0 }
 0x986   :  { %v7494_v19 = vpop.f32.mrf.mxu0  ;;  %v15501_v22 = vpop.f32.mrf.mxu1  ;;  %v7634_v54 = vsel %vm7618_vm0, %v15234_v38, 0.0  ;;  %v15516_v13 = vsel %vm7860_vm11, %v15335_v44, 0.0 }
 0x987   :  { %16861 = vst [vmem:[#allocation29_spill] sm:$0xff] %v15501_v22  ;;  %v15506_v34 = vsub.f32 %v16858_v52, %v7494_v19  ;;  %v15511_v24 = vadd.f32 %v7634_v54, %v15383_v50  ;;  %vm7619_vm2 = vcmp.eq.f32.partialorder %v15586_v26, 0.0  ;;  %vm7861_vm0 = vcmp.eq.f32.partialorder %v15586_v26, 8.0 }
 0x988   :  { %v7496_v12 = vpop.f32.mrf.mxu0  ;;  %v15513_v15 = vpop.f32.mrf.mxu1 }
 0x989   :  { %vm7620_vm3 = vcmp.eq.f32.partialorder %v15506_v34, 0.0  ;;  %vm7862_vm15 = vcmp.eq.f32.partialorder %v15506_v34, 8.0 }
 0x98a   :  { %v7500_v38 = vpop.f32.mrf.mxu0  ;;  %v15519_v20 = vpop.f32.mrf.mxu1  ;;  %v7636_v62 = vsel %vm7620_vm3, %v15246_v45, 0.0  ;;  %v15532_v44 = vsel %vm7862_vm15, %v15349_v10, 0.0  ;;  %vm7740_vm15 = vcmp.eq.f32.partialorder %v15586_v26, 1.0 }
 0x98b   :  { %v15524_v31 = vsub.f32 %v16858_v52, %v7500_v38  ;;  %v15527_v50 = vadd.f32 %v7636_v62, %v15397_v46 }
 0x98c   :  { %v7502_v53 = vpop.f32.mrf.mxu0  ;;  %v15529_v58 = vpop.f32.mrf.mxu1 }
 0x98d   :  { %16862 = vst [vmem:[#allocation70_spill] sm:$0xff] %v15524_v31  ;;  %vm7622_vm9 = vcmp.eq.f32.partialorder %v15524_v31, 0.0  ;;  %vm7864_vm1 = vcmp.eq.f32.partialorder %v15524_v31, 8.0 }
 0x98e   :  { %v7504_v30 = vpop.f32.mrf.mxu0  ;;  %v15535_v61 = vpop.f32.mrf.mxu1  ;;  %v7638_v45 = vsel %vm7622_vm9, %v15258_v11, 0.0  ;;  %v16865_v11 = vld [vmem:[#allocation16_spill] sm:$0xff]  ;;  %vm7741_vm9 = vcmp.eq.f32.partialorder %v15506_v34, 1.0 }
 0x98f   :  { %16863 = vst [vmem:[#allocation69_spill] sm:$0xff] %v15535_v61  ;;  %v15539_v16 = vsub.f32 %v16858_v52, %v7504_v30  ;;  %v15542_v1 = vadd.f32 %v7638_v45, %v15411_v55  ;;  %v15554_v38 = vsel %vm7864_vm1, %v16865_v11, 0.0  ;;  %v16880_v61 = vld [vmem:[#allocation61_spill] sm:$0xff] }
 0x990   :  { %v15544_v46 = vpop.f32.mrf.mxu0  ;;  %v15546_v59 = vpop.f32.mrf.mxu1 }
 0x991   :  { %16864 = vst [vmem:[#allocation59_spill] sm:$0xff] %v15539_v16  ;;  %vm7624_vm7 = vcmp.eq.f32.partialorder %v15539_v16, 0.0  ;;  %vm7866_vm12 = vcmp.eq.f32.partialorder %v15539_v16, 8.0 }
 0x992   :  { %v7510_v10 = vpop.f32.mrf.mxu0  ;;  %v15550_v19 = vpop.f32.mrf.mxu1  ;;  %v7640_v54 = vsel %vm7624_vm7, %v15268_v47, 0.0  ;;  %v16866_v47 = vld [vmem:[#allocation67_spill] sm:$0xff]  ;;  %v15572_v27 = vsel %vm7866_vm12, %v15377_v23, 0.0  ;;  %v16870_v23 = vld [vmem:[#allocation68_spill] sm:$0xff] }
 0x993   :  { %v15557_v62 = vsub.f32 %v16858_v52, %v7510_v10  ;;  %v15560_v55 = vadd.f32 %v7640_v54, %v15425_v42 }
 0x994   :  { %v15562_v30 = vpop.f32.mrf.mxu0  ;;  %v15564_v45 = vpop.f32.mrf.mxu1 }
 0x995   :  { %vm7626_vm5 = vcmp.eq.f32.partialorder %v15557_v62, 0.0  ;;  %vm7868_vm4 = vcmp.eq.f32.partialorder %v15557_v62, 8.0 }
 0x996   :  { %v7514_v2 = vpop.f32.mrf.mxu0  ;;  %v15568_v28 = vpop.f32.mrf.mxu1  ;;  %v7642_v11 = vsel %vm7626_vm5, %v16866_v47, 0.0  ;;  %v15603_v39 = vsel %vm7868_vm4, %v15394_v36, 0.0 }
 0x997   :  { %v15575_v10 = vsub.f32 %v16858_v52, %v7514_v2  ;;  %v15578_v42 = vadd.f32 %v7642_v11, %v15439_v29 }
 0x998   :  { %v15580_v54 = vpop.f32.mrf.mxu0  ;;  %v15582_v63 = vpop.f32.mrf.mxu1 }
 0x999   :  { %16867 = vst [vmem:[#allocation32_spill] sm:$0xff] %v15582_v63  ;;  %vm7628_vm14 = vcmp.eq.f32.partialorder %v15575_v10, 0.0  ;;  %vm7870_vm10 = vcmp.eq.f32.partialorder %v15575_v10, 8.0 }
 0x99a   :  { %v7520_v35 = vpop.f32.mrf.mxu0  ;;  %v15588_v47 = vpop.f32.mrf.mxu1  ;;  %v7644_v25 = vsel %vm7628_vm14, %v16870_v23, 0.0  ;;  %vm7743_vm14 = vcmp.eq.f32.partialorder %v15524_v31, 1.0  ;;  %v15704_v31 = vsub.f32 %v16868_v51, %v15580_v54 }
 0x99b   :  { %16869 = vst [vmem:[#allocation24_spill] sm:$0xff] %v15588_v47  ;;  %v15593_v2 = vsub.f32 %v16858_v52, %v7520_v35  ;;  %v15596_v29 = vadd.f32 %v7644_v25, %v15453_v4  ;;  %v15607_v47 = vsub.f32 %v16868_v51, %v7496_v12  ;;  %v16873_v35 = vld [vmem:[#allocation54_spill] sm:$0xff]  ;;  %v15625_v12 = vsel %vm7870_vm10, %v15408_v0, 0.0 }
 0x99c   :  { %v15598_v11 = vpop.f32.mrf.mxu0  ;;  %v15600_v37 = vpop.f32.mrf.mxu1  ;;  %vm7745_vm10 = vcmp.eq.f32.partialorder %v15539_v16, 1.0 }
 0x99d   :  { %16871 = vst [vmem:[#allocation62_spill] sm:$0xff] %v15600_v37  ;;  %vm7630_vm13 = vcmp.eq.f32.partialorder %v15593_v2, 0.0  ;;  %vm7621_vm11 = vcmp.eq.f32.partialorder %v15607_v47, 0.0  ;;  %vm7872_vm3 = vcmp.eq.f32.partialorder %v15593_v2, 8.0  ;;  %vm7742_vm7 = vcmp.eq.f32.partialorder %v15607_v47, 1.0 }
 0x99e   :  { %v7524_v23 = vpop.f32.mrf.mxu0  ;;  %v15609_v22 = vpop.f32.mrf.mxu1  ;;  %v7646_v4 = vsel %vm7630_vm13, %v16873_v35, 0.0  ;;  %v16878_v35 = vld [vmem:[#allocation57_spill] sm:$0xff]  ;;  %vm7863_vm12 = vcmp.eq.f32.partialorder %v15607_v47, 8.0 }
 0x99f   :  { %16872 = vst [vmem:[#allocation64_spill] sm:$0xff] %v15609_v22  ;;  %v15615_v25 = vsub.f32 %v16858_v52, %v7524_v23  ;;  %v15618_v36 = vadd.f32 %v7646_v4, %v15469_v40  ;;  %v16875_v22 = vld [vmem:[#allocation13_spill] sm:$0xff]  ;;  %v15632_v52 = vsub.f32 %v16868_v51, %v7502_v53 }
 0x9a0   :  { %v15620_v37 = vpop.f32.mrf.mxu0  ;;  %v15622_v63 = vpop.f32.mrf.mxu1  ;;  %v7635_v6 = vsel %vm7619_vm2, %v16875_v22, 0.0 }
 0x9a1   :  { %16874 = vst [vmem:[#allocation30_spill] sm:$0xff] %v15622_v63  ;;  %vm7632_vm8 = vcmp.eq.f32.partialorder %v15615_v25, 0.0  ;;  %16876 = vst [vmem:[#allocation38_spill] sm:$0xff] %v15632_v52  ;;  %v7651_v48 = vadd.f32 %v7635_v6, %v15390_v8  ;;  %v15657_v8 = vsub.f32 %v16868_v51, %v15544_v46  ;;  %vm7623_vm1 = vcmp.eq.f32.partialorder %v15632_v52, 0.0 }
 0x9a2   :  { %v7700_v40 = vpop.f32.mrf.mxu0  ;;  %v15634_v23 = vpop.f32.mrf.mxu1  ;;  %v7648_v4 = vsel %vm7632_vm8, %v16878_v35, 0.0  ;;  %v16879_v35 = vld [vmem:[#allocation52_spill] sm:$0xff]  ;;  %vm7874_vm5 = vcmp.eq.f32.partialorder %v15615_v25, 8.0  ;;  %vm7744_vm13 = vcmp.eq.f32.partialorder %v15632_v52, 1.0  ;;  %vm7865_vm2 = vcmp.eq.f32.partialorder %v15632_v52, 8.0 }
 0x9a3   :  { %16877 = vst [vmem:[#allocation72_spill] sm:$0xff] %v15634_v23  ;;  %v7755_v0 = vsel %vm7739_vm6, %v7700_v40, 0.0  ;;  %v15640_v43 = vadd.f32 %v7648_v4, %v15485_v60  ;;  %v15648_v23 = vsel %vm7872_vm3, %v15422_v21, 0.0  ;;  %v7637_v40 = vsel %vm7621_vm11, %v16879_v35, 0.0 }
 0x9a4   :  { %v7771_v22 = vadd.f32 %v7755_v0, %v15511_v24  ;;  %v7702_v63 = vpop.f32.mrf.mxu0  ;;  %v15645_v53 = vpop.f32.mrf.mxu1  ;;  %v7877_v60 = vsel %vm7861_vm0, %v16880_v61, 0.0  ;;  %v7653_v46 = vadd.f32 %v7637_v40, %v15404_v17  ;;  %v15675_v35 = vsel %vm7874_vm5, %v15436_v9, 0.0 }
 0x9a5   :  { %v7756_v57 = vsel %vm7740_vm15, %v7702_v63, 0.0  ;;  %vm7625_vm4 = vcmp.eq.f32.partialorder %v15657_v8, 0.0  ;;  %vm7746_vm8 = vcmp.eq.f32.partialorder %v15657_v8, 1.0  ;;  %vm7867_vm0 = vcmp.eq.f32.partialorder %v15657_v8, 8.0 }
 0x9a6   :  { %v7772_v6 = vadd.f32 %v7756_v57, %v7651_v48  ;;  %v7704_v24 = vpop.f32.mrf.mxu0  ;;  %v15659_v4 = vpop.f32.mrf.mxu1  ;;  %v15663_v21 = vadd.f32 %v15516_v13, %v7771_v22  ;;  %v16882_v22 = vld [vmem:[#allocation14_spill] sm:$0xff]  ;;  %vm7747_vm11 = vcmp.eq.f32.partialorder %v15557_v62, 1.0  ;;  %vm7629_vm3 = vcmp.eq.f32.partialorder %v15704_v31, 0.0 }
 0x9a7   :  { %16881 = vst [vmem:[#allocation47_spill] sm:$0xff] %v15659_v4  ;;  %v7757_v63 = vsel %vm7741_vm9, %v7704_v24, 0.0  ;;  %v7639_v24 = vsel %vm7623_vm1, %v16882_v22, 0.0  ;;  %v15681_v4 = vsub.f32 %v16868_v51, %v15562_v30  ;;  %vm7749_vm1 = vcmp.eq.f32.partialorder %v15575_v10, 1.0 }
 0x9a8   :  { %v7773_v61 = vadd.f32 %v7757_v63, %v15527_v50  ;;  %v7706_v48 = vpop.f32.mrf.mxu0  ;;  %v15670_v57 = vpop.f32.mrf.mxu1  ;;  %v15672_v0 = vadd.f32 %v7877_v60, %v7772_v6  ;;  %v16883_v60 = vld [vmem:[#allocation58_spill] sm:$0xff]  ;;  %v7655_v30 = vadd.f32 %v7639_v24, %v15418_v41  ;;  %vm7871_vm5 = vcmp.eq.f32.partialorder %v15704_v31, 8.0 }
 0x9a9   :  { %v7758_v13 = vsel %vm7742_vm7, %v7706_v48, 0.0  ;;  %v7879_v6 = vsel %vm7863_vm12, %v16883_v60, 0.0  ;;  %vm7627_vm6 = vcmp.eq.f32.partialorder %v15681_v4, 0.0  ;;  %vm7748_vm15 = vcmp.eq.f32.partialorder %v15681_v4, 1.0 }
 0x9aa   :  { %v7774_v50 = vadd.f32 %v7758_v13, %v7653_v46  ;;  %v7710_v63 = vpop.f32.mrf.mxu0  ;;  %v15683_v17 = vpop.f32.mrf.mxu1  ;;  %v15687_v40 = vadd.f32 %v15532_v44, %v7773_v61  ;;  %v16884_v61 = vld [vmem:[#allocation63_spill] sm:$0xff]  ;;  %vm7869_vm9 = vcmp.eq.f32.partialorder %v15681_v4, 8.0  ;;  %vm7750_vm12 = vcmp.eq.f32.partialorder %v15704_v31, 1.0 }
 0x9ab   :  { %v7759_v9 = vsel %vm7743_vm14, %v7710_v63, 0.0  ;;  %v7641_v63 = vsel %vm7625_vm4, %v16884_v61, 0.0  ;;  %vm7751_vm14 = vcmp.eq.f32.partialorder %v15593_v2, 1.0 }
 0x9ac   :  { %v7775_v48 = vadd.f32 %v7759_v9, %v15542_v1  ;;  %v7712_v46 = vpop.f32.mrf.mxu0  ;;  %v15695_v13 = vpop.f32.mrf.mxu1  ;;  %v15697_v22 = vadd.f32 %v7879_v6, %v7774_v50  ;;  %v16885_v50 = vld [vmem:[#allocation9_spill] sm:$0xff]  ;;  %v7657_v61 = vadd.f32 %v7641_v63, %v15432_v18  ;;  %v8202_v63 = vpack.c.bf16 %v15564_v45, %v15546_v59  ;;  %v16887_v59 = vld [vmem:[#allocation11_spill] sm:$0xff] }
 0x9ad   :  { %v7760_v44 = vsel %vm7744_vm13, %v7712_v46, 0.0  ;;  %v7881_v6 = vsel %vm7865_vm2, %v16885_v50, 0.0  ;;  %v7645_v45 = vsel %vm7629_vm3, %v16887_v59, 0.0  ;;  %v16889_v59 = vld [vmem:[#allocation15_spill] sm:$0xff]  ;;  %vm7983_vm3 = vcmp.eq.f32.partialorder %v15506_v34, 9.0 }
 0x9ae   :  { %v7776_v60 = vadd.f32 %v7760_v44, %v7655_v30  ;;  %v7714_v1 = vpop.f32.mrf.mxu0  ;;  %v15706_v9 = vpop.f32.mrf.mxu1  ;;  %v15710_v41 = vadd.f32 %v15554_v38, %v7775_v48  ;;  %v16886_v38 = vld [vmem:[#allocation40_spill] sm:$0xff] }
 0x9af   :  { %v7761_v24 = vsel %vm7745_vm10, %v7714_v1, 0.0  ;;  %v7643_v48 = vsel %vm7627_vm6, %v16886_v38, 0.0  ;;  %v15723_v1 = vsub.f32 %v16868_v51, %v15598_v11  ;;  %vm7753_vm10 = vcmp.eq.f32.partialorder %v15615_v25, 1.0 }
 0x9b0   :  { %v7777_v46 = vadd.f32 %v7761_v24, %v15560_v55  ;;  %v7716_v54 = vpop.f32.mrf.mxu0  ;;  %v8934_v16 = vpop.f32.mrf.mxu1  ;;  %v15716_v30 = vadd.f32 %v7881_v6, %v7776_v60  ;;  %v7883_v24 = vsel %vm7867_vm0, %v15387_v7, 0.0  ;;  %v7659_v11 = vadd.f32 %v7643_v48, %v15446_v3 }
 0x9b1   :  { %v7762_v44 = vsel %vm7746_vm8, %v7716_v54, 0.0  ;;  %vm7631_vm7 = vcmp.eq.f32.partialorder %v15723_v1, 0.0  ;;  %vm7752_vm13 = vcmp.eq.f32.partialorder %v15723_v1, 1.0  ;;  %vm7873_vm2 = vcmp.eq.f32.partialorder %v15723_v1, 8.0 }
 0x9b2   :  { %v7778_v50 = vadd.f32 %v7762_v44, %v7657_v61  ;;  %v7720_v52 = vpop.f32.mrf.mxu0  ;;  %v8362_v55 = vpop.f32.mrf.mxu1  ;;  %v15727_v18 = vadd.f32 %v15572_v27, %v7777_v46 }
 0x9b3   :  { %v7763_v60 = vsel %vm7747_vm11, %v7720_v52, 0.0  ;;  %v15742_v52 = vsub.f32 %v16868_v51, %v15620_v37  ;;  %v7661_v51 = vadd.f32 %v7645_v45, %v15460_v32  ;;  %vm7982_vm11 = vcmp.eq.f32.partialorder %v15586_v26, 9.0 }
 0x9b4   :  { %v7779_v6 = vadd.f32 %v7763_v60, %v15578_v42  ;;  %v7722_v61 = vpop.f32.mrf.mxu0  ;;  %v8935_v54 = vpop.f32.mrf.mxu1  ;;  %v15735_v44 = vadd.f32 %v7883_v24, %v7778_v50 }
 0x9b5   :  { %v7764_v27 = vsel %vm7748_vm15, %v7722_v61, 0.0  ;;  %v8380_v46 = vpack.c.bf16 %v8935_v54, %v8934_v16  ;;  %v7885_v16 = vsel %vm7869_vm9, %v15401_v14, 0.0  ;;  %vm7633_vm4 = vcmp.eq.f32.partialorder %v15742_v52, 0.0 }
 0x9b6   :  { %v7780_v7 = vadd.f32 %v7764_v27, %v7659_v11  ;;  %v7724_v42 = vpop.f32.mrf.mxu0  ;;  %v8365_v38 = vpop.f32.mrf.mxu1  ;;  %v15746_v3 = vadd.f32 %v15603_v39, %v7779_v6  ;;  %v8201_v39 = vpack.c.bf16 %v15568_v28, %v15550_v19  ;;  %v7887_v28 = vsel %vm7871_vm5, %v15415_v56, 0.0 }
 0x9b7   :  { %v7765_v48 = vsel %vm7749_vm1, %v7724_v42, 0.0  ;;  %v8379_v50 = vpack.c.bf16 %v8365_v38, %v8362_v55  ;;  %8796 = vmatprep.subr.bf16.mxu0 %v8380_v46  ;;  %v16888_v55 = vld [vmem:[#allocation51_spill] sm:$0xff]  ;;  %v7649_v45 = vsel %vm7633_vm4, %v16889_v59, 0.0  ;;  %vm7754_vm6 = vcmp.eq.f32.partialorder %v15742_v52, 1.0 }
 0x9b8   :  { %v7781_v60 = vadd.f32 %v7765_v48, %v15596_v29  ;;  %v7726_v37 = vpop.f32.mrf.mxu0  ;;  %8797 = vmatpush3.bf16.msra.mxu0 %v8202_v63  ;;  %v15752_v24 = vadd.f32 %v7885_v16, %v7780_v7  ;;  %v7647_v11 = vsel %vm7631_vm7, %v16888_v55, 0.0  ;;  %v8378_v29 = vpack.c.bf16 %v15695_v13, %v15670_v57 }
 0x9b9   :  { %v7766_v6 = vsel %vm7750_vm12, %v7726_v37, 0.0  ;;  %8798 = vmatprep.subr.bf16.mxu0 %v8379_v50  ;;  %v7663_v54 = vadd.f32 %v7647_v11, %v15478_v33  ;;  %v8200_v57 = vpack.c.bf16 %v15529_v58, %v15513_v15  ;;  %v8377_v33 = vpack.c.bf16 %v15706_v9, %v15683_v17  ;;  %v16890_v50 = vld [vmem:[#allocation69_spill] sm:$0xff]  ;;  %v16893_v37 = vld [vmem:[#allocation7_spill] sm:$0xff] }
 0x9ba   :  { %v7782_v14 = vadd.f32 %v7766_v6, %v7661_v51  ;;  %v7730_v61 = vpop.f32.mrf.mxu0  ;;  %v15763_v32 = vadd.f32 %v15625_v12, %v7781_v60  ;;  %v7889_v42 = vsel %vm7873_vm2, %v15429_v5, 0.0  ;;  %v7665_v48 = vadd.f32 %v7649_v45, %v15494_v49  ;;  %v16891_v60 = vld [vmem:[#allocation60_spill] sm:$0xff]  ;;  %v16899_v45 = vld [vmem:[#allocation70_spill] sm:$0xff] }
 0x9bb   :  { %v7767_v63 = vsel %vm7751_vm14, %v7730_v61, 0.0  ;;  %vm7875_vm8 = vcmp.eq.f32.partialorder %v15742_v52, 8.0  ;;  %v8199_v17 = vpack.c.bf16 %v16890_v50, %v15519_v20  ;;  %vm7981_vm0 = vcmp.eq.f32.partialorder %v16891_v60, 9.0  ;;  %v16908_v50 = vld [vmem:[#allocation64_spill] sm:$0xff] }
 0x9bc   :  { %v7783_v19 = vadd.f32 %v7767_v63, %v15618_v36  ;;  %v7732_v27 = vpop.f32.mrf.mxu0  ;;  %8799 = vmatpush3.bf16.msra.mxu0 %v8201_v39  ;;  %v15771_v46 = vadd.f32 %v7887_v28, %v7782_v14  ;;  %v7891_v39 = vsel %vm7875_vm8, %v16893_v37, 0.0  ;;  %v16895_v14 = vld [vmem:[#allocation47_spill] sm:$0xff]  ;;  %vm7984_vm15 = vcmp.eq.f32.partialorder %v15607_v47, 9.0 }
 0x9bd   :  { %v7768_v12 = vsel %vm7752_vm13, %v7732_v27, 0.0  ;;  %8800 = vmatprep.subr.bf16.mxu0 %v8378_v29  ;;  %vm7985_vm9 = vcmp.eq.f32.partialorder %v16899_v45, 9.0  ;;  %vm7988_vm12 = vcmp.eq.f32.partialorder %v15657_v8, 9.0  ;;  %vm7989_vm5 = vcmp.eq.f32.partialorder %v15557_v62, 9.0  ;;  %v16912_v8 = vld [vmem:[#allocation6_spill] sm:$0xff] }
 0x9be   :  { %v7784_v13 = vadd.f32 %v7768_v12, %v7663_v54  ;;  %v7734_v7 = vpop.f32.mrf.mxu0  ;;  %v15779_v56 = vadd.f32 %v15648_v23, %v7783_v19  ;;  %v16897_v19 = vld [vmem:[#allocation46_spill] sm:$0xff]  ;;  %vm7990_vm14 = vcmp.eq.f32.partialorder %v15681_v4, 9.0  ;;  %vm7991_vm4 = vcmp.eq.f32.partialorder %v15575_v10, 9.0 }
 0x9bf   :  { %v7769_v36 = vsel %vm7753_vm10, %v7734_v7, 0.0  ;;  %vm7992_vm13 = vcmp.eq.f32.partialorder %v15704_v31, 9.0  ;;  %vm7993_vm2 = vcmp.eq.f32.partialorder %v15593_v2, 9.0  ;;  %vm7994_vm10 = vcmp.eq.f32.partialorder %v15723_v1, 9.0 }
 0x9c0   :  { %v7785_v38 = vadd.f32 %v7769_v36, %v15640_v43  ;;  %v7736_v15 = vpop.f32.mrf.mxu0  ;;  %8801 = vmatpush3.bf16.msra.mxu0 %v8200_v57  ;;  %v15787_v58 = vadd.f32 %v7889_v42, %v7784_v13  ;;  %v16892_v43 = vld [vmem:[#allocation30_spill] sm:$0xff]  ;;  %v16900_v57 = vld [vmem:[#allocation32_spill] sm:$0xff]  ;;  %v16902_v42 = vld [vmem:[#allocation29_spill] sm:$0xff]  ;;  %vm7996_vm8 = vcmp.eq.f32.partialorder %v15742_v52, 9.0 }
 0x9c1   :  { %v7770_v23 = vsel %vm7754_vm6, %v7736_v15, 0.0  ;;  %8802 = vmatprep.subr.bf16.mxu0 %v8377_v33  ;;  %v8291_v49 = vpack.c.bf16 %v15645_v53, %v16892_v43  ;;  %v16901_v13 = vld [vmem:[#allocation62_spill] sm:$0xff]  ;;  %v16909_v43 = vld [vmem:[#allocation56_spill] sm:$0xff]  ;;  %vm7995_vm6 = vcmp.eq.f32.partialorder %v15615_v25, 9.0 }
 0x9c2   :  { %v7786_v9 = vadd.f32 %v7770_v23, %v7665_v48  ;;  %v7942_v16 = vpop.f32.mrf.mxu0  ;;  %v15794_v5 = vadd.f32 %v15675_v35, %v7785_v38  ;;  %v16894_v35 = vld [vmem:[#allocation72_spill] sm:$0xff] }
 0x9c3   :  { %v7997_v51 = vsel %vm7981_vm0, %v7942_v16, 0.0  ;;  %v8290_v61 = vpack.c.bf16 %v16895_v14, %v16894_v35  ;;  %v16903_v38 = vld [vmem:[#allocation36_spill] sm:$0xff]  ;;  %vm16915_vm0 = vcmask 261120  }
 0x9c4   :  { %v8013_v6 = vadd.f32 %v7997_v51, %v15663_v21  ;;  %v7944_v55 = vpop.f32.mrf.mxu0  ;;  %8803 = vmatpush3.bf16.msra.mxu0 %v8199_v17  ;;  %v15800_v11 = vadd.f32 %v7891_v39, %v7786_v9  ;;  %v16896_v21 = vld [vmem:[#allocation27_spill] sm:$0xff]  ;;  %v16904_v48 = vpack.c.bf16 %v16902_v42, %v16903_v38  ;;  %v16907_v23 = vld [vmem:[#allocation24_spill] sm:$0xff] }
 0x9c5   :  { %8804 = vmatprep.subr.bf16.mxu0 %v8291_v49  ;;  %v7998_v29 = vsel %vm7982_vm11, %v7944_v55, 0.0  ;;  %v16898_v54 = vpack.c.bf16 %v16896_v21, %v16897_v19  ;;  %v8288_v17 = vpack.c.bf16 %v16908_v50, %v16907_v23  ;;  %v16910_v49 = vld [vmem:[#allocation26_spill] sm:$0xff]  ;;  %vm16916_vm11 = vmmov %vm16915_vm0 }
 0x9c6   :  { %v7946_v20 = vpop.f32.mrf.mxu0  ;;  %v8014_v26 = vadd.f32 %v7998_v29, %v15672_v0  ;;  %v16905_v0 = vld [vmem:[#allocation38_spill] sm:$0xff]  ;;  %v16911_v51 = vpack.c.bf16 %v16909_v43, %v16910_v49  ;;  %v16913_v29 = vld [vmem:[#allocation65_spill] sm:$0xff] }
 0x9c7   :  { %v7999_v53 = vsel %vm7983_vm3, %v7946_v20, 0.0  ;;  %vm7986_vm1 = vcmp.eq.f32.partialorder %v16905_v0, 9.0  ;;  %vm16917_vm3 = vmmov %vm16915_vm0 }
 0x9c8   :  { %v8015_v63 = vadd.f32 %v7999_v53, %v15687_v40  ;;  %v7948_v28 = vpop.f32.mrf.mxu0  ;;  %8805 = vmatpush3.bf16.msra.mxu0 %v16898_v54  ;;  %v8289_v40 = vpack.c.bf16 %v16901_v13, %v16900_v57  ;;  %v16914_v53 = vpack.c.bf16 %v16912_v8, %v16913_v29 }
 0x9c9   :  { %v8000_v27 = vsel %vm7984_vm15, %v7948_v28, 0.0  ;;  %8806 = vmatprep.subr.bf16.mxu0 %v8290_v61  ;;  %vm16918_vm15 = vmmov %vm16915_vm0 }
 0x9ca   :  { %v8381_v12 = vpack.c.bf16 %v8015_v63, %v8013_v6  ;;  %v8016_v34 = vadd.f32 %v8000_v27, %v15697_v22  ;;  %v7952_v59 = vpop.f32.mrf.mxu0  ;;  %v16906_v22 = vld [vmem:[#allocation59_spill] sm:$0xff] }
 0x9cb   :  { %v8001_v7 = vsel %vm7985_vm9, %v7952_v59, 0.0  ;;  %vm7987_vm7 = vcmp.eq.f32.partialorder %v16906_v22, 9.0  ;;  %vm16919_vm9 = vmmov %vm16915_vm0 }
 0x9cc   :  { %v8382_v33 = vpack.c.bf16 %v8016_v34, %v8014_v26  ;;  %v8017_v47 = vadd.f32 %v8001_v7, %v15710_v41  ;;  %v7954_v36 = vpop.f32.mrf.mxu0  ;;  %8807 = vmatpush3.bf16.msra.mxu0 %v16904_v48 }
 0x9cd   :  { %8808 = vmatprep.subr.bf16.mxu0 %v8289_v40  ;;  %v8002_v9 = vsel %vm7986_vm1, %v7954_v36, 0.0  ;;  %vm16920_vm1 = vmmov %vm16915_vm0 }
 0x9ce   :  { %v7956_v15 = vpop.f32.mrf.mxu0  ;;  %8421 = vmatprep.mubr.bf16.mxu0 %v8382_v33  ;;  %v8018_v39 = vadd.f32 %v8002_v9, %v15716_v30 }
 0x9cf   :  { %v8003_v16 = vsel %vm7987_vm7, %v7956_v15, 0.0  ;;  %vm16921_vm7 = vmmov %vm16915_vm0 }
 0x9d0   :  { %v8019_v60 = vadd.f32 %v8003_v16, %v15727_v18  ;;  %v7958_v41 = vpop.f32.mrf.mxu0  ;;  %8809 = vmatpush3.bf16.msra.mxu0 %v16911_v51 }
 0x9d1   :  { %v8004_v37 = vsel %vm7988_vm12, %v7958_v41, 0.0  ;;  %8810 = vmatprep.subr.bf16.mxu0 %v8288_v17  ;;  %vm16922_vm12 = vmmov %vm16915_vm0 }
 0x9d2   :  { %v8383_v6 = vpack.c.bf16 %v8019_v60, %v8017_v47  ;;  %v8020_v55 = vadd.f32 %v8004_v37, %v15735_v44  ;;  %v7962_v20 = vpop.f32.mrf.mxu0 }
 0x9d3   :  { %v8005_v35 = vsel %vm7989_vm5, %v7962_v20, 0.0 }
 0x9d4   :  { %v8384_v14 = vpack.c.bf16 %v8020_v55, %v8018_v39  ;;  %v8021_v18 = vadd.f32 %v8005_v35, %v15746_v3  ;;  %v7964_v61 = vpop.f32.mrf.mxu0  ;;  %8811 = vmatpush3.bf16.msra.mxu0 %v16914_v53 }
 0x9d5   :  { %v8006_v30 = vsel %vm7990_vm14, %v7964_v61, 0.0 }
 0x9d6   :  { %v7966_v63 = vpop.f32.mrf.mxu0  ;;  %v8022_v21 = vadd.f32 %v8006_v30, %v15752_v24 }
 0x9d7   :  { %v8007_v28 = vsel %vm7991_vm4, %v7966_v63, 0.0  ;;  %8422 = vmatmul.mubr.bf16.vlgmr.msra.gmra.mxu0 %v8381_v12 }
 0x9d8   :  { %v8023_v44 = vadd.f32 %v8007_v28, %v15763_v32  ;;  %v7968_v62 = vpop.f32.mrf.mxu0  ;;  %8429 = vmatprep.mubr.bf16.mxu0 %v8384_v14 }
 0x9d9   :  { %v8008_v3 = vsel %vm7992_vm13, %v7968_v62, 0.0 }
 0x9da   :  { %v8385_v19 = vpack.c.bf16 %v8023_v44, %v8021_v18  ;;  %v8024_v54 = vadd.f32 %v8008_v3, %v15771_v46  ;;  %v7972_v27 = vpop.f32.mrf.mxu0 }
 0x9db   :  { %v8009_v4 = vsel %vm7993_vm2, %v7972_v27, 0.0 }
 0x9dc   :  { %v8386_v10 = vpack.c.bf16 %v8024_v54, %v8022_v21  ;;  %v8025_v26 = vadd.f32 %v8009_v4, %v15779_v56  ;;  %v7974_v12 = vpop.f32.mrf.mxu0 }
 0x9dd   :  { %v8010_v31 = vsel %vm7994_vm10, %v7974_v12, 0.0 }
 0x9de   :  { %v7976_v32 = vpop.f32.mrf.mxu0  ;;  %v8026_v46 = vadd.f32 %v8010_v31, %v15787_v58 }
 0x9df   :  { %v8011_v34 = vsel %vm7995_vm6, %v7976_v32, 0.0  ;;  %8430 = vmatmul.mubr.bf16.gmra.mxu0 %v8383_v6 }
 0x9e0   :  { %v8027_v24 = vadd.f32 %v8011_v34, %v15794_v5  ;;  %v7978_v59 = vpop.f32.mrf.mxu0  ;;  %8437 = vmatprep.mubr.bf16.mxu0 %v8386_v10  ;;  %v9207_v5 = vld [vmem:[%s15868_s4] ss:$0 sm:$0xff]  ;;  %s9242_s4 = smov [#allocation2]  }
 0x9e1   :  { %v8012_v2 = vsel %vm7996_vm8, %v7978_v59, 0.0  ;;  %s8467_s0 = sshll.u32 %s9242_s4, 4  ;;  %s8468_s0 = int_to_ptr.vmem [resolvable:$true] %s8467_s0 }
 0x9e2   :  { %v8387_v45 = vpack.c.bf16 %v8027_v24, %v8025_v26  ;;  %v8028_v56 = vadd.f32 %v8012_v2, %v15800_v11  ;;  %s9208_s23 = scalar_lea.vmem %s8468_s0, 2048  ;;  %p9213_p1 = scmp.lt.s32.totalorder %s8468_s0, %s8468_s0 }
 0x9e3   :  { %p9209_p0 = scmp.ne.s32.totalorder %s8468_s0, %s9208_s23  ;;  %p9214_p2 = scmp.lt.s32.totalorder %s9208_s23, %s9208_s23 }
 0x9e4   :  { %v8388_v57 = vpack.c.bf16 %v8028_v56, %v8026_v46 }
 0x9e5   :  { %p9215_p3 = por %p9214_p2, %p9213_p1 }
 0x9e7   :  { %8438 = vmatmul.mubr.bf16.gmra.mxu0 %v8385_v19  ;;  %p9216_p4 = pnand %p9215_p3, %p9209_p0 }
 0x9e8   :  { %8445 = vmatprep.mubr.bf16.mxu0 %v8388_v57 }
 0x9ef   :  { %8446 = vmatmul.mubr.bf16.gmra.mxu0 %v8387_v45 }
 0xa97   :  { %v8812_v25 = vpop.f32.mrf.mxu0 }
 0xa99   :  { %v8813_v1 = vpop.f32.mrf.mxu0 }
 0xa9a   :  { %v8814_v13 = vadd.f32 %v8813_v1, %v8812_v25 }
 0xa9b   :  { %v8815_v40 = vpop.f32.mrf.mxu0 }
 0xa9c   :  { %v8424_v52 = vadd.f32 %v9207_v5, %v8814_v13 }
 0xa9d   :  { %v8816_v7 = vpop.f32.mrf.mxu0 }
 0xa9e   :  { %8454 = vst.msk [vmem:[#allocation2 + $0x40] sm:$0xff] %vm16915_vm0, %v8424_v52  ;;  %v8817_v58 = vadd.f32 %v8816_v7, %v8815_v40 }
 0xa9f   :  { %v8818_v33 = vpop.f32.mrf.mxu0 }
 0xaa0   :  { %v8427_v47 = vadd.f32 %v9207_v5, %v8817_v58 }
 0xaa1   :  { %v8819_v11 = vpop.f32.mrf.mxu0 }
 0xaa2   :  { %8455 = vst.msk [vmem:[#allocation2 + $0x48] sm:$0xff] %vm16916_vm11, %v8427_v47  ;;  %v8820_v36 = vadd.f32 %v8819_v11, %v8818_v33 }
 0xaa3   :  { %v8821_v42 = vpop.f32.mrf.mxu0 }
 0xaa4   :  { %v8432_v38 = vadd.f32 %v9207_v5, %v8820_v36 }
 0xaa5   :  { %v8822_v48 = vpop.f32.mrf.mxu0 }
 0xaa6   :  { %8456 = vst.msk [vmem:[#allocation2 + $0x50] sm:$0xff] %vm16917_vm3, %v8432_v38  ;;  %v8823_v0 = vadd.f32 %v8822_v48, %v8821_v42 }
 0xaa7   :  { %v8824_v15 = vpop.f32.mrf.mxu0 }
 0xaa8   :  { %v8435_v22 = vadd.f32 %v9207_v5, %v8823_v0 }
 0xaa9   :  { %v8825_v23 = vpop.f32.mrf.mxu0 }
 0xaaa   :  { %8457 = vst.msk [vmem:[#allocation2 + $0x58] sm:$0xff] %vm16918_vm15, %v8435_v22  ;;  %v8826_v50 = vadd.f32 %v8825_v23, %v8824_v15 }
 0xaab   :  { %v8827_v17 = vpop.f32.mrf.mxu0 }
 0xaac   :  { %v8440_v9 = vadd.f32 %v9207_v5, %v8826_v50 }
 0xaad   :  { %v8828_v16 = vpop.f32.mrf.mxu0 }
 0xaae   :  { %8458 = vst.msk [vmem:[#allocation2 + $0x60] sm:$0xff] %vm16919_vm9, %v8440_v9  ;;  %v8829_v60 = vadd.f32 %v8828_v16, %v8827_v17 }
 0xaaf   :  { %v8830_v41 = vpop.f32.mrf.mxu0 }
 0xab0   :  { %v8443_v43 = vadd.f32 %v9207_v5, %v8829_v60 }
 0xab1   :  { %v8831_v49 = vpop.f32.mrf.mxu0 }
 0xab2   :  { %8459 = vst.msk [vmem:[#allocation2 + $0x68] sm:$0xff] %vm16920_vm1, %v8443_v43  ;;  %v8832_v51 = vadd.f32 %v8831_v49, %v8830_v41 }
 0xab3   :  { %v8833_v37 = vpop.f32.mrf.mxu0 }
 0xab4   :  { %v8448_v39 = vadd.f32 %v9207_v5, %v8832_v51 }
 0xab5   :  { %v8834_v6 = vpop.f32.mrf.mxu0 }
 0xab6   :  { %8460 = vst.msk [vmem:[#allocation2 + $0x70] sm:$0xff] %vm16921_vm7, %v8448_v39  ;;  %v8835_v55 = vadd.f32 %v8834_v6, %v8833_v37 }
 0xab8   :  { %v8451_v20 = vadd.f32 %v9207_v5, %v8835_v55 }
 0xaba   :  { %8461 = vst.msk [vmem:[#allocation2 + $0x78] sm:$0xff] %vm16922_vm12, %v8451_v20 }
 0xabb   :  { %9219 = shalt.err (!%p9216_p4)
}
 0xabc   :  { %s9243_s29 = smov 128   ;;  %s9244_s30 = smov 8  }
 0xabd   :  { %8473 = dma.vmem_to_hbm [thread:$0]  %s8468_s0, 2048, %s15871_s7, [#allocation3], %s9243_s29, %s9243_s29, %s9244_s30  }
 0xabe   :  { %9228 = dma.done.wait [#allocation3], 2048  }
 0xabf   :  { %9229 = vsyncadd [#allocation3], 4294965248 }
 0xac0   :  { %8477 = vsyncpa [#allocation3], 1 }

</bundles_post_ra>
